<compile_context>
chip_gen: v6e
topology: v6e:2x2x1
jax: 0.10.0
libtpu: 0.0.40
codegen_flags: <defaults>
</compile_context>

<pallas_src>
import jax
import jax.numpy as jnp
from jax.experimental import pallas as pl
from jax.experimental.pallas import tpu as pltpu


# ----------------------------------------------------------------------------
# Fused kernel: encoder LSTM -> top LSTM (masked) -> attention softmax scores.
# Single invocation (no grid); recurrences unrolled; state kept as values.
# ----------------------------------------------------------------------------
def _fused_forward_kernel(x_ref, len_ref,
                          ewih_ref, ewhh_ref, eb_ref,
                          twih_ref, twhh_ref, tb_ref,
                          w1a_ref, w1b_ref, b1_ref, w2_ref, b2_ref,
                          out_ref, score_ref, hid_ref,
                          exproj_sc, txproj_sc):
    Bp, H2 = hid_ref.shape          # padded batch (multiple of 8), top hidden
    TBp = out_ref.shape[0]          # T * Bp, rows ordered (note, sample)
    T = TBp // Bp                   # notes per sample (== N)
    NBp = TBp                       # encoder batch rows (all notes, all samples)
    W = x_ref.shape[0] // NBp       # words per note
    H1 = ewhh_ref.shape[1]

    # ------------- note-encoder LSTM (reference runs it unpacked -> no mask) -
    # Hoisted per-gate input projections: one (W*NBp,E)@(E,H1) matmul per gate.
    for g in range(4):
        exproj_sc[g] = (jnp.dot(x_ref[...], ewih_ref[g],
                                preferred_element_type=jnp.float32)
                        + eb_ref[g])

    h = jnp.zeros((NBp, H1), jnp.float32)
    c = jnp.zeros((NBp, H1), jnp.float32)
    for t in range(W):                                   # fully unrolled
        r0, r1 = t * NBp, (t + 1) * NBp                  # tile-aligned static rows
        zi = exproj_sc[0, r0:r1, :] + jnp.dot(h, ewhh_ref[0],
                                              preferred_element_type=jnp.float32)
        zf = exproj_sc[1, r0:r1, :] + jnp.dot(h, ewhh_ref[1],
                                              preferred_element_type=jnp.float32)
        zg = exproj_sc[2, r0:r1, :] + jnp.dot(h, ewhh_ref[2],
                                              preferred_element_type=jnp.float32)
        zo = exproj_sc[3, r0:r1, :] + jnp.dot(h, ewhh_ref[3],
                                              preferred_element_type=jnp.float32)
        c = jax.nn.sigmoid(zf) * c + jax.nn.sigmoid(zi) * jnp.tanh(zg)
        h = jax.nn.sigmoid(zo) * jnp.tanh(c)
    # h: (NBp, H1) final encoder hidden, rows ordered (note, sample)

    # ------------- top LSTM over notes with pack_padded masking --------------
    # Hoisted per-gate input projection for every note in one matmul each.
    for g in range(4):
        txproj_sc[g] = (jnp.dot(h, twih_ref[g],
                                preferred_element_type=jnp.float32)
                        + tb_ref[g])

    lens_b = len_ref[...]                                # (Bp, H2) int32, pre-broadcast
    zeros_bh = jnp.zeros((Bp, H2), jnp.float32)
    h2 = zeros_bh
    c2 = zeros_bh
    outs = []
    for t in range(T):                                   # fully unrolled
        r0, r1 = t * Bp, (t + 1) * Bp                    # tile-aligned static rows
        zi = txproj_sc[0, r0:r1, :] + jnp.dot(h2, twhh_ref[0],
                                              preferred_element_type=jnp.float32)
        zf = txproj_sc[1, r0:r1, :] + jnp.dot(h2, twhh_ref[1],
                                              preferred_element_type=jnp.float32)
        zg = txproj_sc[2, r0:r1, :] + jnp.dot(h2, twhh_ref[2],
                                              preferred_element_type=jnp.float32)
        zo = txproj_sc[3, r0:r1, :] + jnp.dot(h2, twhh_ref[3],
                                              preferred_element_type=jnp.float32)
        c_new = jax.nn.sigmoid(zf) * c2 + jax.nn.sigmoid(zi) * jnp.tanh(zg)
        h_new = jax.nn.sigmoid(zo) * jnp.tanh(c_new)
        m = t < lens_b                                   # (Bp,H2) bool, no re-broadcast
        c2 = jnp.where(m, c_new, c2)
        h2 = jnp.where(m, h_new, h2)
        outs.append(jnp.where(m, h_new, zeros_bh))
    out_all = jnp.concatenate(outs, axis=0)              # (T*Bp, H2), register value
    out_ref[...] = out_all                                # single sequence store
    hid_ref[...] = h2                                     # single hidden store

    # ------------- attention: softmax_t(fc2(relu(fc1(cat(out_t, hid))))) -----
    # fc1(cat(o, h)) = o @ W1a + h @ W1b + b1 ; everything in two matmuls.
    hproj = (jnp.dot(h2, w1b_ref[...], preferred_element_type=jnp.float32)
             + b1_ref[...])                               # (Bp, H2)
    hrep = jnp.concatenate([hproj] * T, axis=0)           # (T*Bp, H2)
    oproj = jnp.dot(out_all, w1a_ref[...],
                    preferred_element_type=jnp.float32)   # (T*Bp, H2)
    a1 = jnp.maximum(oproj + hrep, 0.0)
    logits = (jnp.dot(a1, w2_ref[...], preferred_element_type=jnp.float32)
              + b2_ref[...])                              # (T*Bp, 1)

    # Register-resident softmax over notes (dim 0 of the (T,B) logical layout);
    # static aligned value slices (Bp rows each), one final store.
    lgs = [logits[t * Bp:(t + 1) * Bp, :] for t in range(T)]
    mx = lgs[0]
    for t in range(1, T):
        mx = jnp.maximum(mx, lgs[t])
    es = [jnp.exp(l - mx) for l in lgs]
    den = es[0]
    for t in range(1, T):
        den = den + es[t]
    score_ref[...] = jnp.concatenate([e / den for e in es], axis=0)


# ----------------------------------------------------------------------------
# Parameter construction (deterministic, synthetic)
# ----------------------------------------------------------------------------
def init_params(key, vocab, E, H1, H2, O):
    ks = jax.random.split(key, 15)
    s = 0.1

    def rnd(k, shape):
        return jax.random.normal(k, shape, jnp.float32) * s

    raw = {
        "emb": rnd(ks[0], (vocab, E)),
        "enc_wih": rnd(ks[1], (4 * H1, E)),
        "enc_whh": rnd(ks[2], (4 * H1, H1)),
        "enc_bih": rnd(ks[3], (4 * H1,)),
        "enc_bhh": rnd(ks[4], (4 * H1,)),
        "top_wih": rnd(ks[5], (4 * H2, H1)),
        "top_whh": rnd(ks[6], (4 * H2, H2)),
        "top_bih": rnd(ks[7], (4 * H2,)),
        "top_bhh": rnd(ks[8], (4 * H2,)),
        "attn_w1": rnd(ks[9], (H2, 2 * H2)),
        "attn_b1": rnd(ks[10], (H2,)),
        "attn_w2": rnd(ks[11], (1, H2)),
        "attn_b2": rnd(ks[12], (1,)),
        "fc_w": rnd(ks[13], (O, 2 * H2)),
        "fc_b": rnd(ks[14], (O,)),
    }

    def split_gates_t(w, H):
        # torch layout (4H, In), gate order [i,f,g,o] -> (4, In, H) transposed
        return jnp.transpose(w.reshape(4, H, -1), (0, 2, 1))

    params = {
        "embeddings": raw["emb"],
        "enc_wih_g": split_gates_t(raw["enc_wih"], H1),          # (4, E, H1)
        "enc_whh_g": split_gates_t(raw["enc_whh"], H1),          # (4, H1, H1)
        "enc_b_g": (raw["enc_bih"] + raw["enc_bhh"]).reshape(4, 1, H1),
        "top_wih_g": split_gates_t(raw["top_wih"], H2),          # (4, H1, H2)
        "top_whh_g": split_gates_t(raw["top_whh"], H2),          # (4, H2, H2)
        "top_b_g": (raw["top_bih"] + raw["top_bhh"]).reshape(4, 1, H2),
        "attn_w1a_t": raw["attn_w1"].T[:H2],                     # multiplies outputs
        "attn_w1b_t": raw["attn_w1"].T[H2:],                     # multiplies hidden
        "attn_b1": raw["attn_b1"].reshape(1, H2),
        "attn_w2c": raw["attn_w2"].T,                            # (H2, 1)
        "attn_b2": raw["attn_b2"].reshape(1, 1),
        "fc_w": raw["fc_w"],                                     # (O, 2H2) XLA epilogue
        "fc_b": raw["fc_b"].reshape(1, O),
    }
    return params, raw


# ----------------------------------------------------------------------------
# Full forward pass (embedding / raw-view glue in XLA, hot path in one kernel)
# ----------------------------------------------------------------------------
def note_order_diagnosis_forward(params, samples, lengths):
    B, N, W = samples.shape
    emb = params["embeddings"]
    E = emb.shape[1]
    H1 = params["enc_whh_g"].shape[1]
    H2 = params["top_whh_g"].shape[1]

    Bp = ((B + 7) // 8) * 8                  # pad batch to a sublane multiple
    T = N                                    # pad_packed output length (== N)

    sample_lengths = jnp.count_nonzero(lengths, axis=1).astype(jnp.int32)   # (B,)
    lens_pad = jnp.pad(sample_lengths, (0, Bp - B))                          # (Bp,)
    lens_bcast = jnp.broadcast_to(lens_pad[:, None], (Bp, H2))               # hoisted mask src

    # torch: samples[i].view(W, N)  (raw row-major reinterpretation, not transpose)
    viewed = samples.reshape(B, W, N)
    embedded = jnp.take(emb, viewed, axis=0)                  # (B, W, N, E)
    x = jnp.transpose(embedded, (1, 2, 0, 3))                 # (W, N, B, E)
    x = jnp.pad(x, ((0, 0), (0, 0), (0, Bp - B), (0, 0)))     # (W, N, Bp, E)
    x_flat = x.reshape(W * N * Bp, E)                         # rows ordered (w, n, b)

    out_flat, score_flat, hid = pl.pallas_call(
        _fused_forward_kernel,
        out_shape=(jax.ShapeDtypeStruct((T * Bp, H2), jnp.float32),   # (t,b) rows
                   jax.ShapeDtypeStruct((T * Bp, 1), jnp.float32),    # (t,b) logits->probs
                   jax.ShapeDtypeStruct((Bp, H2), jnp.float32)),
        scratch_shapes=[pltpu.VMEM((4, W * N * Bp, H1), jnp.float32),
                        pltpu.VMEM((4, T * Bp, H2), jnp.float32)],
        compiler_params=pltpu.CompilerParams(vmem_limit_bytes=32 * 1024 * 1024),
    )(x_flat, lens_bcast,
      params["enc_wih_g"], params["enc_whh_g"], params["enc_b_g"],
      params["top_wih_g"], params["top_whh_g"], params["top_b_g"],
      params["attn_w1a_t"], params["attn_w1b_t"], params["attn_b1"],
      params["attn_w2c"], params["attn_b2"])

    # XLA epilogue: drop padded rows, reproduce torch's raw `.view()`
    # reinterpretations, the bmm context contraction, and the final fc.
    out_seq = out_flat.reshape(T, Bp, H2)[:, :B, :]           # (T, B, H2)
    scores = score_flat.reshape(T, Bp)[:, :B]                 # (T, B)
    hidden = hid[:B]                                          # (B, H2)

    Ov = out_seq.reshape(B, H2, T)                            # output.view(B, H2, -1)
    Sv = scores.reshape(B, T)                                 # scores.view(B, -1, 1)
    ctx = jnp.einsum("bht,bt->bh", Ov, Sv,
                     precision=jax.lax.Precision.HIGHEST)     # (B, H2)
    cc = jnp.concatenate([hidden, ctx], axis=1)               # (B, 2H2)
    return (jnp.dot(cc, params["fc_w"].T,
                    precision=jax.lax.Precision.HIGHEST)
            + params["fc_b"])                                  # (B, output_size)


# ----------------------------------------------------------------------------
# Pure-JAX reference (mirrors the PyTorch math) for a numerical self-check
# ----------------------------------------------------------------------------
def _lstm_ref(x, wih_t, whh_t, b, lengths):
    T, Bt, _ = x.shape
    H = whh_t.shape[0]
    h = jnp.zeros((Bt, H), jnp.float32)
    c = jnp.zeros((Bt, H), jnp.float32)
    outs = []
    for t in range(T):
        gates = x[t] @ wih_t + h @ whh_t + b
        i = jax.nn.sigmoid(gates[:, :H])
        f = jax.nn.sigmoid(gates[:, H:2 * H])
        g = jnp.tanh(gates[:, 2 * H:3 * H])
        o = jax.nn.sigmoid(gates[:, 3 * H:])
        c_new = f * c + i * g
        h_new = o * jnp.tanh(c_new)
        m = t < lengths
        c = jnp.where(m, c_new, c)
        h = jnp.where(m, h_new, h)
        outs.append(jnp.where(m, h_new, 0.0))
    return jnp.stack(outs, 0), h


def forward_ref(raw, samples, lengths):
    B, N, W = samples.shape
    emb = raw["emb"]
    E = emb.shape[1]
    H1 = raw["enc_whh"].shape[1]
    H2 = raw["top_whh"].shape[1]
    sample_lengths = jnp.count_nonzero(lengths, axis=1).astype(jnp.int32)

    viewed = samples.reshape(B, W, N)
    embedded = jnp.take(emb, viewed, axis=0)
    x_enc = jnp.transpose(embedded, (1, 0, 2, 3)).reshape(W, B * N, E)
    _, enc_h = _lstm_ref(x_enc, raw["enc_wih"].T, raw["enc_whh"].T,
                         (raw["enc_bih"] + raw["enc_bhh"])[None],
                         jnp.full((B * N, 1), W, jnp.int32))
    enc_h = enc_h.reshape(B, N, H1)
    valid = jnp.arange(N)[:, None] < sample_lengths[None, :]
    final = jnp.where(valid[..., None], jnp.transpose(enc_h, (1, 0, 2)), 0.0)

    out_seq, hid = _lstm_ref(final, raw["top_wih"].T, raw["top_whh"].T,
                             (raw["top_bih"] + raw["top_bhh"])[None],
                             sample_lengths[:, None])

    rep = jnp.broadcast_to(hid[None], out_seq.shape)
    cat = jnp.concatenate([out_seq, rep], axis=2)
    a1 = jnp.maximum(cat @ raw["attn_w1"].T + raw["attn_b1"], 0.0)
    logit = a1 @ raw["attn_w2"].T + raw["attn_b2"]
    sc = jax.nn.softmax(logit, axis=0)

    Ov = out_seq.reshape(B, H2, -1)
    Sv = sc.reshape(B, -1, 1)
    ctx = jnp.einsum("bht,bto->bho", Ov, Sv)[..., 0]
    cc = jnp.concatenate([hid, ctx], axis=1)
    return cc @ raw["fc_w"].T + raw["fc_b"]


# ----------------------------------------------------------------------------
if __name__ == "__main__":
    B, N, W = 2, 6, 8            # samples, notes per sample, words per note
    vocab, E, H1, H2, O = 20, 16, 32, 32, 4

    key = jax.random.PRNGKey(0)
    k1, k2, k3 = jax.random.split(key, 3)

    samples = jax.random.randint(k1, (B, N, W), 1, vocab, dtype=jnp.int32)
    word_lens = jax.random.randint(k2, (B, N), 1, W + 1, dtype=jnp.int32)
    # sample 0 has all N notes, sample 1 has only its first 4 notes
    # (max(sample_lengths) == N, matching pad_packed_sequence output length).
    note_mask = jnp.array([[1] * N, [1, 1, 1, 1, 0, 0]], dtype=jnp.int32)
    lengths = word_lens * note_mask

    params, raw = init_params(k3, vocab, E, H1, H2, O)

    fwd = jax.jit(note_order_diagnosis_forward)
    out = jax.block_until_ready(fwd(params, samples, lengths))

    with jax.default_matmul_precision("highest"):
        ref = jax.block_until_ready(forward_ref(raw, samples, lengths))

    max_err = float(jnp.max(jnp.abs(out - ref)))
    if max_err > 5e-3:
        raise AssertionError(f"Pallas result mismatch vs reference: {max_err}")

    print("KERNEL_OK")
</pallas_src>

<mosaic_0001>
module attributes {stable_mosaic.version = 11 : i64} {
  func.func @_fused_forward_kernel(%arg0: memref<384x16xf32, #tpu.memory_space<vmem>>, %arg1: memref<8x32xi32, #tpu.memory_space<vmem>>, %arg2: memref<4x16x32xf32, #tpu.memory_space<vmem>>, %arg3: memref<4x32x32xf32, #tpu.memory_space<vmem>>, %arg4: memref<4x1x32xf32, #tpu.memory_space<vmem>>, %arg5: memref<4x32x32xf32, #tpu.memory_space<vmem>>, %arg6: memref<4x32x32xf32, #tpu.memory_space<vmem>>, %arg7: memref<4x1x32xf32, #tpu.memory_space<vmem>>, %arg8: memref<32x32xf32, #tpu.memory_space<vmem>>, %arg9: memref<32x32xf32, #tpu.memory_space<vmem>>, %arg10: memref<1x32xf32, #tpu.memory_space<vmem>>, %arg11: memref<32x1xf32, #tpu.memory_space<vmem>>, %arg12: memref<1x1xf32, #tpu.memory_space<vmem>>, %arg13: memref<48x32xf32, #tpu.memory_space<vmem>>, %arg14: memref<48x1xf32, #tpu.memory_space<vmem>>, %arg15: memref<8x32xf32, #tpu.memory_space<vmem>>, %arg16: memref<4x384x32xf32, #tpu.memory_space<vmem>>, %arg17: memref<4x48x32xf32, #tpu.memory_space<vmem>>) attributes {dimension_semantics = [], scalar_prefetch = 0 : i64, scratch_operands = 2 : i64, tpu.core_type = #tpu.core_type<tc>} {
    %c0 = arith.constant 0 : index
    %c0_0 = arith.constant 0 : index
    %0 = vector.load %arg0[%c0, %c0_0] : memref<384x16xf32, #tpu.memory_space<vmem>>, vector<384x16xf32>
    %c0_1 = arith.constant 0 : index
    %c0_2 = arith.constant 0 : index
    %c0_3 = arith.constant 0 : index
    %1 = vector.load %arg2[%c0_1, %c0_2, %c0_3] : memref<4x16x32xf32, #tpu.memory_space<vmem>>, vector<1x16x32xf32>
    %2 = vector.shape_cast %1 : vector<1x16x32xf32> to vector<16x32xf32>
    %cst = arith.constant dense<0.000000e+00> : vector<384x32xf32>
    %3 = tpu.matmul %0, %2, %cst {dimension_numbers = #tpu.dot_dimension_numbers<[1], [0], [0], [1], [0, 0, 1, 1], [], []>} : vector<384x16xf32>, vector<16x32xf32>, vector<384x32xf32> -> vector<384x32xf32>
    %c0_4 = arith.constant 0 : index
    %c0_5 = arith.constant 0 : index
    %c0_6 = arith.constant 0 : index
    %4 = vector.load %arg4[%c0_4, %c0_5, %c0_6] : memref<4x1x32xf32, #tpu.memory_space<vmem>>, vector<1x1x32xf32>
    %5 = vector.shape_cast %4 : vector<1x1x32xf32> to vector<1x32xf32>
    %6 = vector.broadcast %5 : vector<1x32xf32> to vector<384x32xf32>
    %7 = arith.addf %3, %6 : vector<384x32xf32>
    %c0_7 = arith.constant 0 : index
    %c0_8 = arith.constant 0 : index
    %c0_9 = arith.constant 0 : index
    %8 = vector.load %arg16[%c0_7, %c0_8, %c0_9] : memref<4x384x32xf32, #tpu.memory_space<vmem>>, vector<1x384x32xf32>
    %9 = vector.shape_cast %8 : vector<1x384x32xf32> to vector<384x32xf32>
    %10 = vector.shape_cast %7 : vector<384x32xf32> to vector<1x384x32xf32>
    tpu.vector_store %arg16[%c0_7, %c0_8, %c0_9], %10 {strides = array<i32>} : memref<4x384x32xf32, #tpu.memory_space<vmem>>, vector<1x384x32xf32>,
    %c0_10 = arith.constant 0 : index
    %c0_11 = arith.constant 0 : index
    %11 = vector.load %arg0[%c0_10, %c0_11] : memref<384x16xf32, #tpu.memory_space<vmem>>, vector<384x16xf32>
    %c1 = arith.constant 1 : index
    %c0_12 = arith.constant 0 : index
    %c0_13 = arith.constant 0 : index
    %12 = vector.load %arg2[%c1, %c0_12, %c0_13] : memref<4x16x32xf32, #tpu.memory_space<vmem>>, vector<1x16x32xf32>
    %13 = vector.shape_cast %12 : vector<1x16x32xf32> to vector<16x32xf32>
    %cst_14 = arith.constant dense<0.000000e+00> : vector<384x32xf32>
    %14 = tpu.matmul %11, %13, %cst_14 {dimension_numbers = #tpu.dot_dimension_numbers<[1], [0], [0], [1], [0, 0, 1, 1], [], []>} : vector<384x16xf32>, vector<16x32xf32>, vector<384x32xf32> -> vector<384x32xf32>
    %c1_15 = arith.constant 1 : index
    %c0_16 = arith.constant 0 : index
    %c0_17 = arith.constant 0 : index
    %15 = vector.load %arg4[%c1_15, %c0_16, %c0_17] : memref<4x1x32xf32, #tpu.memory_space<vmem>>, vector<1x1x32xf32>
    %16 = vector.shape_cast %15 : vector<1x1x32xf32> to vector<1x32xf32>
    %17 = vector.broadcast %16 : vector<1x32xf32> to vector<384x32xf32>
    %18 = arith.addf %14, %17 : vector<384x32xf32>
    %c1_18 = arith.constant 1 : index
    %c0_19 = arith.constant 0 : index
    %c0_20 = arith.constant 0 : index
    %19 = vector.load %arg16[%c1_18, %c0_19, %c0_20] : memref<4x384x32xf32, #tpu.memory_space<vmem>>, vector<1x384x32xf32>
    %20 = vector.shape_cast %19 : vector<1x384x32xf32> to vector<384x32xf32>
    %21 = vector.shape_cast %18 : vector<384x32xf32> to vector<1x384x32xf32>
    tpu.vector_store %arg16[%c1_18, %c0_19, %c0_20], %21 {strides = array<i32>} : memref<4x384x32xf32, #tpu.memory_space<vmem>>, vector<1x384x32xf32>,
    %c0_21 = arith.constant 0 : index
    %c0_22 = arith.constant 0 : index
    %22 = vector.load %arg0[%c0_21, %c0_22] : memref<384x16xf32, #tpu.memory_space<vmem>>, vector<384x16xf32>
    %c2 = arith.constant 2 : index
    %c0_23 = arith.constant 0 : index
    %c0_24 = arith.constant 0 : index
    %23 = vector.load %arg2[%c2, %c0_23, %c0_24] : memref<4x16x32xf32, #tpu.memory_space<vmem>>, vector<1x16x32xf32>
    %24 = vector.shape_cast %23 : vector<1x16x32xf32> to vector<16x32xf32>
    %cst_25 = arith.constant dense<0.000000e+00> : vector<384x32xf32>
    %25 = tpu.matmul %22, %24, %cst_25 {dimension_numbers = #tpu.dot_dimension_numbers<[1], [0], [0], [1], [0, 0, 1, 1], [], []>} : vector<384x16xf32>, vector<16x32xf32>, vector<384x32xf32> -> vector<384x32xf32>
    %c2_26 = arith.constant 2 : index
    %c0_27 = arith.constant 0 : index
    %c0_28 = arith.constant 0 : index
    %26 = vector.load %arg4[%c2_26, %c0_27, %c0_28] : memref<4x1x32xf32, #tpu.memory_space<vmem>>, vector<1x1x32xf32>
    %27 = vector.shape_cast %26 : vector<1x1x32xf32> to vector<1x32xf32>
    %28 = vector.broadcast %27 : vector<1x32xf32> to vector<384x32xf32>
    %29 = arith.addf %25, %28 : vector<384x32xf32>
    %c2_29 = arith.constant 2 : index
    %c0_30 = arith.constant 0 : index
    %c0_31 = arith.constant 0 : index
    %30 = vector.load %arg16[%c2_29, %c0_30, %c0_31] : memref<4x384x32xf32, #tpu.memory_space<vmem>>, vector<1x384x32xf32>
    %31 = vector.shape_cast %30 : vector<1x384x32xf32> to vector<384x32xf32>
    %32 = vector.shape_cast %29 : vector<384x32xf32> to vector<1x384x32xf32>
    tpu.vector_store %arg16[%c2_29, %c0_30, %c0_31], %32 {strides = array<i32>} : memref<4x384x32xf32, #tpu.memory_space<vmem>>, vector<1x384x32xf32>,
    %c0_32 = arith.constant 0 : index
    %c0_33 = arith.constant 0 : index
    %33 = vector.load %arg0[%c0_32, %c0_33] : memref<384x16xf32, #tpu.memory_space<vmem>>, vector<384x16xf32>
    %c3 = arith.constant 3 : index
    %c0_34 = arith.constant 0 : index
    %c0_35 = arith.constant 0 : index
    %34 = vector.load %arg2[%c3, %c0_34, %c0_35] : memref<4x16x32xf32, #tpu.memory_space<vmem>>, vector<1x16x32xf32>
    %35 = vector.shape_cast %34 : vector<1x16x32xf32> to vector<16x32xf32>
    %cst_36 = arith.constant dense<0.000000e+00> : vector<384x32xf32>
    %36 = tpu.matmul %33, %35, %cst_36 {dimension_numbers = #tpu.dot_dimension_numbers<[1], [0], [0], [1], [0, 0, 1, 1], [], []>} : vector<384x16xf32>, vector<16x32xf32>, vector<384x32xf32> -> vector<384x32xf32>
    %c3_37 = arith.constant 3 : index
    %c0_38 = arith.constant 0 : index
    %c0_39 = arith.constant 0 : index
    %37 = vector.load %arg4[%c3_37, %c0_38, %c0_39] : memref<4x1x32xf32, #tpu.memory_space<vmem>>, vector<1x1x32xf32>
    %38 = vector.shape_cast %37 : vector<1x1x32xf32> to vector<1x32xf32>
    %39 = vector.broadcast %38 : vector<1x32xf32> to vector<384x32xf32>
    %40 = arith.addf %36, %39 : vector<384x32xf32>
    %c3_40 = arith.constant 3 : index
    %c0_41 = arith.constant 0 : index
    %c0_42 = arith.constant 0 : index
    %41 = vector.load %arg16[%c3_40, %c0_41, %c0_42] : memref<4x384x32xf32, #tpu.memory_space<vmem>>, vector<1x384x32xf32>
    %42 = vector.shape_cast %41 : vector<1x384x32xf32> to vector<384x32xf32>
    %43 = vector.shape_cast %40 : vector<384x32xf32> to vector<1x384x32xf32>
    tpu.vector_store %arg16[%c3_40, %c0_41, %c0_42], %43 {strides = array<i32>} : memref<4x384x32xf32, #tpu.memory_space<vmem>>, vector<1x384x32xf32>,
    %cst_43 = arith.constant 0.000000e+00 : f32
    %44 = vector.broadcast %cst_43 : f32 to vector<48x32xf32>
    %cst_44 = arith.constant 0.000000e+00 : f32
    %45 = vector.broadcast %cst_44 : f32 to vector<48x32xf32>
    %c0_45 = arith.constant 0 : index
    %c0_46 = arith.constant 0 : index
    %c0_47 = arith.constant 0 : index
    %46 = vector.load %arg16[%c0_45, %c0_46, %c0_47] : memref<4x384x32xf32, #tpu.memory_space<vmem>>, vector<1x48x32xf32>
    %47 = vector.shape_cast %46 : vector<1x48x32xf32> to vector<48x32xf32>
    %c0_48 = arith.constant 0 : index
    %c0_49 = arith.constant 0 : index
    %c0_50 = arith.constant 0 : index
    %48 = vector.load %arg3[%c0_48, %c0_49, %c0_50] : memref<4x32x32xf32, #tpu.memory_space<vmem>>, vector<1x32x32xf32>
    %49 = vector.shape_cast %48 : vector<1x32x32xf32> to vector<32x32xf32>
    %cst_51 = arith.constant dense<0.000000e+00> : vector<48x32xf32>
    %50 = tpu.matmul %44, %49, %cst_51 {dimension_numbers = #tpu.dot_dimension_numbers<[1], [0], [0], [1], [0, 0, 1, 1], [], []>} : vector<48x32xf32>, vector<32x32xf32>, vector<48x32xf32> -> vector<48x32xf32>
    %51 = arith.addf %47, %50 : vector<48x32xf32>
    %c1_52 = arith.constant 1 : index
    %c0_53 = arith.constant 0 : index
    %c0_54 = arith.constant 0 : index
    %52 = vector.load %arg16[%c1_52, %c0_53, %c0_54] : memref<4x384x32xf32, #tpu.memory_space<vmem>>, vector<1x48x32xf32>
    %53 = vector.shape_cast %52 : vector<1x48x32xf32> to vector<48x32xf32>
    %c1_55 = arith.constant 1 : index
    %c0_56 = arith.constant 0 : index
    %c0_57 = arith.constant 0 : index
    %54 = vector.load %arg3[%c1_55, %c0_56, %c0_57] : memref<4x32x32xf32, #tpu.memory_space<vmem>>, vector<1x32x32xf32>
    %55 = vector.shape_cast %54 : vector<1x32x32xf32> to vector<32x32xf32>
    %cst_58 = arith.constant dense<0.000000e+00> : vector<48x32xf32>
    %56 = tpu.matmul %44, %55, %cst_58 {dimension_numbers = #tpu.dot_dimension_numbers<[1], [0], [0], [1], [0, 0, 1, 1], [], []>} : vector<48x32xf32>, vector<32x32xf32>, vector<48x32xf32> -> vector<48x32xf32>
    %57 = arith.addf %53, %56 : vector<48x32xf32>
    %c2_59 = arith.constant 2 : index
    %c0_60 = arith.constant 0 : index
    %c0_61 = arith.constant 0 : index
    %58 = vector.load %arg16[%c2_59, %c0_60, %c0_61] : memref<4x384x32xf32, #tpu.memory_space<vmem>>, vector<1x48x32xf32>
    %59 = vector.shape_cast %58 : vector<1x48x32xf32> to vector<48x32xf32>
    %c2_62 = arith.constant 2 : index
    %c0_63 = arith.constant 0 : index
    %c0_64 = arith.constant 0 : index
    %60 = vector.load %arg3[%c2_62, %c0_63, %c0_64] : memref<4x32x32xf32, #tpu.memory_space<vmem>>, vector<1x32x32xf32>
    %61 = vector.shape_cast %60 : vector<1x32x32xf32> to vector<32x32xf32>
    %cst_65 = arith.constant dense<0.000000e+00> : vector<48x32xf32>
    %62 = tpu.matmul %44, %61, %cst_65 {dimension_numbers = #tpu.dot_dimension_numbers<[1], [0], [0], [1], [0, 0, 1, 1], [], []>} : vector<48x32xf32>, vector<32x32xf32>, vector<48x32xf32> -> vector<48x32xf32>
    %63 = arith.addf %59, %62 : vector<48x32xf32>
    %c3_66 = arith.constant 3 : index
    %c0_67 = arith.constant 0 : index
    %c0_68 = arith.constant 0 : index
    %64 = vector.load %arg16[%c3_66, %c0_67, %c0_68] : memref<4x384x32xf32, #tpu.memory_space<vmem>>, vector<1x48x32xf32>
    %65 = vector.shape_cast %64 : vector<1x48x32xf32> to vector<48x32xf32>
    %c3_69 = arith.constant 3 : index
    %c0_70 = arith.constant 0 : index
    %c0_71 = arith.constant 0 : index
    %66 = vector.load %arg3[%c3_69, %c0_70, %c0_71] : memref<4x32x32xf32, #tpu.memory_space<vmem>>, vector<1x32x32xf32>
    %67 = vector.shape_cast %66 : vector<1x32x32xf32> to vector<32x32xf32>
    %cst_72 = arith.constant dense<0.000000e+00> : vector<48x32xf32>
    %68 = tpu.matmul %44, %67, %cst_72 {dimension_numbers = #tpu.dot_dimension_numbers<[1], [0], [0], [1], [0, 0, 1, 1], [], []>} : vector<48x32xf32>, vector<32x32xf32>, vector<48x32xf32> -> vector<48x32xf32>
    %69 = arith.addf %65, %68 : vector<48x32xf32>
    %70 = arith.negf %57 : vector<48x32xf32>
    %71 = math.exp %70 : vector<48x32xf32>
    %cst_73 = arith.constant 1.000000e+00 : f32
    %72 = vector.broadcast %cst_73 : f32 to vector<48x32xf32>
    %73 = arith.addf %72, %71 : vector<48x32xf32>
    %74 = arith.divf %72, %73 : vector<48x32xf32>
    %75 = arith.mulf %74, %45 : vector<48x32xf32>
    %76 = arith.negf %51 : vector<48x32xf32>
    %77 = math.exp %76 : vector<48x32xf32>
    %cst_74 = arith.constant 1.000000e+00 : f32
    %78 = vector.broadcast %cst_74 : f32 to vector<48x32xf32>
    %79 = arith.addf %78, %77 : vector<48x32xf32>
    %80 = arith.divf %78, %79 : vector<48x32xf32>
    %81 = math.tanh %63 : vector<48x32xf32>
    %82 = arith.mulf %80, %81 : vector<48x32xf32>
    %83 = arith.addf %75, %82 : vector<48x32xf32>
    %84 = arith.negf %69 : vector<48x32xf32>
    %85 = math.exp %84 : vector<48x32xf32>
    %cst_75 = arith.constant 1.000000e+00 : f32
    %86 = vector.broadcast %cst_75 : f32 to vector<48x32xf32>
    %87 = arith.addf %86, %85 : vector<48x32xf32>
    %88 = arith.divf %86, %87 : vector<48x32xf32>
    %89 = math.tanh %83 : vector<48x32xf32>
    %90 = arith.mulf %88, %89 : vector<48x32xf32>
    %c0_76 = arith.constant 0 : index
    %c48 = arith.constant 48 : index
    %c0_77 = arith.constant 0 : index
    %91 = vector.load %arg16[%c0_76, %c48, %c0_77] : memref<4x384x32xf32, #tpu.memory_space<vmem>>, vector<1x48x32xf32>
    %92 = vector.shape_cast %91 : vector<1x48x32xf32> to vector<48x32xf32>
    %c0_78 = arith.constant 0 : index
    %c0_79 = arith.constant 0 : index
    %c0_80 = arith.constant 0 : index
    %93 = vector.load %arg3[%c0_78, %c0_79, %c0_80] : memref<4x32x32xf32, #tpu.memory_space<vmem>>, vector<1x32x32xf32>
    %94 = vector.shape_cast %93 : vector<1x32x32xf32> to vector<32x32xf32>
    %cst_81 = arith.constant dense<0.000000e+00> : vector<48x32xf32>
    %95 = tpu.matmul %90, %94, %cst_81 {dimension_numbers = #tpu.dot_dimension_numbers<[1], [0], [0], [1], [0, 0, 1, 1], [], []>} : vector<48x32xf32>, vector<32x32xf32>, vector<48x32xf32> -> vector<48x32xf32>
    %96 = arith.addf %92, %95 : vector<48x32xf32>
    %c1_82 = arith.constant 1 : index
    %c48_83 = arith.constant 48 : index
    %c0_84 = arith.constant 0 : index
    %97 = vector.load %arg16[%c1_82, %c48_83, %c0_84] : memref<4x384x32xf32, #tpu.memory_space<vmem>>, vector<1x48x32xf32>
    %98 = vector.shape_cast %97 : vector<1x48x32xf32> to vector<48x32xf32>
    %c1_85 = arith.constant 1 : index
    %c0_86 = arith.constant 0 : index
    %c0_87 = arith.constant 0 : index
    %99 = vector.load %arg3[%c1_85, %c0_86, %c0_87] : memref<4x32x32xf32, #tpu.memory_space<vmem>>, vector<1x32x32xf32>
    %100 = vector.shape_cast %99 : vector<1x32x32xf32> to vector<32x32xf32>
    %cst_88 = arith.constant dense<0.000000e+00> : vector<48x32xf32>
    %101 = tpu.matmul %90, %100, %cst_88 {dimension_numbers = #tpu.dot_dimension_numbers<[1], [0], [0], [1], [0, 0, 1, 1], [], []>} : vector<48x32xf32>, vector<32x32xf32>, vector<48x32xf32> -> vector<48x32xf32>
    %102 = arith.addf %98, %101 : vector<48x32xf32>
    %c2_89 = arith.constant 2 : index
    %c48_90 = arith.constant 48 : index
    %c0_91 = arith.constant 0 : index
    %103 = vector.load %arg16[%c2_89, %c48_90, %c0_91] : memref<4x384x32xf32, #tpu.memory_space<vmem>>, vector<1x48x32xf32>
    %104 = vector.shape_cast %103 : vector<1x48x32xf32> to vector<48x32xf32>
    %c2_92 = arith.constant 2 : index
    %c0_93 = arith.constant 0 : index
    %c0_94 = arith.constant 0 : index
    %105 = vector.load %arg3[%c2_92, %c0_93, %c0_94] : memref<4x32x32xf32, #tpu.memory_space<vmem>>, vector<1x32x32xf32>
    %106 = vector.shape_cast %105 : vector<1x32x32xf32> to vector<32x32xf32>
    %cst_95 = arith.constant dense<0.000000e+00> : vector<48x32xf32>
    %107 = tpu.matmul %90, %106, %cst_95 {dimension_numbers = #tpu.dot_dimension_numbers<[1], [0], [0], [1], [0, 0, 1, 1], [], []>} : vector<48x32xf32>, vector<32x32xf32>, vector<48x32xf32> -> vector<48x32xf32>
    %108 = arith.addf %104, %107 : vector<48x32xf32>
    %c3_96 = arith.constant 3 : index
    %c48_97 = arith.constant 48 : index
    %c0_98 = arith.constant 0 : index
    %109 = vector.load %arg16[%c3_96, %c48_97, %c0_98] : memref<4x384x32xf32, #tpu.memory_space<vmem>>, vector<1x48x32xf32>
    %110 = vector.shape_cast %109 : vector<1x48x32xf32> to vector<48x32xf32>
    %c3_99 = arith.constant 3 : index
    %c0_100 = arith.constant 0 : index
    %c0_101 = arith.constant 0 : index
    %111 = vector.load %arg3[%c3_99, %c0_100, %c0_101] : memref<4x32x32xf32, #tpu.memory_space<vmem>>, vector<1x32x32xf32>
    %112 = vector.shape_cast %111 : vector<1x32x32xf32> to vector<32x32xf32>
    %cst_102 = arith.constant dense<0.000000e+00> : vector<48x32xf32>
    %113 = tpu.matmul %90, %112, %cst_102 {dimension_numbers = #tpu.dot_dimension_numbers<[1], [0], [0], [1], [0, 0, 1, 1], [], []>} : vector<48x32xf32>, vector<32x32xf32>, vector<48x32xf32> -> vector<48x32xf32>
    %114 = arith.addf %110, %113 : vector<48x32xf32>
    %115 = arith.negf %102 : vector<48x32xf32>
    %116 = math.exp %115 : vector<48x32xf32>
    %cst_103 = arith.constant 1.000000e+00 : f32
    %117 = vector.broadcast %cst_103 : f32 to vector<48x32xf32>
    %118 = arith.addf %117, %116 : vector<48x32xf32>
    %119 = arith.divf %117, %118 : vector<48x32xf32>
    %120 = arith.mulf %119, %83 : vector<48x32xf32>
    %121 = arith.negf %96 : vector<48x32xf32>
    %122 = math.exp %121 : vector<48x32xf32>
    %cst_104 = arith.constant 1.000000e+00 : f32
    %123 = vector.broadcast %cst_104 : f32 to vector<48x32xf32>
    %124 = arith.addf %123, %122 : vector<48x32xf32>
    %125 = arith.divf %123, %124 : vector<48x32xf32>
    %126 = math.tanh %108 : vector<48x32xf32>
    %127 = arith.mulf %125, %126 : vector<48x32xf32>
    %128 = arith.addf %120, %127 : vector<48x32xf32>
    %129 = arith.negf %114 : vector<48x32xf32>
    %130 = math.exp %129 : vector<48x32xf32>
    %cst_105 = arith.constant 1.000000e+00 : f32
    %131 = vector.broadcast %cst_105 : f32 to vector<48x32xf32>
    %132 = arith.addf %131, %130 : vector<48x32xf32>
    %133 = arith.divf %131, %132 : vector<48x32xf32>
    %134 = math.tanh %128 : vector<48x32xf32>
    %135 = arith.mulf %133, %134 : vector<48x32xf32>
    %c0_106 = arith.constant 0 : index
    %c96 = arith.constant 96 : index
    %c0_107 = arith.constant 0 : index
    %136 = vector.load %arg16[%c0_106, %c96, %c0_107] : memref<4x384x32xf32, #tpu.memory_space<vmem>>, vector<1x48x32xf32>
    %137 = vector.shape_cast %136 : vector<1x48x32xf32> to vector<48x32xf32>
    %c0_108 = arith.constant 0 : index
    %c0_109 = arith.constant 0 : index
    %c0_110 = arith.constant 0 : index
    %138 = vector.load %arg3[%c0_108, %c0_109, %c0_110] : memref<4x32x32xf32, #tpu.memory_space<vmem>>, vector<1x32x32xf32>
    %139 = vector.shape_cast %138 : vector<1x32x32xf32> to vector<32x32xf32>
    %cst_111 = arith.constant dense<0.000000e+00> : vector<48x32xf32>
    %140 = tpu.matmul %135, %139, %cst_111 {dimension_numbers = #tpu.dot_dimension_numbers<[1], [0], [0], [1], [0, 0, 1, 1], [], []>} : vector<48x32xf32>, vector<32x32xf32>, vector<48x32xf32> -> vector<48x32xf32>
    %141 = arith.addf %137, %140 : vector<48x32xf32>
    %c1_112 = arith.constant 1 : index
    %c96_113 = arith.constant 96 : index
    %c0_114 = arith.constant 0 : index
    %142 = vector.load %arg16[%c1_112, %c96_113, %c0_114] : memref<4x384x32xf32, #tpu.memory_space<vmem>>, vector<1x48x32xf32>
    %143 = vector.shape_cast %142 : vector<1x48x32xf32> to vector<48x32xf32>
    %c1_115 = arith.constant 1 : index
    %c0_116 = arith.constant 0 : index
    %c0_117 = arith.constant 0 : index
    %144 = vector.load %arg3[%c1_115, %c0_116, %c0_117] : memref<4x32x32xf32, #tpu.memory_space<vmem>>, vector<1x32x32xf32>
    %145 = vector.shape_cast %144 : vector<1x32x32xf32> to vector<32x32xf32>
    %cst_118 = arith.constant dense<0.000000e+00> : vector<48x32xf32>
    %146 = tpu.matmul %135, %145, %cst_118 {dimension_numbers = #tpu.dot_dimension_numbers<[1], [0], [0], [1], [0, 0, 1, 1], [], []>} : vector<48x32xf32>, vector<32x32xf32>, vector<48x32xf32> -> vector<48x32xf32>
    %147 = arith.addf %143, %146 : vector<48x32xf32>
    %c2_119 = arith.constant 2 : index
    %c96_120 = arith.constant 96 : index
    %c0_121 = arith.constant 0 : index
    %148 = vector.load %arg16[%c2_119, %c96_120, %c0_121] : memref<4x384x32xf32, #tpu.memory_space<vmem>>, vector<1x48x32xf32>
    %149 = vector.shape_cast %148 : vector<1x48x32xf32> to vector<48x32xf32>
    %c2_122 = arith.constant 2 : index
    %c0_123 = arith.constant 0 : index
    %c0_124 = arith.constant 0 : index
    %150 = vector.load %arg3[%c2_122, %c0_123, %c0_124] : memref<4x32x32xf32, #tpu.memory_space<vmem>>, vector<1x32x32xf32>
    %151 = vector.shape_cast %150 : vector<1x32x32xf32> to vector<32x32xf32>
    %cst_125 = arith.constant dense<0.000000e+00> : vector<48x32xf32>
    %152 = tpu.matmul %135, %151, %cst_125 {dimension_numbers = #tpu.dot_dimension_numbers<[1], [0], [0], [1], [0, 0, 1, 1], [], []>} : vector<48x32xf32>, vector<32x32xf32>, vector<48x32xf32> -> vector<48x32xf32>
    %153 = arith.addf %149, %152 : vector<48x32xf32>
    %c3_126 = arith.constant 3 : index
    %c96_127 = arith.constant 96 : index
    %c0_128 = arith.constant 0 : index
    %154 = vector.load %arg16[%c3_126, %c96_127, %c0_128] : memref<4x384x32xf32, #tpu.memory_space<vmem>>, vector<1x48x32xf32>
    %155 = vector.shape_cast %154 : vector<1x48x32xf32> to vector<48x32xf32>
    %c3_129 = arith.constant 3 : index
    %c0_130 = arith.constant 0 : index
    %c0_131 = arith.constant 0 : index
    %156 = vector.load %arg3[%c3_129, %c0_130, %c0_131] : memref<4x32x32xf32, #tpu.memory_space<vmem>>, vector<1x32x32xf32>
    %157 = vector.shape_cast %156 : vector<1x32x32xf32> to vector<32x32xf32>
    %cst_132 = arith.constant dense<0.000000e+00> : vector<48x32xf32>
    %158 = tpu.matmul %135, %157, %cst_132 {dimension_numbers = #tpu.dot_dimension_numbers<[1], [0], [0], [1], [0, 0, 1, 1], [], []>} : vector<48x32xf32>, vector<32x32xf32>, vector<48x32xf32> -> vector<48x32xf32>
    %159 = arith.addf %155, %158 : vector<48x32xf32>
    %160 = arith.negf %147 : vector<48x32xf32>
    %161 = math.exp %160 : vector<48x32xf32>
    %cst_133 = arith.constant 1.000000e+00 : f32
    %162 = vector.broadcast %cst_133 : f32 to vector<48x32xf32>
    %163 = arith.addf %162, %161 : vector<48x32xf32>
    %164 = arith.divf %162, %163 : vector<48x32xf32>
    %165 = arith.mulf %164, %128 : vector<48x32xf32>
    %166 = arith.negf %141 : vector<48x32xf32>
    %167 = math.exp %166 : vector<48x32xf32>
    %cst_134 = arith.constant 1.000000e+00 : f32
    %168 = vector.broadcast %cst_134 : f32 to vector<48x32xf32>
    %169 = arith.addf %168, %167 : vector<48x32xf32>
    %170 = arith.divf %168, %169 : vector<48x32xf32>
    %171 = math.tanh %153 : vector<48x32xf32>
    %172 = arith.mulf %170, %171 : vector<48x32xf32>
    %173 = arith.addf %165, %172 : vector<48x32xf32>
    %174 = arith.negf %159 : vector<48x32xf32>
    %175 = math.exp %174 : vector<48x32xf32>
    %cst_135 = arith.constant 1.000000e+00 : f32
    %176 = vector.broadcast %cst_135 : f32 to vector<48x32xf32>
    %177 = arith.addf %176, %175 : vector<48x32xf32>
    %178 = arith.divf %176, %177 : vector<48x32xf32>
    %179 = math.tanh %173 : vector<48x32xf32>
    %180 = arith.mulf %178, %179 : vector<48x32xf32>
    %c0_136 = arith.constant 0 : index
    %c144 = arith.constant 144 : index
    %c0_137 = arith.constant 0 : index
    %181 = vector.load %arg16[%c0_136, %c144, %c0_137] : memref<4x384x32xf32, #tpu.memory_space<vmem>>, vector<1x48x32xf32>
    %182 = vector.shape_cast %181 : vector<1x48x32xf32> to vector<48x32xf32>
    %c0_138 = arith.constant 0 : index
    %c0_139 = arith.constant 0 : index
    %c0_140 = arith.constant 0 : index
    %183 = vector.load %arg3[%c0_138, %c0_139, %c0_140] : memref<4x32x32xf32, #tpu.memory_space<vmem>>, vector<1x32x32xf32>
    %184 = vector.shape_cast %183 : vector<1x32x32xf32> to vector<32x32xf32>
    %cst_141 = arith.constant dense<0.000000e+00> : vector<48x32xf32>
    %185 = tpu.matmul %180, %184, %cst_141 {dimension_numbers = #tpu.dot_dimension_numbers<[1], [0], [0], [1], [0, 0, 1, 1], [], []>} : vector<48x32xf32>, vector<32x32xf32>, vector<48x32xf32> -> vector<48x32xf32>
    %186 = arith.addf %182, %185 : vector<48x32xf32>
    %c1_142 = arith.constant 1 : index
    %c144_143 = arith.constant 144 : index
    %c0_144 = arith.constant 0 : index
    %187 = vector.load %arg16[%c1_142, %c144_143, %c0_144] : memref<4x384x32xf32, #tpu.memory_space<vmem>>, vector<1x48x32xf32>
    %188 = vector.shape_cast %187 : vector<1x48x32xf32> to vector<48x32xf32>
    %c1_145 = arith.constant 1 : index
    %c0_146 = arith.constant 0 : index
    %c0_147 = arith.constant 0 : index
    %189 = vector.load %arg3[%c1_145, %c0_146, %c0_147] : memref<4x32x32xf32, #tpu.memory_space<vmem>>, vector<1x32x32xf32>
    %190 = vector.shape_cast %189 : vector<1x32x32xf32> to vector<32x32xf32>
    %cst_148 = arith.constant dense<0.000000e+00> : vector<48x32xf32>
    %191 = tpu.matmul %180, %190, %cst_148 {dimension_numbers = #tpu.dot_dimension_numbers<[1], [0], [0], [1], [0, 0, 1, 1], [], []>} : vector<48x32xf32>, vector<32x32xf32>, vector<48x32xf32> -> vector<48x32xf32>
    %192 = arith.addf %188, %191 : vector<48x32xf32>
    %c2_149 = arith.constant 2 : index
    %c144_150 = arith.constant 144 : index
    %c0_151 = arith.constant 0 : index
    %193 = vector.load %arg16[%c2_149, %c144_150, %c0_151] : memref<4x384x32xf32, #tpu.memory_space<vmem>>, vector<1x48x32xf32>
    %194 = vector.shape_cast %193 : vector<1x48x32xf32> to vector<48x32xf32>
    %c2_152 = arith.constant 2 : index
    %c0_153 = arith.constant 0 : index
    %c0_154 = arith.constant 0 : index
    %195 = vector.load %arg3[%c2_152, %c0_153, %c0_154] : memref<4x32x32xf32, #tpu.memory_space<vmem>>, vector<1x32x32xf32>
    %196 = vector.shape_cast %195 : vector<1x32x32xf32> to vector<32x32xf32>
    %cst_155 = arith.constant dense<0.000000e+00> : vector<48x32xf32>
    %197 = tpu.matmul %180, %196, %cst_155 {dimension_numbers = #tpu.dot_dimension_numbers<[1], [0], [0], [1], [0, 0, 1, 1], [], []>} : vector<48x32xf32>, vector<32x32xf32>, vector<48x32xf32> -> vector<48x32xf32>
    %198 = arith.addf %194, %197 : vector<48x32xf32>
    %c3_156 = arith.constant 3 : index
    %c144_157 = arith.constant 144 : index
    %c0_158 = arith.constant 0 : index
    %199 = vector.load %arg16[%c3_156, %c144_157, %c0_158] : memref<4x384x32xf32, #tpu.memory_space<vmem>>, vector<1x48x32xf32>
    %200 = vector.shape_cast %199 : vector<1x48x32xf32> to vector<48x32xf32>
    %c3_159 = arith.constant 3 : index
    %c0_160 = arith.constant 0 : index
    %c0_161 = arith.constant 0 : index
    %201 = vector.load %arg3[%c3_159, %c0_160, %c0_161] : memref<4x32x32xf32, #tpu.memory_space<vmem>>, vector<1x32x32xf32>
    %202 = vector.shape_cast %201 : vector<1x32x32xf32> to vector<32x32xf32>
    %cst_162 = arith.constant dense<0.000000e+00> : vector<48x32xf32>
    %203 = tpu.matmul %180, %202, %cst_162 {dimension_numbers = #tpu.dot_dimension_numbers<[1], [0], [0], [1], [0, 0, 1, 1], [], []>} : vector<48x32xf32>, vector<32x32xf32>, vector<48x32xf32> -> vector<48x32xf32>
    %204 = arith.addf %200, %203 : vector<48x32xf32>
    %205 = arith.negf %192 : vector<48x32xf32>
    %206 = math.exp %205 : vector<48x32xf32>
    %cst_163 = arith.constant 1.000000e+00 : f32
    %207 = vector.broadcast %cst_163 : f32 to vector<48x32xf32>
    %208 = arith.addf %207, %206 : vector<48x32xf32>
    %209 = arith.divf %207, %208 : vector<48x32xf32>
    %210 = arith.mulf %209, %173 : vector<48x32xf32>
    %211 = arith.negf %186 : vector<48x32xf32>
    %212 = math.exp %211 : vector<48x32xf32>
    %cst_164 = arith.constant 1.000000e+00 : f32
    %213 = vector.broadcast %cst_164 : f32 to vector<48x32xf32>
    %214 = arith.addf %213, %212 : vector<48x32xf32>
    %215 = arith.divf %213, %214 : vector<48x32xf32>
    %216 = math.tanh %198 : vector<48x32xf32>
    %217 = arith.mulf %215, %216 : vector<48x32xf32>
    %218 = arith.addf %210, %217 : vector<48x32xf32>
    %219 = arith.negf %204 : vector<48x32xf32>
    %220 = math.exp %219 : vector<48x32xf32>
    %cst_165 = arith.constant 1.000000e+00 : f32
    %221 = vector.broadcast %cst_165 : f32 to vector<48x32xf32>
    %222 = arith.addf %221, %220 : vector<48x32xf32>
    %223 = arith.divf %221, %222 : vector<48x32xf32>
    %224 = math.tanh %218 : vector<48x32xf32>
    %225 = arith.mulf %223, %224 : vector<48x32xf32>
    %c0_166 = arith.constant 0 : index
    %c192 = arith.constant 192 : index
    %c0_167 = arith.constant 0 : index
    %226 = vector.load %arg16[%c0_166, %c192, %c0_167] : memref<4x384x32xf32, #tpu.memory_space<vmem>>, vector<1x48x32xf32>
    %227 = vector.shape_cast %226 : vector<1x48x32xf32> to vector<48x32xf32>
    %c0_168 = arith.constant 0 : index
    %c0_169 = arith.constant 0 : index
    %c0_170 = arith.constant 0 : index
    %228 = vector.load %arg3[%c0_168, %c0_169, %c0_170] : memref<4x32x32xf32, #tpu.memory_space<vmem>>, vector<1x32x32xf32>
    %229 = vector.shape_cast %228 : vector<1x32x32xf32> to vector<32x32xf32>
    %cst_171 = arith.constant dense<0.000000e+00> : vector<48x32xf32>
    %230 = tpu.matmul %225, %229, %cst_171 {dimension_numbers = #tpu.dot_dimension_numbers<[1], [0], [0], [1], [0, 0, 1, 1], [], []>} : vector<48x32xf32>, vector<32x32xf32>, vector<48x32xf32> -> vector<48x32xf32>
    %231 = arith.addf %227, %230 : vector<48x32xf32>
    %c1_172 = arith.constant 1 : index
    %c192_173 = arith.constant 192 : index
    %c0_174 = arith.constant 0 : index
    %232 = vector.load %arg16[%c1_172, %c192_173, %c0_174] : memref<4x384x32xf32, #tpu.memory_space<vmem>>, vector<1x48x32xf32>
    %233 = vector.shape_cast %232 : vector<1x48x32xf32> to vector<48x32xf32>
    %c1_175 = arith.constant 1 : index
    %c0_176 = arith.constant 0 : index
    %c0_177 = arith.constant 0 : index
    %234 = vector.load %arg3[%c1_175, %c0_176, %c0_177] : memref<4x32x32xf32, #tpu.memory_space<vmem>>, vector<1x32x32xf32>
    %235 = vector.shape_cast %234 : vector<1x32x32xf32> to vector<32x32xf32>
    %cst_178 = arith.constant dense<0.000000e+00> : vector<48x32xf32>
    %236 = tpu.matmul %225, %235, %cst_178 {dimension_numbers = #tpu.dot_dimension_numbers<[1], [0], [0], [1], [0, 0, 1, 1], [], []>} : vector<48x32xf32>, vector<32x32xf32>, vector<48x32xf32> -> vector<48x32xf32>
    %237 = arith.addf %233, %236 : vector<48x32xf32>
    %c2_179 = arith.constant 2 : index
    %c192_180 = arith.constant 192 : index
    %c0_181 = arith.constant 0 : index
    %238 = vector.load %arg16[%c2_179, %c192_180, %c0_181] : memref<4x384x32xf32, #tpu.memory_space<vmem>>, vector<1x48x32xf32>
    %239 = vector.shape_cast %238 : vector<1x48x32xf32> to vector<48x32xf32>
    %c2_182 = arith.constant 2 : index
    %c0_183 = arith.constant 0 : index
    %c0_184 = arith.constant 0 : index
    %240 = vector.load %arg3[%c2_182, %c0_183, %c0_184] : memref<4x32x32xf32, #tpu.memory_space<vmem>>, vector<1x32x32xf32>
    %241 = vector.shape_cast %240 : vector<1x32x32xf32> to vector<32x32xf32>
    %cst_185 = arith.constant dense<0.000000e+00> : vector<48x32xf32>
    %242 = tpu.matmul %225, %241, %cst_185 {dimension_numbers = #tpu.dot_dimension_numbers<[1], [0], [0], [1], [0, 0, 1, 1], [], []>} : vector<48x32xf32>, vector<32x32xf32>, vector<48x32xf32> -> vector<48x32xf32>
    %243 = arith.addf %239, %242 : vector<48x32xf32>
    %c3_186 = arith.constant 3 : index
    %c192_187 = arith.constant 192 : index
    %c0_188 = arith.constant 0 : index
    %244 = vector.load %arg16[%c3_186, %c192_187, %c0_188] : memref<4x384x32xf32, #tpu.memory_space<vmem>>, vector<1x48x32xf32>
    %245 = vector.shape_cast %244 : vector<1x48x32xf32> to vector<48x32xf32>
    %c3_189 = arith.constant 3 : index
    %c0_190 = arith.constant 0 : index
    %c0_191 = arith.constant 0 : index
    %246 = vector.load %arg3[%c3_189, %c0_190, %c0_191] : memref<4x32x32xf32, #tpu.memory_space<vmem>>, vector<1x32x32xf32>
    %247 = vector.shape_cast %246 : vector<1x32x32xf32> to vector<32x32xf32>
    %cst_192 = arith.constant dense<0.000000e+00> : vector<48x32xf32>
    %248 = tpu.matmul %225, %247, %cst_192 {dimension_numbers = #tpu.dot_dimension_numbers<[1], [0], [0], [1], [0, 0, 1, 1], [], []>} : vector<48x32xf32>, vector<32x32xf32>, vector<48x32xf32> -> vector<48x32xf32>
    %249 = arith.addf %245, %248 : vector<48x32xf32>
    %250 = arith.negf %237 : vector<48x32xf32>
    %251 = math.exp %250 : vector<48x32xf32>
    %cst_193 = arith.constant 1.000000e+00 : f32
    %252 = vector.broadcast %cst_193 : f32 to vector<48x32xf32>
    %253 = arith.addf %252, %251 : vector<48x32xf32>
    %254 = arith.divf %252, %253 : vector<48x32xf32>
    %255 = arith.mulf %254, %218 : vector<48x32xf32>
    %256 = arith.negf %231 : vector<48x32xf32>
    %257 = math.exp %256 : vector<48x32xf32>
    %cst_194 = arith.constant 1.000000e+00 : f32
    %258 = vector.broadcast %cst_194 : f32 to vector<48x32xf32>
    %259 = arith.addf %258, %257 : vector<48x32xf32>
    %260 = arith.divf %258, %259 : vector<48x32xf32>
    %261 = math.tanh %243 : vector<48x32xf32>
    %262 = arith.mulf %260, %261 : vector<48x32xf32>
    %263 = arith.addf %255, %262 : vector<48x32xf32>
    %264 = arith.negf %249 : vector<48x32xf32>
    %265 = math.exp %264 : vector<48x32xf32>
    %cst_195 = arith.constant 1.000000e+00 : f32
    %266 = vector.broadcast %cst_195 : f32 to vector<48x32xf32>
    %267 = arith.addf %266, %265 : vector<48x32xf32>
    %268 = arith.divf %266, %267 : vector<48x32xf32>
    %269 = math.tanh %263 : vector<48x32xf32>
    %270 = arith.mulf %268, %269 : vector<48x32xf32>
    %c0_196 = arith.constant 0 : index
    %c240 = arith.constant 240 : index
    %c0_197 = arith.constant 0 : index
    %271 = vector.load %arg16[%c0_196, %c240, %c0_197] : memref<4x384x32xf32, #tpu.memory_space<vmem>>, vector<1x48x32xf32>
    %272 = vector.shape_cast %271 : vector<1x48x32xf32> to vector<48x32xf32>
    %c0_198 = arith.constant 0 : index
    %c0_199 = arith.constant 0 : index
    %c0_200 = arith.constant 0 : index
    %273 = vector.load %arg3[%c0_198, %c0_199, %c0_200] : memref<4x32x32xf32, #tpu.memory_space<vmem>>, vector<1x32x32xf32>
    %274 = vector.shape_cast %273 : vector<1x32x32xf32> to vector<32x32xf32>
    %cst_201 = arith.constant dense<0.000000e+00> : vector<48x32xf32>
    %275 = tpu.matmul %270, %274, %cst_201 {dimension_numbers = #tpu.dot_dimension_numbers<[1], [0], [0], [1], [0, 0, 1, 1], [], []>} : vector<48x32xf32>, vector<32x32xf32>, vector<48x32xf32> -> vector<48x32xf32>
    %276 = arith.addf %272, %275 : vector<48x32xf32>
    %c1_202 = arith.constant 1 : index
    %c240_203 = arith.constant 240 : index
    %c0_204 = arith.constant 0 : index
    %277 = vector.load %arg16[%c1_202, %c240_203, %c0_204] : memref<4x384x32xf32, #tpu.memory_space<vmem>>, vector<1x48x32xf32>
    %278 = vector.shape_cast %277 : vector<1x48x32xf32> to vector<48x32xf32>
    %c1_205 = arith.constant 1 : index
    %c0_206 = arith.constant 0 : index
    %c0_207 = arith.constant 0 : index
    %279 = vector.load %arg3[%c1_205, %c0_206, %c0_207] : memref<4x32x32xf32, #tpu.memory_space<vmem>>, vector<1x32x32xf32>
    %280 = vector.shape_cast %279 : vector<1x32x32xf32> to vector<32x32xf32>
    %cst_208 = arith.constant dense<0.000000e+00> : vector<48x32xf32>
    %281 = tpu.matmul %270, %280, %cst_208 {dimension_numbers = #tpu.dot_dimension_numbers<[1], [0], [0], [1], [0, 0, 1, 1], [], []>} : vector<48x32xf32>, vector<32x32xf32>, vector<48x32xf32> -> vector<48x32xf32>
    %282 = arith.addf %278, %281 : vector<48x32xf32>
    %c2_209 = arith.constant 2 : index
    %c240_210 = arith.constant 240 : index
    %c0_211 = arith.constant 0 : index
    %283 = vector.load %arg16[%c2_209, %c240_210, %c0_211] : memref<4x384x32xf32, #tpu.memory_space<vmem>>, vector<1x48x32xf32>
    %284 = vector.shape_cast %283 : vector<1x48x32xf32> to vector<48x32xf32>
    %c2_212 = arith.constant 2 : index
    %c0_213 = arith.constant 0 : index
    %c0_214 = arith.constant 0 : index
    %285 = vector.load %arg3[%c2_212, %c0_213, %c0_214] : memref<4x32x32xf32, #tpu.memory_space<vmem>>, vector<1x32x32xf32>
    %286 = vector.shape_cast %285 : vector<1x32x32xf32> to vector<32x32xf32>
    %cst_215 = arith.constant dense<0.000000e+00> : vector<48x32xf32>
    %287 = tpu.matmul %270, %286, %cst_215 {dimension_numbers = #tpu.dot_dimension_numbers<[1], [0], [0], [1], [0, 0, 1, 1], [], []>} : vector<48x32xf32>, vector<32x32xf32>, vector<48x32xf32> -> vector<48x32xf32>
    %288 = arith.addf %284, %287 : vector<48x32xf32>
    %c3_216 = arith.constant 3 : index
    %c240_217 = arith.constant 240 : index
    %c0_218 = arith.constant 0 : index
    %289 = vector.load %arg16[%c3_216, %c240_217, %c0_218] : memref<4x384x32xf32, #tpu.memory_space<vmem>>, vector<1x48x32xf32>
    %290 = vector.shape_cast %289 : vector<1x48x32xf32> to vector<48x32xf32>
    %c3_219 = arith.constant 3 : index
    %c0_220 = arith.constant 0 : index
    %c0_221 = arith.constant 0 : index
    %291 = vector.load %arg3[%c3_219, %c0_220, %c0_221] : memref<4x32x32xf32, #tpu.memory_space<vmem>>, vector<1x32x32xf32>
    %292 = vector.shape_cast %291 : vector<1x32x32xf32> to vector<32x32xf32>
    %cst_222 = arith.constant dense<0.000000e+00> : vector<48x32xf32>
    %293 = tpu.matmul %270, %292, %cst_222 {dimension_numbers = #tpu.dot_dimension_numbers<[1], [0], [0], [1], [0, 0, 1, 1], [], []>} : vector<48x32xf32>, vector<32x32xf32>, vector<48x32xf32> -> vector<48x32xf32>
    %294 = arith.addf %290, %293 : vector<48x32xf32>
    %295 = arith.negf %282 : vector<48x32xf32>
    %296 = math.exp %295 : vector<48x32xf32>
    %cst_223 = arith.constant 1.000000e+00 : f32
    %297 = vector.broadcast %cst_223 : f32 to vector<48x32xf32>
    %298 = arith.addf %297, %296 : vector<48x32xf32>
    %299 = arith.divf %297, %298 : vector<48x32xf32>
    %300 = arith.mulf %299, %263 : vector<48x32xf32>
    %301 = arith.negf %276 : vector<48x32xf32>
    %302 = math.exp %301 : vector<48x32xf32>
    %cst_224 = arith.constant 1.000000e+00 : f32
    %303 = vector.broadcast %cst_224 : f32 to vector<48x32xf32>
    %304 = arith.addf %303, %302 : vector<48x32xf32>
    %305 = arith.divf %303, %304 : vector<48x32xf32>
    %306 = math.tanh %288 : vector<48x32xf32>
    %307 = arith.mulf %305, %306 : vector<48x32xf32>
    %308 = arith.addf %300, %307 : vector<48x32xf32>
    %309 = arith.negf %294 : vector<48x32xf32>
    %310 = math.exp %309 : vector<48x32xf32>
    %cst_225 = arith.constant 1.000000e+00 : f32
    %311 = vector.broadcast %cst_225 : f32 to vector<48x32xf32>
    %312 = arith.addf %311, %310 : vector<48x32xf32>
    %313 = arith.divf %311, %312 : vector<48x32xf32>
    %314 = math.tanh %308 : vector<48x32xf32>
    %315 = arith.mulf %313, %314 : vector<48x32xf32>
    %c0_226 = arith.constant 0 : index
    %c288 = arith.constant 288 : index
    %c0_227 = arith.constant 0 : index
    %316 = vector.load %arg16[%c0_226, %c288, %c0_227] : memref<4x384x32xf32, #tpu.memory_space<vmem>>, vector<1x48x32xf32>
    %317 = vector.shape_cast %316 : vector<1x48x32xf32> to vector<48x32xf32>
    %c0_228 = arith.constant 0 : index
    %c0_229 = arith.constant 0 : index
    %c0_230 = arith.constant 0 : index
    %318 = vector.load %arg3[%c0_228, %c0_229, %c0_230] : memref<4x32x32xf32, #tpu.memory_space<vmem>>, vector<1x32x32xf32>
    %319 = vector.shape_cast %318 : vector<1x32x32xf32> to vector<32x32xf32>
    %cst_231 = arith.constant dense<0.000000e+00> : vector<48x32xf32>
    %320 = tpu.matmul %315, %319, %cst_231 {dimension_numbers = #tpu.dot_dimension_numbers<[1], [0], [0], [1], [0, 0, 1, 1], [], []>} : vector<48x32xf32>, vector<32x32xf32>, vector<48x32xf32> -> vector<48x32xf32>
    %321 = arith.addf %317, %320 : vector<48x32xf32>
    %c1_232 = arith.constant 1 : index
    %c288_233 = arith.constant 288 : index
    %c0_234 = arith.constant 0 : index
    %322 = vector.load %arg16[%c1_232, %c288_233, %c0_234] : memref<4x384x32xf32, #tpu.memory_space<vmem>>, vector<1x48x32xf32>
    %323 = vector.shape_cast %322 : vector<1x48x32xf32> to vector<48x32xf32>
    %c1_235 = arith.constant 1 : index
    %c0_236 = arith.constant 0 : index
    %c0_237 = arith.constant 0 : index
    %324 = vector.load %arg3[%c1_235, %c0_236, %c0_237] : memref<4x32x32xf32, #tpu.memory_space<vmem>>, vector<1x32x32xf32>
    %325 = vector.shape_cast %324 : vector<1x32x32xf32> to vector<32x32xf32>
    %cst_238 = arith.constant dense<0.000000e+00> : vector<48x32xf32>
    %326 = tpu.matmul %315, %325, %cst_238 {dimension_numbers = #tpu.dot_dimension_numbers<[1], [0], [0], [1], [0, 0, 1, 1], [], []>} : vector<48x32xf32>, vector<32x32xf32>, vector<48x32xf32> -> vector<48x32xf32>
    %327 = arith.addf %323, %326 : vector<48x32xf32>
    %c2_239 = arith.constant 2 : index
    %c288_240 = arith.constant 288 : index
    %c0_241 = arith.constant 0 : index
    %328 = vector.load %arg16[%c2_239, %c288_240, %c0_241] : memref<4x384x32xf32, #tpu.memory_space<vmem>>, vector<1x48x32xf32>
    %329 = vector.shape_cast %328 : vector<1x48x32xf32> to vector<48x32xf32>
    %c2_242 = arith.constant 2 : index
    %c0_243 = arith.constant 0 : index
    %c0_244 = arith.constant 0 : index
    %330 = vector.load %arg3[%c2_242, %c0_243, %c0_244] : memref<4x32x32xf32, #tpu.memory_space<vmem>>, vector<1x32x32xf32>
    %331 = vector.shape_cast %330 : vector<1x32x32xf32> to vector<32x32xf32>
    %cst_245 = arith.constant dense<0.000000e+00> : vector<48x32xf32>
    %332 = tpu.matmul %315, %331, %cst_245 {dimension_numbers = #tpu.dot_dimension_numbers<[1], [0], [0], [1], [0, 0, 1, 1], [], []>} : vector<48x32xf32>, vector<32x32xf32>, vector<48x32xf32> -> vector<48x32xf32>
    %333 = arith.addf %329, %332 : vector<48x32xf32>
    %c3_246 = arith.constant 3 : index
    %c288_247 = arith.constant 288 : index
    %c0_248 = arith.constant 0 : index
    %334 = vector.load %arg16[%c3_246, %c288_247, %c0_248] : memref<4x384x32xf32, #tpu.memory_space<vmem>>, vector<1x48x32xf32>
    %335 = vector.shape_cast %334 : vector<1x48x32xf32> to vector<48x32xf32>
    %c3_249 = arith.constant 3 : index
    %c0_250 = arith.constant 0 : index
    %c0_251 = arith.constant 0 : index
    %336 = vector.load %arg3[%c3_249, %c0_250, %c0_251] : memref<4x32x32xf32, #tpu.memory_space<vmem>>, vector<1x32x32xf32>
    %337 = vector.shape_cast %336 : vector<1x32x32xf32> to vector<32x32xf32>
    %cst_252 = arith.constant dense<0.000000e+00> : vector<48x32xf32>
    %338 = tpu.matmul %315, %337, %cst_252 {dimension_numbers = #tpu.dot_dimension_numbers<[1], [0], [0], [1], [0, 0, 1, 1], [], []>} : vector<48x32xf32>, vector<32x32xf32>, vector<48x32xf32> -> vector<48x32xf32>
    %339 = arith.addf %335, %338 : vector<48x32xf32>
    %340 = arith.negf %327 : vector<48x32xf32>
    %341 = math.exp %340 : vector<48x32xf32>
    %cst_253 = arith.constant 1.000000e+00 : f32
    %342 = vector.broadcast %cst_253 : f32 to vector<48x32xf32>
    %343 = arith.addf %342, %341 : vector<48x32xf32>
    %344 = arith.divf %342, %343 : vector<48x32xf32>
    %345 = arith.mulf %344, %308 : vector<48x32xf32>
    %346 = arith.negf %321 : vector<48x32xf32>
    %347 = math.exp %346 : vector<48x32xf32>
    %cst_254 = arith.constant 1.000000e+00 : f32
    %348 = vector.broadcast %cst_254 : f32 to vector<48x32xf32>
    %349 = arith.addf %348, %347 : vector<48x32xf32>
    %350 = arith.divf %348, %349 : vector<48x32xf32>
    %351 = math.tanh %333 : vector<48x32xf32>
    %352 = arith.mulf %350, %351 : vector<48x32xf32>
    %353 = arith.addf %345, %352 : vector<48x32xf32>
    %354 = arith.negf %339 : vector<48x32xf32>
    %355 = math.exp %354 : vector<48x32xf32>
    %cst_255 = arith.constant 1.000000e+00 : f32
    %356 = vector.broadcast %cst_255 : f32 to vector<48x32xf32>
    %357 = arith.addf %356, %355 : vector<48x32xf32>
    %358 = arith.divf %356, %357 : vector<48x32xf32>
    %359 = math.tanh %353 : vector<48x32xf32>
    %360 = arith.mulf %358, %359 : vector<48x32xf32>
    %c0_256 = arith.constant 0 : index
    %c336 = arith.constant 336 : index
    %c0_257 = arith.constant 0 : index
    %361 = vector.load %arg16[%c0_256, %c336, %c0_257] : memref<4x384x32xf32, #tpu.memory_space<vmem>>, vector<1x48x32xf32>
    %362 = vector.shape_cast %361 : vector<1x48x32xf32> to vector<48x32xf32>
    %c0_258 = arith.constant 0 : index
    %c0_259 = arith.constant 0 : index
    %c0_260 = arith.constant 0 : index
    %363 = vector.load %arg3[%c0_258, %c0_259, %c0_260] : memref<4x32x32xf32, #tpu.memory_space<vmem>>, vector<1x32x32xf32>
    %364 = vector.shape_cast %363 : vector<1x32x32xf32> to vector<32x32xf32>
    %cst_261 = arith.constant dense<0.000000e+00> : vector<48x32xf32>
    %365 = tpu.matmul %360, %364, %cst_261 {dimension_numbers = #tpu.dot_dimension_numbers<[1], [0], [0], [1], [0, 0, 1, 1], [], []>} : vector<48x32xf32>, vector<32x32xf32>, vector<48x32xf32> -> vector<48x32xf32>
    %366 = arith.addf %362, %365 : vector<48x32xf32>
    %c1_262 = arith.constant 1 : index
    %c336_263 = arith.constant 336 : index
    %c0_264 = arith.constant 0 : index
    %367 = vector.load %arg16[%c1_262, %c336_263, %c0_264] : memref<4x384x32xf32, #tpu.memory_space<vmem>>, vector<1x48x32xf32>
    %368 = vector.shape_cast %367 : vector<1x48x32xf32> to vector<48x32xf32>
    %c1_265 = arith.constant 1 : index
    %c0_266 = arith.constant 0 : index
    %c0_267 = arith.constant 0 : index
    %369 = vector.load %arg3[%c1_265, %c0_266, %c0_267] : memref<4x32x32xf32, #tpu.memory_space<vmem>>, vector<1x32x32xf32>
    %370 = vector.shape_cast %369 : vector<1x32x32xf32> to vector<32x32xf32>
    %cst_268 = arith.constant dense<0.000000e+00> : vector<48x32xf32>
    %371 = tpu.matmul %360, %370, %cst_268 {dimension_numbers = #tpu.dot_dimension_numbers<[1], [0], [0], [1], [0, 0, 1, 1], [], []>} : vector<48x32xf32>, vector<32x32xf32>, vector<48x32xf32> -> vector<48x32xf32>
    %372 = arith.addf %368, %371 : vector<48x32xf32>
    %c2_269 = arith.constant 2 : index
    %c336_270 = arith.constant 336 : index
    %c0_271 = arith.constant 0 : index
    %373 = vector.load %arg16[%c2_269, %c336_270, %c0_271] : memref<4x384x32xf32, #tpu.memory_space<vmem>>, vector<1x48x32xf32>
    %374 = vector.shape_cast %373 : vector<1x48x32xf32> to vector<48x32xf32>
    %c2_272 = arith.constant 2 : index
    %c0_273 = arith.constant 0 : index
    %c0_274 = arith.constant 0 : index
    %375 = vector.load %arg3[%c2_272, %c0_273, %c0_274] : memref<4x32x32xf32, #tpu.memory_space<vmem>>, vector<1x32x32xf32>
    %376 = vector.shape_cast %375 : vector<1x32x32xf32> to vector<32x32xf32>
    %cst_275 = arith.constant dense<0.000000e+00> : vector<48x32xf32>
    %377 = tpu.matmul %360, %376, %cst_275 {dimension_numbers = #tpu.dot_dimension_numbers<[1], [0], [0], [1], [0, 0, 1, 1], [], []>} : vector<48x32xf32>, vector<32x32xf32>, vector<48x32xf32> -> vector<48x32xf32>
    %378 = arith.addf %374, %377 : vector<48x32xf32>
    %c3_276 = arith.constant 3 : index
    %c336_277 = arith.constant 336 : index
    %c0_278 = arith.constant 0 : index
    %379 = vector.load %arg16[%c3_276, %c336_277, %c0_278] : memref<4x384x32xf32, #tpu.memory_space<vmem>>, vector<1x48x32xf32>
    %380 = vector.shape_cast %379 : vector<1x48x32xf32> to vector<48x32xf32>
    %c3_279 = arith.constant 3 : index
    %c0_280 = arith.constant 0 : index
    %c0_281 = arith.constant 0 : index
    %381 = vector.load %arg3[%c3_279, %c0_280, %c0_281] : memref<4x32x32xf32, #tpu.memory_space<vmem>>, vector<1x32x32xf32>
    %382 = vector.shape_cast %381 : vector<1x32x32xf32> to vector<32x32xf32>
    %cst_282 = arith.constant dense<0.000000e+00> : vector<48x32xf32>
    %383 = tpu.matmul %360, %382, %cst_282 {dimension_numbers = #tpu.dot_dimension_numbers<[1], [0], [0], [1], [0, 0, 1, 1], [], []>} : vector<48x32xf32>, vector<32x32xf32>, vector<48x32xf32> -> vector<48x32xf32>
    %384 = arith.addf %380, %383 : vector<48x32xf32>
    %385 = arith.negf %372 : vector<48x32xf32>
    %386 = math.exp %385 : vector<48x32xf32>
    %cst_283 = arith.constant 1.000000e+00 : f32
    %387 = vector.broadcast %cst_283 : f32 to vector<48x32xf32>
    %388 = arith.addf %387, %386 : vector<48x32xf32>
    %389 = arith.divf %387, %388 : vector<48x32xf32>
    %390 = arith.mulf %389, %353 : vector<48x32xf32>
    %391 = arith.negf %366 : vector<48x32xf32>
    %392 = math.exp %391 : vector<48x32xf32>
    %cst_284 = arith.constant 1.000000e+00 : f32
    %393 = vector.broadcast %cst_284 : f32 to vector<48x32xf32>
    %394 = arith.addf %393, %392 : vector<48x32xf32>
    %395 = arith.divf %393, %394 : vector<48x32xf32>
    %396 = math.tanh %378 : vector<48x32xf32>
    %397 = arith.mulf %395, %396 : vector<48x32xf32>
    %398 = arith.addf %390, %397 : vector<48x32xf32>
    %399 = arith.negf %384 : vector<48x32xf32>
    %400 = math.exp %399 : vector<48x32xf32>
    %cst_285 = arith.constant 1.000000e+00 : f32
    %401 = vector.broadcast %cst_285 : f32 to vector<48x32xf32>
    %402 = arith.addf %401, %400 : vector<48x32xf32>
    %403 = arith.divf %401, %402 : vector<48x32xf32>
    %404 = math.tanh %398 : vector<48x32xf32>
    %405 = arith.mulf %403, %404 : vector<48x32xf32>
    %c0_286 = arith.constant 0 : index
    %c0_287 = arith.constant 0 : index
    %c0_288 = arith.constant 0 : index
    %406 = vector.load %arg5[%c0_286, %c0_287, %c0_288] : memref<4x32x32xf32, #tpu.memory_space<vmem>>, vector<1x32x32xf32>
    %407 = vector.shape_cast %406 : vector<1x32x32xf32> to vector<32x32xf32>
    %cst_289 = arith.constant dense<0.000000e+00> : vector<48x32xf32>
    %408 = tpu.matmul %405, %407, %cst_289 {dimension_numbers = #tpu.dot_dimension_numbers<[1], [0], [0], [1], [0, 0, 1, 1], [], []>} : vector<48x32xf32>, vector<32x32xf32>, vector<48x32xf32> -> vector<48x32xf32>
    %c0_290 = arith.constant 0 : index
    %c0_291 = arith.constant 0 : index
    %c0_292 = arith.constant 0 : index
    %409 = vector.load %arg7[%c0_290, %c0_291, %c0_292] : memref<4x1x32xf32, #tpu.memory_space<vmem>>, vector<1x1x32xf32>
    %410 = vector.shape_cast %409 : vector<1x1x32xf32> to vector<1x32xf32>
    %411 = vector.broadcast %410 : vector<1x32xf32> to vector<48x32xf32>
    %412 = arith.addf %408, %411 : vector<48x32xf32>
    %c0_293 = arith.constant 0 : index
    %c0_294 = arith.constant 0 : index
    %c0_295 = arith.constant 0 : index
    %413 = vector.load %arg17[%c0_293, %c0_294, %c0_295] : memref<4x48x32xf32, #tpu.memory_space<vmem>>, vector<1x48x32xf32>
    %414 = vector.shape_cast %413 : vector<1x48x32xf32> to vector<48x32xf32>
    %415 = vector.shape_cast %412 : vector<48x32xf32> to vector<1x48x32xf32>
    tpu.vector_store %arg17[%c0_293, %c0_294, %c0_295], %415 {strides = array<i32>} : memref<4x48x32xf32, #tpu.memory_space<vmem>>, vector<1x48x32xf32>,
    %c1_296 = arith.constant 1 : index
    %c0_297 = arith.constant 0 : index
    %c0_298 = arith.constant 0 : index
    %416 = vector.load %arg5[%c1_296, %c0_297, %c0_298] : memref<4x32x32xf32, #tpu.memory_space<vmem>>, vector<1x32x32xf32>
    %417 = vector.shape_cast %416 : vector<1x32x32xf32> to vector<32x32xf32>
    %cst_299 = arith.constant dense<0.000000e+00> : vector<48x32xf32>
    %418 = tpu.matmul %405, %417, %cst_299 {dimension_numbers = #tpu.dot_dimension_numbers<[1], [0], [0], [1], [0, 0, 1, 1], [], []>} : vector<48x32xf32>, vector<32x32xf32>, vector<48x32xf32> -> vector<48x32xf32>
    %c1_300 = arith.constant 1 : index
    %c0_301 = arith.constant 0 : index
    %c0_302 = arith.constant 0 : index
    %419 = vector.load %arg7[%c1_300, %c0_301, %c0_302] : memref<4x1x32xf32, #tpu.memory_space<vmem>>, vector<1x1x32xf32>
    %420 = vector.shape_cast %419 : vector<1x1x32xf32> to vector<1x32xf32>
    %421 = vector.broadcast %420 : vector<1x32xf32> to vector<48x32xf32>
    %422 = arith.addf %418, %421 : vector<48x32xf32>
    %c1_303 = arith.constant 1 : index
    %c0_304 = arith.constant 0 : index
    %c0_305 = arith.constant 0 : index
    %423 = vector.load %arg17[%c1_303, %c0_304, %c0_305] : memref<4x48x32xf32, #tpu.memory_space<vmem>>, vector<1x48x32xf32>
    %424 = vector.shape_cast %423 : vector<1x48x32xf32> to vector<48x32xf32>
    %425 = vector.shape_cast %422 : vector<48x32xf32> to vector<1x48x32xf32>
    tpu.vector_store %arg17[%c1_303, %c0_304, %c0_305], %425 {strides = array<i32>} : memref<4x48x32xf32, #tpu.memory_space<vmem>>, vector<1x48x32xf32>,
    %c2_306 = arith.constant 2 : index
    %c0_307 = arith.constant 0 : index
    %c0_308 = arith.constant 0 : index
    %426 = vector.load %arg5[%c2_306, %c0_307, %c0_308] : memref<4x32x32xf32, #tpu.memory_space<vmem>>, vector<1x32x32xf32>
    %427 = vector.shape_cast %426 : vector<1x32x32xf32> to vector<32x32xf32>
    %cst_309 = arith.constant dense<0.000000e+00> : vector<48x32xf32>
    %428 = tpu.matmul %405, %427, %cst_309 {dimension_numbers = #tpu.dot_dimension_numbers<[1], [0], [0], [1], [0, 0, 1, 1], [], []>} : vector<48x32xf32>, vector<32x32xf32>, vector<48x32xf32> -> vector<48x32xf32>
    %c2_310 = arith.constant 2 : index
    %c0_311 = arith.constant 0 : index
    %c0_312 = arith.constant 0 : index
    %429 = vector.load %arg7[%c2_310, %c0_311, %c0_312] : memref<4x1x32xf32, #tpu.memory_space<vmem>>, vector<1x1x32xf32>
    %430 = vector.shape_cast %429 : vector<1x1x32xf32> to vector<1x32xf32>
    %431 = vector.broadcast %430 : vector<1x32xf32> to vector<48x32xf32>
    %432 = arith.addf %428, %431 : vector<48x32xf32>
    %c2_313 = arith.constant 2 : index
    %c0_314 = arith.constant 0 : index
    %c0_315 = arith.constant 0 : index
    %433 = vector.load %arg17[%c2_313, %c0_314, %c0_315] : memref<4x48x32xf32, #tpu.memory_space<vmem>>, vector<1x48x32xf32>
    %434 = vector.shape_cast %433 : vector<1x48x32xf32> to vector<48x32xf32>
    %435 = vector.shape_cast %432 : vector<48x32xf32> to vector<1x48x32xf32>
    tpu.vector_store %arg17[%c2_313, %c0_314, %c0_315], %435 {strides = array<i32>} : memref<4x48x32xf32, #tpu.memory_space<vmem>>, vector<1x48x32xf32>,
    %c3_316 = arith.constant 3 : index
    %c0_317 = arith.constant 0 : index
    %c0_318 = arith.constant 0 : index
    %436 = vector.load %arg5[%c3_316, %c0_317, %c0_318] : memref<4x32x32xf32, #tpu.memory_space<vmem>>, vector<1x32x32xf32>
    %437 = vector.shape_cast %436 : vector<1x32x32xf32> to vector<32x32xf32>
    %cst_319 = arith.constant dense<0.000000e+00> : vector<48x32xf32>
    %438 = tpu.matmul %405, %437, %cst_319 {dimension_numbers = #tpu.dot_dimension_numbers<[1], [0], [0], [1], [0, 0, 1, 1], [], []>} : vector<48x32xf32>, vector<32x32xf32>, vector<48x32xf32> -> vector<48x32xf32>
    %c3_320 = arith.constant 3 : index
    %c0_321 = arith.constant 0 : index
    %c0_322 = arith.constant 0 : index
    %439 = vector.load %arg7[%c3_320, %c0_321, %c0_322] : memref<4x1x32xf32, #tpu.memory_space<vmem>>, vector<1x1x32xf32>
    %440 = vector.shape_cast %439 : vector<1x1x32xf32> to vector<1x32xf32>
    %441 = vector.broadcast %440 : vector<1x32xf32> to vector<48x32xf32>
    %442 = arith.addf %438, %441 : vector<48x32xf32>
    %c3_323 = arith.constant 3 : index
    %c0_324 = arith.constant 0 : index
    %c0_325 = arith.constant 0 : index
    %443 = vector.load %arg17[%c3_323, %c0_324, %c0_325] : memref<4x48x32xf32, #tpu.memory_space<vmem>>, vector<1x48x32xf32>
    %444 = vector.shape_cast %443 : vector<1x48x32xf32> to vector<48x32xf32>
    %445 = vector.shape_cast %442 : vector<48x32xf32> to vector<1x48x32xf32>
    tpu.vector_store %arg17[%c3_323, %c0_324, %c0_325], %445 {strides = array<i32>} : memref<4x48x32xf32, #tpu.memory_space<vmem>>, vector<1x48x32xf32>,
    %c0_326 = arith.constant 0 : index
    %c0_327 = arith.constant 0 : index
    %446 = vector.load %arg1[%c0_326, %c0_327] : memref<8x32xi32, #tpu.memory_space<vmem>>, vector<8x32xi32>
    %cst_328 = arith.constant 0.000000e+00 : f32
    %447 = vector.broadcast %cst_328 : f32 to vector<8x32xf32>
    %c0_329 = arith.constant 0 : index
    %c0_330 = arith.constant 0 : index
    %c0_331 = arith.constant 0 : index
    %448 = vector.load %arg17[%c0_329, %c0_330, %c0_331] : memref<4x48x32xf32, #tpu.memory_space<vmem>>, vector<1x8x32xf32>
    %449 = vector.shape_cast %448 : vector<1x8x32xf32> to vector<8x32xf32>
    %c0_332 = arith.constant 0 : index
    %c0_333 = arith.constant 0 : index
    %c0_334 = arith.constant 0 : index
    %450 = vector.load %arg6[%c0_332, %c0_333, %c0_334] : memref<4x32x32xf32, #tpu.memory_space<vmem>>, vector<1x32x32xf32>
    %451 = vector.shape_cast %450 : vector<1x32x32xf32> to vector<32x32xf32>
    %cst_335 = arith.constant dense<0.000000e+00> : vector<8x32xf32>
    %452 = tpu.matmul %447, %451, %cst_335 {dimension_numbers = #tpu.dot_dimension_numbers<[1], [0], [0], [1], [0, 0, 1, 1], [], []>} : vector<8x32xf32>, vector<32x32xf32>, vector<8x32xf32> -> vector<8x32xf32>
    %453 = arith.addf %449, %452 : vector<8x32xf32>
    %c1_336 = arith.constant 1 : index
    %c0_337 = arith.constant 0 : index
    %c0_338 = arith.constant 0 : index
    %454 = vector.load %arg17[%c1_336, %c0_337, %c0_338] : memref<4x48x32xf32, #tpu.memory_space<vmem>>, vector<1x8x32xf32>
    %455 = vector.shape_cast %454 : vector<1x8x32xf32> to vector<8x32xf32>
    %c1_339 = arith.constant 1 : index
    %c0_340 = arith.constant 0 : index
    %c0_341 = arith.constant 0 : index
    %456 = vector.load %arg6[%c1_339, %c0_340, %c0_341] : memref<4x32x32xf32, #tpu.memory_space<vmem>>, vector<1x32x32xf32>
    %457 = vector.shape_cast %456 : vector<1x32x32xf32> to vector<32x32xf32>
    %cst_342 = arith.constant dense<0.000000e+00> : vector<8x32xf32>
    %458 = tpu.matmul %447, %457, %cst_342 {dimension_numbers = #tpu.dot_dimension_numbers<[1], [0], [0], [1], [0, 0, 1, 1], [], []>} : vector<8x32xf32>, vector<32x32xf32>, vector<8x32xf32> -> vector<8x32xf32>
    %459 = arith.addf %455, %458 : vector<8x32xf32>
    %c2_343 = arith.constant 2 : index
    %c0_344 = arith.constant 0 : index
    %c0_345 = arith.constant 0 : index
    %460 = vector.load %arg17[%c2_343, %c0_344, %c0_345] : memref<4x48x32xf32, #tpu.memory_space<vmem>>, vector<1x8x32xf32>
    %461 = vector.shape_cast %460 : vector<1x8x32xf32> to vector<8x32xf32>
    %c2_346 = arith.constant 2 : index
    %c0_347 = arith.constant 0 : index
    %c0_348 = arith.constant 0 : index
    %462 = vector.load %arg6[%c2_346, %c0_347, %c0_348] : memref<4x32x32xf32, #tpu.memory_space<vmem>>, vector<1x32x32xf32>
    %463 = vector.shape_cast %462 : vector<1x32x32xf32> to vector<32x32xf32>
    %cst_349 = arith.constant dense<0.000000e+00> : vector<8x32xf32>
    %464 = tpu.matmul %447, %463, %cst_349 {dimension_numbers = #tpu.dot_dimension_numbers<[1], [0], [0], [1], [0, 0, 1, 1], [], []>} : vector<8x32xf32>, vector<32x32xf32>, vector<8x32xf32> -> vector<8x32xf32>
    %465 = arith.addf %461, %464 : vector<8x32xf32>
    %c3_350 = arith.constant 3 : index
    %c0_351 = arith.constant 0 : index
    %c0_352 = arith.constant 0 : index
    %466 = vector.load %arg17[%c3_350, %c0_351, %c0_352] : memref<4x48x32xf32, #tpu.memory_space<vmem>>, vector<1x8x32xf32>
    %467 = vector.shape_cast %466 : vector<1x8x32xf32> to vector<8x32xf32>
    %c3_353 = arith.constant 3 : index
    %c0_354 = arith.constant 0 : index
    %c0_355 = arith.constant 0 : index
    %468 = vector.load %arg6[%c3_353, %c0_354, %c0_355] : memref<4x32x32xf32, #tpu.memory_space<vmem>>, vector<1x32x32xf32>
    %469 = vector.shape_cast %468 : vector<1x32x32xf32> to vector<32x32xf32>
    %cst_356 = arith.constant dense<0.000000e+00> : vector<8x32xf32>
    %470 = tpu.matmul %447, %469, %cst_356 {dimension_numbers = #tpu.dot_dimension_numbers<[1], [0], [0], [1], [0, 0, 1, 1], [], []>} : vector<8x32xf32>, vector<32x32xf32>, vector<8x32xf32> -> vector<8x32xf32>
    %471 = arith.addf %467, %470 : vector<8x32xf32>
    %472 = arith.negf %459 : vector<8x32xf32>
    %473 = math.exp %472 : vector<8x32xf32>
    %cst_357 = arith.constant 1.000000e+00 : f32
    %474 = vector.broadcast %cst_357 : f32 to vector<8x32xf32>
    %475 = arith.addf %474, %473 : vector<8x32xf32>
    %476 = arith.divf %474, %475 : vector<8x32xf32>
    %477 = arith.mulf %476, %447 : vector<8x32xf32>
    %478 = arith.negf %453 : vector<8x32xf32>
    %479 = math.exp %478 : vector<8x32xf32>
    %cst_358 = arith.constant 1.000000e+00 : f32
    %480 = vector.broadcast %cst_358 : f32 to vector<8x32xf32>
    %481 = arith.addf %480, %479 : vector<8x32xf32>
    %482 = arith.divf %480, %481 : vector<8x32xf32>
    %483 = math.tanh %465 : vector<8x32xf32>
    %484 = arith.mulf %482, %483 : vector<8x32xf32>
    %485 = arith.addf %477, %484 : vector<8x32xf32>
    %486 = arith.negf %471 : vector<8x32xf32>
    %487 = math.exp %486 : vector<8x32xf32>
    %cst_359 = arith.constant 1.000000e+00 : f32
    %488 = vector.broadcast %cst_359 : f32 to vector<8x32xf32>
    %489 = arith.addf %488, %487 : vector<8x32xf32>
    %490 = arith.divf %488, %489 : vector<8x32xf32>
    %491 = math.tanh %485 : vector<8x32xf32>
    %492 = arith.mulf %490, %491 : vector<8x32xf32>
    %c0_i32 = arith.constant 0 : i32
    %493 = vector.broadcast %c0_i32 : i32 to vector<8x32xi32>
    %494 = arith.cmpi sgt, %446, %493 : vector<8x32xi32>
    %495 = arith.select %494, %485, %447 : vector<8x32xi1>, vector<8x32xf32>
    %496 = arith.select %494, %492, %447 : vector<8x32xi1>, vector<8x32xf32>
    %497 = arith.select %494, %492, %447 : vector<8x32xi1>, vector<8x32xf32>
    %c0_360 = arith.constant 0 : index
    %c8 = arith.constant 8 : index
    %c0_361 = arith.constant 0 : index
    %498 = vector.load %arg17[%c0_360, %c8, %c0_361] : memref<4x48x32xf32, #tpu.memory_space<vmem>>, vector<1x8x32xf32>
    %499 = vector.shape_cast %498 : vector<1x8x32xf32> to vector<8x32xf32>
    %c0_362 = arith.constant 0 : index
    %c0_363 = arith.constant 0 : index
    %c0_364 = arith.constant 0 : index
    %500 = vector.load %arg6[%c0_362, %c0_363, %c0_364] : memref<4x32x32xf32, #tpu.memory_space<vmem>>, vector<1x32x32xf32>
    %501 = vector.shape_cast %500 : vector<1x32x32xf32> to vector<32x32xf32>
    %cst_365 = arith.constant dense<0.000000e+00> : vector<8x32xf32>
    %502 = tpu.matmul %496, %501, %cst_365 {dimension_numbers = #tpu.dot_dimension_numbers<[1], [0], [0], [1], [0, 0, 1, 1], [], []>} : vector<8x32xf32>, vector<32x32xf32>, vector<8x32xf32> -> vector<8x32xf32>
    %503 = arith.addf %499, %502 : vector<8x32xf32>
    %c1_366 = arith.constant 1 : index
    %c8_367 = arith.constant 8 : index
    %c0_368 = arith.constant 0 : index
    %504 = vector.load %arg17[%c1_366, %c8_367, %c0_368] : memref<4x48x32xf32, #tpu.memory_space<vmem>>, vector<1x8x32xf32>
    %505 = vector.shape_cast %504 : vector<1x8x32xf32> to vector<8x32xf32>
    %c1_369 = arith.constant 1 : index
    %c0_370 = arith.constant 0 : index
    %c0_371 = arith.constant 0 : index
    %506 = vector.load %arg6[%c1_369, %c0_370, %c0_371] : memref<4x32x32xf32, #tpu.memory_space<vmem>>, vector<1x32x32xf32>
    %507 = vector.shape_cast %506 : vector<1x32x32xf32> to vector<32x32xf32>
    %cst_372 = arith.constant dense<0.000000e+00> : vector<8x32xf32>
    %508 = tpu.matmul %496, %507, %cst_372 {dimension_numbers = #tpu.dot_dimension_numbers<[1], [0], [0], [1], [0, 0, 1, 1], [], []>} : vector<8x32xf32>, vector<32x32xf32>, vector<8x32xf32> -> vector<8x32xf32>
    %509 = arith.addf %505, %508 : vector<8x32xf32>
    %c2_373 = arith.constant 2 : index
    %c8_374 = arith.constant 8 : index
    %c0_375 = arith.constant 0 : index
    %510 = vector.load %arg17[%c2_373, %c8_374, %c0_375] : memref<4x48x32xf32, #tpu.memory_space<vmem>>, vector<1x8x32xf32>
    %511 = vector.shape_cast %510 : vector<1x8x32xf32> to vector<8x32xf32>
    %c2_376 = arith.constant 2 : index
    %c0_377 = arith.constant 0 : index
    %c0_378 = arith.constant 0 : index
    %512 = vector.load %arg6[%c2_376, %c0_377, %c0_378] : memref<4x32x32xf32, #tpu.memory_space<vmem>>, vector<1x32x32xf32>
    %513 = vector.shape_cast %512 : vector<1x32x32xf32> to vector<32x32xf32>
    %cst_379 = arith.constant dense<0.000000e+00> : vector<8x32xf32>
    %514 = tpu.matmul %496, %513, %cst_379 {dimension_numbers = #tpu.dot_dimension_numbers<[1], [0], [0], [1], [0, 0, 1, 1], [], []>} : vector<8x32xf32>, vector<32x32xf32>, vector<8x32xf32> -> vector<8x32xf32>
    %515 = arith.addf %511, %514 : vector<8x32xf32>
    %c3_380 = arith.constant 3 : index
    %c8_381 = arith.constant 8 : index
    %c0_382 = arith.constant 0 : index
    %516 = vector.load %arg17[%c3_380, %c8_381, %c0_382] : memref<4x48x32xf32, #tpu.memory_space<vmem>>, vector<1x8x32xf32>
    %517 = vector.shape_cast %516 : vector<1x8x32xf32> to vector<8x32xf32>
    %c3_383 = arith.constant 3 : index
    %c0_384 = arith.constant 0 : index
    %c0_385 = arith.constant 0 : index
    %518 = vector.load %arg6[%c3_383, %c0_384, %c0_385] : memref<4x32x32xf32, #tpu.memory_space<vmem>>, vector<1x32x32xf32>
    %519 = vector.shape_cast %518 : vector<1x32x32xf32> to vector<32x32xf32>
    %cst_386 = arith.constant dense<0.000000e+00> : vector<8x32xf32>
    %520 = tpu.matmul %496, %519, %cst_386 {dimension_numbers = #tpu.dot_dimension_numbers<[1], [0], [0], [1], [0, 0, 1, 1], [], []>} : vector<8x32xf32>, vector<32x32xf32>, vector<8x32xf32> -> vector<8x32xf32>
    %521 = arith.addf %517, %520 : vector<8x32xf32>
    %522 = arith.negf %509 : vector<8x32xf32>
    %523 = math.exp %522 : vector<8x32xf32>
    %cst_387 = arith.constant 1.000000e+00 : f32
    %524 = vector.broadcast %cst_387 : f32 to vector<8x32xf32>
    %525 = arith.addf %524, %523 : vector<8x32xf32>
    %526 = arith.divf %524, %525 : vector<8x32xf32>
    %527 = arith.mulf %526, %495 : vector<8x32xf32>
    %528 = arith.negf %503 : vector<8x32xf32>
    %529 = math.exp %528 : vector<8x32xf32>
    %cst_388 = arith.constant 1.000000e+00 : f32
    %530 = vector.broadcast %cst_388 : f32 to vector<8x32xf32>
    %531 = arith.addf %530, %529 : vector<8x32xf32>
    %532 = arith.divf %530, %531 : vector<8x32xf32>
    %533 = math.tanh %515 : vector<8x32xf32>
    %534 = arith.mulf %532, %533 : vector<8x32xf32>
    %535 = arith.addf %527, %534 : vector<8x32xf32>
    %536 = arith.negf %521 : vector<8x32xf32>
    %537 = math.exp %536 : vector<8x32xf32>
    %cst_389 = arith.constant 1.000000e+00 : f32
    %538 = vector.broadcast %cst_389 : f32 to vector<8x32xf32>
    %539 = arith.addf %538, %537 : vector<8x32xf32>
    %540 = arith.divf %538, %539 : vector<8x32xf32>
    %541 = math.tanh %535 : vector<8x32xf32>
    %542 = arith.mulf %540, %541 : vector<8x32xf32>
    %c1_i32 = arith.constant 1 : i32
    %543 = vector.broadcast %c1_i32 : i32 to vector<8x32xi32>
    %544 = arith.cmpi sgt, %446, %543 : vector<8x32xi32>
    %545 = arith.select %544, %535, %495 : vector<8x32xi1>, vector<8x32xf32>
    %546 = arith.select %544, %542, %496 : vector<8x32xi1>, vector<8x32xf32>
    %547 = arith.select %544, %542, %447 : vector<8x32xi1>, vector<8x32xf32>
    %c0_390 = arith.constant 0 : index
    %c16 = arith.constant 16 : index
    %c0_391 = arith.constant 0 : index
    %548 = vector.load %arg17[%c0_390, %c16, %c0_391] : memref<4x48x32xf32, #tpu.memory_space<vmem>>, vector<1x8x32xf32>
    %549 = vector.shape_cast %548 : vector<1x8x32xf32> to vector<8x32xf32>
    %c0_392 = arith.constant 0 : index
    %c0_393 = arith.constant 0 : index
    %c0_394 = arith.constant 0 : index
    %550 = vector.load %arg6[%c0_392, %c0_393, %c0_394] : memref<4x32x32xf32, #tpu.memory_space<vmem>>, vector<1x32x32xf32>
    %551 = vector.shape_cast %550 : vector<1x32x32xf32> to vector<32x32xf32>
    %cst_395 = arith.constant dense<0.000000e+00> : vector<8x32xf32>
    %552 = tpu.matmul %546, %551, %cst_395 {dimension_numbers = #tpu.dot_dimension_numbers<[1], [0], [0], [1], [0, 0, 1, 1], [], []>} : vector<8x32xf32>, vector<32x32xf32>, vector<8x32xf32> -> vector<8x32xf32>
    %553 = arith.addf %549, %552 : vector<8x32xf32>
    %c1_396 = arith.constant 1 : index
    %c16_397 = arith.constant 16 : index
    %c0_398 = arith.constant 0 : index
    %554 = vector.load %arg17[%c1_396, %c16_397, %c0_398] : memref<4x48x32xf32, #tpu.memory_space<vmem>>, vector<1x8x32xf32>
    %555 = vector.shape_cast %554 : vector<1x8x32xf32> to vector<8x32xf32>
    %c1_399 = arith.constant 1 : index
    %c0_400 = arith.constant 0 : index
    %c0_401 = arith.constant 0 : index
    %556 = vector.load %arg6[%c1_399, %c0_400, %c0_401] : memref<4x32x32xf32, #tpu.memory_space<vmem>>, vector<1x32x32xf32>
    %557 = vector.shape_cast %556 : vector<1x32x32xf32> to vector<32x32xf32>
    %cst_402 = arith.constant dense<0.000000e+00> : vector<8x32xf32>
    %558 = tpu.matmul %546, %557, %cst_402 {dimension_numbers = #tpu.dot_dimension_numbers<[1], [0], [0], [1], [0, 0, 1, 1], [], []>} : vector<8x32xf32>, vector<32x32xf32>, vector<8x32xf32> -> vector<8x32xf32>
    %559 = arith.addf %555, %558 : vector<8x32xf32>
    %c2_403 = arith.constant 2 : index
    %c16_404 = arith.constant 16 : index
    %c0_405 = arith.constant 0 : index
    %560 = vector.load %arg17[%c2_403, %c16_404, %c0_405] : memref<4x48x32xf32, #tpu.memory_space<vmem>>, vector<1x8x32xf32>
    %561 = vector.shape_cast %560 : vector<1x8x32xf32> to vector<8x32xf32>
    %c2_406 = arith.constant 2 : index
    %c0_407 = arith.constant 0 : index
    %c0_408 = arith.constant 0 : index
    %562 = vector.load %arg6[%c2_406, %c0_407, %c0_408] : memref<4x32x32xf32, #tpu.memory_space<vmem>>, vector<1x32x32xf32>
    %563 = vector.shape_cast %562 : vector<1x32x32xf32> to vector<32x32xf32>
    %cst_409 = arith.constant dense<0.000000e+00> : vector<8x32xf32>
    %564 = tpu.matmul %546, %563, %cst_409 {dimension_numbers = #tpu.dot_dimension_numbers<[1], [0], [0], [1], [0, 0, 1, 1], [], []>} : vector<8x32xf32>, vector<32x32xf32>, vector<8x32xf32> -> vector<8x32xf32>
    %565 = arith.addf %561, %564 : vector<8x32xf32>
    %c3_410 = arith.constant 3 : index
    %c16_411 = arith.constant 16 : index
    %c0_412 = arith.constant 0 : index
    %566 = vector.load %arg17[%c3_410, %c16_411, %c0_412] : memref<4x48x32xf32, #tpu.memory_space<vmem>>, vector<1x8x32xf32>
    %567 = vector.shape_cast %566 : vector<1x8x32xf32> to vector<8x32xf32>
    %c3_413 = arith.constant 3 : index
    %c0_414 = arith.constant 0 : index
    %c0_415 = arith.constant 0 : index
    %568 = vector.load %arg6[%c3_413, %c0_414, %c0_415] : memref<4x32x32xf32, #tpu.memory_space<vmem>>, vector<1x32x32xf32>
    %569 = vector.shape_cast %568 : vector<1x32x32xf32> to vector<32x32xf32>
    %cst_416 = arith.constant dense<0.000000e+00> : vector<8x32xf32>
    %570 = tpu.matmul %546, %569, %cst_416 {dimension_numbers = #tpu.dot_dimension_numbers<[1], [0], [0], [1], [0, 0, 1, 1], [], []>} : vector<8x32xf32>, vector<32x32xf32>, vector<8x32xf32> -> vector<8x32xf32>
    %571 = arith.addf %567, %570 : vector<8x32xf32>
    %572 = arith.negf %559 : vector<8x32xf32>
    %573 = math.exp %572 : vector<8x32xf32>
    %cst_417 = arith.constant 1.000000e+00 : f32
    %574 = vector.broadcast %cst_417 : f32 to vector<8x32xf32>
    %575 = arith.addf %574, %573 : vector<8x32xf32>
    %576 = arith.divf %574, %575 : vector<8x32xf32>
    %577 = arith.mulf %576, %545 : vector<8x32xf32>
    %578 = arith.negf %553 : vector<8x32xf32>
    %579 = math.exp %578 : vector<8x32xf32>
    %cst_418 = arith.constant 1.000000e+00 : f32
    %580 = vector.broadcast %cst_418 : f32 to vector<8x32xf32>
    %581 = arith.addf %580, %579 : vector<8x32xf32>
    %582 = arith.divf %580, %581 : vector<8x32xf32>
    %583 = math.tanh %565 : vector<8x32xf32>
    %584 = arith.mulf %582, %583 : vector<8x32xf32>
    %585 = arith.addf %577, %584 : vector<8x32xf32>
    %586 = arith.negf %571 : vector<8x32xf32>
    %587 = math.exp %586 : vector<8x32xf32>
    %cst_419 = arith.constant 1.000000e+00 : f32
    %588 = vector.broadcast %cst_419 : f32 to vector<8x32xf32>
    %589 = arith.addf %588, %587 : vector<8x32xf32>
    %590 = arith.divf %588, %589 : vector<8x32xf32>
    %591 = math.tanh %585 : vector<8x32xf32>
    %592 = arith.mulf %590, %591 : vector<8x32xf32>
    %c2_i32 = arith.constant 2 : i32
    %593 = vector.broadcast %c2_i32 : i32 to vector<8x32xi32>
    %594 = arith.cmpi sgt, %446, %593 : vector<8x32xi32>
    %595 = arith.select %594, %585, %545 : vector<8x32xi1>, vector<8x32xf32>
    %596 = arith.select %594, %592, %546 : vector<8x32xi1>, vector<8x32xf32>
    %597 = arith.select %594, %592, %447 : vector<8x32xi1>, vector<8x32xf32>
    %c0_420 = arith.constant 0 : index
    %c24 = arith.constant 24 : index
    %c0_421 = arith.constant 0 : index
    %598 = vector.load %arg17[%c0_420, %c24, %c0_421] : memref<4x48x32xf32, #tpu.memory_space<vmem>>, vector<1x8x32xf32>
    %599 = vector.shape_cast %598 : vector<1x8x32xf32> to vector<8x32xf32>
    %c0_422 = arith.constant 0 : index
    %c0_423 = arith.constant 0 : index
    %c0_424 = arith.constant 0 : index
    %600 = vector.load %arg6[%c0_422, %c0_423, %c0_424] : memref<4x32x32xf32, #tpu.memory_space<vmem>>, vector<1x32x32xf32>
    %601 = vector.shape_cast %600 : vector<1x32x32xf32> to vector<32x32xf32>
    %cst_425 = arith.constant dense<0.000000e+00> : vector<8x32xf32>
    %602 = tpu.matmul %596, %601, %cst_425 {dimension_numbers = #tpu.dot_dimension_numbers<[1], [0], [0], [1], [0, 0, 1, 1], [], []>} : vector<8x32xf32>, vector<32x32xf32>, vector<8x32xf32> -> vector<8x32xf32>
    %603 = arith.addf %599, %602 : vector<8x32xf32>
    %c1_426 = arith.constant 1 : index
    %c24_427 = arith.constant 24 : index
    %c0_428 = arith.constant 0 : index
    %604 = vector.load %arg17[%c1_426, %c24_427, %c0_428] : memref<4x48x32xf32, #tpu.memory_space<vmem>>, vector<1x8x32xf32>
    %605 = vector.shape_cast %604 : vector<1x8x32xf32> to vector<8x32xf32>
    %c1_429 = arith.constant 1 : index
    %c0_430 = arith.constant 0 : index
    %c0_431 = arith.constant 0 : index
    %606 = vector.load %arg6[%c1_429, %c0_430, %c0_431] : memref<4x32x32xf32, #tpu.memory_space<vmem>>, vector<1x32x32xf32>
    %607 = vector.shape_cast %606 : vector<1x32x32xf32> to vector<32x32xf32>
    %cst_432 = arith.constant dense<0.000000e+00> : vector<8x32xf32>
    %608 = tpu.matmul %596, %607, %cst_432 {dimension_numbers = #tpu.dot_dimension_numbers<[1], [0], [0], [1], [0, 0, 1, 1], [], []>} : vector<8x32xf32>, vector<32x32xf32>, vector<8x32xf32> -> vector<8x32xf32>
    %609 = arith.addf %605, %608 : vector<8x32xf32>
    %c2_433 = arith.constant 2 : index
    %c24_434 = arith.constant 24 : index
    %c0_435 = arith.constant 0 : index
    %610 = vector.load %arg17[%c2_433, %c24_434, %c0_435] : memref<4x48x32xf32, #tpu.memory_space<vmem>>, vector<1x8x32xf32>
    %611 = vector.shape_cast %610 : vector<1x8x32xf32> to vector<8x32xf32>
    %c2_436 = arith.constant 2 : index
    %c0_437 = arith.constant 0 : index
    %c0_438 = arith.constant 0 : index
    %612 = vector.load %arg6[%c2_436, %c0_437, %c0_438] : memref<4x32x32xf32, #tpu.memory_space<vmem>>, vector<1x32x32xf32>
    %613 = vector.shape_cast %612 : vector<1x32x32xf32> to vector<32x32xf32>
    %cst_439 = arith.constant dense<0.000000e+00> : vector<8x32xf32>
    %614 = tpu.matmul %596, %613, %cst_439 {dimension_numbers = #tpu.dot_dimension_numbers<[1], [0], [0], [1], [0, 0, 1, 1], [], []>} : vector<8x32xf32>, vector<32x32xf32>, vector<8x32xf32> -> vector<8x32xf32>
    %615 = arith.addf %611, %614 : vector<8x32xf32>
    %c3_440 = arith.constant 3 : index
    %c24_441 = arith.constant 24 : index
    %c0_442 = arith.constant 0 : index
    %616 = vector.load %arg17[%c3_440, %c24_441, %c0_442] : memref<4x48x32xf32, #tpu.memory_space<vmem>>, vector<1x8x32xf32>
    %617 = vector.shape_cast %616 : vector<1x8x32xf32> to vector<8x32xf32>
    %c3_443 = arith.constant 3 : index
    %c0_444 = arith.constant 0 : index
    %c0_445 = arith.constant 0 : index
    %618 = vector.load %arg6[%c3_443, %c0_444, %c0_445] : memref<4x32x32xf32, #tpu.memory_space<vmem>>, vector<1x32x32xf32>
    %619 = vector.shape_cast %618 : vector<1x32x32xf32> to vector<32x32xf32>
    %cst_446 = arith.constant dense<0.000000e+00> : vector<8x32xf32>
    %620 = tpu.matmul %596, %619, %cst_446 {dimension_numbers = #tpu.dot_dimension_numbers<[1], [0], [0], [1], [0, 0, 1, 1], [], []>} : vector<8x32xf32>, vector<32x32xf32>, vector<8x32xf32> -> vector<8x32xf32>
    %621 = arith.addf %617, %620 : vector<8x32xf32>
    %622 = arith.negf %609 : vector<8x32xf32>
    %623 = math.exp %622 : vector<8x32xf32>
    %cst_447 = arith.constant 1.000000e+00 : f32
    %624 = vector.broadcast %cst_447 : f32 to vector<8x32xf32>
    %625 = arith.addf %624, %623 : vector<8x32xf32>
    %626 = arith.divf %624, %625 : vector<8x32xf32>
    %627 = arith.mulf %626, %595 : vector<8x32xf32>
    %628 = arith.negf %603 : vector<8x32xf32>
    %629 = math.exp %628 : vector<8x32xf32>
    %cst_448 = arith.constant 1.000000e+00 : f32
    %630 = vector.broadcast %cst_448 : f32 to vector<8x32xf32>
    %631 = arith.addf %630, %629 : vector<8x32xf32>
    %632 = arith.divf %630, %631 : vector<8x32xf32>
    %633 = math.tanh %615 : vector<8x32xf32>
    %634 = arith.mulf %632, %633 : vector<8x32xf32>
    %635 = arith.addf %627, %634 : vector<8x32xf32>
    %636 = arith.negf %621 : vector<8x32xf32>
    %637 = math.exp %636 : vector<8x32xf32>
    %cst_449 = arith.constant 1.000000e+00 : f32
    %638 = vector.broadcast %cst_449 : f32 to vector<8x32xf32>
    %639 = arith.addf %638, %637 : vector<8x32xf32>
    %640 = arith.divf %638, %639 : vector<8x32xf32>
    %641 = math.tanh %635 : vector<8x32xf32>
    %642 = arith.mulf %640, %641 : vector<8x32xf32>
    %c3_i32 = arith.constant 3 : i32
    %643 = vector.broadcast %c3_i32 : i32 to vector<8x32xi32>
    %644 = arith.cmpi sgt, %446, %643 : vector<8x32xi32>
    %645 = arith.select %644, %635, %595 : vector<8x32xi1>, vector<8x32xf32>
    %646 = arith.select %644, %642, %596 : vector<8x32xi1>, vector<8x32xf32>
    %647 = arith.select %644, %642, %447 : vector<8x32xi1>, vector<8x32xf32>
    %c0_450 = arith.constant 0 : index
    %c32 = arith.constant 32 : index
    %c0_451 = arith.constant 0 : index
    %648 = vector.load %arg17[%c0_450, %c32, %c0_451] : memref<4x48x32xf32, #tpu.memory_space<vmem>>, vector<1x8x32xf32>
    %649 = vector.shape_cast %648 : vector<1x8x32xf32> to vector<8x32xf32>
    %c0_452 = arith.constant 0 : index
    %c0_453 = arith.constant 0 : index
    %c0_454 = arith.constant 0 : index
    %650 = vector.load %arg6[%c0_452, %c0_453, %c0_454] : memref<4x32x32xf32, #tpu.memory_space<vmem>>, vector<1x32x32xf32>
    %651 = vector.shape_cast %650 : vector<1x32x32xf32> to vector<32x32xf32>
    %cst_455 = arith.constant dense<0.000000e+00> : vector<8x32xf32>
    %652 = tpu.matmul %646, %651, %cst_455 {dimension_numbers = #tpu.dot_dimension_numbers<[1], [0], [0], [1], [0, 0, 1, 1], [], []>} : vector<8x32xf32>, vector<32x32xf32>, vector<8x32xf32> -> vector<8x32xf32>
    %653 = arith.addf %649, %652 : vector<8x32xf32>
    %c1_456 = arith.constant 1 : index
    %c32_457 = arith.constant 32 : index
    %c0_458 = arith.constant 0 : index
    %654 = vector.load %arg17[%c1_456, %c32_457, %c0_458] : memref<4x48x32xf32, #tpu.memory_space<vmem>>, vector<1x8x32xf32>
    %655 = vector.shape_cast %654 : vector<1x8x32xf32> to vector<8x32xf32>
    %c1_459 = arith.constant 1 : index
    %c0_460 = arith.constant 0 : index
    %c0_461 = arith.constant 0 : index
    %656 = vector.load %arg6[%c1_459, %c0_460, %c0_461] : memref<4x32x32xf32, #tpu.memory_space<vmem>>, vector<1x32x32xf32>
    %657 = vector.shape_cast %656 : vector<1x32x32xf32> to vector<32x32xf32>
    %cst_462 = arith.constant dense<0.000000e+00> : vector<8x32xf32>
    %658 = tpu.matmul %646, %657, %cst_462 {dimension_numbers = #tpu.dot_dimension_numbers<[1], [0], [0], [1], [0, 0, 1, 1], [], []>} : vector<8x32xf32>, vector<32x32xf32>, vector<8x32xf32> -> vector<8x32xf32>
    %659 = arith.addf %655, %658 : vector<8x32xf32>
    %c2_463 = arith.constant 2 : index
    %c32_464 = arith.constant 32 : index
    %c0_465 = arith.constant 0 : index
    %660 = vector.load %arg17[%c2_463, %c32_464, %c0_465] : memref<4x48x32xf32, #tpu.memory_space<vmem>>, vector<1x8x32xf32>
    %661 = vector.shape_cast %660 : vector<1x8x32xf32> to vector<8x32xf32>
    %c2_466 = arith.constant 2 : index
    %c0_467 = arith.constant 0 : index
    %c0_468 = arith.constant 0 : index
    %662 = vector.load %arg6[%c2_466, %c0_467, %c0_468] : memref<4x32x32xf32, #tpu.memory_space<vmem>>, vector<1x32x32xf32>
    %663 = vector.shape_cast %662 : vector<1x32x32xf32> to vector<32x32xf32>
    %cst_469 = arith.constant dense<0.000000e+00> : vector<8x32xf32>
    %664 = tpu.matmul %646, %663, %cst_469 {dimension_numbers = #tpu.dot_dimension_numbers<[1], [0], [0], [1], [0, 0, 1, 1], [], []>} : vector<8x32xf32>, vector<32x32xf32>, vector<8x32xf32> -> vector<8x32xf32>
    %665 = arith.addf %661, %664 : vector<8x32xf32>
    %c3_470 = arith.constant 3 : index
    %c32_471 = arith.constant 32 : index
    %c0_472 = arith.constant 0 : index
    %666 = vector.load %arg17[%c3_470, %c32_471, %c0_472] : memref<4x48x32xf32, #tpu.memory_space<vmem>>, vector<1x8x32xf32>
    %667 = vector.shape_cast %666 : vector<1x8x32xf32> to vector<8x32xf32>
    %c3_473 = arith.constant 3 : index
    %c0_474 = arith.constant 0 : index
    %c0_475 = arith.constant 0 : index
    %668 = vector.load %arg6[%c3_473, %c0_474, %c0_475] : memref<4x32x32xf32, #tpu.memory_space<vmem>>, vector<1x32x32xf32>
    %669 = vector.shape_cast %668 : vector<1x32x32xf32> to vector<32x32xf32>
    %cst_476 = arith.constant dense<0.000000e+00> : vector<8x32xf32>
    %670 = tpu.matmul %646, %669, %cst_476 {dimension_numbers = #tpu.dot_dimension_numbers<[1], [0], [0], [1], [0, 0, 1, 1], [], []>} : vector<8x32xf32>, vector<32x32xf32>, vector<8x32xf32> -> vector<8x32xf32>
    %671 = arith.addf %667, %670 : vector<8x32xf32>
    %672 = arith.negf %659 : vector<8x32xf32>
    %673 = math.exp %672 : vector<8x32xf32>
    %cst_477 = arith.constant 1.000000e+00 : f32
    %674 = vector.broadcast %cst_477 : f32 to vector<8x32xf32>
    %675 = arith.addf %674, %673 : vector<8x32xf32>
    %676 = arith.divf %674, %675 : vector<8x32xf32>
    %677 = arith.mulf %676, %645 : vector<8x32xf32>
    %678 = arith.negf %653 : vector<8x32xf32>
    %679 = math.exp %678 : vector<8x32xf32>
    %cst_478 = arith.constant 1.000000e+00 : f32
    %680 = vector.broadcast %cst_478 : f32 to vector<8x32xf32>
    %681 = arith.addf %680, %679 : vector<8x32xf32>
    %682 = arith.divf %680, %681 : vector<8x32xf32>
    %683 = math.tanh %665 : vector<8x32xf32>
    %684 = arith.mulf %682, %683 : vector<8x32xf32>
    %685 = arith.addf %677, %684 : vector<8x32xf32>
    %686 = arith.negf %671 : vector<8x32xf32>
    %687 = math.exp %686 : vector<8x32xf32>
    %cst_479 = arith.constant 1.000000e+00 : f32
    %688 = vector.broadcast %cst_479 : f32 to vector<8x32xf32>
    %689 = arith.addf %688, %687 : vector<8x32xf32>
    %690 = arith.divf %688, %689 : vector<8x32xf32>
    %691 = math.tanh %685 : vector<8x32xf32>
    %692 = arith.mulf %690, %691 : vector<8x32xf32>
    %c4_i32 = arith.constant 4 : i32
    %693 = vector.broadcast %c4_i32 : i32 to vector<8x32xi32>
    %694 = arith.cmpi sgt, %446, %693 : vector<8x32xi32>
    %695 = arith.select %694, %685, %645 : vector<8x32xi1>, vector<8x32xf32>
    %696 = arith.select %694, %692, %646 : vector<8x32xi1>, vector<8x32xf32>
    %697 = arith.select %694, %692, %447 : vector<8x32xi1>, vector<8x32xf32>
    %c0_480 = arith.constant 0 : index
    %c40 = arith.constant 40 : index
    %c0_481 = arith.constant 0 : index
    %698 = vector.load %arg17[%c0_480, %c40, %c0_481] : memref<4x48x32xf32, #tpu.memory_space<vmem>>, vector<1x8x32xf32>
    %699 = vector.shape_cast %698 : vector<1x8x32xf32> to vector<8x32xf32>
    %c0_482 = arith.constant 0 : index
    %c0_483 = arith.constant 0 : index
    %c0_484 = arith.constant 0 : index
    %700 = vector.load %arg6[%c0_482, %c0_483, %c0_484] : memref<4x32x32xf32, #tpu.memory_space<vmem>>, vector<1x32x32xf32>
    %701 = vector.shape_cast %700 : vector<1x32x32xf32> to vector<32x32xf32>
    %cst_485 = arith.constant dense<0.000000e+00> : vector<8x32xf32>
    %702 = tpu.matmul %696, %701, %cst_485 {dimension_numbers = #tpu.dot_dimension_numbers<[1], [0], [0], [1], [0, 0, 1, 1], [], []>} : vector<8x32xf32>, vector<32x32xf32>, vector<8x32xf32> -> vector<8x32xf32>
    %703 = arith.addf %699, %702 : vector<8x32xf32>
    %c1_486 = arith.constant 1 : index
    %c40_487 = arith.constant 40 : index
    %c0_488 = arith.constant 0 : index
    %704 = vector.load %arg17[%c1_486, %c40_487, %c0_488] : memref<4x48x32xf32, #tpu.memory_space<vmem>>, vector<1x8x32xf32>
    %705 = vector.shape_cast %704 : vector<1x8x32xf32> to vector<8x32xf32>
    %c1_489 = arith.constant 1 : index
    %c0_490 = arith.constant 0 : index
    %c0_491 = arith.constant 0 : index
    %706 = vector.load %arg6[%c1_489, %c0_490, %c0_491] : memref<4x32x32xf32, #tpu.memory_space<vmem>>, vector<1x32x32xf32>
    %707 = vector.shape_cast %706 : vector<1x32x32xf32> to vector<32x32xf32>
    %cst_492 = arith.constant dense<0.000000e+00> : vector<8x32xf32>
    %708 = tpu.matmul %696, %707, %cst_492 {dimension_numbers = #tpu.dot_dimension_numbers<[1], [0], [0], [1], [0, 0, 1, 1], [], []>} : vector<8x32xf32>, vector<32x32xf32>, vector<8x32xf32> -> vector<8x32xf32>
    %709 = arith.addf %705, %708 : vector<8x32xf32>
    %c2_493 = arith.constant 2 : index
    %c40_494 = arith.constant 40 : index
    %c0_495 = arith.constant 0 : index
    %710 = vector.load %arg17[%c2_493, %c40_494, %c0_495] : memref<4x48x32xf32, #tpu.memory_space<vmem>>, vector<1x8x32xf32>
    %711 = vector.shape_cast %710 : vector<1x8x32xf32> to vector<8x32xf32>
    %c2_496 = arith.constant 2 : index
    %c0_497 = arith.constant 0 : index
    %c0_498 = arith.constant 0 : index
    %712 = vector.load %arg6[%c2_496, %c0_497, %c0_498] : memref<4x32x32xf32, #tpu.memory_space<vmem>>, vector<1x32x32xf32>
    %713 = vector.shape_cast %712 : vector<1x32x32xf32> to vector<32x32xf32>
    %cst_499 = arith.constant dense<0.000000e+00> : vector<8x32xf32>
    %714 = tpu.matmul %696, %713, %cst_499 {dimension_numbers = #tpu.dot_dimension_numbers<[1], [0], [0], [1], [0, 0, 1, 1], [], []>} : vector<8x32xf32>, vector<32x32xf32>, vector<8x32xf32> -> vector<8x32xf32>
    %715 = arith.addf %711, %714 : vector<8x32xf32>
    %c3_500 = arith.constant 3 : index
    %c40_501 = arith.constant 40 : index
    %c0_502 = arith.constant 0 : index
    %716 = vector.load %arg17[%c3_500, %c40_501, %c0_502] : memref<4x48x32xf32, #tpu.memory_space<vmem>>, vector<1x8x32xf32>
    %717 = vector.shape_cast %716 : vector<1x8x32xf32> to vector<8x32xf32>
    %c3_503 = arith.constant 3 : index
    %c0_504 = arith.constant 0 : index
    %c0_505 = arith.constant 0 : index
    %718 = vector.load %arg6[%c3_503, %c0_504, %c0_505] : memref<4x32x32xf32, #tpu.memory_space<vmem>>, vector<1x32x32xf32>
    %719 = vector.shape_cast %718 : vector<1x32x32xf32> to vector<32x32xf32>
    %cst_506 = arith.constant dense<0.000000e+00> : vector<8x32xf32>
    %720 = tpu.matmul %696, %719, %cst_506 {dimension_numbers = #tpu.dot_dimension_numbers<[1], [0], [0], [1], [0, 0, 1, 1], [], []>} : vector<8x32xf32>, vector<32x32xf32>, vector<8x32xf32> -> vector<8x32xf32>
    %721 = arith.addf %717, %720 : vector<8x32xf32>
    %722 = arith.negf %709 : vector<8x32xf32>
    %723 = math.exp %722 : vector<8x32xf32>
    %cst_507 = arith.constant 1.000000e+00 : f32
    %724 = vector.broadcast %cst_507 : f32 to vector<8x32xf32>
    %725 = arith.addf %724, %723 : vector<8x32xf32>
    %726 = arith.divf %724, %725 : vector<8x32xf32>
    %727 = arith.mulf %726, %695 : vector<8x32xf32>
    %728 = arith.negf %703 : vector<8x32xf32>
    %729 = math.exp %728 : vector<8x32xf32>
    %cst_508 = arith.constant 1.000000e+00 : f32
    %730 = vector.broadcast %cst_508 : f32 to vector<8x32xf32>
    %731 = arith.addf %730, %729 : vector<8x32xf32>
    %732 = arith.divf %730, %731 : vector<8x32xf32>
    %733 = math.tanh %715 : vector<8x32xf32>
    %734 = arith.mulf %732, %733 : vector<8x32xf32>
    %735 = arith.addf %727, %734 : vector<8x32xf32>
    %736 = arith.negf %721 : vector<8x32xf32>
    %737 = math.exp %736 : vector<8x32xf32>
    %cst_509 = arith.constant 1.000000e+00 : f32
    %738 = vector.broadcast %cst_509 : f32 to vector<8x32xf32>
    %739 = arith.addf %738, %737 : vector<8x32xf32>
    %740 = arith.divf %738, %739 : vector<8x32xf32>
    %741 = math.tanh %735 : vector<8x32xf32>
    %742 = arith.mulf %740, %741 : vector<8x32xf32>
    %c5_i32 = arith.constant 5 : i32
    %743 = vector.broadcast %c5_i32 : i32 to vector<8x32xi32>
    %744 = arith.cmpi sgt, %446, %743 : vector<8x32xi32>
    %745 = arith.select %744, %742, %696 : vector<8x32xi1>, vector<8x32xf32>
    %746 = arith.select %744, %742, %447 : vector<8x32xi1>, vector<8x32xf32>
    %747 = tpu.concatenate %497, %547, %597, %647, %697, %746 in 0 : vector<8x32xf32>, vector<8x32xf32>, vector<8x32xf32>, vector<8x32xf32>, vector<8x32xf32>, vector<8x32xf32> -> vector<48x32xf32>
    %c0_510 = arith.constant 0 : index
    %c0_511 = arith.constant 0 : index
    %748 = vector.load %arg13[%c0_510, %c0_511] : memref<48x32xf32, #tpu.memory_space<vmem>>, vector<48x32xf32>
    tpu.vector_store %arg13[%c0_510, %c0_511], %747 {strides = array<i32>} : memref<48x32xf32, #tpu.memory_space<vmem>>, vector<48x32xf32>,
    %c0_512 = arith.constant 0 : index
    %c0_513 = arith.constant 0 : index
    %749 = vector.load %arg15[%c0_512, %c0_513] : memref<8x32xf32, #tpu.memory_space<vmem>>, vector<8x32xf32>
    tpu.vector_store %arg15[%c0_512, %c0_513], %745 {strides = array<i32>} : memref<8x32xf32, #tpu.memory_space<vmem>>, vector<8x32xf32>,
    %c0_514 = arith.constant 0 : index
    %c0_515 = arith.constant 0 : index
    %750 = vector.load %arg9[%c0_514, %c0_515] : memref<32x32xf32, #tpu.memory_space<vmem>>, vector<32x32xf32>
    %cst_516 = arith.constant dense<0.000000e+00> : vector<8x32xf32>
    %751 = tpu.matmul %745, %750, %cst_516 {dimension_numbers = #tpu.dot_dimension_numbers<[1], [0], [0], [1], [0, 0, 1, 1], [], []>} : vector<8x32xf32>, vector<32x32xf32>, vector<8x32xf32> -> vector<8x32xf32>
    %c0_517 = arith.constant 0 : index
    %c0_518 = arith.constant 0 : index
    %752 = vector.load %arg10[%c0_517, %c0_518] : memref<1x32xf32, #tpu.memory_space<vmem>>, vector<1x32xf32>
    %753 = vector.broadcast %752 : vector<1x32xf32> to vector<8x32xf32>
    %754 = arith.addf %751, %753 : vector<8x32xf32>
    %755 = tpu.concatenate %754, %754, %754, %754, %754, %754 in 0 : vector<8x32xf32>, vector<8x32xf32>, vector<8x32xf32>, vector<8x32xf32>, vector<8x32xf32>, vector<8x32xf32> -> vector<48x32xf32>
    %c0_519 = arith.constant 0 : index
    %c0_520 = arith.constant 0 : index
    %756 = vector.load %arg8[%c0_519, %c0_520] : memref<32x32xf32, #tpu.memory_space<vmem>>, vector<32x32xf32>
    %cst_521 = arith.constant dense<0.000000e+00> : vector<48x32xf32>
    %757 = tpu.matmul %747, %756, %cst_521 {dimension_numbers = #tpu.dot_dimension_numbers<[1], [0], [0], [1], [0, 0, 1, 1], [], []>} : vector<48x32xf32>, vector<32x32xf32>, vector<48x32xf32> -> vector<48x32xf32>
    %758 = arith.addf %757, %755 : vector<48x32xf32>
    %cst_522 = arith.constant 0.000000e+00 : f32
    %759 = vector.broadcast %cst_522 : f32 to vector<48x32xf32>
    %760 = arith.maximumf %758, %759 : vector<48x32xf32>
    %c0_523 = arith.constant 0 : index
    %c0_524 = arith.constant 0 : index
    %761 = vector.load %arg11[%c0_523, %c0_524] : memref<32x1xf32, #tpu.memory_space<vmem>>, vector<32x1xf32>
    %cst_525 = arith.constant dense<0.000000e+00> : vector<48x1xf32>
    %762 = tpu.matmul %760, %761, %cst_525 {dimension_numbers = #tpu.dot_dimension_numbers<[1], [0], [0], [1], [0, 0, 1, 1], [], []>} : vector<48x32xf32>, vector<32x1xf32>, vector<48x1xf32> -> vector<48x1xf32>
    %c0_526 = arith.constant 0 : index
    %c0_527 = arith.constant 0 : index
    %763 = vector.load %arg12[%c0_526, %c0_527] : memref<1x1xf32, #tpu.memory_space<vmem>>, vector<1x1xf32>
    %764 = vector.broadcast %763 : vector<1x1xf32> to vector<48x1xf32>
    %765 = arith.addf %762, %764 : vector<48x1xf32>
    %766 = vector.extract_strided_slice %765 {offsets = [0, 0], sizes = [8, 1], strides = [1, 1]} : vector<48x1xf32> to vector<8x1xf32>
    %767 = vector.extract_strided_slice %765 {offsets = [8, 0], sizes = [8, 1], strides = [1, 1]} : vector<48x1xf32> to vector<8x1xf32>
    %768 = vector.extract_strided_slice %765 {offsets = [16, 0], sizes = [8, 1], strides = [1, 1]} : vector<48x1xf32> to vector<8x1xf32>
    %769 = vector.extract_strided_slice %765 {offsets = [24, 0], sizes = [8, 1], strides = [1, 1]} : vector<48x1xf32> to vector<8x1xf32>
    %770 = vector.extract_strided_slice %765 {offsets = [32, 0], sizes = [8, 1], strides = [1, 1]} : vector<48x1xf32> to vector<8x1xf32>
    %771 = vector.extract_strided_slice %765 {offsets = [40, 0], sizes = [8, 1], strides = [1, 1]} : vector<48x1xf32> to vector<8x1xf32>
    %772 = arith.maximumf %766, %767 : vector<8x1xf32>
    %773 = arith.maximumf %772, %768 : vector<8x1xf32>
    %774 = arith.maximumf %773, %769 : vector<8x1xf32>
    %775 = arith.maximumf %774, %770 : vector<8x1xf32>
    %776 = arith.maximumf %775, %771 : vector<8x1xf32>
    %777 = arith.subf %766, %776 : vector<8x1xf32>
    %778 = math.exp %777 : vector<8x1xf32>
    %779 = arith.subf %767, %776 : vector<8x1xf32>
    %780 = math.exp %779 : vector<8x1xf32>
    %781 = arith.subf %768, %776 : vector<8x1xf32>
    %782 = math.exp %781 : vector<8x1xf32>
    %783 = arith.subf %769, %776 : vector<8x1xf32>
    %784 = math.exp %783 : vector<8x1xf32>
    %785 = arith.subf %770, %776 : vector<8x1xf32>
    %786 = math.exp %785 : vector<8x1xf32>
    %787 = arith.subf %771, %776 : vector<8x1xf32>
    %788 = math.exp %787 : vector<8x1xf32>
    %789 = arith.addf %778, %780 : vector<8x1xf32>
    %790 = arith.addf %789, %782 : vector<8x1xf32>
    %791 = arith.addf %790, %784 : vector<8x1xf32>
    %792 = arith.addf %791, %786 : vector<8x1xf32>
    %793 = arith.addf %792, %788 : vector<8x1xf32>
    %794 = arith.divf %778, %793 : vector<8x1xf32>
    %795 = arith.divf %780, %793 : vector<8x1xf32>
    %796 = arith.divf %782, %793 : vector<8x1xf32>
    %797 = arith.divf %784, %793 : vector<8x1xf32>
    %798 = arith.divf %786, %793 : vector<8x1xf32>
    %799 = arith.divf %788, %793 : vector<8x1xf32>
    %800 = tpu.concatenate %794, %795, %796, %797, %798, %799 in 0 : vector<8x1xf32>, vector<8x1xf32>, vector<8x1xf32>, vector<8x1xf32>, vector<8x1xf32>, vector<8x1xf32> -> vector<48x1xf32>
    %c0_528 = arith.constant 0 : index
    %c0_529 = arith.constant 0 : index
    %801 = vector.load %arg14[%c0_528, %c0_529] : memref<48x1xf32, #tpu.memory_space<vmem>>, vector<48x1xf32>
    tpu.vector_store %arg14[%c0_528, %c0_529], %800 {strides = array<i32>} : memref<48x1xf32, #tpu.memory_space<vmem>>, vector<48x1xf32>,
    return
  }
}

</mosaic_0001>

<bundles_post_ra>
// kernel: note_order_diagnosis_forward.1
= control target key start
LH: loop header
LB: loop body
LE: loop exit
PB: predicated region body
PF: predicated region fallthrough
CT: control target
= control target key end

     0   :  { %vm106_vm0 = vcmask 130048   ;;  %vm556_vm1 = vcmask 261120   ;;  %vm13309_vm2 = vmmov 0   ;;  %vm9774_vm9 = vcmask 7168   ;;  %s16038_s2 = inlined_call_operand.vmem [shape: f32[4,16,32], index: 2, kind: input, shape index: {}]   ;;  %s16039_s0 = inlined_call_operand.vmem [shape: f32[384,16], index: 0, kind: input, shape index: {}]   ;;  %s16040_s3 = inlined_call_operand.vmem [shape: f32[4,32,32], index: 3, kind: input, shape index: {}]   ;;  %s16041_s4 = inlined_call_operand.vmem [shape: f32[4,1,32], index: 4, kind: input, shape index: {}]   ;;  %s16042_s5 = inlined_call_operand.vmem [shape: f32[4,32,32], index: 5, kind: input, shape index: {}]   ;;  %s16043_s6 = inlined_call_operand.vmem [shape: f32[4,32,32], index: 6, kind: input, shape index: {}]   ;;  %s16044_s7 = inlined_call_operand.vmem [shape: f32[4,1,32], index: 7, kind: input, shape index: {}]   ;;  %s16045_s1 = inlined_call_operand.vmem [shape: s32[8,32], index: 1, kind: input, shape index: {}]   ;;  %s16046_s13 = inlined_call_operand.vmem [shape: f32[48,32], index: 13, kind: output, shape index: {0}]   ;;  %s16047_s8 = inlined_call_operand.vmem [shape: f32[32,32], index: 8, kind: input, shape index: {}]   ;;  %s16048_s9 = inlined_call_operand.vmem [shape: f32[32,32], index: 9, kind: input, shape index: {}]   ;;  %s16049_s15 = inlined_call_operand.vmem [shape: f32[8,32], index: 15, kind: output, shape index: {2}]   ;;  %s16050_s11 = inlined_call_operand.vmem [shape: f32[32,1], index: 11, kind: input, shape index: {}]   ;;  %s16051_s12 = inlined_call_operand.<no memory space> [shape: f32[1,1], index: 12, kind: input, shape index: {}]   ;;  %s16052_s10 = inlined_call_operand.vmem [shape: f32[1,32], index: 10, kind: input, shape index: {}]   ;;  %s16053_s14 = inlined_call_operand.vmem [shape: f32[48,1], index: 14, kind: output, shape index: {1}]  }
   0x1   :  { %v98_v0 = vld [vmem:[%s16038_s2 + $0x8] sm:$0xff]  ;;  %v97_v1 = vld [vmem:[%s16038_s2] sm:$0xff]  ;;  %v13404_v3 = vld [vmem:[%s16039_s0 + $0x170] sm:$0xff] }
   0x2   :  { %11135 = vmatprep.subr.mxu0 %v98_v0  ;;  %12360 = vmatprep.subr.mxu1 %v98_v0  ;;  %v13399_v2 = vld [vmem:[%s16039_s0] sm:$0xff]  ;;  %v13409_v4 = vld [vmem:[%s16039_s0 + $0x8] sm:$0xff]  ;;  %v13414_v5 = vld [vmem:[%s16039_s0 + $0x178] sm:$0xff] }
   0x3   :  { %11136 = vmatpush3.msra.mxu0 %v98_v0  ;;  %12362 = vmatpush3.msra.mxu1 %v98_v0  ;;  %v9843_v6 = vld [vmem:[%s16038_s2 + $0x18] sm:$0xff]  ;;  %v13422_v7 = vld [vmem:[%s16039_s0 + $0x10] sm:$0xff]  ;;  %v9895_v9 = vld [vmem:[%s16038_s2 + $0x28] sm:$0xff] }
   0x4   :  { %11137 = vmatprep.subr.mxu0 %v97_v1  ;;  %12361 = vmatprep.subr.mxu1 %v97_v1  ;;  %v9842_v8 = vld [vmem:[%s16038_s2 + $0x10] sm:$0xff]  ;;  %v13443_v10 = vld [vmem:[%s16039_s0 + $0x18] sm:$0xff]  ;;  %v13453_v12 = vld [vmem:[%s16039_s0 + $0x20] sm:$0xff] }
   0x5   :  { %11138 = vmatpush3.msra.mxu0 %v97_v1  ;;  %12363 = vmatpush3.msra.mxu1 %v97_v1  ;;  %v9947_v11 = vld [vmem:[%s16038_s2 + $0x38] sm:$0xff]  ;;  %v13462_v13 = vld [vmem:[%s16039_s0 + $0x28] sm:$0xff]  ;;  %v13469_v14 = vld [vmem:[%s16039_s0 + $0x30] sm:$0xff] }
   0x6   :  { %11139 = vmatprep.mubr.msk.f32.mxu0 %vm106_vm0, %v13399_v2  ;;  %11208 = vmatprep.mubr.msk.f32.mxu1 %vm106_vm0, %v13404_v3  ;;  %v9946_v15 = vld [vmem:[%s16038_s2 + $0x30] sm:$0xff]  ;;  %v9894_v16 = vld [vmem:[%s16038_s2 + $0x20] sm:$0xff]  ;;  %v13488_v17 = vld [vmem:[%s16039_s0 + $0x38] sm:$0xff] }
   0x7   :  { %11140 = vmatmul.mubr.msk.f32.vlgmr.msra.gmra.mxu0 %vm106_vm0, %v13409_v4  ;;  %11209 = vmatmul.mubr.msk.f32.vlgmr.msra.gmra.mxu1 %vm106_vm0, %v13414_v5  ;;  %v13495_v18 = vld [vmem:[%s16039_s0 + $0x40] sm:$0xff]  ;;  %v13502_v19 = vld [vmem:[%s16040_s3 + $0x18] sm:$0xff]  ;;  %v13511_v20 = vld [vmem:[%s16039_s0 + $0x48] sm:$0xff] }
   0x8   :  { %11211 = vmatprep.subr.mxu1 %v9843_v6  ;;  %11142 = vmatprep.mubr.msk.f32.mxu0 %vm106_vm0, %v13422_v7  ;;  %v13516_v21 = vld [vmem:[%s16040_s3 + $0x38] sm:$0xff]  ;;  %v13523_v22 = vld [vmem:[%s16039_s0 + $0x50] sm:$0xff]  ;;  %v13543_v24 = vld [vmem:[%s16039_s0 + $0x60] sm:$0xff] }
   0x9   :  { %11212 = vmatpush3.msra.mxu1 %v9843_v6  ;;  %11215 = vmatprep.mubr.msk.f32.mxu1 %vm106_vm0, %v13399_v2  ;;  %v13536_v23 = vld [vmem:[%s16039_s0 + $0x58] sm:$0xff]  ;;  %v13554_v25 = vld [vmem:[%s16039_s0 + $0x68] sm:$0xff]  ;;  %v13561_v26 = vld [vmem:[%s16039_s0 + $0x70] sm:$0xff] }
   0xa   :  { %11213 = vmatprep.subr.mxu1 %v9842_v8  ;;  %11287 = vmatprep.subr.mxu0 %v9895_v9  ;;  %v13572_v27 = vld [vmem:[%s16039_s0 + $0x78] sm:$0xff]  ;;  %v13579_v28 = vld [vmem:[%s16039_s0 + $0x80] sm:$0xff]  ;;  %v13590_v29 = vld [vmem:[%s16039_s0 + $0x88] sm:$0xff] }
   0xb   :  { %11214 = vmatpush3.msra.mxu1 %v9842_v8  ;;  %11143 = vmatmul.mubr.msk.f32.gmra.mxu0 %vm106_vm0, %v13443_v10  ;;  %v13597_v30 = vld [vmem:[%s16039_s0 + $0x90] sm:$0xff]  ;;  %v13608_v31 = vld [vmem:[%s16039_s0 + $0x98] sm:$0xff]  ;;  %v13615_v32 = vld [vmem:[%s16039_s0 + $0xa0] sm:$0xff] }
   0xc   :  { %11216 = vmatmul.mubr.msk.f32.vlgmr.msra.gmra.mxu1 %vm106_vm0, %v13409_v4  ;;  %11363 = vmatprep.subr.mxu1 %v9947_v11  ;;  %v13626_v33 = vld [vmem:[%s16039_s0 + $0xa8] sm:$0xff]  ;;  %v13633_v34 = vld [vmem:[%s16039_s0 + $0xb0] sm:$0xff]  ;;  %v13644_v35 = vld [vmem:[%s16039_s0 + $0xb8] sm:$0xff] }
   0xd   :  { %11364 = vmatpush3.msra.mxu1 %v9947_v11  ;;  %11145 = vmatprep.mubr.msk.f32.mxu0 %vm106_vm0, %v13453_v12  ;;  %v13651_v36 = vld [vmem:[%s16039_s0 + $0xc0] sm:$0xff]  ;;  %v13662_v37 = vld [vmem:[%s16039_s0 + $0xc8] sm:$0xff]  ;;  %v13669_v38 = vld [vmem:[%s16039_s0 + $0xd0] sm:$0xff] }
   0xe   :  { %11218 = vmatprep.mubr.msk.f32.mxu1 %vm106_vm0, %v13422_v7  ;;  %11288 = vmatpush3.msra.mxu0 %v9895_v9  ;;  %v13680_v39 = vld [vmem:[%s16039_s0 + $0xd8] sm:$0xff]  ;;  %v13687_v40 = vld [vmem:[%s16039_s0 + $0xe0] sm:$0xff]  ;;  %v13698_v41 = vld [vmem:[%s16039_s0 + $0xe8] sm:$0xff] }
   0xf   :  { %11146 = vmatmul.mubr.msk.f32.gmra.mxu0 %vm106_vm0, %v13462_v13  ;;  %11365 = vmatprep.subr.mxu1 %v9946_v15  ;;  %v13705_v42 = vld [vmem:[%s16039_s0 + $0xf0] sm:$0xff]  ;;  %v13716_v43 = vld [vmem:[%s16039_s0 + $0xf8] sm:$0xff]  ;;  %v13723_v44 = vld [vmem:[%s16039_s0 + $0x100] sm:$0xff] }
  0x10   :  { %11219 = vmatmul.mubr.msk.f32.gmra.mxu1 %vm106_vm0, %v13443_v10  ;;  %11148 = vmatprep.mubr.msk.f32.mxu0 %vm106_vm0, %v13469_v14  ;;  %v13734_v45 = vld [vmem:[%s16039_s0 + $0x108] sm:$0xff]  ;;  %v13741_v46 = vld [vmem:[%s16039_s0 + $0x110] sm:$0xff]  ;;  %v13752_v47 = vld [vmem:[%s16039_s0 + $0x118] sm:$0xff] }
  0x11   :  { %11221 = vmatprep.mubr.msk.f32.mxu1 %vm106_vm0, %v13453_v12  ;;  %11366 = vmatpush3.msra.mxu1 %v9946_v15  ;;  %v13759_v48 = vld [vmem:[%s16039_s0 + $0x120] sm:$0xff]  ;;  %v13770_v49 = vld [vmem:[%s16039_s0 + $0x128] sm:$0xff]  ;;  %v13777_v50 = vld [vmem:[%s16039_s0 + $0x130] sm:$0xff] }
  0x12   :  { %11289 = vmatprep.subr.mxu0 %v9894_v16  ;;  %11456 = vmatprep.subr.mxu1 %v13516_v21  ;;  %v13788_v51 = vld [vmem:[%s16039_s0 + $0x138] sm:$0xff]  ;;  %v13795_v52 = vld [vmem:[%s16039_s0 + $0x140] sm:$0xff]  ;;  %v13806_v53 = vld [vmem:[%s16039_s0 + $0x148] sm:$0xff] }
  0x13   :  { %11149 = vmatmul.mubr.msk.f32.gmra.mxu0 %vm106_vm0, %v13488_v17  ;;  %v13813_v54 = vld [vmem:[%s16039_s0 + $0x150] sm:$0xff]  ;;  %v13824_v55 = vld [vmem:[%s16039_s0 + $0x158] sm:$0xff]  ;;  %v13831_v56 = vld [vmem:[%s16039_s0 + $0x160] sm:$0xff] }
  0x14   :  { %11222 = vmatmul.mubr.msk.f32.gmra.mxu1 %vm106_vm0, %v13462_v13  ;;  %11151 = vmatprep.mubr.msk.f32.mxu0 %vm106_vm0, %v13495_v18  ;;  %v13842_v57 = vld [vmem:[%s16039_s0 + $0x168] sm:$0xff]  ;;  %v13859_v58 = vld [vmem:[%s16040_s3 + $0x10] sm:$0xff]  ;;  %v13911_v62 = vld [vmem:[%s16040_s3] sm:$0xff] }
  0x15   :  { %11224 = vmatprep.mubr.msk.f32.mxu1 %vm106_vm0, %v13469_v14  ;;  %11290 = vmatpush3.msra.mxu0 %v9894_v16  ;;  %v13874_v59 = vld [vmem:[%s16040_s3 + $0x8] sm:$0xff]  ;;  %v13889_v60 = vld [vmem:[%s16040_s3 + $0x30] sm:$0xff]  ;;  %v13920_v63 = vld [vmem:[%s16040_s3 + $0x20] sm:$0xff] }
  0x16   :  { %11439 = vmatprep.subr.mxu0 %v13502_v19  ;;  %v13902_v61 = vld [vmem:[%s16040_s3 + $0x28] sm:$0xff]  ;;  %v13933_v0 = vld [vmem:[%s16040_s3 + $0x58] sm:$0xff]  ;;  %v14113_v6 = vld [vmem:[%s16041_s4] ss:$0 sm:$0xff] }
  0x17   :  { %11152 = vmatmul.mubr.msk.f32.gmra.mxu0 %vm106_vm0, %v13511_v20  ;;  %v13942_v1 = vld [vmem:[%s16040_s3 + $0x78] sm:$0xff]  ;;  %v10003_v9 = vld [vmem:[%s16040_s3 + $0x48] sm:$0xff]  ;;  %v14133_v15 = vld [vmem:[%s16041_s4 + $0x1] ss:$0 sm:$0xff] }
  0x18   :  { %11225 = vmatmul.mubr.msk.f32.gmra.mxu1 %vm106_vm0, %v13488_v17  ;;  %11154 = vmatprep.mubr.msk.f32.mxu0 %vm106_vm0, %v13523_v22 }
  0x19   :  { %11227 = vmatprep.mubr.msk.f32.mxu1 %vm106_vm0, %v13495_v18 }
  0x1b   :  { %11155 = vmatmul.mubr.msk.f32.gmra.mxu0 %vm106_vm0, %v13536_v23 }
  0x1c   :  { %11228 = vmatmul.mubr.msk.f32.gmra.mxu1 %vm106_vm0, %v13511_v20  ;;  %11157 = vmatprep.mubr.msk.f32.mxu0 %vm106_vm0, %v13543_v24 }
  0x1d   :  { %11230 = vmatprep.mubr.msk.f32.mxu1 %vm106_vm0, %v13523_v22 }
  0x1f   :  { %11158 = vmatmul.mubr.msk.f32.gmra.mxu0 %vm106_vm0, %v13554_v25 }
  0x20   :  { %11231 = vmatmul.mubr.msk.f32.gmra.mxu1 %vm106_vm0, %v13536_v23  ;;  %11160 = vmatprep.mubr.msk.f32.mxu0 %vm106_vm0, %v13561_v26 }
  0x21   :  { %11233 = vmatprep.mubr.msk.f32.mxu1 %vm106_vm0, %v13543_v24 }
  0x23   :  { %11161 = vmatmul.mubr.msk.f32.gmra.mxu0 %vm106_vm0, %v13572_v27 }
  0x24   :  { %11234 = vmatmul.mubr.msk.f32.gmra.mxu1 %vm106_vm0, %v13554_v25  ;;  %11163 = vmatprep.mubr.msk.f32.mxu0 %vm106_vm0, %v13579_v28 }
  0x25   :  { %11236 = vmatprep.mubr.msk.f32.mxu1 %vm106_vm0, %v13561_v26 }
  0x27   :  { %11164 = vmatmul.mubr.msk.f32.gmra.mxu0 %vm106_vm0, %v13590_v29 }
  0x28   :  { %11237 = vmatmul.mubr.msk.f32.gmra.mxu1 %vm106_vm0, %v13572_v27  ;;  %11166 = vmatprep.mubr.msk.f32.mxu0 %vm106_vm0, %v13597_v30 }
  0x29   :  { %11239 = vmatprep.mubr.msk.f32.mxu1 %vm106_vm0, %v13579_v28 }
  0x2b   :  { %11167 = vmatmul.mubr.msk.f32.gmra.mxu0 %vm106_vm0, %v13608_v31 }
  0x2c   :  { %11240 = vmatmul.mubr.msk.f32.gmra.mxu1 %vm106_vm0, %v13590_v29  ;;  %11169 = vmatprep.mubr.msk.f32.mxu0 %vm106_vm0, %v13615_v32 }
  0x2d   :  { %11242 = vmatprep.mubr.msk.f32.mxu1 %vm106_vm0, %v13597_v30 }
  0x2f   :  { %11170 = vmatmul.mubr.msk.f32.gmra.mxu0 %vm106_vm0, %v13626_v33 }
  0x30   :  { %11243 = vmatmul.mubr.msk.f32.gmra.mxu1 %vm106_vm0, %v13608_v31  ;;  %11172 = vmatprep.mubr.msk.f32.mxu0 %vm106_vm0, %v13633_v34 }
  0x31   :  { %11245 = vmatprep.mubr.msk.f32.mxu1 %vm106_vm0, %v13615_v32 }
  0x33   :  { %11173 = vmatmul.mubr.msk.f32.gmra.mxu0 %vm106_vm0, %v13644_v35 }
  0x34   :  { %11246 = vmatmul.mubr.msk.f32.gmra.mxu1 %vm106_vm0, %v13626_v33  ;;  %11175 = vmatprep.mubr.msk.f32.mxu0 %vm106_vm0, %v13651_v36 }
  0x35   :  { %11248 = vmatprep.mubr.msk.f32.mxu1 %vm106_vm0, %v13633_v34 }
  0x37   :  { %11176 = vmatmul.mubr.msk.f32.gmra.mxu0 %vm106_vm0, %v13662_v37 }
  0x38   :  { %11249 = vmatmul.mubr.msk.f32.gmra.mxu1 %vm106_vm0, %v13644_v35  ;;  %11178 = vmatprep.mubr.msk.f32.mxu0 %vm106_vm0, %v13669_v38 }
  0x39   :  { %11251 = vmatprep.mubr.msk.f32.mxu1 %vm106_vm0, %v13651_v36 }
  0x3b   :  { %11179 = vmatmul.mubr.msk.f32.gmra.mxu0 %vm106_vm0, %v13680_v39 }
  0x3c   :  { %11252 = vmatmul.mubr.msk.f32.gmra.mxu1 %vm106_vm0, %v13662_v37  ;;  %11181 = vmatprep.mubr.msk.f32.mxu0 %vm106_vm0, %v13687_v40 }
  0x3d   :  { %11254 = vmatprep.mubr.msk.f32.mxu1 %vm106_vm0, %v13669_v38 }
  0x3f   :  { %11182 = vmatmul.mubr.msk.f32.gmra.mxu0 %vm106_vm0, %v13698_v41 }
  0x40   :  { %11255 = vmatmul.mubr.msk.f32.gmra.mxu1 %vm106_vm0, %v13680_v39  ;;  %11184 = vmatprep.mubr.msk.f32.mxu0 %vm106_vm0, %v13705_v42 }
  0x41   :  { %11257 = vmatprep.mubr.msk.f32.mxu1 %vm106_vm0, %v13687_v40 }
  0x43   :  { %11185 = vmatmul.mubr.msk.f32.gmra.mxu0 %vm106_vm0, %v13716_v43 }
  0x44   :  { %11258 = vmatmul.mubr.msk.f32.gmra.mxu1 %vm106_vm0, %v13698_v41  ;;  %11187 = vmatprep.mubr.msk.f32.mxu0 %vm106_vm0, %v13723_v44 }
  0x45   :  { %11260 = vmatprep.mubr.msk.f32.mxu1 %vm106_vm0, %v13705_v42 }
  0x47   :  { %11188 = vmatmul.mubr.msk.f32.gmra.mxu0 %vm106_vm0, %v13734_v45 }
  0x48   :  { %11261 = vmatmul.mubr.msk.f32.gmra.mxu1 %vm106_vm0, %v13716_v43  ;;  %11190 = vmatprep.mubr.msk.f32.mxu0 %vm106_vm0, %v13741_v46 }
  0x49   :  { %11263 = vmatprep.mubr.msk.f32.mxu1 %vm106_vm0, %v13723_v44 }
  0x4b   :  { %11191 = vmatmul.mubr.msk.f32.gmra.mxu0 %vm106_vm0, %v13752_v47 }
  0x4c   :  { %11264 = vmatmul.mubr.msk.f32.gmra.mxu1 %vm106_vm0, %v13734_v45  ;;  %11193 = vmatprep.mubr.msk.f32.mxu0 %vm106_vm0, %v13759_v48 }
  0x4d   :  { %11266 = vmatprep.mubr.msk.f32.mxu1 %vm106_vm0, %v13741_v46 }
  0x4f   :  { %11194 = vmatmul.mubr.msk.f32.gmra.mxu0 %vm106_vm0, %v13770_v49 }
  0x50   :  { %11267 = vmatmul.mubr.msk.f32.gmra.mxu1 %vm106_vm0, %v13752_v47  ;;  %11196 = vmatprep.mubr.msk.f32.mxu0 %vm106_vm0, %v13777_v50 }
  0x51   :  { %11269 = vmatprep.mubr.msk.f32.mxu1 %vm106_vm0, %v13759_v48 }
  0x53   :  { %11197 = vmatmul.mubr.msk.f32.gmra.mxu0 %vm106_vm0, %v13788_v51 }
  0x54   :  { %11270 = vmatmul.mubr.msk.f32.gmra.mxu1 %vm106_vm0, %v13770_v49  ;;  %11199 = vmatprep.mubr.msk.f32.mxu0 %vm106_vm0, %v13795_v52 }
  0x55   :  { %11272 = vmatprep.mubr.msk.f32.mxu1 %vm106_vm0, %v13777_v50 }
  0x57   :  { %11200 = vmatmul.mubr.msk.f32.gmra.mxu0 %vm106_vm0, %v13806_v53 }
  0x58   :  { %11273 = vmatmul.mubr.msk.f32.gmra.mxu1 %vm106_vm0, %v13788_v51  ;;  %11202 = vmatprep.mubr.msk.f32.mxu0 %vm106_vm0, %v13813_v54 }
  0x59   :  { %11275 = vmatprep.mubr.msk.f32.mxu1 %vm106_vm0, %v13795_v52 }
  0x5b   :  { %11203 = vmatmul.mubr.msk.f32.gmra.mxu0 %vm106_vm0, %v13824_v55 }
  0x5c   :  { %11276 = vmatmul.mubr.msk.f32.gmra.mxu1 %vm106_vm0, %v13806_v53  ;;  %11205 = vmatprep.mubr.msk.f32.mxu0 %vm106_vm0, %v13831_v56 }
  0x5d   :  { %11278 = vmatprep.mubr.msk.f32.mxu1 %vm106_vm0, %v13813_v54 }
  0x5f   :  { %11206 = vmatmul.mubr.msk.f32.gmra.mxu0 %vm106_vm0, %v13842_v57 }
  0x60   :  { %11279 = vmatmul.mubr.msk.f32.gmra.mxu1 %vm106_vm0, %v13824_v55  ;;  %11291 = vmatprep.mubr.msk.f32.mxu0 %vm106_vm0, %v13399_v2 }
  0x61   :  { %11281 = vmatprep.mubr.msk.f32.mxu1 %vm106_vm0, %v13831_v56 }
  0x63   :  { %11292 = vmatmul.mubr.msk.f32.vlgmr.msra.gmra.mxu0 %vm106_vm0, %v13409_v4 }
  0x64   :  { %11282 = vmatmul.mubr.msk.f32.gmra.mxu1 %vm106_vm0, %v13842_v57  ;;  %11294 = vmatprep.mubr.msk.f32.mxu0 %vm106_vm0, %v13422_v7 }
  0x65   :  { %11284 = vmatprep.mubr.msk.f32.mxu1 %vm106_vm0, %v13404_v3  ;;  %11440 = vmatpush3.msra.mxu0 %v13502_v19 }
  0x66   :  { %11441 = vmatprep.subr.mxu0 %v13859_v58 }
  0x67   :  { %11295 = vmatmul.mubr.msk.f32.gmra.mxu0 %vm106_vm0, %v13443_v10 }
  0x68   :  { %11285 = vmatmul.mubr.msk.f32.gmra.mxu1 %vm106_vm0, %v13414_v5  ;;  %11297 = vmatprep.mubr.msk.f32.mxu0 %vm106_vm0, %v13453_v12 }
  0x69   :  { %11367 = vmatprep.mubr.msk.f32.mxu1 %vm106_vm0, %v13399_v2  ;;  %11442 = vmatpush3.msra.mxu0 %v13859_v58  ;;  %v13308_v2 = vmov 0.0  }
  0x6a   :  { %11443 = vmatprep.subr.mxu0 %v13874_v59 }
  0x6b   :  { %11298 = vmatmul.mubr.msk.f32.gmra.mxu0 %vm106_vm0, %v13462_v13 }
  0x6c   :  { %11368 = vmatmul.mubr.msk.f32.vlgmr.msra.gmra.mxu1 %vm106_vm0, %v13409_v4  ;;  %11300 = vmatprep.mubr.msk.f32.mxu0 %vm106_vm0, %v13469_v14  ;;  %v10004_v4 = vld [vmem:[%s16040_s3 + $0x50] sm:$0xff] }
  0x6d   :  { %11457 = vmatpush3.msra.mxu1 %v13516_v21  ;;  %11370 = vmatprep.mubr.msk.f32.mxu1 %vm106_vm0, %v13422_v7 }
  0x6e   :  { %11458 = vmatprep.subr.mxu1 %v13889_v60  ;;  %11444 = vmatpush3.msra.mxu0 %v13874_v59 }
  0x6f   :  { %11301 = vmatmul.mubr.msk.f32.gmra.mxu0 %vm106_vm0, %v13488_v17  ;;  %11459 = vmatpush3.msra.mxu1 %v13889_v60 }
  0x70   :  { %11371 = vmatmul.mubr.msk.f32.gmra.mxu1 %vm106_vm0, %v13443_v10  ;;  %11303 = vmatprep.mubr.msk.f32.mxu0 %vm106_vm0, %v13495_v18 }
  0x71   :  { %11373 = vmatprep.mubr.msk.f32.mxu1 %vm106_vm0, %v13453_v12  ;;  %11460 = vmatprep.subr.mxu1 %v13902_v61 }
  0x72   :  { %11461 = vmatpush3.msra.mxu1 %v13902_v61  ;;  %11445 = vmatprep.subr.mxu0 %v13911_v62 }
  0x73   :  { %11304 = vmatmul.mubr.msk.f32.gmra.mxu0 %vm106_vm0, %v13511_v20  ;;  %11462 = vmatprep.subr.mxu1 %v13920_v63 }
  0x74   :  { %11374 = vmatmul.mubr.msk.f32.gmra.mxu1 %vm106_vm0, %v13462_v13  ;;  %11306 = vmatprep.mubr.msk.f32.mxu0 %vm106_vm0, %v13523_v22 }
  0x75   :  { %11376 = vmatprep.mubr.msk.f32.mxu1 %vm106_vm0, %v13469_v14  ;;  %11446 = vmatpush3.msra.mxu0 %v13911_v62 }
  0x76   :  { %11463 = vmatpush3.msra.mxu1 %v13920_v63  ;;  %11473 = vmatprep.subr.mxu0 %v13933_v0 }
  0x77   :  { %11307 = vmatmul.mubr.msk.f32.gmra.mxu0 %vm106_vm0, %v13536_v23  ;;  %11490 = vmatprep.subr.mxu1 %v13942_v1 }
  0x78   :  { %11377 = vmatmul.mubr.msk.f32.gmra.mxu1 %vm106_vm0, %v13488_v17  ;;  %11309 = vmatprep.mubr.msk.f32.mxu0 %vm106_vm0, %v13543_v24 }
  0x79   :  { %11379 = vmatprep.mubr.msk.f32.mxu1 %vm106_vm0, %v13495_v18 }
  0x7b   :  { %11310 = vmatmul.mubr.msk.f32.gmra.mxu0 %vm106_vm0, %v13554_v25 }
  0x7c   :  { %11380 = vmatmul.mubr.msk.f32.gmra.mxu1 %vm106_vm0, %v13511_v20  ;;  %11312 = vmatprep.mubr.msk.f32.mxu0 %vm106_vm0, %v13561_v26 }
  0x7d   :  { %11382 = vmatprep.mubr.msk.f32.mxu1 %vm106_vm0, %v13523_v22 }
  0x7f   :  { %11313 = vmatmul.mubr.msk.f32.gmra.mxu0 %vm106_vm0, %v13572_v27 }
  0x80   :  { %11383 = vmatmul.mubr.msk.f32.gmra.mxu1 %vm106_vm0, %v13536_v23  ;;  %11315 = vmatprep.mubr.msk.f32.mxu0 %vm106_vm0, %v13579_v28  ;;  %v10008_v23 = vld [vmem:[%s16040_s3 + $0x70] sm:$0xff] }
  0x81   :  { %11385 = vmatprep.mubr.msk.f32.mxu1 %vm106_vm0, %v13543_v24 }
  0x83   :  { %11316 = vmatmul.mubr.msk.f32.gmra.mxu0 %vm106_vm0, %v13590_v29 }
  0x84   :  { %11386 = vmatmul.mubr.msk.f32.gmra.mxu1 %vm106_vm0, %v13554_v25  ;;  %11318 = vmatprep.mubr.msk.f32.mxu0 %vm106_vm0, %v13597_v30 }
  0x85   :  { %11388 = vmatprep.mubr.msk.f32.mxu1 %vm106_vm0, %v13561_v26 }
  0x87   :  { %11319 = vmatmul.mubr.msk.f32.gmra.mxu0 %vm106_vm0, %v13608_v31 }
  0x88   :  { %11389 = vmatmul.mubr.msk.f32.gmra.mxu1 %vm106_vm0, %v13572_v27  ;;  %11321 = vmatprep.mubr.msk.f32.mxu0 %vm106_vm0, %v13615_v32 }
  0x89   :  { %11391 = vmatprep.mubr.msk.f32.mxu1 %vm106_vm0, %v13579_v28 }
  0x8b   :  { %11322 = vmatmul.mubr.msk.f32.gmra.mxu0 %vm106_vm0, %v13626_v33 }
  0x8c   :  { %11392 = vmatmul.mubr.msk.f32.gmra.mxu1 %vm106_vm0, %v13590_v29  ;;  %11324 = vmatprep.mubr.msk.f32.mxu0 %vm106_vm0, %v13633_v34 }
  0x8d   :  { %11394 = vmatprep.mubr.msk.f32.mxu1 %vm106_vm0, %v13597_v30  ;;  %v10007_v30 = vld [vmem:[%s16040_s3 + $0x68] sm:$0xff] }
  0x8f   :  { %11325 = vmatmul.mubr.msk.f32.gmra.mxu0 %vm106_vm0, %v13644_v35 }
  0x90   :  { %11395 = vmatmul.mubr.msk.f32.gmra.mxu1 %vm106_vm0, %v13608_v31  ;;  %11327 = vmatprep.mubr.msk.f32.mxu0 %vm106_vm0, %v13651_v36 }
  0x91   :  { %11397 = vmatprep.mubr.msk.f32.mxu1 %vm106_vm0, %v13615_v32 }
  0x93   :  { %11328 = vmatmul.mubr.msk.f32.gmra.mxu0 %vm106_vm0, %v13662_v37 }
  0x94   :  { %11398 = vmatmul.mubr.msk.f32.gmra.mxu1 %vm106_vm0, %v13626_v33  ;;  %11330 = vmatprep.mubr.msk.f32.mxu0 %vm106_vm0, %v13669_v38 }
  0x95   :  { %11400 = vmatprep.mubr.msk.f32.mxu1 %vm106_vm0, %v13633_v34 }
  0x97   :  { %11331 = vmatmul.mubr.msk.f32.gmra.mxu0 %vm106_vm0, %v13680_v39 }
  0x98   :  { %11401 = vmatmul.mubr.msk.f32.gmra.mxu1 %vm106_vm0, %v13644_v35  ;;  %11333 = vmatprep.mubr.msk.f32.mxu0 %vm106_vm0, %v13687_v40 }
  0x99   :  { %11403 = vmatprep.mubr.msk.f32.mxu1 %vm106_vm0, %v13651_v36 }
  0x9b   :  { %11334 = vmatmul.mubr.msk.f32.gmra.mxu0 %vm106_vm0, %v13698_v41 }
  0x9c   :  { %11404 = vmatmul.mubr.msk.f32.gmra.mxu1 %vm106_vm0, %v13662_v37  ;;  %11336 = vmatprep.mubr.msk.f32.mxu0 %vm106_vm0, %v13705_v42  ;;  %v10006_v37 = vld [vmem:[%s16040_s3 + $0x60] sm:$0xff] }
  0x9d   :  { %11406 = vmatprep.mubr.msk.f32.mxu1 %vm106_vm0, %v13669_v38 }
  0x9f   :  { %11337 = vmatmul.mubr.msk.f32.gmra.mxu0 %vm106_vm0, %v13716_v43 }
  0xa0   :  { %11407 = vmatmul.mubr.msk.f32.gmra.mxu1 %vm106_vm0, %v13680_v39  ;;  %11339 = vmatprep.mubr.msk.f32.mxu0 %vm106_vm0, %v13723_v44 }
  0xa1   :  { %11409 = vmatprep.mubr.msk.f32.mxu1 %vm106_vm0, %v13687_v40 }
  0xa3   :  { %11340 = vmatmul.mubr.msk.f32.gmra.mxu0 %vm106_vm0, %v13734_v45 }
  0xa4   :  { %11410 = vmatmul.mubr.msk.f32.gmra.mxu1 %vm106_vm0, %v13698_v41  ;;  %11342 = vmatprep.mubr.msk.f32.mxu0 %vm106_vm0, %v13741_v46 }
  0xa5   :  { %11412 = vmatprep.mubr.msk.f32.mxu1 %vm106_vm0, %v13705_v42 }
  0xa7   :  { %11343 = vmatmul.mubr.msk.f32.gmra.mxu0 %vm106_vm0, %v13752_v47 }
  0xa8   :  { %11413 = vmatmul.mubr.msk.f32.gmra.mxu1 %vm106_vm0, %v13716_v43  ;;  %11345 = vmatprep.mubr.msk.f32.mxu0 %vm106_vm0, %v13759_v48 }
  0xa9   :  { %11415 = vmatprep.mubr.msk.f32.mxu1 %vm106_vm0, %v13723_v44 }
  0xab   :  { %11346 = vmatmul.mubr.msk.f32.gmra.mxu0 %vm106_vm0, %v13770_v49 }
  0xac   :  { %11416 = vmatmul.mubr.msk.f32.gmra.mxu1 %vm106_vm0, %v13734_v45  ;;  %11348 = vmatprep.mubr.msk.f32.mxu0 %vm106_vm0, %v13777_v50 }
  0xad   :  { %11418 = vmatprep.mubr.msk.f32.mxu1 %vm106_vm0, %v13741_v46 }
  0xaf   :  { %11349 = vmatmul.mubr.msk.f32.gmra.mxu0 %vm106_vm0, %v13788_v51 }
  0xb0   :  { %11419 = vmatmul.mubr.msk.f32.gmra.mxu1 %vm106_vm0, %v13752_v47  ;;  %11351 = vmatprep.mubr.msk.f32.mxu0 %vm106_vm0, %v13795_v52 }
  0xb1   :  { %11421 = vmatprep.mubr.msk.f32.mxu1 %vm106_vm0, %v13759_v48 }
  0xb3   :  { %11352 = vmatmul.mubr.msk.f32.gmra.mxu0 %vm106_vm0, %v13806_v53 }
  0xb4   :  { %11422 = vmatmul.mubr.msk.f32.gmra.mxu1 %vm106_vm0, %v13770_v49  ;;  %11354 = vmatprep.mubr.msk.f32.mxu0 %vm106_vm0, %v13813_v54 }
  0xb5   :  { %11424 = vmatprep.mubr.msk.f32.mxu1 %vm106_vm0, %v13777_v50 }
  0xb7   :  { %11355 = vmatmul.mubr.msk.f32.gmra.mxu0 %vm106_vm0, %v13824_v55 }
  0xb8   :  { %11425 = vmatmul.mubr.msk.f32.gmra.mxu1 %vm106_vm0, %v13788_v51  ;;  %11357 = vmatprep.mubr.msk.f32.mxu0 %vm106_vm0, %v13831_v56 }
  0xb9   :  { %11427 = vmatprep.mubr.msk.f32.mxu1 %vm106_vm0, %v13795_v52 }
  0xbb   :  { %11358 = vmatmul.mubr.msk.f32.gmra.mxu0 %vm106_vm0, %v13842_v57 }
  0xbc   :  { %11428 = vmatmul.mubr.msk.f32.gmra.mxu1 %vm106_vm0, %v13806_v53  ;;  %11360 = vmatprep.mubr.msk.f32.mxu0 %vm106_vm0, %v13404_v3 }
  0xbd   :  { %11430 = vmatprep.mubr.msk.f32.mxu1 %vm106_vm0, %v13813_v54 }
  0xbf   :  { %11361 = vmatmul.mubr.msk.f32.gmra.mxu0 %vm106_vm0, %v13414_v5 }
  0xc0   :  { %11431 = vmatmul.mubr.msk.f32.gmra.mxu1 %vm106_vm0, %v13824_v55  ;;  %11447 = vmatprep.mubr.f32.mxu0 %v13308_v2 }
  0xc1   :  { %11433 = vmatprep.mubr.msk.f32.mxu1 %vm106_vm0, %v13831_v56 }
  0xc3   :  { %11448 = vmatmul.mubr.f32.vlgmr.msra.gmra.mxu0 %v13308_v2 }
  0xc4   :  { %11434 = vmatmul.mubr.msk.f32.gmra.mxu1 %vm106_vm0, %v13842_v57  ;;  %11450 = vmatprep.mubr.f32.mxu0 %v13308_v2 }
  0xc5   :  { %11436 = vmatprep.mubr.msk.f32.mxu1 %vm106_vm0, %v13404_v3  ;;  %11474 = vmatpush3.msra.mxu0 %v13933_v0 }
  0xc6   :  { %11475 = vmatprep.subr.mxu0 %v10004_v4 }
  0xc7   :  { %v11141_v7 = vpop.f32.mrf.mxu0  ;;  %v11210_v8 = vpop.f32.mrf.mxu1  ;;  %11451 = vmatmul.mubr.f32.gmra.mxu0 %v13308_v2 }
  0xc8   :  { %v323_v10 = vadd.f32 %v11141_v7, %v14113_v6  ;;  %v553_v3 = vadd.f32 %v11210_v8, %v14113_v6  ;;  %11437 = vmatmul.mubr.msk.f32.gmra.mxu1 %vm106_vm0, %v13414_v5  ;;  %11453 = vmatprep.mubr.f32.mxu0 %v13308_v2  ;;  %v10002_v5 = vld [vmem:[%s16040_s3 + $0x40] sm:$0xff] }
  0xc9   :  { %v317_v11 = vpop.f32.mrf.mxu0  ;;  %v547_v12 = vpop.f32.mrf.mxu1  ;;  %11464 = vmatprep.mubr.f32.mxu1 %v13308_v2  ;;  %11476 = vmatpush3.msra.mxu0 %v10004_v4 }
  0xca   :  { %558 = vst.msk [vmem:[#allocation2 + $0x8] sm:$0xff] %vm556_vm1, %v323_v10  ;;  %604 = vst.msk [vmem:[#allocation2 + $0x178] sm:$0xff] %vm556_vm1, %v553_v3  ;;  %v318_v13 = vadd.f32 %v14113_v6, %v317_v11  ;;  %v548_v14 = vadd.f32 %v14113_v6, %v547_v12  ;;  %11477 = vmatprep.subr.mxu0 %v10003_v9 }
  0xcb   :  { %v11144_v16 = vpop.f32.mrf.mxu0  ;;  %11454 = vmatmul.mubr.f32.gmra.mxu0 %v13308_v2 }
  0xcc   :  { %557 = vst.msk [vmem:[#allocation2] sm:$0xff] %vm556_vm1, %v318_v13  ;;  %603 = vst.msk [vmem:[#allocation2 + $0x170] sm:$0xff] %vm556_vm1, %v548_v14  ;;  %v333_v17 = vadd.f32 %v11144_v16, %v14113_v6  ;;  %v11217_v18 = vpop.f32.mrf.mxu1  ;;  %11465 = vmatmul.mubr.f32.vlgmr.msra.gmra.mxu1 %v13308_v2  ;;  %11478 = vmatpush3.msra.mxu0 %v10003_v9 }
  0xcd   :  { %v880_v20 = vadd.f32 %v11217_v18, %v14133_v15  ;;  %v327_v22 = vpop.f32.mrf.mxu0  ;;  %11479 = vmatprep.subr.mxu0 %v10002_v5  ;;  %11467 = vmatprep.mubr.f32.mxu1 %v13308_v2 }
  0xce   :  { %560 = vst.msk [vmem:[#allocation2 + $0x18] sm:$0xff] %vm556_vm1, %v333_v17  ;;  %v328_v24 = vadd.f32 %v14113_v6, %v327_v22  ;;  %v874_v25 = vpop.f32.mrf.mxu1  ;;  %11480 = vmatpush3.msra.mxu0 %v10002_v5  ;;  %11481 = vmatprep.mubr.f32.mxu0 %v13308_v2 }
  0xcf   :  { %1115 = vst.msk [vmem:[#allocation2 + $0x188] sm:$0xff] %vm556_vm1, %v880_v20  ;;  %v875_v26 = vadd.f32 %v14133_v15, %v874_v25  ;;  %v11147_v27 = vpop.f32.mrf.mxu0  ;;  %11482 = vmatmul.mubr.f32.vlgmr.msra.gmra.mxu0 %v13308_v2  ;;  %11491 = vmatpush3.msra.mxu1 %v13942_v1 }
  0xd0   :  { %559 = vst.msk [vmem:[#allocation2 + $0x10] sm:$0xff] %vm556_vm1, %v328_v24  ;;  %v343_v28 = vadd.f32 %v11147_v27, %v14113_v6  ;;  %v11220_v29 = vpop.f32.mrf.mxu1  ;;  %11468 = vmatmul.mubr.f32.gmra.mxu1 %v13308_v2  ;;  %11492 = vmatprep.subr.mxu1 %v10008_v23 }
  0xd1   :  { %1114 = vst.msk [vmem:[#allocation2 + $0x180] sm:$0xff] %vm556_vm1, %v875_v26  ;;  %v890_v31 = vadd.f32 %v11220_v29, %v14133_v15  ;;  %v337_v32 = vpop.f32.mrf.mxu0  ;;  %11470 = vmatprep.mubr.f32.mxu1 %v13308_v2  ;;  %11484 = vmatprep.mubr.f32.mxu0 %v13308_v2 }
  0xd2   :  { %562 = vst.msk [vmem:[#allocation2 + $0x28] sm:$0xff] %vm556_vm1, %v343_v28  ;;  %v338_v33 = vadd.f32 %v14113_v6, %v337_v32  ;;  %v884_v34 = vpop.f32.mrf.mxu1  ;;  %11493 = vmatpush3.msra.mxu1 %v10008_v23  ;;  %11507 = vmatprep.subr.mxu0 %v13502_v19 }
  0xd3   :  { %1117 = vst.msk [vmem:[#allocation2 + $0x198] sm:$0xff] %vm556_vm1, %v890_v31  ;;  %v885_v35 = vadd.f32 %v14133_v15, %v884_v34  ;;  %v11150_v36 = vpop.f32.mrf.mxu0  ;;  %11485 = vmatmul.mubr.f32.gmra.mxu0 %v13308_v2  ;;  %11494 = vmatprep.subr.mxu1 %v10007_v30 }
  0xd4   :  { %561 = vst.msk [vmem:[#allocation2 + $0x20] sm:$0xff] %vm556_vm1, %v338_v33  ;;  %v353_v38 = vadd.f32 %v11150_v36, %v14113_v6  ;;  %v11223_v39 = vpop.f32.mrf.mxu1  ;;  %11471 = vmatmul.mubr.f32.gmra.mxu1 %v13308_v2  ;;  %11487 = vmatprep.mubr.f32.mxu0 %v13308_v2 }
  0xd5   :  { %1116 = vst.msk [vmem:[#allocation2 + $0x190] sm:$0xff] %vm556_vm1, %v885_v35  ;;  %v900_v40 = vadd.f32 %v11223_v39, %v14133_v15  ;;  %11495 = vmatpush3.msra.mxu1 %v10007_v30  ;;  %v347_v41 = vpop.f32.mrf.mxu0  ;;  %11498 = vmatprep.mubr.f32.mxu1 %v13308_v2 }
  0xd6   :  { %564 = vst.msk [vmem:[#allocation2 + $0x38] sm:$0xff] %vm556_vm1, %v353_v38  ;;  %v348_v42 = vadd.f32 %v14113_v6, %v347_v41  ;;  %v894_v43 = vpop.f32.mrf.mxu1  ;;  %11496 = vmatprep.subr.mxu1 %v10006_v37  ;;  %11508 = vmatpush3.msra.mxu0 %v13502_v19 }
  0xd7   :  { %1119 = vst.msk [vmem:[#allocation2 + $0x1a8] sm:$0xff] %vm556_vm1, %v900_v40  ;;  %v895_v44 = vadd.f32 %v14133_v15, %v894_v43  ;;  %11497 = vmatpush3.msra.mxu1 %v10006_v37  ;;  %v11153_v45 = vpop.f32.mrf.mxu0  ;;  %11488 = vmatmul.mubr.f32.gmra.mxu0 %v13308_v2 }
  0xd8   :  { %563 = vst.msk [vmem:[#allocation2 + $0x30] sm:$0xff] %vm556_vm1, %v348_v42  ;;  %v363_v46 = vadd.f32 %v11153_v45, %v14113_v6  ;;  %v11226_v47 = vpop.f32.mrf.mxu1  ;;  %11499 = vmatmul.mubr.f32.vlgmr.msra.gmra.mxu1 %v13308_v2  ;;  %11524 = vmatprep.subr.mxu1 %v13516_v21 }
  0xd9   :  { %1118 = vst.msk [vmem:[#allocation2 + $0x1a0] sm:$0xff] %vm556_vm1, %v895_v44  ;;  %v910_v19 = vadd.f32 %v11226_v47, %v14133_v15  ;;  %v357_v48 = vpop.f32.mrf.mxu0  ;;  %11501 = vmatprep.mubr.f32.mxu1 %v13308_v2  ;;  %11525 = vmatpush3.msra.mxu1 %v13516_v21 }
  0xda   :  { %566 = vst.msk [vmem:[#allocation2 + $0x48] sm:$0xff] %vm556_vm1, %v363_v46  ;;  %v358_v49 = vadd.f32 %v14113_v6, %v357_v48  ;;  %v904_v50 = vpop.f32.mrf.mxu1  ;;  %11509 = vmatprep.subr.mxu0 %v13859_v58  ;;  %11526 = vmatprep.subr.mxu1 %v13889_v60 }
  0xdb   :  { %1121 = vst.msk [vmem:[#allocation2 + $0x1b8] sm:$0xff] %vm556_vm1, %v910_v19  ;;  %v905_v51 = vadd.f32 %v14133_v15, %v904_v50  ;;  %v11156_v52 = vpop.f32.mrf.mxu0  ;;  %11510 = vmatpush3.msra.mxu0 %v13859_v58  ;;  %11527 = vmatpush3.msra.mxu1 %v13889_v60 }
  0xdc   :  { %565 = vst.msk [vmem:[#allocation2 + $0x40] sm:$0xff] %vm556_vm1, %v358_v49  ;;  %v373_v21 = vadd.f32 %v11156_v52, %v14113_v6  ;;  %v11229_v53 = vpop.f32.mrf.mxu1  ;;  %11502 = vmatmul.mubr.f32.gmra.mxu1 %v13308_v2  ;;  %11511 = vmatprep.subr.mxu0 %v13874_v59 }
  0xdd   :  { %1120 = vst.msk [vmem:[#allocation2 + $0x1b0] sm:$0xff] %vm556_vm1, %v905_v51  ;;  %v920_v54 = vadd.f32 %v11229_v53, %v14133_v15  ;;  %v367_v55 = vpop.f32.mrf.mxu0  ;;  %11504 = vmatprep.mubr.f32.mxu1 %v13308_v2  ;;  %11528 = vmatprep.subr.mxu1 %v13902_v61 }
  0xde   :  { %568 = vst.msk [vmem:[#allocation2 + $0x58] sm:$0xff] %vm556_vm1, %v373_v21  ;;  %v368_v56 = vadd.f32 %v14113_v6, %v367_v55  ;;  %v914_v57 = vpop.f32.mrf.mxu1  ;;  %11512 = vmatpush3.msra.mxu0 %v13874_v59  ;;  %11529 = vmatpush3.msra.mxu1 %v13902_v61 }
  0xdf   :  { %1123 = vst.msk [vmem:[#allocation2 + $0x1c8] sm:$0xff] %vm556_vm1, %v920_v54  ;;  %v915_v58 = vadd.f32 %v14133_v15, %v914_v57  ;;  %v11159_v60 = vpop.f32.mrf.mxu0  ;;  %11513 = vmatprep.subr.mxu0 %v13911_v62  ;;  %11530 = vmatprep.subr.mxu1 %v13920_v63 }
  0xe0   :  { %567 = vst.msk [vmem:[#allocation2 + $0x50] sm:$0xff] %vm556_vm1, %v368_v56  ;;  %v383_v4 = vadd.f32 %v11159_v60, %v14113_v6  ;;  %v11232_v7 = vpop.f32.mrf.mxu1  ;;  %11505 = vmatmul.mubr.f32.gmra.mxu1 %v13308_v2  ;;  %11514 = vmatpush3.msra.mxu0 %v13911_v62 }
  0xe1   :  { %1122 = vst.msk [vmem:[#allocation2 + $0x1c0] sm:$0xff] %vm556_vm1, %v915_v58  ;;  %v930_v59 = vadd.f32 %v11232_v7, %v14133_v15  ;;  %v377_v61 = vpop.f32.mrf.mxu0  ;;  %11531 = vmatpush3.msra.mxu1 %v13920_v63  ;;  %11541 = vmatprep.subr.mxu0 %v13933_v0 }
  0xe2   :  { %570 = vst.msk [vmem:[#allocation2 + $0x68] sm:$0xff] %vm556_vm1, %v383_v4  ;;  %v378_v8 = vadd.f32 %v14113_v6, %v377_v61  ;;  %v924_v9 = vpop.f32.mrf.mxu1  ;;  %11558 = vmatprep.subr.mxu1 %v13942_v1 }
  0xe3   :  { %1125 = vst.msk [vmem:[#allocation2 + $0x1d8] sm:$0xff] %vm556_vm1, %v930_v59  ;;  %v925_v62 = vadd.f32 %v14133_v15, %v924_v9  ;;  %v11162_v10 = vpop.f32.mrf.mxu0 }
  0xe4   :  { %569 = vst.msk [vmem:[#allocation2 + $0x60] sm:$0xff] %vm556_vm1, %v378_v8  ;;  %v393_v3 = vadd.f32 %v11162_v10, %v14113_v6  ;;  %v11235_v11 = vpop.f32.mrf.mxu1 }
  0xe5   :  { %1124 = vst.msk [vmem:[#allocation2 + $0x1d0] sm:$0xff] %vm556_vm1, %v925_v62  ;;  %v940_v63 = vadd.f32 %v11235_v11, %v14133_v15  ;;  %v387_v0 = vpop.f32.mrf.mxu0 }
  0xe6   :  { %572 = vst.msk [vmem:[#allocation2 + $0x78] sm:$0xff] %vm556_vm1, %v393_v3  ;;  %v388_v12 = vadd.f32 %v14113_v6, %v387_v0  ;;  %v934_v1 = vpop.f32.mrf.mxu1 }
  0xe7   :  { %1127 = vst.msk [vmem:[#allocation2 + $0x1e8] sm:$0xff] %vm556_vm1, %v940_v63  ;;  %v935_v13 = vadd.f32 %v14133_v15, %v934_v1  ;;  %v11165_v14 = vpop.f32.mrf.mxu0 }
  0xe8   :  { %571 = vst.msk [vmem:[#allocation2 + $0x70] sm:$0xff] %vm556_vm1, %v388_v12  ;;  %v403_v5 = vadd.f32 %v11165_v14, %v14113_v6  ;;  %v11238_v16 = vpop.f32.mrf.mxu1 }
  0xe9   :  { %1126 = vst.msk [vmem:[#allocation2 + $0x1e0] sm:$0xff] %vm556_vm1, %v935_v13  ;;  %v950_v17 = vadd.f32 %v11238_v16, %v14133_v15  ;;  %v397_v18 = vpop.f32.mrf.mxu0 }
  0xea   :  { %574 = vst.msk [vmem:[#allocation2 + $0x88] sm:$0xff] %vm556_vm1, %v403_v5  ;;  %v398_v20 = vadd.f32 %v14113_v6, %v397_v18  ;;  %v944_v22 = vpop.f32.mrf.mxu1 }
  0xeb   :  { %1129 = vst.msk [vmem:[#allocation2 + $0x1f8] sm:$0xff] %vm556_vm1, %v950_v17  ;;  %v945_v23 = vadd.f32 %v14133_v15, %v944_v22  ;;  %v11168_v24 = vpop.f32.mrf.mxu0 }
  0xec   :  { %573 = vst.msk [vmem:[#allocation2 + $0x80] sm:$0xff] %vm556_vm1, %v398_v20  ;;  %v413_v25 = vadd.f32 %v11168_v24, %v14113_v6  ;;  %v11241_v26 = vpop.f32.mrf.mxu1 }
  0xed   :  { %1128 = vst.msk [vmem:[#allocation2 + $0x1f0] sm:$0xff] %vm556_vm1, %v945_v23  ;;  %v960_v27 = vadd.f32 %v11241_v26, %v14133_v15  ;;  %v407_v28 = vpop.f32.mrf.mxu0 }
  0xee   :  { %576 = vst.msk [vmem:[#allocation2 + $0x98] sm:$0xff] %vm556_vm1, %v413_v25  ;;  %v408_v29 = vadd.f32 %v14113_v6, %v407_v28  ;;  %v954_v30 = vpop.f32.mrf.mxu1 }
  0xef   :  { %1131 = vst.msk [vmem:[#allocation2 + $0x208] sm:$0xff] %vm556_vm1, %v960_v27  ;;  %v955_v31 = vadd.f32 %v14133_v15, %v954_v30  ;;  %v11171_v32 = vpop.f32.mrf.mxu0 }
  0xf0   :  { %575 = vst.msk [vmem:[#allocation2 + $0x90] sm:$0xff] %vm556_vm1, %v408_v29  ;;  %v423_v33 = vadd.f32 %v11171_v32, %v14113_v6  ;;  %v11244_v34 = vpop.f32.mrf.mxu1 }
  0xf1   :  { %1130 = vst.msk [vmem:[#allocation2 + $0x200] sm:$0xff] %vm556_vm1, %v955_v31  ;;  %v970_v35 = vadd.f32 %v11244_v34, %v14133_v15  ;;  %v417_v36 = vpop.f32.mrf.mxu0 }
  0xf2   :  { %578 = vst.msk [vmem:[#allocation2 + $0xa8] sm:$0xff] %vm556_vm1, %v423_v33  ;;  %v418_v37 = vadd.f32 %v14113_v6, %v417_v36  ;;  %v964_v38 = vpop.f32.mrf.mxu1 }
  0xf3   :  { %1133 = vst.msk [vmem:[#allocation2 + $0x218] sm:$0xff] %vm556_vm1, %v970_v35  ;;  %v965_v39 = vadd.f32 %v14133_v15, %v964_v38  ;;  %v11174_v40 = vpop.f32.mrf.mxu0 }
  0xf4   :  { %577 = vst.msk [vmem:[#allocation2 + $0xa0] sm:$0xff] %vm556_vm1, %v418_v37  ;;  %v433_v41 = vadd.f32 %v11174_v40, %v14113_v6  ;;  %v11247_v42 = vpop.f32.mrf.mxu1 }
  0xf5   :  { %1132 = vst.msk [vmem:[#allocation2 + $0x210] sm:$0xff] %vm556_vm1, %v965_v39  ;;  %v980_v43 = vadd.f32 %v11247_v42, %v14133_v15  ;;  %v427_v44 = vpop.f32.mrf.mxu0 }
  0xf6   :  { %580 = vst.msk [vmem:[#allocation2 + $0xb8] sm:$0xff] %vm556_vm1, %v433_v41  ;;  %v428_v45 = vadd.f32 %v14113_v6, %v427_v44  ;;  %v974_v46 = vpop.f32.mrf.mxu1 }
  0xf7   :  { %1135 = vst.msk [vmem:[#allocation2 + $0x228] sm:$0xff] %vm556_vm1, %v980_v43  ;;  %v975_v47 = vadd.f32 %v14133_v15, %v974_v46  ;;  %v11177_v19 = vpop.f32.mrf.mxu0 }
  0xf8   :  { %579 = vst.msk [vmem:[#allocation2 + $0xb0] sm:$0xff] %vm556_vm1, %v428_v45  ;;  %v443_v48 = vadd.f32 %v11177_v19, %v14113_v6  ;;  %v11250_v49 = vpop.f32.mrf.mxu1 }
  0xf9   :  { %1134 = vst.msk [vmem:[#allocation2 + $0x220] sm:$0xff] %vm556_vm1, %v975_v47  ;;  %v990_v50 = vadd.f32 %v11250_v49, %v14133_v15  ;;  %v437_v51 = vpop.f32.mrf.mxu0 }
  0xfa   :  { %582 = vst.msk [vmem:[#allocation2 + $0xc8] sm:$0xff] %vm556_vm1, %v443_v48  ;;  %v438_v52 = vadd.f32 %v14113_v6, %v437_v51  ;;  %v984_v21 = vpop.f32.mrf.mxu1 }
  0xfb   :  { %1137 = vst.msk [vmem:[#allocation2 + $0x238] sm:$0xff] %vm556_vm1, %v990_v50  ;;  %v985_v53 = vadd.f32 %v14133_v15, %v984_v21  ;;  %v11180_v54 = vpop.f32.mrf.mxu0 }
  0xfc   :  { %581 = vst.msk [vmem:[#allocation2 + $0xc0] sm:$0xff] %vm556_vm1, %v438_v52  ;;  %v453_v55 = vadd.f32 %v11180_v54, %v14113_v6  ;;  %v11253_v56 = vpop.f32.mrf.mxu1 }
  0xfd   :  { %1136 = vst.msk [vmem:[#allocation2 + $0x230] sm:$0xff] %vm556_vm1, %v985_v53  ;;  %v1000_v57 = vadd.f32 %v11253_v56, %v14133_v15  ;;  %v447_v58 = vpop.f32.mrf.mxu0 }
  0xfe   :  { %584 = vst.msk [vmem:[#allocation2 + $0xd8] sm:$0xff] %vm556_vm1, %v453_v55  ;;  %v448_v60 = vadd.f32 %v14113_v6, %v447_v58  ;;  %v994_v4 = vpop.f32.mrf.mxu1 }
  0xff   :  { %1139 = vst.msk [vmem:[#allocation2 + $0x248] sm:$0xff] %vm556_vm1, %v1000_v57  ;;  %v995_v7 = vadd.f32 %v14133_v15, %v994_v4  ;;  %v11183_v59 = vpop.f32.mrf.mxu0 }
 0x100   :  { %583 = vst.msk [vmem:[#allocation2 + $0xd0] sm:$0xff] %vm556_vm1, %v448_v60  ;;  %v463_v61 = vadd.f32 %v11183_v59, %v14113_v6  ;;  %v11256_v8 = vpop.f32.mrf.mxu1 }
 0x101   :  { %1138 = vst.msk [vmem:[#allocation2 + $0x240] sm:$0xff] %vm556_vm1, %v995_v7  ;;  %v1010_v9 = vadd.f32 %v11256_v8, %v14133_v15  ;;  %v457_v62 = vpop.f32.mrf.mxu0 }
 0x102   :  { %586 = vst.msk [vmem:[#allocation2 + $0xe8] sm:$0xff] %vm556_vm1, %v463_v61  ;;  %v458_v10 = vadd.f32 %v14113_v6, %v457_v62  ;;  %v1004_v3 = vpop.f32.mrf.mxu1 }
 0x103   :  { %1141 = vst.msk [vmem:[#allocation2 + $0x258] sm:$0xff] %vm556_vm1, %v1010_v9  ;;  %v1005_v11 = vadd.f32 %v14133_v15, %v1004_v3  ;;  %v11186_v63 = vpop.f32.mrf.mxu0 }
 0x104   :  { %585 = vst.msk [vmem:[#allocation2 + $0xe0] sm:$0xff] %vm556_vm1, %v458_v10  ;;  %v473_v0 = vadd.f32 %v11186_v63, %v14113_v6  ;;  %v11259_v12 = vpop.f32.mrf.mxu1  ;;  %v14359_v63 = vld [vmem:[%s16041_s4 + $0x2] ss:$0 sm:$0xff] }
 0x105   :  { %1140 = vst.msk [vmem:[#allocation2 + $0x250] sm:$0xff] %vm556_vm1, %v1005_v11  ;;  %v1020_v1 = vadd.f32 %v11259_v12, %v14133_v15  ;;  %v467_v13 = vpop.f32.mrf.mxu0 }
 0x106   :  { %588 = vst.msk [vmem:[#allocation2 + $0xf8] sm:$0xff] %vm556_vm1, %v473_v0  ;;  %v468_v14 = vadd.f32 %v14113_v6, %v467_v13  ;;  %v1014_v5 = vpop.f32.mrf.mxu1 }
 0x107   :  { %1143 = vst.msk [vmem:[#allocation2 + $0x268] sm:$0xff] %vm556_vm1, %v1020_v1  ;;  %v1015_v16 = vadd.f32 %v14133_v15, %v1014_v5  ;;  %v11189_v17 = vpop.f32.mrf.mxu0 }
 0x108   :  { %587 = vst.msk [vmem:[#allocation2 + $0xf0] sm:$0xff] %vm556_vm1, %v468_v14  ;;  %v483_v18 = vadd.f32 %v11189_v17, %v14113_v6  ;;  %v11262_v20 = vpop.f32.mrf.mxu1 }
 0x109   :  { %1142 = vst.msk [vmem:[#allocation2 + $0x260] sm:$0xff] %vm556_vm1, %v1015_v16  ;;  %v1030_v22 = vadd.f32 %v11262_v20, %v14133_v15  ;;  %v477_v23 = vpop.f32.mrf.mxu0 }
 0x10a   :  { %590 = vst.msk [vmem:[#allocation2 + $0x108] sm:$0xff] %vm556_vm1, %v483_v18  ;;  %v478_v24 = vadd.f32 %v14113_v6, %v477_v23  ;;  %v1024_v25 = vpop.f32.mrf.mxu1 }
 0x10b   :  { %1145 = vst.msk [vmem:[#allocation2 + $0x278] sm:$0xff] %vm556_vm1, %v1030_v22  ;;  %v1025_v26 = vadd.f32 %v14133_v15, %v1024_v25  ;;  %v11192_v27 = vpop.f32.mrf.mxu0 }
 0x10c   :  { %589 = vst.msk [vmem:[#allocation2 + $0x100] sm:$0xff] %vm556_vm1, %v478_v24  ;;  %v493_v28 = vadd.f32 %v11192_v27, %v14113_v6  ;;  %v11265_v29 = vpop.f32.mrf.mxu1 }
 0x10d   :  { %1144 = vst.msk [vmem:[#allocation2 + $0x270] sm:$0xff] %vm556_vm1, %v1025_v26  ;;  %v1040_v30 = vadd.f32 %v11265_v29, %v14133_v15  ;;  %v487_v31 = vpop.f32.mrf.mxu0  ;;  %v14382_v29 = vld [vmem:[%s16041_s4 + $0x3] ss:$0 sm:$0xff] }
 0x10e   :  { %592 = vst.msk [vmem:[#allocation2 + $0x118] sm:$0xff] %vm556_vm1, %v493_v28  ;;  %v488_v32 = vadd.f32 %v14113_v6, %v487_v31  ;;  %v1034_v33 = vpop.f32.mrf.mxu1 }
 0x10f   :  { %1147 = vst.msk [vmem:[#allocation2 + $0x288] sm:$0xff] %vm556_vm1, %v1040_v30  ;;  %v1035_v34 = vadd.f32 %v14133_v15, %v1034_v33  ;;  %v11195_v35 = vpop.f32.mrf.mxu0 }
 0x110   :  { %591 = vst.msk [vmem:[#allocation2 + $0x110] sm:$0xff] %vm556_vm1, %v488_v32  ;;  %v503_v36 = vadd.f32 %v11195_v35, %v14113_v6  ;;  %v11268_v37 = vpop.f32.mrf.mxu1 }
 0x111   :  { %1146 = vst.msk [vmem:[#allocation2 + $0x280] sm:$0xff] %vm556_vm1, %v1035_v34  ;;  %v1050_v38 = vadd.f32 %v11268_v37, %v14133_v15  ;;  %v497_v39 = vpop.f32.mrf.mxu0 }
 0x112   :  { %594 = vst.msk [vmem:[#allocation2 + $0x128] sm:$0xff] %vm556_vm1, %v503_v36  ;;  %v498_v40 = vadd.f32 %v14113_v6, %v497_v39  ;;  %v1044_v41 = vpop.f32.mrf.mxu1 }
 0x113   :  { %1149 = vst.msk [vmem:[#allocation2 + $0x298] sm:$0xff] %vm556_vm1, %v1050_v38  ;;  %v1045_v42 = vadd.f32 %v14133_v15, %v1044_v41  ;;  %v11198_v43 = vpop.f32.mrf.mxu0 }
 0x114   :  { %593 = vst.msk [vmem:[#allocation2 + $0x120] sm:$0xff] %vm556_vm1, %v498_v40  ;;  %v513_v44 = vadd.f32 %v11198_v43, %v14113_v6  ;;  %v11271_v45 = vpop.f32.mrf.mxu1 }
 0x115   :  { %1148 = vst.msk [vmem:[#allocation2 + $0x290] sm:$0xff] %vm556_vm1, %v1045_v42  ;;  %v1060_v46 = vadd.f32 %v11271_v45, %v14133_v15  ;;  %v507_v47 = vpop.f32.mrf.mxu0 }
 0x116   :  { %596 = vst.msk [vmem:[#allocation2 + $0x138] sm:$0xff] %vm556_vm1, %v513_v44  ;;  %v508_v19 = vadd.f32 %v14113_v6, %v507_v47  ;;  %v1054_v48 = vpop.f32.mrf.mxu1 }
 0x117   :  { %1151 = vst.msk [vmem:[#allocation2 + $0x2a8] sm:$0xff] %vm556_vm1, %v1060_v46  ;;  %v1055_v49 = vadd.f32 %v14133_v15, %v1054_v48  ;;  %v11201_v50 = vpop.f32.mrf.mxu0 }
 0x118   :  { %595 = vst.msk [vmem:[#allocation2 + $0x130] sm:$0xff] %vm556_vm1, %v508_v19  ;;  %v523_v51 = vadd.f32 %v11201_v50, %v14113_v6  ;;  %v11274_v52 = vpop.f32.mrf.mxu1 }
 0x119   :  { %1150 = vst.msk [vmem:[#allocation2 + $0x2a0] sm:$0xff] %vm556_vm1, %v1055_v49  ;;  %v1070_v21 = vadd.f32 %v11274_v52, %v14133_v15  ;;  %v517_v53 = vpop.f32.mrf.mxu0 }
 0x11a   :  { %598 = vst.msk [vmem:[#allocation2 + $0x148] sm:$0xff] %vm556_vm1, %v523_v51  ;;  %v518_v54 = vadd.f32 %v14113_v6, %v517_v53  ;;  %v1064_v55 = vpop.f32.mrf.mxu1 }
 0x11b   :  { %1153 = vst.msk [vmem:[#allocation2 + $0x2b8] sm:$0xff] %vm556_vm1, %v1070_v21  ;;  %v1065_v56 = vadd.f32 %v14133_v15, %v1064_v55  ;;  %v11204_v57 = vpop.f32.mrf.mxu0 }
 0x11c   :  { %597 = vst.msk [vmem:[#allocation2 + $0x140] sm:$0xff] %vm556_vm1, %v518_v54  ;;  %v533_v58 = vadd.f32 %v11204_v57, %v14113_v6  ;;  %v11277_v60 = vpop.f32.mrf.mxu1 }
 0x11d   :  { %1152 = vst.msk [vmem:[#allocation2 + $0x2b0] sm:$0xff] %vm556_vm1, %v1065_v56  ;;  %v1080_v4 = vadd.f32 %v11277_v60, %v14133_v15  ;;  %v527_v7 = vpop.f32.mrf.mxu0 }
 0x11e   :  { %600 = vst.msk [vmem:[#allocation2 + $0x158] sm:$0xff] %vm556_vm1, %v533_v58  ;;  %v528_v59 = vadd.f32 %v14113_v6, %v527_v7  ;;  %v1074_v61 = vpop.f32.mrf.mxu1 }
 0x11f   :  { %1155 = vst.msk [vmem:[#allocation2 + $0x2c8] sm:$0xff] %vm556_vm1, %v1080_v4  ;;  %v1075_v8 = vadd.f32 %v14133_v15, %v1074_v61  ;;  %v11207_v9 = vpop.f32.mrf.mxu0 }
 0x120   :  { %599 = vst.msk [vmem:[#allocation2 + $0x150] sm:$0xff] %vm556_vm1, %v528_v59  ;;  %v543_v62 = vadd.f32 %v11207_v9, %v14113_v6  ;;  %v11280_v10 = vpop.f32.mrf.mxu1 }
 0x121   :  { %1154 = vst.msk [vmem:[#allocation2 + $0x2c0] sm:$0xff] %vm556_vm1, %v1075_v8  ;;  %v1090_v3 = vadd.f32 %v11280_v10, %v14133_v15  ;;  %v537_v11 = vpop.f32.mrf.mxu0 }
 0x122   :  { %602 = vst.msk [vmem:[#allocation2 + $0x168] sm:$0xff] %vm556_vm1, %v543_v62  ;;  %v538_v0 = vadd.f32 %v14113_v6, %v537_v11  ;;  %v1084_v12 = vpop.f32.mrf.mxu1 }
 0x123   :  { %1157 = vst.msk [vmem:[#allocation2 + $0x2d8] sm:$0xff] %vm556_vm1, %v1090_v3  ;;  %v1085_v1 = vadd.f32 %v14133_v15, %v1084_v12  ;;  %v11293_v13 = vpop.f32.mrf.mxu0 }
 0x124   :  { %601 = vst.msk [vmem:[#allocation2 + $0x160] sm:$0xff] %vm556_vm1, %v538_v0  ;;  %v11283_v14 = vpop.f32.mrf.mxu1  ;;  %v1437_v5 = vadd.f32 %v11293_v13, %v14359_v63 }
 0x125   :  { %1156 = vst.msk [vmem:[#allocation2 + $0x2d0] sm:$0xff] %vm556_vm1, %v1085_v1  ;;  %v1100_v16 = vadd.f32 %v11283_v14, %v14133_v15  ;;  %v1431_v17 = vpop.f32.mrf.mxu0 }
 0x126   :  { %1672 = vst.msk [vmem:[#allocation2 + $0x308] sm:$0xff] %vm556_vm1, %v1437_v5  ;;  %v1094_v18 = vpop.f32.mrf.mxu1  ;;  %v1432_v6 = vadd.f32 %v14359_v63, %v1431_v17 }
 0x127   :  { %1159 = vst.msk [vmem:[#allocation2 + $0x2e8] sm:$0xff] %vm556_vm1, %v1100_v16  ;;  %v1095_v20 = vadd.f32 %v14133_v15, %v1094_v18  ;;  %v11296_v22 = vpop.f32.mrf.mxu0 }
 0x128   :  { %1671 = vst.msk [vmem:[#allocation2 + $0x300] sm:$0xff] %vm556_vm1, %v1432_v6  ;;  %v11286_v23 = vpop.f32.mrf.mxu1  ;;  %v1447_v24 = vadd.f32 %v11296_v22, %v14359_v63 }
 0x129   :  { %1158 = vst.msk [vmem:[#allocation2 + $0x2e0] sm:$0xff] %vm556_vm1, %v1095_v20  ;;  %v1110_v25 = vadd.f32 %v11286_v23, %v14133_v15  ;;  %v1441_v26 = vpop.f32.mrf.mxu0 }
 0x12a   :  { %1674 = vst.msk [vmem:[#allocation2 + $0x318] sm:$0xff] %vm556_vm1, %v1447_v24  ;;  %v1104_v27 = vpop.f32.mrf.mxu1  ;;  %v1442_v28 = vadd.f32 %v14359_v63, %v1441_v26 }
 0x12b   :  { %1161 = vst.msk [vmem:[#allocation2 + $0x2f8] sm:$0xff] %vm556_vm1, %v1110_v25  ;;  %v1105_v30 = vadd.f32 %v14133_v15, %v1104_v27  ;;  %v11299_v31 = vpop.f32.mrf.mxu0 }
 0x12c   :  { %1673 = vst.msk [vmem:[#allocation2 + $0x310] sm:$0xff] %vm556_vm1, %v1442_v28  ;;  %v1457_v32 = vadd.f32 %v11299_v31, %v14359_v63  ;;  %v11369_v33 = vpop.f32.mrf.mxu1 }
 0x12d   :  { %1160 = vst.msk [vmem:[#allocation2 + $0x2f0] sm:$0xff] %vm556_vm1, %v1105_v30  ;;  %v1994_v34 = vadd.f32 %v11369_v33, %v14382_v29  ;;  %v1451_v35 = vpop.f32.mrf.mxu0 }
 0x12e   :  { %1676 = vst.msk [vmem:[#allocation2 + $0x328] sm:$0xff] %vm556_vm1, %v1457_v32  ;;  %v1452_v36 = vadd.f32 %v14359_v63, %v1451_v35  ;;  %v1988_v37 = vpop.f32.mrf.mxu1 }
 0x12f   :  { %2229 = vst.msk [vmem:[#allocation2 + $0x488] sm:$0xff] %vm556_vm1, %v1994_v34  ;;  %v1989_v15 = vadd.f32 %v14382_v29, %v1988_v37  ;;  %v11302_v38 = vpop.f32.mrf.mxu0 }
 0x130   :  { %1675 = vst.msk [vmem:[#allocation2 + $0x320] sm:$0xff] %vm556_vm1, %v1452_v36  ;;  %v1467_v39 = vadd.f32 %v11302_v38, %v14359_v63  ;;  %v11372_v40 = vpop.f32.mrf.mxu1 }
 0x131   :  { %2228 = vst.msk [vmem:[#allocation2 + $0x480] sm:$0xff] %vm556_vm1, %v1989_v15  ;;  %v2004_v41 = vadd.f32 %v11372_v40, %v14382_v29  ;;  %v1461_v42 = vpop.f32.mrf.mxu0 }
 0x132   :  { %1678 = vst.msk [vmem:[#allocation2 + $0x338] sm:$0xff] %vm556_vm1, %v1467_v39  ;;  %v1462_v43 = vadd.f32 %v14359_v63, %v1461_v42  ;;  %v1998_v44 = vpop.f32.mrf.mxu1 }
 0x133   :  { %2231 = vst.msk [vmem:[#allocation2 + $0x498] sm:$0xff] %vm556_vm1, %v2004_v41  ;;  %v1999_v45 = vadd.f32 %v14382_v29, %v1998_v44  ;;  %v11305_v46 = vpop.f32.mrf.mxu0 }
 0x134   :  { %1677 = vst.msk [vmem:[#allocation2 + $0x330] sm:$0xff] %vm556_vm1, %v1462_v43  ;;  %v1477_v47 = vadd.f32 %v11305_v46, %v14359_v63  ;;  %v11375_v19 = vpop.f32.mrf.mxu1 }
 0x135   :  { %2230 = vst.msk [vmem:[#allocation2 + $0x490] sm:$0xff] %vm556_vm1, %v1999_v45  ;;  %v2014_v48 = vadd.f32 %v11375_v19, %v14382_v29  ;;  %v1471_v49 = vpop.f32.mrf.mxu0 }
 0x136   :  { %1680 = vst.msk [vmem:[#allocation2 + $0x348] sm:$0xff] %vm556_vm1, %v1477_v47  ;;  %v1472_v50 = vadd.f32 %v14359_v63, %v1471_v49  ;;  %v2008_v51 = vpop.f32.mrf.mxu1 }
 0x137   :  { %2233 = vst.msk [vmem:[#allocation2 + $0x4a8] sm:$0xff] %vm556_vm1, %v2014_v48  ;;  %v2009_v52 = vadd.f32 %v14382_v29, %v2008_v51  ;;  %v11308_v21 = vpop.f32.mrf.mxu0 }
 0x138   :  { %1679 = vst.msk [vmem:[#allocation2 + $0x340] sm:$0xff] %vm556_vm1, %v1472_v50  ;;  %v1487_v53 = vadd.f32 %v11308_v21, %v14359_v63  ;;  %v11378_v54 = vpop.f32.mrf.mxu1 }
 0x139   :  { %2232 = vst.msk [vmem:[#allocation2 + $0x4a0] sm:$0xff] %vm556_vm1, %v2009_v52  ;;  %v2024_v55 = vadd.f32 %v11378_v54, %v14382_v29  ;;  %v1481_v56 = vpop.f32.mrf.mxu0 }
 0x13a   :  { %1682 = vst.msk [vmem:[#allocation2 + $0x358] sm:$0xff] %vm556_vm1, %v1487_v53  ;;  %v1482_v57 = vadd.f32 %v14359_v63, %v1481_v56  ;;  %v2018_v58 = vpop.f32.mrf.mxu1 }
 0x13b   :  { %2235 = vst.msk [vmem:[#allocation2 + $0x4b8] sm:$0xff] %vm556_vm1, %v2024_v55  ;;  %v2019_v60 = vadd.f32 %v14382_v29, %v2018_v58  ;;  %v11311_v4 = vpop.f32.mrf.mxu0 }
 0x13c   :  { %1681 = vst.msk [vmem:[#allocation2 + $0x350] sm:$0xff] %vm556_vm1, %v1482_v57  ;;  %v1497_v7 = vadd.f32 %v11311_v4, %v14359_v63  ;;  %v11381_v59 = vpop.f32.mrf.mxu1 }
 0x13d   :  { %2234 = vst.msk [vmem:[#allocation2 + $0x4b0] sm:$0xff] %vm556_vm1, %v2019_v60  ;;  %v2034_v61 = vadd.f32 %v11381_v59, %v14382_v29  ;;  %v1491_v8 = vpop.f32.mrf.mxu0 }
 0x13e   :  { %1684 = vst.msk [vmem:[#allocation2 + $0x368] sm:$0xff] %vm556_vm1, %v1497_v7  ;;  %v1492_v9 = vadd.f32 %v14359_v63, %v1491_v8  ;;  %v2028_v62 = vpop.f32.mrf.mxu1 }
 0x13f   :  { %2237 = vst.msk [vmem:[#allocation2 + $0x4c8] sm:$0xff] %vm556_vm1, %v2034_v61  ;;  %v2029_v10 = vadd.f32 %v14382_v29, %v2028_v62  ;;  %v11314_v3 = vpop.f32.mrf.mxu0 }
 0x140   :  { %1683 = vst.msk [vmem:[#allocation2 + $0x360] sm:$0xff] %vm556_vm1, %v1492_v9  ;;  %v1507_v11 = vadd.f32 %v11314_v3, %v14359_v63  ;;  %v11384_v0 = vpop.f32.mrf.mxu1 }
 0x141   :  { %2236 = vst.msk [vmem:[#allocation2 + $0x4c0] sm:$0xff] %vm556_vm1, %v2029_v10  ;;  %v2044_v12 = vadd.f32 %v11384_v0, %v14382_v29  ;;  %v1501_v1 = vpop.f32.mrf.mxu0 }
 0x142   :  { %1686 = vst.msk [vmem:[#allocation2 + $0x378] sm:$0xff] %vm556_vm1, %v1507_v11  ;;  %v1502_v13 = vadd.f32 %v14359_v63, %v1501_v1  ;;  %v2038_v14 = vpop.f32.mrf.mxu1 }
 0x143   :  { %2239 = vst.msk [vmem:[#allocation2 + $0x4d8] sm:$0xff] %vm556_vm1, %v2044_v12  ;;  %v2039_v5 = vadd.f32 %v14382_v29, %v2038_v14  ;;  %v11317_v16 = vpop.f32.mrf.mxu0 }
 0x144   :  { %1685 = vst.msk [vmem:[#allocation2 + $0x370] sm:$0xff] %vm556_vm1, %v1502_v13  ;;  %v1517_v17 = vadd.f32 %v11317_v16, %v14359_v63  ;;  %v11387_v18 = vpop.f32.mrf.mxu1 }
 0x145   :  { %2238 = vst.msk [vmem:[#allocation2 + $0x4d0] sm:$0xff] %vm556_vm1, %v2039_v5  ;;  %v2054_v6 = vadd.f32 %v11387_v18, %v14382_v29  ;;  %v1511_v20 = vpop.f32.mrf.mxu0 }
 0x146   :  { %1688 = vst.msk [vmem:[#allocation2 + $0x388] sm:$0xff] %vm556_vm1, %v1517_v17  ;;  %v1512_v22 = vadd.f32 %v14359_v63, %v1511_v20  ;;  %v2048_v23 = vpop.f32.mrf.mxu1 }
 0x147   :  { %2241 = vst.msk [vmem:[#allocation2 + $0x4e8] sm:$0xff] %vm556_vm1, %v2054_v6  ;;  %v2049_v24 = vadd.f32 %v14382_v29, %v2048_v23  ;;  %v11320_v25 = vpop.f32.mrf.mxu0 }
 0x148   :  { %1687 = vst.msk [vmem:[#allocation2 + $0x380] sm:$0xff] %vm556_vm1, %v1512_v22  ;;  %v1527_v26 = vadd.f32 %v11320_v25, %v14359_v63  ;;  %v11390_v27 = vpop.f32.mrf.mxu1 }
 0x149   :  { %2240 = vst.msk [vmem:[#allocation2 + $0x4e0] sm:$0xff] %vm556_vm1, %v2049_v24  ;;  %v2064_v28 = vadd.f32 %v11390_v27, %v14382_v29  ;;  %v1521_v30 = vpop.f32.mrf.mxu0 }
 0x14a   :  { %1690 = vst.msk [vmem:[#allocation2 + $0x398] sm:$0xff] %vm556_vm1, %v1527_v26  ;;  %v1522_v31 = vadd.f32 %v14359_v63, %v1521_v30  ;;  %v2058_v32 = vpop.f32.mrf.mxu1 }
 0x14b   :  { %2243 = vst.msk [vmem:[#allocation2 + $0x4f8] sm:$0xff] %vm556_vm1, %v2064_v28  ;;  %v2059_v33 = vadd.f32 %v14382_v29, %v2058_v32  ;;  %v11323_v34 = vpop.f32.mrf.mxu0 }
 0x14c   :  { %1689 = vst.msk [vmem:[#allocation2 + $0x390] sm:$0xff] %vm556_vm1, %v1522_v31  ;;  %v1537_v35 = vadd.f32 %v11323_v34, %v14359_v63  ;;  %v11393_v36 = vpop.f32.mrf.mxu1 }
 0x14d   :  { %2242 = vst.msk [vmem:[#allocation2 + $0x4f0] sm:$0xff] %vm556_vm1, %v2059_v33  ;;  %v2074_v37 = vadd.f32 %v11393_v36, %v14382_v29  ;;  %v1531_v15 = vpop.f32.mrf.mxu0 }
 0x14e   :  { %1692 = vst.msk [vmem:[#allocation2 + $0x3a8] sm:$0xff] %vm556_vm1, %v1537_v35  ;;  %v1532_v38 = vadd.f32 %v14359_v63, %v1531_v15  ;;  %v2068_v39 = vpop.f32.mrf.mxu1 }
 0x14f   :  { %2245 = vst.msk [vmem:[#allocation2 + $0x508] sm:$0xff] %vm556_vm1, %v2074_v37  ;;  %v2069_v40 = vadd.f32 %v14382_v29, %v2068_v39  ;;  %v11326_v41 = vpop.f32.mrf.mxu0 }
 0x150   :  { %1691 = vst.msk [vmem:[#allocation2 + $0x3a0] sm:$0xff] %vm556_vm1, %v1532_v38  ;;  %v1547_v42 = vadd.f32 %v11326_v41, %v14359_v63  ;;  %v11396_v43 = vpop.f32.mrf.mxu1 }
 0x151   :  { %2244 = vst.msk [vmem:[#allocation2 + $0x500] sm:$0xff] %vm556_vm1, %v2069_v40  ;;  %v2084_v44 = vadd.f32 %v11396_v43, %v14382_v29  ;;  %v1541_v45 = vpop.f32.mrf.mxu0 }
 0x152   :  { %1694 = vst.msk [vmem:[#allocation2 + $0x3b8] sm:$0xff] %vm556_vm1, %v1547_v42  ;;  %v1542_v46 = vadd.f32 %v14359_v63, %v1541_v45  ;;  %v2078_v47 = vpop.f32.mrf.mxu1 }
 0x153   :  { %2247 = vst.msk [vmem:[#allocation2 + $0x518] sm:$0xff] %vm556_vm1, %v2084_v44  ;;  %v2079_v19 = vadd.f32 %v14382_v29, %v2078_v47  ;;  %v11329_v48 = vpop.f32.mrf.mxu0 }
 0x154   :  { %1693 = vst.msk [vmem:[#allocation2 + $0x3b0] sm:$0xff] %vm556_vm1, %v1542_v46  ;;  %v1557_v49 = vadd.f32 %v11329_v48, %v14359_v63  ;;  %v11399_v50 = vpop.f32.mrf.mxu1 }
 0x155   :  { %2246 = vst.msk [vmem:[#allocation2 + $0x510] sm:$0xff] %vm556_vm1, %v2079_v19  ;;  %v2094_v51 = vadd.f32 %v11399_v50, %v14382_v29  ;;  %v1551_v52 = vpop.f32.mrf.mxu0 }
 0x156   :  { %1696 = vst.msk [vmem:[#allocation2 + $0x3c8] sm:$0xff] %vm556_vm1, %v1557_v49  ;;  %v1552_v21 = vadd.f32 %v14359_v63, %v1551_v52  ;;  %v2088_v53 = vpop.f32.mrf.mxu1 }
 0x157   :  { %2249 = vst.msk [vmem:[#allocation2 + $0x528] sm:$0xff] %vm556_vm1, %v2094_v51  ;;  %v2089_v54 = vadd.f32 %v14382_v29, %v2088_v53  ;;  %v11332_v55 = vpop.f32.mrf.mxu0 }
 0x158   :  { %1695 = vst.msk [vmem:[#allocation2 + $0x3c0] sm:$0xff] %vm556_vm1, %v1552_v21  ;;  %v1567_v56 = vadd.f32 %v11332_v55, %v14359_v63  ;;  %v11402_v57 = vpop.f32.mrf.mxu1 }
 0x159   :  { %2248 = vst.msk [vmem:[#allocation2 + $0x520] sm:$0xff] %vm556_vm1, %v2089_v54  ;;  %v2104_v58 = vadd.f32 %v11402_v57, %v14382_v29  ;;  %v1561_v60 = vpop.f32.mrf.mxu0 }
 0x15a   :  { %1698 = vst.msk [vmem:[#allocation2 + $0x3d8] sm:$0xff] %vm556_vm1, %v1567_v56  ;;  %v1562_v4 = vadd.f32 %v14359_v63, %v1561_v60  ;;  %v2098_v7 = vpop.f32.mrf.mxu1 }
 0x15b   :  { %2251 = vst.msk [vmem:[#allocation2 + $0x538] sm:$0xff] %vm556_vm1, %v2104_v58  ;;  %v2099_v59 = vadd.f32 %v14382_v29, %v2098_v7  ;;  %v11335_v61 = vpop.f32.mrf.mxu0 }
 0x15c   :  { %1697 = vst.msk [vmem:[#allocation2 + $0x3d0] sm:$0xff] %vm556_vm1, %v1562_v4  ;;  %v1577_v8 = vadd.f32 %v11335_v61, %v14359_v63  ;;  %v11405_v9 = vpop.f32.mrf.mxu1 }
 0x15d   :  { %2250 = vst.msk [vmem:[#allocation2 + $0x530] sm:$0xff] %vm556_vm1, %v2099_v59  ;;  %v2114_v62 = vadd.f32 %v11405_v9, %v14382_v29  ;;  %v1571_v10 = vpop.f32.mrf.mxu0 }
 0x15e   :  { %1700 = vst.msk [vmem:[#allocation2 + $0x3e8] sm:$0xff] %vm556_vm1, %v1577_v8  ;;  %v1572_v3 = vadd.f32 %v14359_v63, %v1571_v10  ;;  %v2108_v11 = vpop.f32.mrf.mxu1 }
 0x15f   :  { %2253 = vst.msk [vmem:[#allocation2 + $0x548] sm:$0xff] %vm556_vm1, %v2114_v62  ;;  %v2109_v0 = vadd.f32 %v14382_v29, %v2108_v11  ;;  %v11338_v12 = vpop.f32.mrf.mxu0 }
 0x160   :  { %1699 = vst.msk [vmem:[#allocation2 + $0x3e0] sm:$0xff] %vm556_vm1, %v1572_v3  ;;  %v1587_v1 = vadd.f32 %v11338_v12, %v14359_v63  ;;  %v11408_v13 = vpop.f32.mrf.mxu1 }
 0x161   :  { %2252 = vst.msk [vmem:[#allocation2 + $0x540] sm:$0xff] %vm556_vm1, %v2109_v0  ;;  %v2124_v14 = vadd.f32 %v11408_v13, %v14382_v29  ;;  %v1581_v5 = vpop.f32.mrf.mxu0 }
 0x162   :  { %1702 = vst.msk [vmem:[#allocation2 + $0x3f8] sm:$0xff] %vm556_vm1, %v1587_v1  ;;  %v1582_v16 = vadd.f32 %v14359_v63, %v1581_v5  ;;  %v2118_v17 = vpop.f32.mrf.mxu1 }
 0x163   :  { %2255 = vst.msk [vmem:[#allocation2 + $0x558] sm:$0xff] %vm556_vm1, %v2124_v14  ;;  %v2119_v18 = vadd.f32 %v14382_v29, %v2118_v17  ;;  %v11341_v6 = vpop.f32.mrf.mxu0 }
 0x164   :  { %1701 = vst.msk [vmem:[#allocation2 + $0x3f0] sm:$0xff] %vm556_vm1, %v1582_v16  ;;  %v1597_v20 = vadd.f32 %v11341_v6, %v14359_v63  ;;  %v11411_v22 = vpop.f32.mrf.mxu1 }
 0x165   :  { %2254 = vst.msk [vmem:[#allocation2 + $0x550] sm:$0xff] %vm556_vm1, %v2119_v18  ;;  %v2134_v23 = vadd.f32 %v11411_v22, %v14382_v29  ;;  %v1591_v24 = vpop.f32.mrf.mxu0 }
 0x166   :  { %1704 = vst.msk [vmem:[#allocation2 + $0x408] sm:$0xff] %vm556_vm1, %v1597_v20  ;;  %v1592_v25 = vadd.f32 %v14359_v63, %v1591_v24  ;;  %v2128_v26 = vpop.f32.mrf.mxu1 }
 0x167   :  { %2257 = vst.msk [vmem:[#allocation2 + $0x568] sm:$0xff] %vm556_vm1, %v2134_v23  ;;  %v2129_v27 = vadd.f32 %v14382_v29, %v2128_v26  ;;  %v11344_v28 = vpop.f32.mrf.mxu0  ;;  %v2277_v23 = vld [vmem:[#allocation2 + $0x8] sm:$0xff] }
 0x168   :  { %1703 = vst.msk [vmem:[#allocation2 + $0x400] sm:$0xff] %vm556_vm1, %v1592_v25  ;;  %v1607_v30 = vadd.f32 %v11344_v28, %v14359_v63  ;;  %v11414_v31 = vpop.f32.mrf.mxu1  ;;  %v2276_v28 = vld [vmem:[#allocation2] sm:$0xff] }
 0x169   :  { %2256 = vst.msk [vmem:[#allocation2 + $0x560] sm:$0xff] %vm556_vm1, %v2129_v27  ;;  %v2144_v32 = vadd.f32 %v11414_v31, %v14382_v29  ;;  %v1601_v33 = vpop.f32.mrf.mxu0 }
 0x16a   :  { %1706 = vst.msk [vmem:[#allocation2 + $0x418] sm:$0xff] %vm556_vm1, %v1607_v30  ;;  %v1602_v34 = vadd.f32 %v14359_v63, %v1601_v33  ;;  %v2138_v35 = vpop.f32.mrf.mxu1 }
 0x16b   :  { %2259 = vst.msk [vmem:[#allocation2 + $0x578] sm:$0xff] %vm556_vm1, %v2144_v32  ;;  %v2139_v36 = vadd.f32 %v14382_v29, %v2138_v35  ;;  %v11347_v37 = vpop.f32.mrf.mxu0 }
 0x16c   :  { %1705 = vst.msk [vmem:[#allocation2 + $0x410] sm:$0xff] %vm556_vm1, %v1602_v34  ;;  %v1617_v15 = vadd.f32 %v11347_v37, %v14359_v63  ;;  %v11417_v38 = vpop.f32.mrf.mxu1  ;;  %v2279_v34 = vld [vmem:[#allocation2 + $0x18] sm:$0xff] }
 0x16d   :  { %2258 = vst.msk [vmem:[#allocation2 + $0x570] sm:$0xff] %vm556_vm1, %v2139_v36  ;;  %v2154_v39 = vadd.f32 %v11417_v38, %v14382_v29  ;;  %v1611_v40 = vpop.f32.mrf.mxu0 }
 0x16e   :  { %1708 = vst.msk [vmem:[#allocation2 + $0x428] sm:$0xff] %vm556_vm1, %v1617_v15  ;;  %v1612_v41 = vadd.f32 %v14359_v63, %v1611_v40  ;;  %v2148_v42 = vpop.f32.mrf.mxu1 }
 0x16f   :  { %2261 = vst.msk [vmem:[#allocation2 + $0x588] sm:$0xff] %vm556_vm1, %v2154_v39  ;;  %v2149_v43 = vadd.f32 %v14382_v29, %v2148_v42  ;;  %v11350_v44 = vpop.f32.mrf.mxu0  ;;  %v2278_v39 = vld [vmem:[#allocation2 + $0x10] sm:$0xff] }
 0x170   :  { %1707 = vst.msk [vmem:[#allocation2 + $0x420] sm:$0xff] %vm556_vm1, %v1612_v41  ;;  %v1627_v45 = vadd.f32 %v11350_v44, %v14359_v63  ;;  %v11420_v46 = vpop.f32.mrf.mxu1 }
 0x171   :  { %2260 = vst.msk [vmem:[#allocation2 + $0x580] sm:$0xff] %vm556_vm1, %v2149_v43  ;;  %v2164_v47 = vadd.f32 %v11420_v46, %v14382_v29  ;;  %v1621_v19 = vpop.f32.mrf.mxu0 }
 0x172   :  { %1710 = vst.msk [vmem:[#allocation2 + $0x438] sm:$0xff] %vm556_vm1, %v1627_v45  ;;  %v1622_v48 = vadd.f32 %v14359_v63, %v1621_v19  ;;  %v2158_v49 = vpop.f32.mrf.mxu1  ;;  %v2281_v45 = vld [vmem:[#allocation2 + $0x28] sm:$0xff] }
 0x173   :  { %2263 = vst.msk [vmem:[#allocation2 + $0x598] sm:$0xff] %vm556_vm1, %v2164_v47  ;;  %v2159_v50 = vadd.f32 %v14382_v29, %v2158_v49  ;;  %v11353_v51 = vpop.f32.mrf.mxu0 }
 0x174   :  { %1709 = vst.msk [vmem:[#allocation2 + $0x430] sm:$0xff] %vm556_vm1, %v1622_v48  ;;  %v1637_v52 = vadd.f32 %v11353_v51, %v14359_v63  ;;  %v11423_v21 = vpop.f32.mrf.mxu1  ;;  %v2391_v48 = vld [vmem:[#allocation2 + $0x188] sm:$0xff]  ;;  %v2280_v51 = vld [vmem:[#allocation2 + $0x20] sm:$0xff] }
 0x175   :  { %2262 = vst.msk [vmem:[#allocation2 + $0x590] sm:$0xff] %vm556_vm1, %v2159_v50  ;;  %v2174_v53 = vadd.f32 %v11423_v21, %v14382_v29  ;;  %v1631_v54 = vpop.f32.mrf.mxu0 }
 0x176   :  { %1712 = vst.msk [vmem:[#allocation2 + $0x448] sm:$0xff] %vm556_vm1, %v1637_v52  ;;  %v1632_v55 = vadd.f32 %v14359_v63, %v1631_v54  ;;  %v2168_v56 = vpop.f32.mrf.mxu1  ;;  %v2390_v54 = vld [vmem:[#allocation2 + $0x180] sm:$0xff] }
 0x177   :  { %2265 = vst.msk [vmem:[#allocation2 + $0x5a8] sm:$0xff] %vm556_vm1, %v2174_v53  ;;  %v2169_v57 = vadd.f32 %v14382_v29, %v2168_v56  ;;  %v11356_v58 = vpop.f32.mrf.mxu0 }
 0x178   :  { %1711 = vst.msk [vmem:[#allocation2 + $0x440] sm:$0xff] %vm556_vm1, %v1632_v55  ;;  %v1647_v60 = vadd.f32 %v11356_v58, %v14359_v63  ;;  %v11426_v4 = vpop.f32.mrf.mxu1 }
 0x179   :  { %2264 = vst.msk [vmem:[#allocation2 + $0x5a0] sm:$0xff] %vm556_vm1, %v2169_v57  ;;  %v2184_v7 = vadd.f32 %v11426_v4, %v14382_v29  ;;  %v1641_v59 = vpop.f32.mrf.mxu0  ;;  %v2393_v4 = vld [vmem:[#allocation2 + $0x198] sm:$0xff] }
 0x17a   :  { %1714 = vst.msk [vmem:[#allocation2 + $0x458] sm:$0xff] %vm556_vm1, %v1647_v60  ;;  %v1642_v61 = vadd.f32 %v14359_v63, %v1641_v59  ;;  %v2178_v8 = vpop.f32.mrf.mxu1 }
 0x17b   :  { %2267 = vst.msk [vmem:[#allocation2 + $0x5b8] sm:$0xff] %vm556_vm1, %v2184_v7  ;;  %v2179_v9 = vadd.f32 %v14382_v29, %v2178_v8  ;;  %v11359_v62 = vpop.f32.mrf.mxu0 }
 0x17c   :  { %1713 = vst.msk [vmem:[#allocation2 + $0x450] sm:$0xff] %vm556_vm1, %v1642_v61  ;;  %v1657_v10 = vadd.f32 %v11359_v62, %v14359_v63  ;;  %v11429_v3 = vpop.f32.mrf.mxu1 }
 0x17d   :  { %2266 = vst.msk [vmem:[#allocation2 + $0x5b0] sm:$0xff] %vm556_vm1, %v2179_v9  ;;  %v2194_v11 = vadd.f32 %v11429_v3, %v14382_v29  ;;  %v1651_v0 = vpop.f32.mrf.mxu0  ;;  %v2502_v9 = vld [vmem:[#allocation2 + $0x300] sm:$0xff] }
 0x17e   :  { %1716 = vst.msk [vmem:[#allocation2 + $0x468] sm:$0xff] %vm556_vm1, %v1657_v10  ;;  %v1652_v12 = vadd.f32 %v14359_v63, %v1651_v0  ;;  %v2188_v1 = vpop.f32.mrf.mxu1  ;;  %v2392_v10 = vld [vmem:[#allocation2 + $0x190] sm:$0xff] }
 0x17f   :  { %2269 = vst.msk [vmem:[#allocation2 + $0x5c8] sm:$0xff] %vm556_vm1, %v2194_v11  ;;  %v2189_v13 = vadd.f32 %v14382_v29, %v2188_v1  ;;  %v11362_v14 = vpop.f32.mrf.mxu0  ;;  %v2395_v1 = vld [vmem:[#allocation2 + $0x1a8] sm:$0xff] }
 0x180   :  { %1715 = vst.msk [vmem:[#allocation2 + $0x460] sm:$0xff] %vm556_vm1, %v1652_v12  ;;  %v1667_v5 = vadd.f32 %v11362_v14, %v14359_v63  ;;  %v11432_v16 = vpop.f32.mrf.mxu1 }
 0x181   :  { %2268 = vst.msk [vmem:[#allocation2 + $0x5c0] sm:$0xff] %vm556_vm1, %v2189_v13  ;;  %v2204_v17 = vadd.f32 %v11432_v16, %v14382_v29  ;;  %v1661_v18 = vpop.f32.mrf.mxu0 }
 0x182   :  { %1718 = vst.msk [vmem:[#allocation2 + $0x478] sm:$0xff] %vm556_vm1, %v1667_v5  ;;  %v1662_v6 = vadd.f32 %v14359_v63, %v1661_v18  ;;  %v2198_v20 = vpop.f32.mrf.mxu1 }
 0x183   :  { %2271 = vst.msk [vmem:[#allocation2 + $0x5d8] sm:$0xff] %vm556_vm1, %v2204_v17  ;;  %v2199_v22 = vadd.f32 %v14382_v29, %v2198_v20  ;;  %v11449_v24 = vpop.f32.mrf.mxu0  ;;  %v2394_v20 = vld [vmem:[#allocation2 + $0x1a0] sm:$0xff] }
 0x184   :  { %1717 = vst.msk [vmem:[#allocation2 + $0x470] sm:$0xff] %vm556_vm1, %v1662_v6  ;;  %v11435_v25 = vpop.f32.mrf.mxu1  ;;  %v2385_v26 = vadd.f32 %v11449_v24, %v2277_v23  ;;  %v2505_v6 = vld [vmem:[#allocation2 + $0x318] sm:$0xff] }
 0x185   :  { %2270 = vst.msk [vmem:[#allocation2 + $0x5d0] sm:$0xff] %vm556_vm1, %v2199_v22  ;;  %v2214_v27 = vadd.f32 %v11435_v25, %v14382_v29  ;;  %v2355_v30 = vpop.f32.mrf.mxu0 }
 0x186   :  { %v10017_v31 = vmul.f32 -1.442695, %v2385_v26  ;;  %v2208_v32 = vpop.f32.mrf.mxu1  ;;  %v2384_v63 = vadd.f32 %v2355_v30, %v2276_v28 }
 0x187   :  { %2273 = vst.msk [vmem:[#allocation2 + $0x5e8] sm:$0xff] %vm556_vm1, %v2214_v27  ;;  %v2209_v33 = vadd.f32 %v14382_v29, %v2208_v32  ;;  %v11452_v35 = vpop.f32.mrf.mxu0 }
 0x188   :  { %12366 = vpow2.f32 %v10017_v31  ;;  %v10016_v36 = vmul.f32 -1.442695, %v2384_v63  ;;  %v11438_v37 = vpop.f32.mrf.mxu1  ;;  %v2387_v15 = vadd.f32 %v11452_v35, %v2279_v34 }
 0x189   :  { %2272 = vst.msk [vmem:[#allocation2 + $0x5e0] sm:$0xff] %vm556_vm1, %v2209_v33  ;;  %v2224_v38 = vadd.f32 %v11438_v37, %v14382_v29  ;;  %v2365_v40 = vpop.f32.mrf.mxu0  ;;  %v2504_v33 = vld [vmem:[#allocation2 + $0x310] sm:$0xff] }
 0x18a   :  { %12368 = vpow2.f32 %v10016_v36  ;;  %v10019_v41 = vmul.f32 -1.442695, %v2387_v15  ;;  %v2218_v42 = vpop.f32.mrf.mxu1  ;;  %v2386_v43 = vadd.f32 %v2365_v40, %v2278_v39  ;;  %v2615_v40 = vld [vmem:[#allocation2 + $0x488] sm:$0xff] }
 0x18b   :  { %2275 = vst.msk [vmem:[#allocation2 + $0x5f8] sm:$0xff] %vm556_vm1, %v2224_v38  ;;  %v2219_v44 = vadd.f32 %v14382_v29, %v2218_v42  ;;  %v11455_v46 = vpop.f32.mrf.mxu0  ;;  %v2503_v29 = vld [vmem:[#allocation2 + $0x308] sm:$0xff] }
 0x18c   :  { %12370 = vpow2.f32 %v10019_v41  ;;  %v10018_v47 = vmul.f32 -1.442695, %v2386_v43  ;;  %v2389_v19 = vadd.f32 %v11455_v46, %v2281_v45  ;;  %v11466_v49 = vpop.f32.mrf.mxu1 }
 0x18d   :  { %2274 = vst.msk [vmem:[#allocation2 + $0x5f0] sm:$0xff] %vm556_vm1, %v2219_v44  ;;  %v2497_v50 = vadd.f32 %v11466_v49, %v2391_v48  ;;  %v2375_v52 = vpop.f32.mrf.mxu0 }
 0x18e   :  { %12372 = vpow2.f32 %v10018_v47  ;;  %v10021_v21 = vmul.f32 -1.442695, %v2389_v19  ;;  %v2388_v53 = vadd.f32 %v2375_v52, %v2280_v51  ;;  %v2467_v55 = vpop.f32.mrf.mxu1  ;;  %v2507_v47 = vld [vmem:[#allocation2 + $0x328] sm:$0xff] }
 0x18f   :  { %v10011_v56 = vmul.f32 -1.442695, %v2497_v50  ;;  %v2496_v57 = vadd.f32 %v2467_v55, %v2390_v54  ;;  %v11483_v58 = vpop.f32.mrf.mxu0 }
 0x190   :  { %12374 = vpow2.f32 %v10021_v21  ;;  %v10020_v60 = vmul.f32 -1.442695, %v2388_v53  ;;  %v11469_v7 = vpop.f32.mrf.mxu1  ;;  %v2609_v59 = vadd.f32 %v11483_v58, %v2503_v29  ;;  %v2614_v53 = vld [vmem:[#allocation2 + $0x480] sm:$0xff] }
 0x191   :  { %12376 = vpow2.f32 %v10011_v56  ;;  %v10010_v61 = vmul.f32 -1.442695, %v2496_v57  ;;  %v2499_v8 = vadd.f32 %v11469_v7, %v2393_v4  ;;  %v2579_v62 = vpop.f32.mrf.mxu0  ;;  %v2617_v57 = vld [vmem:[#allocation2 + $0x498] sm:$0xff]  ;;  %v2616_v7 = vld [vmem:[#allocation2 + $0x490] sm:$0xff] }
 0x192   :  { %12378 = vpow2.f32 %v10020_v60  ;;  %v2477_v3 = vpop.f32.mrf.mxu1  ;;  %v2608_v11 = vadd.f32 %v2579_v62, %v2502_v9  ;;  %v2506_v60 = vld [vmem:[#allocation2 + $0x320] sm:$0xff] }
 0x193   :  { %12380 = vpow2.f32 %v10010_v61  ;;  %v10013_v0 = vmul.f32 -1.442695, %v2499_v8  ;;  %v2498_v12 = vadd.f32 %v2477_v3, %v2392_v10  ;;  %v11486_v14 = vpop.f32.mrf.mxu0  ;;  %v2619_v3 = vld [vmem:[#allocation2 + $0x4a8] sm:$0xff] }
 0x194   :  { %12382 = vtanh.f32 %v2609_v59  ;;  %v11472_v13 = vpop.f32.mrf.mxu1  ;;  %v2611_v25 = vadd.f32 %v11486_v14, %v2505_v6 }
 0x195   :  { %v12367_v5 = vpop.eup %12366  ;;  %12384 = vpow2.f32 %v10013_v0  ;;  %v10012_v16 = vmul.f32 -1.442695, %v2498_v12  ;;  %v2501_v17 = vadd.f32 %v11472_v13, %v2395_v1  ;;  %v2589_v28 = vpop.f32.mrf.mxu0  ;;  %v2618_v1 = vld [vmem:[#allocation2 + $0x4a0] sm:$0xff] }
 0x196   :  { %v2787_v18 = vadd.f32 1.0, %v12367_v5  ;;  %12386 = vtanh.f32 %v2608_v11  ;;  %v2487_v22 = vpop.f32.mrf.mxu1  ;;  %v2610_v36 = vadd.f32 %v2589_v28, %v2504_v33 }
 0x197   :  { %v12369_v23 = vpop.eup %12368  ;;  %12388 = vpow2.f32 %v10012_v16  ;;  %v10015_v24 = vmul.f32 -1.442695, %v2501_v17  ;;  %v2500_v26 = vadd.f32 %v2487_v22, %v2394_v20  ;;  %v11489_v39 = vpop.f32.mrf.mxu0 }
 0x198   :  { %12390 = vrcp.f32 %v2787_v18  ;;  %v2786_v27 = vadd.f32 1.0, %v12369_v23  ;;  %v11500_v30 = vpop.f32.mrf.mxu1  ;;  %v2613_v49 = vadd.f32 %v11489_v39, %v2507_v47 }
 0x199   :  { %v12371_v31 = vpop.eup %12370  ;;  %12392 = vpow2.f32 %v10015_v24  ;;  %v10014_v32 = vmul.f32 -1.442695, %v2500_v26  ;;  %v2721_v43 = vadd.f32 %v11500_v30, %v2615_v40  ;;  %v2599_v21 = vpop.f32.mrf.mxu0 }
 0x19a   :  { %12394 = vrcp.f32 %v2786_v27  ;;  %v2789_v63 = vadd.f32 1.0, %v12371_v31  ;;  %v2691_v34 = vpop.f32.mrf.mxu1  ;;  %v2612_v61 = vadd.f32 %v2599_v21, %v2506_v60 }
 0x19b   :  { %v12373_v35 = vpop.eup %12372  ;;  %12396 = vtanh.f32 %v2611_v25  ;;  %v10023_v55 = vmul.f32 -1.442695, %v2721_v43  ;;  %v2720_v56 = vadd.f32 %v2691_v34, %v2614_v53 }
 0x19c   :  { %12398 = vrcp.f32 %v2789_v63  ;;  %v2788_v37 = vadd.f32 1.0, %v12373_v35  ;;  %v11503_v15 = vpop.f32.mrf.mxu1 }
 0x19d   :  { %v12375_v38 = vpop.eup %12374  ;;  %12400 = vpow2.f32 %v10014_v32  ;;  %v2723_v4 = vadd.f32 %v11503_v15, %v2617_v57  ;;  %v10022_v0 = vmul.f32 -1.442695, %v2720_v56 }
 0x19e   :  { %v12377_v41 = vpop.eup %12376  ;;  %12402 = vrcp.f32 %v2788_v37  ;;  %v2791_v42 = vadd.f32 1.0, %v12375_v38  ;;  %v2701_v44 = vpop.f32.mrf.mxu1 }
 0x19f   :  { %v12379_v45 = vpop.eup %12378  ;;  %v2745_v46 = vadd.f32 1.0, %v12377_v41  ;;  %12404 = vtanh.f32 %v2610_v36  ;;  %v2722_v8 = vadd.f32 %v2701_v44, %v2616_v7  ;;  %v10025_v5 = vmul.f32 -1.442695, %v2723_v4 }
 0x1a0   :  { %v12381_v19 = vpop.eup %12380  ;;  %12406 = vrcp.f32 %v2791_v42  ;;  %v2790_v48 = vadd.f32 1.0, %v12379_v45  ;;  %v11506_v50 = vpop.f32.mrf.mxu1 }
 0x1a1   :  { %v12383_v51 = vpop.eup %12382  ;;  %12408 = vrcp.f32 %v2745_v46  ;;  %v2744_v52 = vadd.f32 1.0, %v12381_v19  ;;  %v2725_v12 = vadd.f32 %v11506_v50, %v2619_v3  ;;  %v10024_v18 = vmul.f32 -1.442695, %v2722_v8 }
 0x1a2   :  { %v12385_v54 = vpop.eup %12384  ;;  %12410 = vrcp.f32 %v2790_v48  ;;  %v2711_v9 = vpop.f32.mrf.mxu1 }
 0x1a3   :  { %v12387_v29 = vpop.eup %12386  ;;  %12412 = vrcp.f32 %v2744_v52  ;;  %v2747_v58 = vadd.f32 1.0, %v12385_v54  ;;  %v2724_v16 = vadd.f32 %v2711_v9, %v2618_v1  ;;  %v10027_v22 = vmul.f32 -1.442695, %v2725_v12 }
 0x1a4   :  { %v12389_v59 = vpop.eup %12388  ;;  %12414 = vtanh.f32 %v2613_v49 }
 0x1a5   :  { %v12391_v62 = vpop.eup %12390  ;;  %12416 = vrcp.f32 %v2747_v58  ;;  %v2746_v10 = vadd.f32 1.0, %v12389_v59  ;;  %v10026_v25 = vmul.f32 -1.442695, %v2724_v16  ;;  %v14603_v16 = vld [vmem:[%s16040_s3 + $0x78] sm:$0xff] }
 0x1a6   :  { %v12393_v11 = vpop.eup %12392  ;;  %12418 = vpow2.f32 %v10023_v55  ;;  %v2811_v34 = vmul.f32 %v12391_v62, %v12383_v51 }
 0x1a7   :  { %v12395_v13 = vpop.eup %12394  ;;  %12420 = vrcp.f32 %v2746_v10  ;;  %v2749_v14 = vadd.f32 1.0, %v12393_v11 }
 0x1a8   :  { %v12397_v17 = vpop.eup %12396  ;;  %12422 = vtanh.f32 %v2612_v61  ;;  %v2810_v36 = vmul.f32 %v12395_v13, %v12387_v29 }
 0x1a9   :  { %v12399_v6 = vpop.eup %12398  ;;  %12424 = vrcp.f32 %v2749_v14 }
 0x1aa   :  { %v12401_v20 = vpop.eup %12400  ;;  %12426 = vpow2.f32 %v10022_v0  ;;  %v2813_v46 = vmul.f32 %v12399_v6, %v12397_v17 }
 0x1ab   :  { %v12403_v23 = vpop.eup %12402  ;;  %v2748_v24 = vadd.f32 1.0, %v12401_v20  ;;  %12428 = vpow2.f32 %v10025_v5  ;;  %v14597_v5 = vld [vmem:[%s16040_s3 + $0x58] sm:$0xff]  ;;  %v14611_v20 = vld [vmem:[%s16040_s3 + $0x50] sm:$0xff] }
 0x1ac   :  { %v12405_v26 = vpop.eup %12404  ;;  %12430 = vpow2.f32 %v10024_v18 }
 0x1ad   :  { %v12407_v27 = vpop.eup %12406  ;;  %12432 = vrcp.f32 %v2748_v24  ;;  %v2812_v43 = vmul.f32 %v12405_v26, %v12403_v23  ;;  %v14629_v26 = vld [vmem:[%s16040_s3 + $0x48] sm:$0xff] }
 0x1ae   :  { %v12409_v28 = vpop.eup %12408  ;;  %12434 = vpow2.f32 %v10027_v22  ;;  %v14617_v22 = vld [vmem:[%s16040_s3 + $0x70] sm:$0xff] }
 0x1af   :  { %v12411_v30 = vpop.eup %12410  ;;  %v2763_v31 = vmul.f32 0.0, %v12409_v28  ;;  %12436 = vpow2.f32 %v10026_v25  ;;  %v14647_v28 = vld [vmem:[%s16040_s3 + $0x40] sm:$0xff] }
 0x1b0   :  { %v12413_v32 = vpop.eup %12412 }
 0x1b1   :  { %v12415_v63 = vpop.eup %12414  ;;  %v2762_v33 = vmul.f32 0.0, %v12413_v32  ;;  %v14572_v15 = vadd.f32 %v2811_v34, %v2763_v31  ;;  %v14665_v31 = vld [vmem:[%s16040_s3 + $0x18] sm:$0xff]  ;;  %v14699_v34 = vld [vmem:[%s16040_s3 + $0x8] sm:$0xff] }
 0x1b2   :  { %v12417_v35 = vpop.eup %12416  ;;  %v2815_v57 = vmul.f32 %v12415_v63, %v12407_v27  ;;  %v14635_v27 = vld [vmem:[%s16040_s3 + $0x68] sm:$0xff]  ;;  %v14671_v32 = vld [vmem:[%s16040_s3 + $0x38] sm:$0xff]  ;;  %v14683_v63 = vld [vmem:[%s16040_s3 + $0x10] sm:$0xff] }
 0x1b3   :  { %v12419_v37 = vpop.eup %12418  ;;  %v2765_v39 = vmul.f32 0.0, %v12417_v35  ;;  %v14574_v40 = vadd.f32 %v2810_v36, %v2762_v33  ;;  %12438 = vtanh.f32 %v14572_v15  ;;  %v14689_v33 = vld [vmem:[%s16040_s3 + $0x30] sm:$0xff]  ;;  %v14705_v35 = vld [vmem:[%s16040_s3 + $0x28] sm:$0xff]  ;;  %v14713_v36 = vld [vmem:[%s16040_s3] sm:$0xff] }
 0x1b4   :  { %v12421_v38 = vpop.eup %12420  ;;  %v2841_v44 = vadd.f32 1.0, %v12419_v37  ;;  %v14719_v37 = vld [vmem:[%s16040_s3 + $0x20] sm:$0xff] }
 0x1b5   :  { %v12423_v41 = vpop.eup %12422  ;;  %v2764_v42 = vmul.f32 0.0, %v12421_v38  ;;  %12440 = vtanh.f32 %v14574_v40  ;;  %v14580_v49 = vadd.f32 %v2813_v46, %v2765_v39  ;;  %v2871_v38 = vld [vmem:[#allocation2 + $0x38] sm:$0xff] }
 0x1b6   :  { %v12425_v45 = vpop.eup %12424  ;;  %12442 = vrcp.f32 %v2841_v44  ;;  %v2814_v29 = vmul.f32 %v12423_v41, %v12411_v30  ;;  %v14653_v30 = vld [vmem:[%s16040_s3 + $0x60] sm:$0xff]  ;;  %v2996_v41 = vld [vmem:[#allocation2 + $0x1b8] sm:$0xff] }
 0x1b7   :  { %v12427_v47 = vpop.eup %12426  ;;  %v14577_v19 = vadd.f32 %v2812_v43, %v2764_v42  ;;  %v2767_v52 = vmul.f32 0.0, %v12425_v45  ;;  %v2870_v45 = vld [vmem:[#allocation2 + $0x30] sm:$0xff] }
 0x1b8   :  { %v12429_v48 = vpop.eup %12428  ;;  %v2840_v50 = vadd.f32 1.0, %v12427_v47  ;;  %v2995_v47 = vld [vmem:[#allocation2 + $0x1b0] sm:$0xff] }
 0x1b9   :  { %v12431_v51 = vpop.eup %12430  ;;  %v2843_v53 = vadd.f32 1.0, %v12429_v48  ;;  %v14584_v60 = vadd.f32 %v2815_v57, %v2767_v52 }
 0x1ba   :  { %v12433_v21 = vpop.eup %12432  ;;  %12444 = vrcp.f32 %v2840_v50  ;;  %v2842_v54 = vadd.f32 1.0, %v12431_v51 }
 0x1bb   :  { %v12435_v55 = vpop.eup %12434  ;;  %v2766_v56 = vmul.f32 0.0, %v12433_v21  ;;  %12446 = vtanh.f32 %v14577_v19 }
 0x1bc   :  { %v12437_v58 = vpop.eup %12436  ;;  %12448 = vtanh.f32 %v14580_v49  ;;  %v2845_v59 = vadd.f32 1.0, %v12435_v55 }
 0x1bd   :  { %v14586_v4 = vadd.f32 %v2814_v29, %v2766_v56  ;;  %12450 = vrcp.f32 %v2842_v54  ;;  %v2844_v7 = vadd.f32 1.0, %v12437_v58  ;;  %v2998_v58 = vld [vmem:[#allocation2 + $0x1c8] sm:$0xff] }
 0x1be   :  { %12452 = vrcp.f32 %v2843_v53  ;;  %v2873_v53 = vld [vmem:[#allocation2 + $0x48] sm:$0xff] }
 0x1bf   :  { %12454 = vtanh.f32 %v14586_v4 }
 0x1c0   :  { %12456 = vrcp.f32 %v2844_v7  ;;  %v12439_v61 = vpop.eup %12438 }
 0x1c1   :  { %12458 = vtanh.f32 %v14584_v60 }
 0x1c2   :  { %12460 = vrcp.f32 %v2845_v59  ;;  %v12441_v8 = vpop.eup %12440  ;;  %v2872_v59 = vld [vmem:[#allocation2 + $0x40] sm:$0xff] }
 0x1c3   :  { %v12443_v9 = vpop.eup %12442 }
 0x1c4   :  { %v2865_v0 = vmul.f32 %v12443_v9, %v12439_v61 }
 0x1c7   :  { %v12445_v62 = vpop.eup %12444 }
 0x1c8   :  { %v12447_v10 = vpop.eup %12446  ;;  %v2864_v3 = vmul.f32 %v12445_v62, %v12441_v8  ;;  %v2997_v8 = vld [vmem:[#allocation2 + $0x1c0] sm:$0xff] }
 0x1c9   :  { %v12449_v11 = vpop.eup %12448 }
 0x1ca   :  { %v12451_v12 = vpop.eup %12450  ;;  %11515 = vmatprep.mubr.msk.f32.mxu0 %vm556_vm1, %v2864_v3  ;;  %11532 = vmatprep.mubr.msk.f32.mxu1 %vm556_vm1, %v2864_v3 }
 0x1cb   :  { %v12453_v1 = vpop.eup %12452  ;;  %11516 = vmatmul.mubr.msk.f32.vlgmr.msra.gmra.mxu0 %vm556_vm1, %v2865_v0  ;;  %11533 = vmatmul.mubr.msk.f32.vlgmr.msra.gmra.mxu1 %vm556_vm1, %v2865_v0  ;;  %v2866_v13 = vmul.f32 %v12451_v12, %v12447_v10 }
 0x1cc   :  { %v12455_v14 = vpop.eup %12454  ;;  %11542 = vmatpush3.msra.mxu0 %v14597_v5  ;;  %11559 = vmatpush3.msra.mxu1 %v14603_v16  ;;  %v2867_v18 = vmul.f32 %v12453_v1, %v12449_v11 }
 0x1cd   :  { %v12457_v17 = vpop.eup %12456  ;;  %11518 = vmatprep.mubr.msk.f32.mxu0 %vm556_vm1, %v2866_v13  ;;  %11535 = vmatprep.mubr.msk.f32.mxu1 %vm556_vm1, %v2866_v13 }
 0x1ce   :  { %v12459_v6 = vpop.eup %12458  ;;  %11543 = vmatprep.subr.mxu0 %v14611_v20  ;;  %11560 = vmatprep.subr.mxu1 %v14617_v22  ;;  %v2868_v23 = vmul.f32 %v12457_v17, %v12455_v14 }
 0x1cf   :  { %11519 = vmatmul.mubr.msk.f32.gmra.mxu0 %vm556_vm1, %v2867_v18  ;;  %11536 = vmatmul.mubr.msk.f32.gmra.mxu1 %vm556_vm1, %v2867_v18  ;;  %v12461_v24 = vpop.eup %12460 }
 0x1d0   :  { %11521 = vmatprep.mubr.msk.f32.mxu0 %vm556_vm1, %v2868_v23  ;;  %11538 = vmatprep.mubr.msk.f32.mxu1 %vm556_vm1, %v2868_v23  ;;  %v2869_v25 = vmul.f32 %v12461_v24, %v12459_v6 }
 0x1d1   :  { %11544 = vmatpush3.msra.mxu0 %v14611_v20  ;;  %11561 = vmatpush3.msra.mxu1 %v14617_v22 }
 0x1d2   :  { %11545 = vmatprep.subr.mxu0 %v14629_v26  ;;  %11562 = vmatprep.subr.mxu1 %v14635_v27 }
 0x1d3   :  { %11522 = vmatmul.mubr.msk.f32.gmra.mxu0 %vm556_vm1, %v2869_v25  ;;  %11539 = vmatmul.mubr.msk.f32.gmra.mxu1 %vm556_vm1, %v2869_v25 }
 0x1d4   :  { %11546 = vmatpush3.msra.mxu0 %v14629_v26  ;;  %11549 = vmatprep.mubr.msk.f32.mxu0 %vm556_vm1, %v2864_v3 }
 0x1d5   :  { %11563 = vmatpush3.msra.mxu1 %v14635_v27  ;;  %11566 = vmatprep.mubr.msk.f32.mxu1 %vm556_vm1, %v2864_v3 }
 0x1d6   :  { %11547 = vmatprep.subr.mxu0 %v14647_v28  ;;  %11564 = vmatprep.subr.mxu1 %v14653_v30 }
 0x1d7   :  { %11548 = vmatpush3.msra.mxu0 %v14647_v28  ;;  %11565 = vmatpush3.msra.mxu1 %v14653_v30 }
 0x1d8   :  { %11550 = vmatmul.mubr.msk.f32.vlgmr.msra.gmra.mxu0 %vm556_vm1, %v2865_v0  ;;  %11567 = vmatmul.mubr.msk.f32.vlgmr.msra.gmra.mxu1 %vm556_vm1, %v2865_v0  ;;  %v2875_v0 = vld [vmem:[#allocation2 + $0x58] sm:$0xff] }
 0x1d9   :  { %11552 = vmatprep.mubr.msk.f32.mxu0 %vm556_vm1, %v2866_v13  ;;  %11569 = vmatprep.mubr.msk.f32.mxu1 %vm556_vm1, %v2866_v13 }
 0x1da   :  { %11575 = vmatprep.subr.mxu0 %v14665_v31  ;;  %11592 = vmatprep.subr.mxu1 %v14671_v32 }
 0x1db   :  { %11576 = vmatpush3.msra.mxu0 %v14665_v31  ;;  %11593 = vmatpush3.msra.mxu1 %v14671_v32 }
 0x1dc   :  { %11553 = vmatmul.mubr.msk.f32.gmra.mxu0 %vm556_vm1, %v2867_v18  ;;  %11570 = vmatmul.mubr.msk.f32.gmra.mxu1 %vm556_vm1, %v2867_v18  ;;  %v3000_v18 = vld [vmem:[#allocation2 + $0x1d8] sm:$0xff] }
 0x1dd   :  { %11555 = vmatprep.mubr.msk.f32.mxu0 %vm556_vm1, %v2868_v23  ;;  %11572 = vmatprep.mubr.msk.f32.mxu1 %vm556_vm1, %v2868_v23  ;;  %v2874_v23 = vld [vmem:[#allocation2 + $0x50] sm:$0xff] }
 0x1de   :  { %11577 = vmatprep.subr.mxu0 %v14683_v63  ;;  %11594 = vmatprep.subr.mxu1 %v14689_v33 }
 0x1df   :  { %11578 = vmatpush3.msra.mxu0 %v14683_v63  ;;  %11595 = vmatpush3.msra.mxu1 %v14689_v33 }
 0x1e0   :  { %11556 = vmatmul.mubr.msk.f32.gmra.mxu0 %vm556_vm1, %v2869_v25  ;;  %11573 = vmatmul.mubr.msk.f32.gmra.mxu1 %vm556_vm1, %v2869_v25  ;;  %v2999_v25 = vld [vmem:[#allocation2 + $0x1d0] sm:$0xff] }
 0x1e1   :  { %11579 = vmatprep.subr.mxu0 %v14699_v34  ;;  %11596 = vmatprep.subr.mxu1 %v14705_v35 }
 0x1e2   :  { %11580 = vmatpush3.msra.mxu0 %v14699_v34  ;;  %11597 = vmatpush3.msra.mxu1 %v14705_v35 }
 0x1e3   :  { %11581 = vmatprep.subr.mxu0 %v14713_v36  ;;  %11598 = vmatprep.subr.mxu1 %v14719_v37 }
 0x1e4   :  { %11582 = vmatpush3.msra.mxu0 %v14713_v36  ;;  %11599 = vmatpush3.msra.mxu1 %v14719_v37 }
 0x1e5   :  { %11609 = vmatprep.subr.mxu0 %v14597_v5  ;;  %11626 = vmatprep.subr.mxu1 %v14603_v16 }
 0x28b   :  { %v11517_v39 = vpop.f32.mrf.mxu0  ;;  %v11534_v42 = vpop.f32.mrf.mxu1 }
 0x28c   :  { %v2990_v43 = vadd.f32 %v11517_v39, %v2871_v38  ;;  %v3097_v44 = vadd.f32 %v11534_v42, %v2996_v41 }
 0x28d   :  { %v2960_v46 = vpop.f32.mrf.mxu0  ;;  %v3067_v48 = vpop.f32.mrf.mxu1 }
 0x28e   :  { %v10059_v50 = vmul.f32 -1.442695, %v2990_v43  ;;  %v10053_v51 = vmul.f32 -1.442695, %v3097_v44  ;;  %v2989_v52 = vadd.f32 %v2960_v46, %v2870_v45  ;;  %v3096_v21 = vadd.f32 %v3067_v48, %v2995_v47  ;;  %v3103_v46 = vld [vmem:[#allocation2 + $0x338] sm:$0xff] }
 0x28f   :  { %v11520_v54 = vpop.f32.mrf.mxu0  ;;  %v11537_v55 = vpop.f32.mrf.mxu1  ;;  %v3210_v48 = vld [vmem:[#allocation2 + $0x4b8] sm:$0xff] }
 0x290   :  { %12462 = vpow2.f32 %v10059_v50  ;;  %v10058_v56 = vmul.f32 -1.442695, %v2989_v52  ;;  %v10052_v57 = vmul.f32 -1.442695, %v3096_v21  ;;  %v2992_v29 = vadd.f32 %v11520_v54, %v2873_v53  ;;  %v3102_v21 = vld [vmem:[#allocation2 + $0x330] sm:$0xff] }
 0x291   :  { %12464 = vpow2.f32 %v10053_v51  ;;  %v3099_v7 = vadd.f32 %v11537_v55, %v2998_v58  ;;  %v2970_v61 = vpop.f32.mrf.mxu0  ;;  %v3077_v9 = vpop.f32.mrf.mxu1  ;;  %v3209_v54 = vld [vmem:[#allocation2 + $0x4b0] sm:$0xff] }
 0x292   :  { %12466 = vpow2.f32 %v10058_v56  ;;  %v10061_v62 = vmul.f32 -1.442695, %v2992_v29  ;;  %v2991_v10 = vadd.f32 %v2970_v61, %v2872_v59  ;;  %v3098_v3 = vadd.f32 %v3077_v9, %v2997_v8 }
 0x293   :  { %12468 = vpow2.f32 %v10052_v57  ;;  %v10055_v11 = vmul.f32 -1.442695, %v3099_v7  ;;  %v11523_v12 = vpop.f32.mrf.mxu0  ;;  %v11540_v1 = vpop.f32.mrf.mxu1 }
 0x294   :  { %12470 = vpow2.f32 %v10061_v62  ;;  %v10060_v13 = vmul.f32 -1.442695, %v2991_v10  ;;  %v10054_v14 = vmul.f32 -1.442695, %v3098_v3  ;;  %v2994_v17 = vadd.f32 %v11523_v12, %v2875_v0 }
 0x295   :  { %12472 = vpow2.f32 %v10055_v11  ;;  %v3101_v6 = vadd.f32 %v11540_v1, %v3000_v18  ;;  %v2980_v24 = vpop.f32.mrf.mxu0  ;;  %v3087_v38 = vpop.f32.mrf.mxu1 }
 0x296   :  { %12474 = vpow2.f32 %v10060_v13  ;;  %v10063_v39 = vmul.f32 -1.442695, %v2994_v17  ;;  %v2993_v41 = vadd.f32 %v2980_v24, %v2874_v23  ;;  %v3100_v42 = vadd.f32 %v3087_v38, %v2999_v25  ;;  %v3212_v38 = vld [vmem:[#allocation2 + $0x4c8] sm:$0xff] }
 0x297   :  { %12476 = vpow2.f32 %v10054_v14  ;;  %v10057_v43 = vmul.f32 -1.442695, %v3101_v6 }
 0x298   :  { %12478 = vpow2.f32 %v10063_v39  ;;  %v10062_v44 = vmul.f32 -1.442695, %v2993_v41  ;;  %v10056_v45 = vmul.f32 -1.442695, %v3100_v42  ;;  %v11551_v47 = vpop.f32.mrf.mxu0  ;;  %v11568_v50 = vpop.f32.mrf.mxu1 }
 0x299   :  { %12480 = vpow2.f32 %v10057_v43  ;;  %v3204_v51 = vadd.f32 %v11551_v47, %v3103_v46  ;;  %v3311_v52 = vadd.f32 %v11568_v50, %v3210_v48 }
 0x29a   :  { %12482 = vpow2.f32 %v10062_v44  ;;  %v3174_v53 = vpop.f32.mrf.mxu0  ;;  %v3281_v55 = vpop.f32.mrf.mxu1 }
 0x29b   :  { %12484 = vpow2.f32 %v10056_v45  ;;  %v10065_v56 = vmul.f32 -1.442695, %v3311_v52  ;;  %v3203_v57 = vadd.f32 %v3174_v53, %v3102_v21  ;;  %v3310_v29 = vadd.f32 %v3281_v55, %v3209_v54  ;;  %v3105_v45 = vld [vmem:[#allocation2 + $0x348] sm:$0xff] }
 0x29c   :  { %12486 = vtanh.f32 %v3204_v51  ;;  %v11571_v3 = vpop.f32.mrf.mxu1  ;;  %v11554_v17 = vpop.f32.mrf.mxu0  ;;  %v3211_v51 = vld [vmem:[#allocation2 + $0x4c0] sm:$0xff] }
 0x29d   :  { %v12463_v58 = vpop.eup %12462  ;;  %12488 = vpow2.f32 %v10065_v56  ;;  %v10064_v7 = vmul.f32 -1.442695, %v3310_v29  ;;  %v3313_v42 = vadd.f32 %v11571_v3, %v3212_v38  ;;  %v3206_v50 = vadd.f32 %v11554_v17, %v3105_v45 }
 0x29e   :  { %v12465_v59 = vpop.eup %12464  ;;  %v3377_v61 = vadd.f32 1.0, %v12463_v58  ;;  %12490 = vtanh.f32 %v3203_v57  ;;  %v3291_v23 = vpop.f32.mrf.mxu1  ;;  %v3104_v58 = vld [vmem:[#allocation2 + $0x340] sm:$0xff] }
 0x29f   :  { %v12467_v8 = vpop.eup %12466  ;;  %v3335_v9 = vadd.f32 1.0, %v12465_v59  ;;  %12492 = vpow2.f32 %v10064_v7  ;;  %v3184_v46 = vpop.f32.mrf.mxu0  ;;  %v3312_v54 = vadd.f32 %v3291_v23, %v3211_v51  ;;  %v10067_v56 = vmul.f32 -1.442695, %v3313_v42  ;;  %v3214_v59 = vld [vmem:[#allocation2 + $0x4d8] sm:$0xff] }
 0x2a0   :  { %v12469_v62 = vpop.eup %12468  ;;  %12494 = vrcp.f32 %v3377_v61  ;;  %v3376_v10 = vadd.f32 1.0, %v12467_v8  ;;  %v11574_v52 = vpop.f32.mrf.mxu1  ;;  %v3205_v8 = vadd.f32 %v3184_v46, %v3104_v58 }
 0x2a1   :  { %v12471_v11 = vpop.eup %12470  ;;  %12496 = vrcp.f32 %v3335_v9  ;;  %v3334_v0 = vadd.f32 1.0, %v12469_v62  ;;  %v11557_v7 = vpop.f32.mrf.mxu0  ;;  %v3315_v9 = vadd.f32 %v11574_v52, %v3214_v59 }
 0x2a2   :  { %v12473_v12 = vpop.eup %12472  ;;  %12498 = vrcp.f32 %v3376_v10  ;;  %v3379_v1 = vadd.f32 1.0, %v12471_v11  ;;  %v3301_v62 = vpop.f32.mrf.mxu1  ;;  %v10066_v11 = vmul.f32 -1.442695, %v3312_v54 }
 0x2a3   :  { %v12475_v13 = vpop.eup %12474  ;;  %12500 = vrcp.f32 %v3334_v0  ;;  %v3337_v14 = vadd.f32 1.0, %v12473_v12  ;;  %v3107_v0 = vld [vmem:[#allocation2 + $0x358] sm:$0xff]  ;;  %v10069_v38 = vmul.f32 -1.442695, %v3315_v9 }
 0x2a4   :  { %v12477_v18 = vpop.eup %12476  ;;  %12502 = vrcp.f32 %v3379_v1  ;;  %v3378_v6 = vadd.f32 1.0, %v12475_v13  ;;  %v3208_v13 = vadd.f32 %v11557_v7, %v3107_v0 }
 0x2a5   :  { %v12479_v24 = vpop.eup %12478  ;;  %12504 = vrcp.f32 %v3337_v14  ;;  %v3336_v25 = vadd.f32 1.0, %v12477_v18  ;;  %v3213_v14 = vld [vmem:[#allocation2 + $0x4d0] sm:$0xff] }
 0x2a6   :  { %v12481_v39 = vpop.eup %12480  ;;  %12506 = vrcp.f32 %v3378_v6  ;;  %v3381_v41 = vadd.f32 1.0, %v12479_v24  ;;  %v3194_v6 = vpop.f32.mrf.mxu0  ;;  %v3314_v23 = vadd.f32 %v3301_v62, %v3213_v14 }
 0x2a7   :  { %v12483_v43 = vpop.eup %12482  ;;  %12508 = vrcp.f32 %v3336_v25  ;;  %v3339_v44 = vadd.f32 1.0, %v12481_v39 }
 0x2a8   :  { %v12485_v47 = vpop.eup %12484  ;;  %12510 = vrcp.f32 %v3381_v41  ;;  %v3380_v48 = vadd.f32 1.0, %v12483_v43  ;;  %v3106_v43 = vld [vmem:[#allocation2 + $0x350] sm:$0xff] }
 0x2a9   :  { %v12487_v21 = vpop.eup %12486  ;;  %12512 = vrcp.f32 %v3339_v44  ;;  %v3338_v53 = vadd.f32 1.0, %v12485_v47  ;;  %v3207_v45 = vadd.f32 %v3194_v6, %v3106_v43  ;;  %v10068_v47 = vmul.f32 -1.442695, %v3314_v23 }
 0x2aa   :  { %v12489_v55 = vpop.eup %12488  ;;  %12514 = vrcp.f32 %v3380_v48 }
 0x2ab   :  { %v12491_v57 = vpop.eup %12490  ;;  %12516 = vrcp.f32 %v3338_v53  ;;  %v3431_v29 = vadd.f32 1.0, %v12489_v55 }
 0x2ac   :  { %v12493_v61 = vpop.eup %12492  ;;  %12518 = vtanh.f32 %v3206_v50 }
 0x2ad   :  { %v12495_v10 = vpop.eup %12494  ;;  %12520 = vrcp.f32 %v3431_v29  ;;  %v3430_v3 = vadd.f32 1.0, %v12493_v61 }
 0x2ae   :  { %v12497_v12 = vpop.eup %12496  ;;  %v3401_v1 = vmul.f32 %v12495_v10, %v12487_v21  ;;  %12522 = vpow2.f32 %v10067_v56 }
 0x2af   :  { %v12499_v17 = vpop.eup %12498  ;;  %v3353_v18 = vmul.f32 %v12497_v12, %v14572_v15  ;;  %12524 = vrcp.f32 %v3430_v3 }
 0x2b0   :  { %v12501_v24 = vpop.eup %12500  ;;  %v3400_v25 = vmul.f32 %v12499_v17, %v12491_v57  ;;  %12526 = vtanh.f32 %v3205_v8 }
 0x2b1   :  { %v12503_v39 = vpop.eup %12502  ;;  %v14727_v41 = vadd.f32 %v3401_v1, %v3353_v18  ;;  %v3352_v42 = vmul.f32 %v12501_v24, %v14574_v40  ;;  %12528 = vpow2.f32 %v10066_v11 }
 0x2b2   :  { %v12505_v44 = vpop.eup %12504  ;;  %12530 = vtanh.f32 %v3208_v13 }
 0x2b3   :  { %v12507_v46 = vpop.eup %12506  ;;  %12532 = vtanh.f32 %v14727_v41  ;;  %v14731_v15 = vadd.f32 %v3400_v25, %v3352_v42  ;;  %v3355_v21 = vmul.f32 %v12505_v44, %v14580_v49 }
 0x2b4   :  { %v12509_v48 = vpop.eup %12508  ;;  %12534 = vpow2.f32 %v10069_v38 }
 0x2b5   :  { %v12511_v50 = vpop.eup %12510  ;;  %12536 = vtanh.f32 %v14731_v15  ;;  %v3354_v58 = vmul.f32 %v12509_v48, %v14577_v19 }
 0x2b6   :  { %v12513_v51 = vpop.eup %12512  ;;  %12538 = vtanh.f32 %v3207_v45  ;;  %v3460_v45 = vld [vmem:[#allocation2 + $0x60] sm:$0xff] }
 0x2b7   :  { %v12515_v52 = vpop.eup %12514  ;;  %12540 = vpow2.f32 %v10068_v47  ;;  %v3357_v8 = vmul.f32 %v12513_v51, %v14584_v60 }
 0x2b8   :  { %v12517_v40 = vpop.eup %12516 }
 0x2b9   :  { %v12519_v53 = vpop.eup %12518  ;;  %v3356_v1 = vmul.f32 %v12517_v40, %v14586_v4  ;;  %v3588_v40 = vld [vmem:[#allocation2 + $0x1f8] sm:$0xff] }
 0x2ba   :  { %v12521_v54 = vpop.eup %12520  ;;  %v3403_v55 = vmul.f32 %v12519_v53, %v12503_v39 }
 0x2bb   :  { %v12523_v56 = vpop.eup %12522 }
 0x2bc   :  { %v12525_v57 = vpop.eup %12524  ;;  %v14735_v29 = vadd.f32 %v3403_v55, %v3355_v21  ;;  %v3433_v62 = vadd.f32 1.0, %v12523_v56  ;;  %v3462_v55 = vld [vmem:[#allocation2 + $0x70] sm:$0xff] }
 0x2bd   :  { %v12527_v7 = vpop.eup %12526 }
 0x2be   :  { %v12529_v59 = vpop.eup %12528  ;;  %v3402_v61 = vmul.f32 %v12527_v7, %v12507_v46  ;;  %12542 = vtanh.f32 %v14735_v29  ;;  %v3585_v46 = vld [vmem:[#allocation2 + $0x1e0] sm:$0xff] }
 0x2bf   :  { %v12531_v9 = vpop.eup %12530  ;;  %v3432_v10 = vadd.f32 1.0, %v12529_v59 }
 0x2c0   :  { %v12533_v3 = vpop.eup %12532  ;;  %v14740_v49 = vadd.f32 %v3402_v61, %v3354_v58  ;;  %v3405_v11 = vmul.f32 %v12531_v9, %v12511_v50  ;;  %v3587_v61 = vld [vmem:[#allocation2 + $0x1f0] sm:$0xff] }
 0x2c1   :  { %v12535_v0 = vpop.eup %12534  ;;  %12544 = vrcp.f32 %v3432_v10  ;;  %v3455_v17 = vmul.f32 %v12533_v3, %v12521_v54 }
 0x2c2   :  { %v12537_v12 = vpop.eup %12536  ;;  %12546 = vtanh.f32 %v14740_v49  ;;  %v14743_v19 = vadd.f32 %v3405_v11, %v3357_v8  ;;  %v3435_v6 = vadd.f32 1.0, %v12535_v0  ;;  %v3465_v11 = vld [vmem:[#allocation2 + $0x88] sm:$0xff] }
 0x2c3   :  { %v12539_v13 = vpop.eup %12538  ;;  %12548 = vrcp.f32 %v3433_v62  ;;  %v3454_v60 = vmul.f32 %v12537_v12, %v12525_v57  ;;  %v3590_v12 = vld [vmem:[#allocation2 + $0x208] sm:$0xff] }
 0x2c4   :  { %v12541_v14 = vpop.eup %12540  ;;  %v3404_v18 = vmul.f32 %v12539_v13, %v12515_v52  ;;  %12550 = vtanh.f32 %v14743_v19 }
 0x2c5   :  { %v3434_v23 = vadd.f32 1.0, %v12541_v14  ;;  %11583 = vmatprep.mubr.msk.f32.mxu0 %vm556_vm1, %v3454_v60  ;;  %11600 = vmatprep.mubr.msk.f32.mxu1 %vm556_vm1, %v3454_v60 }
 0x2c6   :  { %v14749_v24 = vadd.f32 %v3404_v18, %v3356_v1  ;;  %11584 = vmatmul.mubr.msk.f32.vlgmr.msra.gmra.mxu0 %vm556_vm1, %v3455_v17  ;;  %11601 = vmatmul.mubr.msk.f32.vlgmr.msra.gmra.mxu1 %vm556_vm1, %v3455_v17 }
 0x2c7   :  { %12552 = vrcp.f32 %v3434_v23  ;;  %11610 = vmatpush3.msra.mxu0 %v14597_v5  ;;  %11627 = vmatpush3.msra.mxu1 %v14603_v16 }
 0x2c8   :  { %12554 = vtanh.f32 %v14749_v24  ;;  %11611 = vmatprep.subr.mxu0 %v14611_v20  ;;  %11628 = vmatprep.subr.mxu1 %v14617_v22 }
 0x2c9   :  { %12556 = vrcp.f32 %v3435_v6  ;;  %11612 = vmatpush3.msra.mxu0 %v14611_v20  ;;  %11629 = vmatpush3.msra.mxu1 %v14617_v22 }
 0x2ca   :  { %11613 = vmatprep.subr.mxu0 %v14629_v26  ;;  %11630 = vmatprep.subr.mxu1 %v14635_v27 }
 0x2cb   :  { %11614 = vmatpush3.msra.mxu0 %v14629_v26  ;;  %11631 = vmatpush3.msra.mxu1 %v14635_v27  ;;  %v12543_v4 = vpop.eup %12542 }
 0x2cc   :  { %11615 = vmatprep.subr.mxu0 %v14647_v28  ;;  %11632 = vmatprep.subr.mxu1 %v14653_v30 }
 0x2cd   :  { %11616 = vmatpush3.msra.mxu0 %v14647_v28  ;;  %11633 = vmatpush3.msra.mxu1 %v14653_v30 }
 0x2ce   :  { %v12545_v20 = vpop.eup %12544  ;;  %11643 = vmatprep.subr.mxu0 %v14665_v31  ;;  %11660 = vmatprep.subr.mxu1 %v14671_v32 }
 0x2cf   :  { %v12547_v22 = vpop.eup %12546 }
 0x2d0   :  { %v12549_v25 = vpop.eup %12548  ;;  %v3456_v38 = vmul.f32 %v12547_v22, %v12545_v20 }
 0x2d1   :  { %v3457_v26 = vmul.f32 %v12549_v25, %v12543_v4  ;;  %v12551_v27 = vpop.eup %12550 }
 0x2d2   :  { %11586 = vmatprep.mubr.msk.f32.mxu0 %vm556_vm1, %v3456_v38  ;;  %11603 = vmatprep.mubr.msk.f32.mxu1 %vm556_vm1, %v3456_v38 }
 0x2d3   :  { %11587 = vmatmul.mubr.msk.f32.gmra.mxu0 %vm556_vm1, %v3457_v26  ;;  %11604 = vmatmul.mubr.msk.f32.gmra.mxu1 %vm556_vm1, %v3457_v26 }
 0x2d4   :  { %v12553_v28 = vpop.eup %12552 }
 0x2d5   :  { %v12555_v30 = vpop.eup %12554 }
 0x2d6   :  { %v12557_v39 = vpop.eup %12556  ;;  %v3458_v42 = vmul.f32 %v12555_v30, %v12553_v28 }
 0x2d7   :  { %v3459_v43 = vmul.f32 %v12557_v39, %v12551_v27 }
 0x2d8   :  { %11589 = vmatprep.mubr.msk.f32.mxu0 %vm556_vm1, %v3458_v42  ;;  %11606 = vmatprep.mubr.msk.f32.mxu1 %vm556_vm1, %v3458_v42 }
 0x2d9   :  { %11590 = vmatmul.mubr.msk.f32.gmra.mxu0 %vm556_vm1, %v3459_v43  ;;  %11607 = vmatmul.mubr.msk.f32.gmra.mxu1 %vm556_vm1, %v3459_v43 }
 0x2da   :  { %11617 = vmatprep.mubr.msk.f32.mxu0 %vm556_vm1, %v3454_v60  ;;  %11634 = vmatprep.mubr.msk.f32.mxu1 %vm556_vm1, %v3454_v60 }
 0x2dd   :  { %11618 = vmatmul.mubr.msk.f32.vlgmr.msra.gmra.mxu0 %vm556_vm1, %v3455_v17  ;;  %11635 = vmatmul.mubr.msk.f32.vlgmr.msra.gmra.mxu1 %vm556_vm1, %v3455_v17 }
 0x2de   :  { %11620 = vmatprep.mubr.msk.f32.mxu0 %vm556_vm1, %v3456_v38  ;;  %11637 = vmatprep.mubr.msk.f32.mxu1 %vm556_vm1, %v3456_v38  ;;  %v3464_v38 = vld [vmem:[#allocation2 + $0x80] sm:$0xff] }
 0x2df   :  { %11644 = vmatpush3.msra.mxu0 %v14665_v31  ;;  %11661 = vmatpush3.msra.mxu1 %v14671_v32  ;;  %v3461_v31 = vld [vmem:[#allocation2 + $0x68] sm:$0xff] }
 0x2e0   :  { %11645 = vmatprep.subr.mxu0 %v14683_v63  ;;  %11662 = vmatprep.subr.mxu1 %v14689_v33 }
 0x2e1   :  { %11621 = vmatmul.mubr.msk.f32.gmra.mxu0 %vm556_vm1, %v3457_v26  ;;  %11638 = vmatmul.mubr.msk.f32.gmra.mxu1 %vm556_vm1, %v3457_v26  ;;  %v3589_v26 = vld [vmem:[#allocation2 + $0x200] sm:$0xff] }
 0x2e2   :  { %11623 = vmatprep.mubr.msk.f32.mxu0 %vm556_vm1, %v3458_v42  ;;  %11640 = vmatprep.mubr.msk.f32.mxu1 %vm556_vm1, %v3458_v42  ;;  %v3800_v42 = vld [vmem:[#allocation2 + $0x4e8] sm:$0xff] }
 0x2e3   :  { %11646 = vmatpush3.msra.mxu0 %v14683_v63  ;;  %11663 = vmatpush3.msra.mxu1 %v14689_v33  ;;  %v3586_v63 = vld [vmem:[#allocation2 + $0x1e8] sm:$0xff] }
 0x2e4   :  { %11647 = vmatprep.subr.mxu0 %v14699_v34  ;;  %11664 = vmatprep.subr.mxu1 %v14705_v35 }
 0x2e5   :  { %11624 = vmatmul.mubr.msk.f32.gmra.mxu0 %vm556_vm1, %v3459_v43  ;;  %11641 = vmatmul.mubr.msk.f32.gmra.mxu1 %vm556_vm1, %v3459_v43 }
 0x2e6   :  { %11648 = vmatpush3.msra.mxu0 %v14699_v34  ;;  %11665 = vmatpush3.msra.mxu1 %v14705_v35 }
 0x2e7   :  { %11649 = vmatprep.subr.mxu0 %v14713_v36  ;;  %11666 = vmatprep.subr.mxu1 %v14719_v37 }
 0x2e8   :  { %11650 = vmatpush3.msra.mxu0 %v14713_v36  ;;  %11667 = vmatpush3.msra.mxu1 %v14719_v37 }
 0x2e9   :  { %11677 = vmatprep.subr.mxu0 %v14597_v5  ;;  %11694 = vmatprep.subr.mxu1 %v14603_v16  ;;  %v3463_v5 = vld [vmem:[#allocation2 + $0x78] sm:$0xff] }
 0x386   :  { %v11585_v32 = vpop.f32.mrf.mxu0  ;;  %v11602_v33 = vpop.f32.mrf.mxu1 }
 0x387   :  { %v3580_v44 = vadd.f32 %v11585_v32, %v3461_v31  ;;  %v3687_v34 = vadd.f32 %v11602_v33, %v3586_v63  ;;  %v3693_v33 = vld [vmem:[#allocation2 + $0x368] sm:$0xff] }
 0x388   :  { %v3550_v35 = vpop.f32.mrf.mxu0  ;;  %v3657_v47 = vpop.f32.mrf.mxu1 }
 0x389   :  { %v10101_v48 = vmul.f32 -1.442695, %v3580_v44  ;;  %v10095_v50 = vmul.f32 -1.442695, %v3687_v34  ;;  %v3579_v51 = vadd.f32 %v3550_v35, %v3460_v45  ;;  %v3686_v36 = vadd.f32 %v3657_v47, %v3585_v46  ;;  %v3799_v34 = vld [vmem:[#allocation2 + $0x4e0] sm:$0xff] }
 0x38b   :  { %12558 = vpow2.f32 %v10101_v48  ;;  %v10100_v37 = vmul.f32 -1.442695, %v3579_v51  ;;  %v10094_v52 = vmul.f32 -1.442695, %v3686_v36  ;;  %v3692_v48 = vld [vmem:[#allocation2 + $0x360] sm:$0xff] }
 0x38c   :  { %12560 = vpow2.f32 %v10095_v50 }
 0x38d   :  { %12562 = vpow2.f32 %v10100_v37 }
 0x38e   :  { %12564 = vpow2.f32 %v10094_v52  ;;  %v3802_v52 = vld [vmem:[#allocation2 + $0x4f8] sm:$0xff] }
 0x393   :  { %v11588_v16 = vpop.f32.mrf.mxu0  ;;  %v11605_v21 = vpop.f32.mrf.mxu1 }
 0x394   :  { %v3582_v53 = vadd.f32 %v11588_v16, %v3463_v5  ;;  %v3689_v54 = vadd.f32 %v11605_v21, %v3588_v40  ;;  %v3801_v21 = vld [vmem:[#allocation2 + $0x4f0] sm:$0xff] }
 0x395   :  { %v3560_v56 = vpop.f32.mrf.mxu0  ;;  %v3667_v57 = vpop.f32.mrf.mxu1 }
 0x396   :  { %v10103_v58 = vmul.f32 -1.442695, %v3582_v53  ;;  %v10097_v7 = vmul.f32 -1.442695, %v3689_v54  ;;  %v3581_v59 = vadd.f32 %v3560_v56, %v3462_v55  ;;  %v3688_v8 = vadd.f32 %v3667_v57, %v3587_v61  ;;  %v3695_v55 = vld [vmem:[#allocation2 + $0x378] sm:$0xff] }
 0x398   :  { %v12559_v9 = vpop.eup %12558  ;;  %12566 = vpow2.f32 %v10103_v58  ;;  %v10102_v62 = vmul.f32 -1.442695, %v3581_v59  ;;  %v10096_v23 = vmul.f32 -1.442695, %v3688_v8 }
 0x399   :  { %v12561_v10 = vpop.eup %12560  ;;  %v3967_v3 = vadd.f32 1.0, %v12559_v9  ;;  %12568 = vpow2.f32 %v10097_v7  ;;  %v11591_v0 = vpop.f32.mrf.mxu0 }
 0x39a   :  { %v11608_v1 = vpop.f32.mrf.mxu1  ;;  %v12563_v13 = vpop.eup %12562  ;;  %v3925_v60 = vadd.f32 1.0, %v12561_v10  ;;  %12570 = vpow2.f32 %v10102_v62  ;;  %v3584_v14 = vadd.f32 %v11591_v0, %v3465_v11  ;;  %v3694_v62 = vld [vmem:[#allocation2 + $0x370] sm:$0xff] }
 0x39b   :  { %v3691_v17 = vadd.f32 %v11608_v1, %v3590_v12  ;;  %v12565_v18 = vpop.eup %12564  ;;  %12572 = vrcp.f32 %v3967_v3  ;;  %v3966_v6 = vadd.f32 1.0, %v12563_v13  ;;  %v3570_v4 = vpop.f32.mrf.mxu0 }
 0x39c   :  { %v3677_v20 = vpop.f32.mrf.mxu1  ;;  %12574 = vrcp.f32 %v3925_v60  ;;  %v3924_v22 = vadd.f32 1.0, %v12565_v18  ;;  %v10105_v25 = vmul.f32 -1.442695, %v3584_v14  ;;  %v3583_v28 = vadd.f32 %v3570_v4, %v3464_v38 }
 0x39d   :  { %12576 = vrcp.f32 %v3966_v6  ;;  %v10099_v27 = vmul.f32 -1.442695, %v3691_v17  ;;  %v3690_v30 = vadd.f32 %v3677_v20, %v3589_v26  ;;  %v11619_v39 = vpop.f32.mrf.mxu0  ;;  %v3697_v20 = vld [vmem:[#allocation2 + $0x388] sm:$0xff] }
 0x39e   :  { %v11636_v43 = vpop.f32.mrf.mxu1  ;;  %12578 = vrcp.f32 %v3924_v22  ;;  %v10104_v32 = vmul.f32 -1.442695, %v3583_v28  ;;  %v3794_v35 = vadd.f32 %v11619_v39, %v3693_v33 }
 0x39f   :  { %v3901_v31 = vadd.f32 %v11636_v43, %v3800_v42  ;;  %12580 = vpow2.f32 %v10096_v23  ;;  %v10098_v63 = vmul.f32 -1.442695, %v3690_v30  ;;  %v3764_v44 = vpop.f32.mrf.mxu0 }
 0x3a0   :  { %v3871_v45 = vpop.f32.mrf.mxu1  ;;  %12582 = vpow2.f32 %v10105_v25  ;;  %v3793_v51 = vadd.f32 %v3764_v44, %v3692_v48 }
 0x3a1   :  { %v3900_v46 = vadd.f32 %v3871_v45, %v3799_v34  ;;  %12584 = vpow2.f32 %v10099_v27  ;;  %v10107_v47 = vmul.f32 -1.442695, %v3901_v31  ;;  %v11622_v36 = vpop.f32.mrf.mxu0  ;;  %v3804_v27 = vld [vmem:[#allocation2 + $0x508] sm:$0xff] }
 0x3a2   :  { %v11639_v50 = vpop.f32.mrf.mxu1  ;;  %12586 = vpow2.f32 %v10104_v32  ;;  %v3796_v59 = vadd.f32 %v11622_v36, %v3695_v55 }
 0x3a3   :  { %12588 = vpow2.f32 %v10098_v63  ;;  %v10106_v37 = vmul.f32 -1.442695, %v3900_v46  ;;  %v3903_v16 = vadd.f32 %v11639_v50, %v3802_v52  ;;  %v3774_v56 = vpop.f32.mrf.mxu0  ;;  %v3803_v63 = vld [vmem:[#allocation2 + $0x500] sm:$0xff] }
 0x3a4   :  { %v3881_v5 = vpop.f32.mrf.mxu1  ;;  %12590 = vtanh.f32 %v3794_v35  ;;  %v3795_v3 = vadd.f32 %v3774_v56, %v3694_v62 }
 0x3a5   :  { %v12567_v40 = vpop.eup %12566  ;;  %12592 = vpow2.f32 %v10107_v47  ;;  %v3902_v57 = vadd.f32 %v3881_v5, %v3801_v21  ;;  %v10109_v9 = vmul.f32 -1.442695, %v3903_v16  ;;  %v11625_v17 = vpop.f32.mrf.mxu0 }
 0x3a6   :  { %v12569_v53 = vpop.eup %12568  ;;  %v3969_v54 = vadd.f32 1.0, %v12567_v40  ;;  %12594 = vtanh.f32 %v3793_v51  ;;  %v11642_v13 = vpop.f32.mrf.mxu1  ;;  %v3798_v26 = vadd.f32 %v11625_v17, %v3697_v20  ;;  %v3696_v51 = vld [vmem:[#allocation2 + $0x380] sm:$0xff] }
 0x3a7   :  { %v12571_v58 = vpop.eup %12570  ;;  %v3927_v7 = vadd.f32 1.0, %v12569_v53  ;;  %12596 = vpow2.f32 %v10106_v37  ;;  %v10108_v0 = vmul.f32 -1.442695, %v3902_v57  ;;  %v3905_v42 = vadd.f32 %v11642_v13, %v3804_v27  ;;  %v3784_v34 = vpop.f32.mrf.mxu0  ;;  %v14862_v27 = vld [vmem:[%s16040_s3 + $0x70] sm:$0xff] }
 0x3a8   :  { %v12573_v61 = vpop.eup %12572  ;;  %12598 = vrcp.f32 %v3969_v54  ;;  %v3968_v8 = vadd.f32 1.0, %v12571_v58  ;;  %v3891_v28 = vpop.f32.mrf.mxu1  ;;  %v3797_v37 = vadd.f32 %v3784_v34, %v3696_v51  ;;  %v14903_v34 = vld [vmem:[%s16040_s3 + $0x18] sm:$0xff] }
 0x3a9   :  { %v12575_v10 = vpop.eup %12574  ;;  %12600 = vrcp.f32 %v3927_v7  ;;  %v3904_v45 = vadd.f32 %v3891_v28, %v3803_v63  ;;  %v10111_v50 = vmul.f32 -1.442695, %v3905_v42  ;;  %v14877_v42 = vld [vmem:[%s16040_s3 + $0x68] sm:$0xff]  ;;  %v14885_v63 = vld [vmem:[%s16040_s3 + $0x40] sm:$0xff] }
 0x3aa   :  { %v12577_v11 = vpop.eup %12576  ;;  %12602 = vrcp.f32 %v3968_v8  ;;  %v3943_v38 = vmul.f32 %v12575_v10, %v14727_v41 }
 0x3ab   :  { %v12579_v12 = vpop.eup %12578  ;;  %12604 = vtanh.f32 %v3796_v59  ;;  %v10110_v16 = vmul.f32 -1.442695, %v3904_v45  ;;  %v14909_v45 = vld [vmem:[%s16040_s3 + $0x38] sm:$0xff] }
 0x3ac   :  { %v12581_v1 = vpop.eup %12580  ;;  %12606 = vpow2.f32 %v10109_v9  ;;  %v3942_v32 = vmul.f32 %v12579_v12, %v14731_v15 }
 0x3ad   :  { %v12583_v60 = vpop.eup %12582  ;;  %v3926_v14 = vadd.f32 1.0, %v12581_v1  ;;  %12608 = vtanh.f32 %v3795_v3 }
 0x3ae   :  { %v12585_v18 = vpop.eup %12584  ;;  %v3971_v6 = vadd.f32 1.0, %v12583_v60  ;;  %12610 = vpow2.f32 %v10108_v0 }
 0x3af   :  { %v12587_v23 = vpop.eup %12586  ;;  %12612 = vrcp.f32 %v3926_v14  ;;  %v3929_v4 = vadd.f32 1.0, %v12585_v18 }
 0x3b0   :  { %v12589_v22 = vpop.eup %12588  ;;  %12614 = vrcp.f32 %v3971_v6  ;;  %v3970_v25 = vadd.f32 1.0, %v12587_v23 }
 0x3b1   :  { %v12591_v30 = vpop.eup %12590  ;;  %12616 = vrcp.f32 %v3929_v4  ;;  %v3928_v39 = vadd.f32 1.0, %v12589_v22 }
 0x3b2   :  { %v12593_v43 = vpop.eup %12592  ;;  %12618 = vrcp.f32 %v3970_v25  ;;  %v3991_v31 = vmul.f32 %v12591_v30, %v12573_v61  ;;  %v14844_v25 = vld [vmem:[%s16040_s3 + $0x58] sm:$0xff] }
 0x3b3   :  { %v12595_v33 = vpop.eup %12594  ;;  %12620 = vrcp.f32 %v3928_v39  ;;  %v4021_v44 = vadd.f32 1.0, %v12593_v43  ;;  %v14871_v39 = vld [vmem:[%s16040_s3 + $0x48] sm:$0xff] }
 0x3b4   :  { %v12597_v35 = vpop.eup %12596  ;;  %v14808_v41 = vadd.f32 %v3991_v31, %v3943_v38  ;;  %v3990_v46 = vmul.f32 %v12595_v33, %v12577_v11  ;;  %12622 = vtanh.f32 %v3798_v26  ;;  %v14850_v38 = vld [vmem:[%s16040_s3 + $0x78] sm:$0xff]  ;;  %v14856_v26 = vld [vmem:[%s16040_s3 + $0x50] sm:$0xff]  ;;  %v14891_v33 = vld [vmem:[%s16040_s3 + $0x60] sm:$0xff] }
 0x3b5   :  { %v12599_v47 = vpop.eup %12598  ;;  %12624 = vrcp.f32 %v4021_v44  ;;  %v4020_v48 = vadd.f32 1.0, %v12597_v35 }
 0x3b6   :  { %v12601_v36 = vpop.eup %12600  ;;  %12626 = vtanh.f32 %v14808_v41  ;;  %v14811_v15 = vadd.f32 %v3990_v46, %v3942_v32 }
 0x3b7   :  { %v12603_v52 = vpop.eup %12602  ;;  %12628 = vrcp.f32 %v4020_v48  ;;  %v3945_v5 = vmul.f32 %v12601_v36, %v14735_v29  ;;  %v14931_v36 = vld [vmem:[%s16040_s3 + $0x10] sm:$0xff] }
 0x3b8   :  { %v12605_v40 = vpop.eup %12604  ;;  %12630 = vtanh.f32 %v14811_v15 }
 0x3b9   :  { %v12607_v21 = vpop.eup %12606  ;;  %v3993_v53 = vmul.f32 %v12605_v40, %v12599_v47  ;;  %12632 = vpow2.f32 %v10111_v50  ;;  %v14971_v40 = vld [vmem:[%s16040_s3 + $0x20] sm:$0xff] }
 0x3ba   :  { %v12609_v54 = vpop.eup %12608  ;;  %12634 = vtanh.f32 %v3797_v37  ;;  %v4023_v8 = vadd.f32 1.0, %v12607_v21  ;;  %v14937_v37 = vld [vmem:[%s16040_s3 + $0x30] sm:$0xff]  ;;  %v4051_v21 = vld [vmem:[#allocation2 + $0x98] sm:$0xff] }
 0x3bb   :  { %v12611_v55 = vpop.eup %12610  ;;  %v14815_v56 = vadd.f32 %v3993_v53, %v3945_v5  ;;  %v3992_v57 = vmul.f32 %v12609_v54, %v12603_v52  ;;  %12636 = vpow2.f32 %v10110_v16  ;;  %v14949_v52 = vld [vmem:[%s16040_s3 + $0x8] sm:$0xff]  ;;  %v14965_v16 = vld [vmem:[%s16040_s3] sm:$0xff]  ;;  %v4176_v54 = vld [vmem:[#allocation2 + $0x218] sm:$0xff] }
 0x3bc   :  { %v12613_v58 = vpop.eup %12612  ;;  %v4022_v7 = vadd.f32 1.0, %v12611_v55  ;;  %v14955_v5 = vld [vmem:[%s16040_s3 + $0x28] sm:$0xff] }
 0x3bd   :  { %v12615_v59 = vpop.eup %12614  ;;  %v3944_v61 = vmul.f32 %v12613_v58, %v14740_v49  ;;  %12638 = vtanh.f32 %v14815_v56 }
 0x3be   :  { %v12617_v29 = vpop.eup %12616  ;;  %12640 = vrcp.f32 %v4022_v7  ;;  %v4050_v7 = vld [vmem:[#allocation2 + $0x90] sm:$0xff] }
 0x3bf   :  { %v12619_v9 = vpop.eup %12618  ;;  %v14819_v62 = vadd.f32 %v3992_v57, %v3944_v61  ;;  %v3947_v0 = vmul.f32 %v12617_v29, %v14743_v19  ;;  %v4175_v61 = vld [vmem:[#allocation2 + $0x210] sm:$0xff] }
 0x3c0   :  { %v12621_v10 = vpop.eup %12620 }
 0x3c1   :  { %v12623_v3 = vpop.eup %12622  ;;  %12642 = vtanh.f32 %v14819_v62  ;;  %v3946_v17 = vmul.f32 %v12621_v10, %v14749_v24 }
 0x3c2   :  { %v12625_v11 = vpop.eup %12624  ;;  %12644 = vrcp.f32 %v4023_v8  ;;  %v3995_v12 = vmul.f32 %v12623_v3, %v12615_v59 }
 0x3c3   :  { %v12627_v1 = vpop.eup %12626 }
 0x3c4   :  { %v12629_v13 = vpop.eup %12628  ;;  %v14823_v14 = vadd.f32 %v3995_v12, %v3947_v0  ;;  %v14828_v23 = vmul.f32 %v12627_v1, %v12625_v11  ;;  %v4053_v12 = vld [vmem:[#allocation2 + $0xa8] sm:$0xff] }
 0x3c5   :  { %v12631_v49 = vpop.eup %12630 }
 0x3c6   :  { %v12633_v60 = vpop.eup %12632  ;;  %v14826_v18 = vmul.f32 %v12631_v49, %v12629_v13  ;;  %12646 = vtanh.f32 %v14823_v14  ;;  %v4178_v13 = vld [vmem:[#allocation2 + $0x228] sm:$0xff] }
 0x3c7   :  { %v12635_v6 = vpop.eup %12634  ;;  %v4025_v19 = vadd.f32 1.0, %v12633_v60 }
 0x3c8   :  { %v12637_v4 = vpop.eup %12636  ;;  %v3994_v20 = vmul.f32 %v12635_v6, %v12619_v9  ;;  %11651 = vmatprep.mubr.msk.f32.mxu0 %vm556_vm1, %v14826_v18  ;;  %11668 = vmatprep.mubr.msk.f32.mxu1 %vm556_vm1, %v14826_v18 }
 0x3c9   :  { %v4024_v22 = vadd.f32 1.0, %v12637_v4  ;;  %11652 = vmatmul.mubr.msk.f32.vlgmr.msra.gmra.mxu0 %vm556_vm1, %v14828_v23  ;;  %11669 = vmatmul.mubr.msk.f32.vlgmr.msra.gmra.mxu1 %vm556_vm1, %v14828_v23 }
 0x3ca   :  { %v14839_v24 = vadd.f32 %v3994_v20, %v3946_v17  ;;  %11678 = vmatpush3.msra.mxu0 %v14844_v25  ;;  %11695 = vmatpush3.msra.mxu1 %v14850_v38  ;;  %v12639_v28 = vpop.eup %12638 }
 0x3cb   :  { %12648 = vrcp.f32 %v4024_v22  ;;  %11679 = vmatprep.subr.mxu0 %v14856_v26  ;;  %11696 = vmatprep.subr.mxu1 %v14862_v27  ;;  %v12641_v30 = vpop.eup %12640 }
 0x3cc   :  { %12650 = vtanh.f32 %v14839_v24  ;;  %11680 = vmatpush3.msra.mxu0 %v14856_v26  ;;  %11697 = vmatpush3.msra.mxu1 %v14862_v27 }
 0x3cd   :  { %12652 = vrcp.f32 %v4025_v19  ;;  %11681 = vmatprep.subr.mxu0 %v14871_v39  ;;  %11698 = vmatprep.subr.mxu1 %v14877_v42 }
 0x3ce   :  { %v12643_v43 = vpop.eup %12642  ;;  %11682 = vmatpush3.msra.mxu0 %v14871_v39  ;;  %11699 = vmatpush3.msra.mxu1 %v14877_v42 }
 0x3cf   :  { %v12645_v31 = vpop.eup %12644  ;;  %v4046_v32 = vmul.f32 %v12643_v43, %v12641_v30  ;;  %11683 = vmatprep.subr.mxu0 %v14885_v63  ;;  %11700 = vmatprep.subr.mxu1 %v14891_v33 }
 0x3d0   :  { %v4047_v44 = vmul.f32 %v12645_v31, %v12639_v28  ;;  %11684 = vmatpush3.msra.mxu0 %v14885_v63  ;;  %11701 = vmatpush3.msra.mxu1 %v14891_v33 }
 0x3d1   :  { %11654 = vmatprep.mubr.msk.f32.mxu0 %vm556_vm1, %v4046_v32  ;;  %11671 = vmatprep.mubr.msk.f32.mxu1 %vm556_vm1, %v4046_v32 }
 0x3d2   :  { %11655 = vmatmul.mubr.msk.f32.gmra.mxu0 %vm556_vm1, %v4047_v44  ;;  %11672 = vmatmul.mubr.msk.f32.gmra.mxu1 %vm556_vm1, %v4047_v44 }
 0x3d3   :  { %11711 = vmatprep.subr.mxu0 %v14903_v34  ;;  %11728 = vmatprep.subr.mxu1 %v14909_v45  ;;  %v12647_v35 = vpop.eup %12646 }
 0x3d8   :  { %v12649_v46 = vpop.eup %12648 }
 0x3d9   :  { %v12651_v47 = vpop.eup %12650 }
 0x3da   :  { %v12653_v48 = vpop.eup %12652  ;;  %v4048_v50 = vmul.f32 %v12651_v47, %v12649_v46  ;;  %v4055_v47 = vld [vmem:[#allocation2 + $0xb8] sm:$0xff] }
 0x3db   :  { %v4049_v51 = vmul.f32 %v12653_v48, %v12647_v35 }
 0x3dc   :  { %11657 = vmatprep.mubr.msk.f32.mxu0 %vm556_vm1, %v4048_v50  ;;  %11674 = vmatprep.mubr.msk.f32.mxu1 %vm556_vm1, %v4048_v50 }
 0x3dd   :  { %11658 = vmatmul.mubr.msk.f32.gmra.mxu0 %vm556_vm1, %v4049_v51  ;;  %11675 = vmatmul.mubr.msk.f32.gmra.mxu1 %vm556_vm1, %v4049_v51 }
 0x3de   :  { %11685 = vmatprep.mubr.msk.f32.mxu0 %vm556_vm1, %v14826_v18  ;;  %11702 = vmatprep.mubr.msk.f32.mxu1 %vm556_vm1, %v14826_v18  ;;  %v4052_v18 = vld [vmem:[#allocation2 + $0xa0] sm:$0xff] }
 0x3e1   :  { %11686 = vmatmul.mubr.msk.f32.vlgmr.msra.gmra.mxu0 %vm556_vm1, %v14828_v23  ;;  %11703 = vmatmul.mubr.msk.f32.vlgmr.msra.gmra.mxu1 %vm556_vm1, %v14828_v23  ;;  %v4177_v23 = vld [vmem:[#allocation2 + $0x220] sm:$0xff] }
 0x3e2   :  { %11688 = vmatprep.mubr.msk.f32.mxu0 %vm556_vm1, %v4046_v32  ;;  %11705 = vmatprep.mubr.msk.f32.mxu1 %vm556_vm1, %v4046_v32 }
 0x3e3   :  { %11712 = vmatpush3.msra.mxu0 %v14903_v34  ;;  %11729 = vmatpush3.msra.mxu1 %v14909_v45 }
 0x3e4   :  { %11713 = vmatprep.subr.mxu0 %v14931_v36  ;;  %11730 = vmatprep.subr.mxu1 %v14937_v37 }
 0x3e5   :  { %11689 = vmatmul.mubr.msk.f32.gmra.mxu0 %vm556_vm1, %v4047_v44  ;;  %11706 = vmatmul.mubr.msk.f32.gmra.mxu1 %vm556_vm1, %v4047_v44 }
 0x3e6   :  { %11691 = vmatprep.mubr.msk.f32.mxu0 %vm556_vm1, %v4048_v50  ;;  %11708 = vmatprep.mubr.msk.f32.mxu1 %vm556_vm1, %v4048_v50  ;;  %v4180_v50 = vld [vmem:[#allocation2 + $0x238] sm:$0xff] }
 0x3e7   :  { %11714 = vmatpush3.msra.mxu0 %v14931_v36  ;;  %11731 = vmatpush3.msra.mxu1 %v14937_v37 }
 0x3e8   :  { %11715 = vmatprep.subr.mxu0 %v14949_v52  ;;  %11732 = vmatprep.subr.mxu1 %v14955_v5 }
 0x3e9   :  { %11692 = vmatmul.mubr.msk.f32.gmra.mxu0 %vm556_vm1, %v4049_v51  ;;  %11709 = vmatmul.mubr.msk.f32.gmra.mxu1 %vm556_vm1, %v4049_v51 }
 0x3ea   :  { %11716 = vmatpush3.msra.mxu0 %v14949_v52  ;;  %11733 = vmatpush3.msra.mxu1 %v14955_v5 }
 0x3eb   :  { %11717 = vmatprep.subr.mxu0 %v14965_v16  ;;  %11734 = vmatprep.subr.mxu1 %v14971_v40 }
 0x3ec   :  { %11718 = vmatpush3.msra.mxu0 %v14965_v16  ;;  %11735 = vmatpush3.msra.mxu1 %v14971_v40 }
 0x3ed   :  { %11745 = vmatprep.subr.mxu0 %v14844_v25  ;;  %11762 = vmatprep.subr.mxu1 %v14850_v38 }
 0x489   :  { %v11653_v53 = vpop.f32.mrf.mxu0  ;;  %v11670_v55 = vpop.f32.mrf.mxu1 }
 0x48a   :  { %v4170_v57 = vadd.f32 %v11653_v53, %v4051_v21  ;;  %v4277_v58 = vadd.f32 %v11670_v55, %v4176_v54 }
 0x48b   :  { %v4140_v59 = vpop.f32.mrf.mxu0  ;;  %v4247_v29 = vpop.f32.mrf.mxu1 }
 0x48c   :  { %v10143_v8 = vmul.f32 -1.442695, %v4170_v57  ;;  %v10137_v9 = vmul.f32 -1.442695, %v4277_v58  ;;  %v4169_v10 = vadd.f32 %v4140_v59, %v4050_v7  ;;  %v4276_v3 = vadd.f32 %v4247_v29, %v4175_v61  ;;  %v4054_v58 = vld [vmem:[#allocation2 + $0xb0] sm:$0xff] }
 0x48e   :  { %12654 = vpow2.f32 %v10143_v8  ;;  %v10142_v11 = vmul.f32 -1.442695, %v4169_v10  ;;  %v10136_v0 = vmul.f32 -1.442695, %v4276_v3  ;;  %v4283_v3 = vld [vmem:[#allocation2 + $0x398] sm:$0xff] }
 0x48f   :  { %12656 = vpow2.f32 %v10137_v9  ;;  %v4179_v9 = vld [vmem:[#allocation2 + $0x230] sm:$0xff] }
 0x490   :  { %12658 = vpow2.f32 %v10142_v11 }
 0x491   :  { %12660 = vpow2.f32 %v10136_v0 }
 0x492   :  { %v11656_v1 = vpop.f32.mrf.mxu0  ;;  %v11673_v49 = vpop.f32.mrf.mxu1 }
 0x493   :  { %v4172_v60 = vadd.f32 %v11656_v1, %v4053_v12  ;;  %v4279_v17 = vadd.f32 %v11673_v49, %v4178_v13  ;;  %v4390_v13 = vld [vmem:[#allocation2 + $0x518] sm:$0xff] }
 0x494   :  { %v4150_v6 = vpop.f32.mrf.mxu0  ;;  %v4257_v4 = vpop.f32.mrf.mxu1 }
 0x495   :  { %v10145_v20 = vmul.f32 -1.442695, %v4172_v60  ;;  %v10139_v19 = vmul.f32 -1.442695, %v4279_v17  ;;  %v4171_v22 = vadd.f32 %v4150_v6, %v4052_v18  ;;  %v4278_v28 = vadd.f32 %v4257_v4, %v4177_v23  ;;  %v4389_v23 = vld [vmem:[#allocation2 + $0x510] sm:$0xff] }
 0x497   :  { %12662 = vpow2.f32 %v10145_v20  ;;  %v10144_v30 = vmul.f32 -1.442695, %v4171_v22  ;;  %v10138_v43 = vmul.f32 -1.442695, %v4278_v28 }
 0x498   :  { %12664 = vpow2.f32 %v10139_v19 }
 0x499   :  { %12666 = vpow2.f32 %v10144_v30 }
 0x49a   :  { %12668 = vpow2.f32 %v10138_v43 }
 0x49b   :  { %v12655_v31 = vpop.eup %12654 }
 0x49c   :  { %v12657_v32 = vpop.eup %12656  ;;  %v4557_v44 = vadd.f32 1.0, %v12655_v31  ;;  %v4392_v31 = vld [vmem:[#allocation2 + $0x528] sm:$0xff] }
 0x49d   :  { %v12659_v35 = vpop.eup %12658  ;;  %v4515_v46 = vadd.f32 1.0, %v12657_v32  ;;  %v11659_v48 = vpop.f32.mrf.mxu0 }
 0x49e   :  { %v11676_v51 = vpop.f32.mrf.mxu1  ;;  %v12661_v21 = vpop.eup %12660  ;;  %12670 = vrcp.f32 %v4557_v44  ;;  %v4556_v53 = vadd.f32 1.0, %v12659_v35  ;;  %v4174_v54 = vadd.f32 %v11659_v48, %v4055_v47 }
 0x49f   :  { %v4281_v55 = vadd.f32 %v11676_v51, %v4180_v50  ;;  %12672 = vrcp.f32 %v4515_v46  ;;  %v4514_v57 = vadd.f32 1.0, %v12661_v21  ;;  %v4160_v7 = vpop.f32.mrf.mxu0  ;;  %v4282_v46 = vld [vmem:[#allocation2 + $0x390] sm:$0xff]  ;;  %v4391_v21 = vld [vmem:[#allocation2 + $0x520] sm:$0xff] }
 0x4a0   :  { %v4267_v59 = vpop.f32.mrf.mxu1  ;;  %12674 = vrcp.f32 %v4556_v53  ;;  %v10147_v61 = vmul.f32 -1.442695, %v4174_v54  ;;  %v4173_v8 = vadd.f32 %v4160_v7, %v4054_v58  ;;  %v4285_v54 = vld [vmem:[#allocation2 + $0x3a8] sm:$0xff] }
 0x4a1   :  { %v10141_v29 = vmul.f32 -1.442695, %v4281_v55  ;;  %12676 = vrcp.f32 %v4514_v57  ;;  %v4280_v10 = vadd.f32 %v4267_v59, %v4179_v9  ;;  %v11687_v11 = vpop.f32.mrf.mxu0 }
 0x4a2   :  { %v11704_v0 = vpop.f32.mrf.mxu1  ;;  %12678 = vpow2.f32 %v10147_v61  ;;  %v10146_v12 = vmul.f32 -1.442695, %v4173_v8  ;;  %v4384_v1 = vadd.f32 %v11687_v11, %v4283_v3  ;;  %v4284_v61 = vld [vmem:[#allocation2 + $0x3a0] sm:$0xff] }
 0x4a3   :  { %12680 = vpow2.f32 %v10141_v29  ;;  %v10140_v49 = vmul.f32 -1.442695, %v4280_v10  ;;  %v4491_v60 = vadd.f32 %v11704_v0, %v4390_v13  ;;  %v4354_v17 = vpop.f32.mrf.mxu0 }
 0x4a4   :  { %v4461_v18 = vpop.f32.mrf.mxu1  ;;  %v12663_v6 = vpop.eup %12662  ;;  %12682 = vpow2.f32 %v10146_v12  ;;  %v4383_v51 = vadd.f32 %v4354_v17, %v4282_v46 }
 0x4a5   :  { %v12665_v4 = vpop.eup %12664  ;;  %v4559_v20 = vadd.f32 1.0, %v12663_v6  ;;  %12684 = vpow2.f32 %v10140_v49  ;;  %v4490_v19 = vadd.f32 %v4461_v18, %v4389_v23  ;;  %v11690_v22 = vpop.f32.mrf.mxu0  ;;  %v10149_v35 = vmul.f32 -1.442695, %v4491_v60  ;;  %v4287_v23 = vld [vmem:[#allocation2 + $0x3b8] sm:$0xff] }
 0x4a6   :  { %v11707_v28 = vpop.f32.mrf.mxu1  ;;  %v12667_v30 = vpop.eup %12666  ;;  %v4517_v43 = vadd.f32 1.0, %v12665_v4  ;;  %12686 = vtanh.f32 %v4384_v1  ;;  %v4386_v58 = vadd.f32 %v11690_v22, %v4285_v54  ;;  %v4394_v1 = vld [vmem:[#allocation2 + $0x538] sm:$0xff]  ;;  %v4393_v4 = vld [vmem:[#allocation2 + $0x530] sm:$0xff] }
 0x4a7   :  { %v12669_v32 = vpop.eup %12668  ;;  %12688 = vrcp.f32 %v4559_v20  ;;  %v4558_v44 = vadd.f32 1.0, %v12667_v30  ;;  %v4493_v47 = vadd.f32 %v11707_v28, %v4392_v31  ;;  %v10148_v53 = vmul.f32 -1.442695, %v4490_v19  ;;  %v4364_v55 = vpop.f32.mrf.mxu0 }
 0x4a8   :  { %v4471_v48 = vpop.f32.mrf.mxu1  ;;  %12690 = vrcp.f32 %v4517_v43  ;;  %v4516_v50 = vadd.f32 1.0, %v12669_v32  ;;  %v4385_v9 = vadd.f32 %v4364_v55, %v4284_v61 }
 0x4a9   :  { %12692 = vrcp.f32 %v4558_v44  ;;  %v4492_v57 = vadd.f32 %v4471_v48, %v4391_v21  ;;  %v10151_v59 = vmul.f32 -1.442695, %v4493_v47  ;;  %v11693_v0 = vpop.f32.mrf.mxu0  ;;  %v4286_v47 = vld [vmem:[#allocation2 + $0x3b0] sm:$0xff] }
 0x4aa   :  { %12694 = vrcp.f32 %v4516_v50  ;;  %v11710_v29 = vpop.f32.mrf.mxu1  ;;  %v4388_v19 = vadd.f32 %v11693_v0, %v4287_v23 }
 0x4ab   :  { %v12671_v7 = vpop.eup %12670  ;;  %12696 = vpow2.f32 %v10149_v35  ;;  %v10150_v3 = vmul.f32 -1.442695, %v4492_v57  ;;  %v4495_v17 = vadd.f32 %v11710_v29, %v4394_v1  ;;  %v4374_v22 = vpop.f32.mrf.mxu0 }
 0x4ac   :  { %v12673_v8 = vpop.eup %12672  ;;  %12698 = vtanh.f32 %v4383_v51  ;;  %v4481_v13 = vpop.f32.mrf.mxu1  ;;  %v4387_v50 = vadd.f32 %v4374_v22, %v4286_v47 }
 0x4ad   :  { %v12675_v10 = vpop.eup %12674  ;;  %12700 = vpow2.f32 %v10148_v53  ;;  %v4494_v28 = vadd.f32 %v4481_v13, %v4393_v4  ;;  %v4533_v44 = vmul.f32 %v12673_v8, %v14808_v41  ;;  %v10153_v46 = vmul.f32 -1.442695, %v4495_v17 }
 0x4ae   :  { %v12677_v11 = vpop.eup %12676  ;;  %12702 = vtanh.f32 %v4386_v58 }
 0x4af   :  { %v12679_v12 = vpop.eup %12678  ;;  %12704 = vpow2.f32 %v10151_v59  ;;  %v10152_v21 = vmul.f32 -1.442695, %v4494_v28  ;;  %v4532_v57 = vmul.f32 %v12677_v11, %v14811_v15 }
 0x4b0   :  { %v12681_v49 = vpop.eup %12680  ;;  %v4561_v60 = vadd.f32 1.0, %v12679_v12  ;;  %12706 = vtanh.f32 %v4385_v9 }
 0x4b1   :  { %v12683_v18 = vpop.eup %12682  ;;  %v4519_v6 = vadd.f32 1.0, %v12681_v49  ;;  %12708 = vpow2.f32 %v10150_v3 }
 0x4b2   :  { %v12685_v20 = vpop.eup %12684  ;;  %v4560_v43 = vadd.f32 1.0, %v12683_v18 }
 0x4b3   :  { %v12687_v30 = vpop.eup %12686  ;;  %12710 = vrcp.f32 %v4519_v6  ;;  %v4518_v31 = vadd.f32 1.0, %v12685_v20 }
 0x4b4   :  { %v12689_v32 = vpop.eup %12688  ;;  %12712 = vrcp.f32 %v4561_v60  ;;  %v4581_v35 = vmul.f32 %v12687_v30, %v12671_v7 }
 0x4b5   :  { %v12691_v48 = vpop.eup %12690  ;;  %12714 = vrcp.f32 %v4518_v31 }
 0x4b6   :  { %v12693_v51 = vpop.eup %12692  ;;  %12716 = vtanh.f32 %v4388_v19  ;;  %v14979_v55 = vadd.f32 %v4581_v35, %v4533_v44  ;;  %v4535_v59 = vmul.f32 %v12691_v48, %v14815_v56 }
 0x4b7   :  { %v12695_v53 = vpop.eup %12694  ;;  %12718 = vrcp.f32 %v4560_v43 }
 0x4b8   :  { %v12697_v54 = vpop.eup %12696  ;;  %12720 = vpow2.f32 %v10153_v46  ;;  %v4534_v12 = vmul.f32 %v12695_v53, %v14819_v62 }
 0x4b9   :  { %v12699_v58 = vpop.eup %12698  ;;  %12722 = vtanh.f32 %v4387_v50  ;;  %v4611_v29 = vadd.f32 1.0, %v12697_v54 }
 0x4ba   :  { %v12701_v41 = vpop.eup %12700  ;;  %v4580_v7 = vmul.f32 %v12699_v58, %v12675_v10  ;;  %12724 = vpow2.f32 %v10152_v21 }
 0x4bb   :  { %v12703_v61 = vpop.eup %12702  ;;  %v4610_v8 = vadd.f32 1.0, %v12701_v41  ;;  %12726 = vtanh.f32 %v14979_v55 }
 0x4bc   :  { %v12705_v9 = vpop.eup %12704  ;;  %v14984_v3 = vadd.f32 %v4580_v7, %v4532_v57  ;;  %v4583_v0 = vmul.f32 %v12703_v61, %v12689_v32 }
 0x4bd   :  { %v12707_v15 = vpop.eup %12706  ;;  %12728 = vrcp.f32 %v4610_v8  ;;  %v4613_v1 = vadd.f32 1.0, %v12705_v9  ;;  %v4643_v9 = vld [vmem:[#allocation2 + $0xd8] sm:$0xff] }
 0x4be   :  { %v12709_v11 = vpop.eup %12708  ;;  %12730 = vtanh.f32 %v14984_v3  ;;  %v14988_v10 = vadd.f32 %v4583_v0, %v4535_v59  ;;  %v4582_v56 = vmul.f32 %v12707_v15, %v12693_v51  ;;  %v4768_v15 = vld [vmem:[#allocation2 + $0x258] sm:$0xff] }
 0x4bf   :  { %12732 = vrcp.f32 %v4611_v29  ;;  %v4612_v13 = vadd.f32 1.0, %v12709_v11 }
 0x4c0   :  { %v12711_v49 = vpop.eup %12710  ;;  %12734 = vtanh.f32 %v14988_v10  ;;  %v14991_v60 = vadd.f32 %v4582_v56, %v4534_v12  ;;  %v4642_v56 = vld [vmem:[#allocation2 + $0xd0] sm:$0xff] }
 0x4c1   :  { %v12713_v17 = vpop.eup %12712  ;;  %12736 = vrcp.f32 %v4612_v13  ;;  %v4537_v62 = vmul.f32 %v12711_v49, %v14823_v14  ;;  %v4767_v13 = vld [vmem:[#allocation2 + $0x250] sm:$0xff] }
 0x4c2   :  { %v12715_v18 = vpop.eup %12714  ;;  %12738 = vtanh.f32 %v14991_v60 }
 0x4c3   :  { %v12717_v6 = vpop.eup %12716  ;;  %12740 = vrcp.f32 %v4613_v1  ;;  %v4536_v19 = vmul.f32 %v12715_v18, %v14839_v24 }
 0x4c4   :  { %v12719_v23 = vpop.eup %12718  ;;  %v4585_v4 = vmul.f32 %v12717_v6, %v12713_v17 }
 0x4c5   :  { %v12721_v20 = vpop.eup %12720 }
 0x4c6   :  { %v12723_v22 = vpop.eup %12722  ;;  %v14996_v28 = vadd.f32 %v4585_v4, %v4537_v62  ;;  %v4615_v31 = vadd.f32 1.0, %v12721_v20  ;;  %v4645_v20 = vld [vmem:[#allocation2 + $0xe8] sm:$0xff] }
 0x4c7   :  { %v12725_v30 = vpop.eup %12724  ;;  %v4584_v43 = vmul.f32 %v12723_v22, %v12719_v23  ;;  %v4770_v22 = vld [vmem:[#allocation2 + $0x268] sm:$0xff] }
 0x4c8   :  { %v4614_v32 = vadd.f32 1.0, %v12725_v30  ;;  %v12727_v44 = vpop.eup %12726  ;;  %12742 = vtanh.f32 %v14996_v28 }
 0x4c9   :  { %v14999_v35 = vadd.f32 %v4584_v43, %v4536_v19 }
 0x4ca   :  { %v12729_v14 = vpop.eup %12728  ;;  %12744 = vrcp.f32 %v4614_v32  ;;  %v4644_v32 = vld [vmem:[#allocation2 + $0xe0] sm:$0xff] }
 0x4cb   :  { %v12731_v46 = vpop.eup %12730  ;;  %12746 = vtanh.f32 %v14999_v35 }
 0x4cc   :  { %v12733_v47 = vpop.eup %12732  ;;  %12748 = vrcp.f32 %v4615_v31  ;;  %v4634_v24 = vmul.f32 %v12731_v46, %v12729_v14 }
 0x4cd   :  { %v12735_v48 = vpop.eup %12734  ;;  %v4635_v50 = vmul.f32 %v12733_v47, %v12727_v44 }
 0x4ce   :  { %v12737_v51 = vpop.eup %12736  ;;  %11719 = vmatprep.mubr.msk.f32.mxu0 %vm556_vm1, %v4634_v24  ;;  %11736 = vmatprep.mubr.msk.f32.mxu1 %vm556_vm1, %v4634_v24 }
 0x4cf   :  { %v12739_v21 = vpop.eup %12738  ;;  %11720 = vmatmul.mubr.msk.f32.vlgmr.msra.gmra.mxu0 %vm556_vm1, %v4635_v50  ;;  %11737 = vmatmul.mubr.msk.f32.vlgmr.msra.gmra.mxu1 %vm556_vm1, %v4635_v50 }
 0x4d0   :  { %v12741_v53 = vpop.eup %12740  ;;  %v4636_v54 = vmul.f32 %v12739_v21, %v12737_v51  ;;  %11746 = vmatpush3.msra.mxu0 %v14844_v25  ;;  %11763 = vmatpush3.msra.mxu1 %v14850_v38 }
 0x4d1   :  { %v4637_v57 = vmul.f32 %v12741_v53, %v12735_v48  ;;  %11747 = vmatprep.subr.mxu0 %v14856_v26  ;;  %11764 = vmatprep.subr.mxu1 %v14862_v27 }
 0x4d2   :  { %11722 = vmatprep.mubr.msk.f32.mxu0 %vm556_vm1, %v4636_v54  ;;  %11739 = vmatprep.mubr.msk.f32.mxu1 %vm556_vm1, %v4636_v54 }
 0x4d3   :  { %11723 = vmatmul.mubr.msk.f32.gmra.mxu0 %vm556_vm1, %v4637_v57  ;;  %11740 = vmatmul.mubr.msk.f32.gmra.mxu1 %vm556_vm1, %v4637_v57 }
 0x4d4   :  { %11748 = vmatpush3.msra.mxu0 %v14856_v26  ;;  %11765 = vmatpush3.msra.mxu1 %v14862_v27 }
 0x4d5   :  { %11749 = vmatprep.subr.mxu0 %v14871_v39  ;;  %11766 = vmatprep.subr.mxu1 %v14877_v42  ;;  %v12743_v58 = vpop.eup %12742 }
 0x4d6   :  { %11750 = vmatpush3.msra.mxu0 %v14871_v39  ;;  %11767 = vmatpush3.msra.mxu1 %v14877_v42  ;;  %v4641_v39 = vld [vmem:[#allocation2 + $0xc8] sm:$0xff] }
 0x4d7   :  { %v12745_v41 = vpop.eup %12744  ;;  %11751 = vmatprep.subr.mxu0 %v14885_v63  ;;  %11768 = vmatprep.subr.mxu1 %v14891_v33 }
 0x4d8   :  { %v12747_v7 = vpop.eup %12746  ;;  %11752 = vmatpush3.msra.mxu0 %v14885_v63  ;;  %11769 = vmatpush3.msra.mxu1 %v14891_v33  ;;  %v4766_v63 = vld [vmem:[#allocation2 + $0x248] sm:$0xff] }
 0x4d9   :  { %v12749_v26 = vpop.eup %12748  ;;  %v4638_v27 = vmul.f32 %v12747_v7, %v12745_v41  ;;  %11779 = vmatprep.subr.mxu0 %v14903_v34  ;;  %11796 = vmatprep.subr.mxu1 %v14909_v45  ;;  %v4769_v7 = vld [vmem:[#allocation2 + $0x260] sm:$0xff] }
 0x4da   :  { %v4639_v59 = vmul.f32 %v12749_v26, %v12743_v58 }
 0x4db   :  { %11725 = vmatprep.mubr.msk.f32.mxu0 %vm556_vm1, %v4638_v27  ;;  %11742 = vmatprep.mubr.msk.f32.mxu1 %vm556_vm1, %v4638_v27 }
 0x4dc   :  { %11726 = vmatmul.mubr.msk.f32.gmra.mxu0 %vm556_vm1, %v4639_v59  ;;  %11743 = vmatmul.mubr.msk.f32.gmra.mxu1 %vm556_vm1, %v4639_v59 }
 0x4dd   :  { %11753 = vmatprep.mubr.msk.f32.mxu0 %vm556_vm1, %v4634_v24  ;;  %11770 = vmatprep.mubr.msk.f32.mxu1 %vm556_vm1, %v4634_v24 }
 0x4e0   :  { %11754 = vmatmul.mubr.msk.f32.vlgmr.msra.gmra.mxu0 %vm556_vm1, %v4635_v50  ;;  %11771 = vmatmul.mubr.msk.f32.vlgmr.msra.gmra.mxu1 %vm556_vm1, %v4635_v50 }
 0x4e1   :  { %11756 = vmatprep.mubr.msk.f32.mxu0 %vm556_vm1, %v4636_v54  ;;  %11773 = vmatprep.mubr.msk.f32.mxu1 %vm556_vm1, %v4636_v54 }
 0x4e2   :  { %11780 = vmatpush3.msra.mxu0 %v14903_v34  ;;  %11797 = vmatpush3.msra.mxu1 %v14909_v45 }
 0x4e3   :  { %11781 = vmatprep.subr.mxu0 %v14931_v36  ;;  %11798 = vmatprep.subr.mxu1 %v14937_v37 }
 0x4e4   :  { %11757 = vmatmul.mubr.msk.f32.gmra.mxu0 %vm556_vm1, %v4637_v57  ;;  %11774 = vmatmul.mubr.msk.f32.gmra.mxu1 %vm556_vm1, %v4637_v57 }
 0x4e5   :  { %11759 = vmatprep.mubr.msk.f32.mxu0 %vm556_vm1, %v4638_v27  ;;  %11776 = vmatprep.mubr.msk.f32.mxu1 %vm556_vm1, %v4638_v27 }
 0x4e6   :  { %11782 = vmatpush3.msra.mxu0 %v14931_v36  ;;  %11799 = vmatpush3.msra.mxu1 %v14937_v37  ;;  %v4640_v36 = vld [vmem:[#allocation2 + $0xc0] sm:$0xff] }
 0x4e7   :  { %11783 = vmatprep.subr.mxu0 %v14949_v52  ;;  %11800 = vmatprep.subr.mxu1 %v14955_v5 }
 0x4e8   :  { %11760 = vmatmul.mubr.msk.f32.gmra.mxu0 %vm556_vm1, %v4639_v59  ;;  %11777 = vmatmul.mubr.msk.f32.gmra.mxu1 %vm556_vm1, %v4639_v59 }
 0x4e9   :  { %11784 = vmatpush3.msra.mxu0 %v14949_v52  ;;  %11801 = vmatpush3.msra.mxu1 %v14955_v5  ;;  %v4765_v52 = vld [vmem:[#allocation2 + $0x240] sm:$0xff] }
 0x4ea   :  { %11785 = vmatprep.subr.mxu0 %v14965_v16  ;;  %11802 = vmatprep.subr.mxu1 %v14971_v40 }
 0x4eb   :  { %11786 = vmatpush3.msra.mxu0 %v14965_v16  ;;  %11803 = vmatpush3.msra.mxu1 %v14971_v40 }
 0x4ec   :  { %11813 = vmatprep.subr.mxu0 %v14844_v25  ;;  %11830 = vmatprep.subr.mxu1 %v14850_v38 }
 0x58f   :  { %v11721_v42 = vpop.f32.mrf.mxu0  ;;  %v11738_v33 = vpop.f32.mrf.mxu1 }
 0x590   :  { %v4760_v34 = vadd.f32 %v11721_v42, %v4641_v39  ;;  %v4867_v45 = vadd.f32 %v11738_v33, %v4766_v63 }
 0x591   :  { %v4730_v37 = vpop.f32.mrf.mxu0  ;;  %v4837_v5 = vpop.f32.mrf.mxu1 }
 0x592   :  { %v10185_v61 = vmul.f32 -1.442695, %v4760_v34  ;;  %v10179_v29 = vmul.f32 -1.442695, %v4867_v45  ;;  %v4759_v8 = vadd.f32 %v4730_v37, %v4640_v36  ;;  %v4866_v16 = vadd.f32 %v4837_v5, %v4765_v52  ;;  %v4980_v34 = vld [vmem:[#allocation2 + $0x548] sm:$0xff] }
 0x593   :  { %v11724_v40 = vpop.f32.mrf.mxu0  ;;  %v11741_v0 = vpop.f32.mrf.mxu1 }
 0x594   :  { %12750 = vpow2.f32 %v10185_v61  ;;  %v10184_v25 = vmul.f32 -1.442695, %v4759_v8  ;;  %v10178_v38 = vmul.f32 -1.442695, %v4866_v16  ;;  %v4762_v12 = vadd.f32 %v11724_v40, %v4643_v9  ;;  %v4979_v61 = vld [vmem:[#allocation2 + $0x540] sm:$0xff]  ;;  %v4873_v40 = vld [vmem:[#allocation2 + $0x3c8] sm:$0xff] }
 0x595   :  { %12752 = vpow2.f32 %v10179_v29  ;;  %v4869_v11 = vadd.f32 %v11741_v0, %v4768_v15  ;;  %v4740_v1 = vpop.f32.mrf.mxu0  ;;  %v4847_v49 = vpop.f32.mrf.mxu1 }
 0x596   :  { %12754 = vpow2.f32 %v10184_v25  ;;  %v10187_v17 = vmul.f32 -1.442695, %v4762_v12  ;;  %v4761_v18 = vadd.f32 %v4740_v1, %v4642_v56  ;;  %v4868_v62 = vadd.f32 %v4847_v49, %v4767_v13  ;;  %v4982_v49 = vld [vmem:[#allocation2 + $0x558] sm:$0xff] }
 0x597   :  { %12756 = vpow2.f32 %v10178_v38  ;;  %v10181_v6 = vmul.f32 -1.442695, %v4869_v11  ;;  %v4872_v11 = vld [vmem:[#allocation2 + $0x3c0] sm:$0xff] }
 0x598   :  { %12758 = vpow2.f32 %v10187_v17  ;;  %v10186_v23 = vmul.f32 -1.442695, %v4761_v18  ;;  %v10180_v4 = vmul.f32 -1.442695, %v4868_v62 }
 0x599   :  { %12760 = vpow2.f32 %v10181_v6  ;;  %v4981_v6 = vld [vmem:[#allocation2 + $0x550] sm:$0xff] }
 0x59a   :  { %12762 = vpow2.f32 %v10186_v23 }
 0x59b   :  { %12764 = vpow2.f32 %v10180_v4 }
 0x59c   :  { %v11727_v19 = vpop.f32.mrf.mxu0  ;;  %v11744_v30 = vpop.f32.mrf.mxu1 }
 0x59d   :  { %v4764_v43 = vadd.f32 %v11727_v19, %v4645_v20  ;;  %v4871_v31 = vadd.f32 %v11744_v30, %v4770_v22  ;;  %v4875_v20 = vld [vmem:[#allocation2 + $0x3d8] sm:$0xff] }
 0x59e   :  { %v4750_v44 = vpop.f32.mrf.mxu0  ;;  %v4857_v14 = vpop.f32.mrf.mxu1 }
 0x59f   :  { %v10189_v46 = vmul.f32 -1.442695, %v4764_v43  ;;  %v10183_v47 = vmul.f32 -1.442695, %v4871_v31  ;;  %v4763_v24 = vadd.f32 %v4750_v44, %v4644_v32  ;;  %v4870_v39 = vadd.f32 %v4857_v14, %v4769_v7  ;;  %v4984_v32 = vld [vmem:[#allocation2 + $0x568] sm:$0xff] }
 0x5a0   :  { %v11755_v48 = vpop.f32.mrf.mxu0  ;;  %v11772_v50 = vpop.f32.mrf.mxu1 }
 0x5a1   :  { %v12751_v51 = vpop.eup %12750  ;;  %12766 = vpow2.f32 %v10189_v46  ;;  %v10188_v21 = vmul.f32 -1.442695, %v4763_v24  ;;  %v5081_v37 = vadd.f32 %v11772_v50, %v4980_v34  ;;  %v10182_v9 = vmul.f32 -1.442695, %v4870_v39  ;;  %v4874_v24 = vld [vmem:[#allocation2 + $0x3d0] sm:$0xff]  ;;  %v4876_v39 = vld [vmem:[#allocation2 + $0x3e0] sm:$0xff] }
 0x5a2   :  { %v12753_v53 = vpop.eup %12752  ;;  %v5147_v54 = vadd.f32 1.0, %v12751_v51  ;;  %12768 = vpow2.f32 %v10183_v47  ;;  %v5051_v57 = vpop.f32.mrf.mxu1  ;;  %v4974_v12 = vadd.f32 %v11755_v48, %v4873_v40 }
 0x5a3   :  { %v12755_v58 = vpop.eup %12754  ;;  %v5105_v41 = vadd.f32 1.0, %v12753_v53  ;;  %12770 = vpow2.f32 %v10188_v21  ;;  %v4944_v26 = vpop.f32.mrf.mxu0  ;;  %v5080_v0 = vadd.f32 %v5051_v57, %v4979_v61  ;;  %v10191_v15 = vmul.f32 -1.442695, %v5081_v37  ;;  %v4983_v21 = vld [vmem:[#allocation2 + $0x560] sm:$0xff]  ;;  %v4877_v57 = vld [vmem:[#allocation2 + $0x3e8] sm:$0xff] }
 0x5a4   :  { %v12757_v27 = vpop.eup %12756  ;;  %12772 = vrcp.f32 %v5147_v54  ;;  %v5146_v59 = vadd.f32 1.0, %v12755_v58  ;;  %v11775_v42 = vpop.f32.mrf.mxu1  ;;  %v4973_v56 = vadd.f32 %v4944_v26, %v4872_v11 }
 0x5a5   :  { %v12759_v63 = vpop.eup %12758  ;;  %12774 = vrcp.f32 %v5105_v41  ;;  %v5104_v33 = vadd.f32 1.0, %v12757_v27  ;;  %v11758_v29 = vpop.f32.mrf.mxu0  ;;  %v10190_v13 = vmul.f32 -1.442695, %v5080_v0  ;;  %v5083_v18 = vadd.f32 %v11775_v42, %v4982_v49 }
 0x5a6   :  { %v12761_v45 = vpop.eup %12760  ;;  %12776 = vrcp.f32 %v5146_v59  ;;  %v5149_v36 = vadd.f32 1.0, %v12759_v63  ;;  %v5061_v25 = vpop.f32.mrf.mxu1  ;;  %v4976_v31 = vadd.f32 %v11758_v29, %v4875_v20 }
 0x5a7   :  { %v12763_v52 = vpop.eup %12762  ;;  %12778 = vrcp.f32 %v5104_v33  ;;  %v5107_v5 = vadd.f32 1.0, %v12761_v45  ;;  %v4954_v1 = vpop.f32.mrf.mxu0  ;;  %v5082_v19 = vadd.f32 %v5061_v25, %v4981_v6  ;;  %v10193_v47 = vmul.f32 -1.442695, %v5083_v18 }
 0x5a8   :  { %v12765_v8 = vpop.eup %12764  ;;  %12780 = vrcp.f32 %v5149_v36  ;;  %v5148_v16 = vadd.f32 1.0, %v12763_v52  ;;  %v11778_v17 = vpop.f32.mrf.mxu1  ;;  %v4975_v51 = vadd.f32 %v4954_v1, %v4874_v24 }
 0x5a9   :  { %12782 = vrcp.f32 %v5107_v5  ;;  %v5106_v38 = vadd.f32 1.0, %v12765_v8  ;;  %v11761_v22 = vpop.f32.mrf.mxu0  ;;  %v5085_v48 = vadd.f32 %v11778_v17, %v4984_v32  ;;  %v10192_v54 = vmul.f32 -1.442695, %v5082_v19 }
 0x5aa   :  { %12784 = vrcp.f32 %v5148_v16  ;;  %v5071_v44 = vpop.f32.mrf.mxu1  ;;  %v4978_v26 = vadd.f32 %v11761_v22, %v4877_v57  ;;  %v15095_v57 = vld [vmem:[%s16040_s3 + $0x78] sm:$0xff] }
 0x5ab   :  { %12786 = vrcp.f32 %v5106_v38  ;;  %v4964_v58 = vpop.f32.mrf.mxu0  ;;  %v5084_v41 = vadd.f32 %v5071_v44, %v4983_v21  ;;  %v10195_v59 = vmul.f32 -1.442695, %v5085_v48 }
 0x5ac   :  { %12788 = vpow2.f32 %v10182_v9  ;;  %v4977_v63 = vadd.f32 %v4964_v58, %v4876_v39  ;;  %v15115_v39 = vld [vmem:[%s16040_s3 + $0x48] sm:$0xff] }
 0x5ad   :  { %12790 = vtanh.f32 %v4974_v12  ;;  %v10194_v34 = vmul.f32 -1.442695, %v5084_v41  ;;  %v15101_v41 = vld [vmem:[%s16040_s3 + $0x50] sm:$0xff] }
 0x5ae   :  { %v12767_v62 = vpop.eup %12766  ;;  %12792 = vpow2.f32 %v10191_v15 }
 0x5af   :  { %v12769_v23 = vpop.eup %12768  ;;  %v5151_v4 = vadd.f32 1.0, %v12767_v62  ;;  %12794 = vtanh.f32 %v4973_v56 }
 0x5b0   :  { %v12771_v30 = vpop.eup %12770  ;;  %v5109_v43 = vadd.f32 1.0, %v12769_v23  ;;  %12796 = vpow2.f32 %v10190_v13 }
 0x5b1   :  { %v12773_v14 = vpop.eup %12772  ;;  %12798 = vrcp.f32 %v5151_v4  ;;  %v5150_v46 = vadd.f32 1.0, %v12771_v30 }
 0x5b2   :  { %v12775_v50 = vpop.eup %12774  ;;  %12800 = vrcp.f32 %v5109_v43 }
 0x5b3   :  { %v12777_v53 = vpop.eup %12776  ;;  %12802 = vrcp.f32 %v5150_v46  ;;  %v5123_v37 = vmul.f32 %v12775_v50, %v14979_v55 }
 0x5b4   :  { %v12779_v7 = vpop.eup %12778  ;;  %12804 = vtanh.f32 %v4976_v31 }
 0x5b5   :  { %v12781_v27 = vpop.eup %12780  ;;  %12806 = vpow2.f32 %v10193_v47  ;;  %v5122_v8 = vmul.f32 %v12779_v7, %v14984_v3  ;;  %v15107_v7 = vld [vmem:[%s16040_s3 + $0x70] sm:$0xff] }
 0x5b6   :  { %v12783_v42 = vpop.eup %12782  ;;  %12808 = vtanh.f32 %v4975_v51 }
 0x5b7   :  { %v12785_v33 = vpop.eup %12784  ;;  %12810 = vpow2.f32 %v10192_v54  ;;  %v5125_v56 = vmul.f32 %v12783_v42, %v14988_v10  ;;  %v15089_v54 = vld [vmem:[%s16040_s3 + $0x58] sm:$0xff]  ;;  %v15121_v42 = vld [vmem:[%s16040_s3 + $0x68] sm:$0xff] }
 0x5b8   :  { %v12787_v45 = vpop.eup %12786  ;;  %12812 = vtanh.f32 %v4978_v26 }
 0x5b9   :  { %v12789_v36 = vpop.eup %12788  ;;  %12814 = vpow2.f32 %v10195_v59  ;;  %v5124_v49 = vmul.f32 %v12787_v45, %v14991_v60  ;;  %v15133_v45 = vld [vmem:[%s16040_s3 + $0x40] sm:$0xff] }
 0x5ba   :  { %v12791_v52 = vpop.eup %12790  ;;  %v5108_v5 = vadd.f32 1.0, %v12789_v36  ;;  %12816 = vtanh.f32 %v4977_v63  ;;  %v15139_v36 = vld [vmem:[%s16040_s3 + $0x60] sm:$0xff] }
 0x5bb   :  { %v12793_v61 = vpop.eup %12792  ;;  %v5171_v29 = vmul.f32 %v12791_v52, %v12773_v14  ;;  %12818 = vpow2.f32 %v10194_v34 }
 0x5bc   :  { %v12795_v16 = vpop.eup %12794  ;;  %12820 = vrcp.f32 %v5108_v5  ;;  %v5201_v38 = vadd.f32 1.0, %v12793_v61  ;;  %v15147_v61 = vld [vmem:[%s16040_s3 + $0x18] sm:$0xff] }
 0x5bd   :  { %v12797_v9 = vpop.eup %12796  ;;  %v15060_v40 = vadd.f32 %v5171_v29, %v5123_v37  ;;  %v5170_v0 = vmul.f32 %v12795_v16, %v12777_v53  ;;  %v15153_v29 = vld [vmem:[%s16040_s3 + $0x38] sm:$0xff]  ;;  %v15171_v16 = vld [vmem:[%s16040_s3 + $0x10] sm:$0xff] }
 0x5be   :  { %v12799_v25 = vpop.eup %12798  ;;  %v5200_v12 = vadd.f32 1.0, %v12797_v9  ;;  %v15177_v9 = vld [vmem:[%s16040_s3 + $0x30] sm:$0xff] }
 0x5bf   :  { %v12801_v15 = vpop.eup %12800  ;;  %12822 = vtanh.f32 %v15060_v40  ;;  %v15063_v55 = vadd.f32 %v5170_v0, %v5122_v8  ;;  %v15189_v0 = vld [vmem:[%s16040_s3 + $0x8] sm:$0xff] }
 0x5c0   :  { %v12803_v11 = vpop.eup %12802  ;;  %12824 = vrcp.f32 %v5200_v12  ;;  %v5127_v23 = vmul.f32 %v12801_v15, %v14996_v28  ;;  %v15211_v12 = vld [vmem:[%s16040_s3 + $0x20] sm:$0xff]  ;;  %v5231_v15 = vld [vmem:[#allocation2 + $0xf8] sm:$0xff] }
 0x5c1   :  { %v12805_v3 = vpop.eup %12804  ;;  %12826 = vtanh.f32 %v15063_v55 }
 0x5c2   :  { %v12807_v1 = vpop.eup %12806  ;;  %12828 = vrcp.f32 %v5201_v38  ;;  %v5173_v13 = vmul.f32 %v12805_v3, %v12781_v27  ;;  %v15205_v38 = vld [vmem:[%s16040_s3] sm:$0xff] }
 0x5c3   :  { %v12809_v17 = vpop.eup %12808  ;;  %v5203_v20 = vadd.f32 1.0, %v12807_v1 }
 0x5c4   :  { %v12811_v18 = vpop.eup %12810  ;;  %v15068_v62 = vadd.f32 %v5173_v13, %v5125_v56  ;;  %v5172_v6 = vmul.f32 %v12809_v17, %v12785_v33  ;;  %v5356_v56 = vld [vmem:[#allocation2 + $0x278] sm:$0xff] }
 0x5c5   :  { %v12813_v4 = vpop.eup %12812  ;;  %v5202_v19 = vadd.f32 1.0, %v12811_v18  ;;  %v5355_v18 = vld [vmem:[#allocation2 + $0x270] sm:$0xff] }
 0x5c6   :  { %v12815_v22 = vpop.eup %12814  ;;  %12830 = vtanh.f32 %v15068_v62  ;;  %v15072_v10 = vadd.f32 %v5172_v6, %v5124_v49  ;;  %v5175_v30 = vmul.f32 %v12813_v4, %v12799_v25  ;;  %v15195_v25 = vld [vmem:[%s16040_s3 + $0x28] sm:$0xff]  ;;  %v5230_v49 = vld [vmem:[#allocation2 + $0xf0] sm:$0xff] }
 0x5c7   :  { %v12817_v43 = vpop.eup %12816  ;;  %12832 = vrcp.f32 %v5202_v19  ;;  %v5205_v46 = vadd.f32 1.0, %v12815_v22 }
 0x5c8   :  { %v12819_v31 = vpop.eup %12818  ;;  %12834 = vtanh.f32 %v15072_v10  ;;  %v15075_v60 = vadd.f32 %v5175_v30, %v5127_v23  ;;  %v5174_v32 = vmul.f32 %v12817_v43, %v12803_v11  ;;  %v5233_v43 = vld [vmem:[#allocation2 + $0x108] sm:$0xff] }
 0x5c9   :  { %v12821_v44 = vpop.eup %12820  ;;  %12836 = vrcp.f32 %v5203_v20  ;;  %v5204_v28 = vadd.f32 1.0, %v12819_v31 }
 0x5ca   :  { %v5126_v14 = vmul.f32 %v12821_v44, %v14999_v35  ;;  %12838 = vtanh.f32 %v15075_v60 }
 0x5cb   :  { %12840 = vrcp.f32 %v5204_v28 }
 0x5cc   :  { %v12823_v47 = vpop.eup %12822  ;;  %v15079_v24 = vadd.f32 %v5174_v32, %v5126_v14  ;;  %v5358_v32 = vld [vmem:[#allocation2 + $0x288] sm:$0xff] }
 0x5cd   :  { %v12825_v48 = vpop.eup %12824 }
 0x5ce   :  { %v12827_v50 = vpop.eup %12826  ;;  %12842 = vtanh.f32 %v15079_v24 }
 0x5cf   :  { %v12829_v51 = vpop.eup %12828  ;;  %12844 = vrcp.f32 %v5205_v46  ;;  %v5224_v21 = vmul.f32 %v12827_v50, %v12825_v48  ;;  %v5232_v46 = vld [vmem:[#allocation2 + $0x100] sm:$0xff] }
 0x5d0   :  { %v5225_v53 = vmul.f32 %v12829_v51, %v12823_v47  ;;  %v5357_v48 = vld [vmem:[#allocation2 + $0x280] sm:$0xff] }
 0x5d1   :  { %11787 = vmatprep.mubr.msk.f32.mxu0 %vm556_vm1, %v5224_v21  ;;  %11804 = vmatprep.mubr.msk.f32.mxu1 %vm556_vm1, %v5224_v21 }
 0x5d2   :  { %11788 = vmatmul.mubr.msk.f32.vlgmr.msra.gmra.mxu0 %vm556_vm1, %v5225_v53  ;;  %11805 = vmatmul.mubr.msk.f32.vlgmr.msra.gmra.mxu1 %vm556_vm1, %v5225_v53 }
 0x5d3   :  { %v12831_v35 = vpop.eup %12830  ;;  %11814 = vmatpush3.msra.mxu0 %v15089_v54  ;;  %11831 = vmatpush3.msra.mxu1 %v15095_v57 }
 0x5d4   :  { %v12833_v58 = vpop.eup %12832  ;;  %11815 = vmatprep.subr.mxu0 %v15101_v41  ;;  %11832 = vmatprep.subr.mxu1 %v15107_v7 }
 0x5d5   :  { %v12835_v26 = vpop.eup %12834  ;;  %11816 = vmatpush3.msra.mxu0 %v15101_v41  ;;  %11833 = vmatpush3.msra.mxu1 %v15107_v7 }
 0x5d6   :  { %v12837_v27 = vpop.eup %12836  ;;  %v5226_v59 = vmul.f32 %v12835_v26, %v12833_v58  ;;  %11817 = vmatprep.subr.mxu0 %v15115_v39  ;;  %11834 = vmatprep.subr.mxu1 %v15121_v42 }
 0x5d7   :  { %v5227_v63 = vmul.f32 %v12837_v27, %v12831_v35  ;;  %11818 = vmatpush3.msra.mxu0 %v15115_v39  ;;  %11835 = vmatpush3.msra.mxu1 %v15121_v42  ;;  %v12839_v33 = vpop.eup %12838  ;;  %v5235_v27 = vld [vmem:[#allocation2 + $0x118] sm:$0xff] }
 0x5d8   :  { %11790 = vmatprep.mubr.msk.f32.mxu0 %vm556_vm1, %v5226_v59  ;;  %11807 = vmatprep.mubr.msk.f32.mxu1 %vm556_vm1, %v5226_v59  ;;  %v12841_v34 = vpop.eup %12840 }
 0x5d9   :  { %11791 = vmatmul.mubr.msk.f32.gmra.mxu0 %vm556_vm1, %v5227_v63  ;;  %11808 = vmatmul.mubr.msk.f32.gmra.mxu1 %vm556_vm1, %v5227_v63 }
 0x5da   :  { %11819 = vmatprep.subr.mxu0 %v15133_v45  ;;  %11836 = vmatprep.subr.mxu1 %v15139_v36 }
 0x5db   :  { %v12843_v37 = vpop.eup %12842  ;;  %11820 = vmatpush3.msra.mxu0 %v15133_v45  ;;  %11837 = vmatpush3.msra.mxu1 %v15139_v36 }
 0x5dc   :  { %v12845_v52 = vpop.eup %12844  ;;  %v5228_v5 = vmul.f32 %v12843_v37, %v12841_v34  ;;  %11847 = vmatprep.subr.mxu0 %v15147_v61  ;;  %11864 = vmatprep.subr.mxu1 %v15153_v29 }
 0x5dd   :  { %v5229_v8 = vmul.f32 %v12845_v52, %v12839_v33  ;;  %v5234_v52 = vld [vmem:[#allocation2 + $0x110] sm:$0xff] }
 0x5de   :  { %11793 = vmatprep.mubr.msk.f32.mxu0 %vm556_vm1, %v5228_v5  ;;  %11810 = vmatprep.mubr.msk.f32.mxu1 %vm556_vm1, %v5228_v5 }
 0x5df   :  { %11794 = vmatmul.mubr.msk.f32.gmra.mxu0 %vm556_vm1, %v5229_v8  ;;  %11811 = vmatmul.mubr.msk.f32.gmra.mxu1 %vm556_vm1, %v5229_v8 }
 0x5e0   :  { %11821 = vmatprep.mubr.msk.f32.mxu0 %vm556_vm1, %v5224_v21  ;;  %11838 = vmatprep.mubr.msk.f32.mxu1 %vm556_vm1, %v5224_v21 }
 0x5e3   :  { %11822 = vmatmul.mubr.msk.f32.vlgmr.msra.gmra.mxu0 %vm556_vm1, %v5225_v53  ;;  %11839 = vmatmul.mubr.msk.f32.vlgmr.msra.gmra.mxu1 %vm556_vm1, %v5225_v53 }
 0x5e4   :  { %11824 = vmatprep.mubr.msk.f32.mxu0 %vm556_vm1, %v5226_v59  ;;  %11841 = vmatprep.mubr.msk.f32.mxu1 %vm556_vm1, %v5226_v59 }
 0x5e5   :  { %11848 = vmatpush3.msra.mxu0 %v15147_v61  ;;  %11865 = vmatpush3.msra.mxu1 %v15153_v29 }
 0x5e6   :  { %11849 = vmatprep.subr.mxu0 %v15171_v16  ;;  %11866 = vmatprep.subr.mxu1 %v15177_v9 }
 0x5e7   :  { %11825 = vmatmul.mubr.msk.f32.gmra.mxu0 %vm556_vm1, %v5227_v63  ;;  %11842 = vmatmul.mubr.msk.f32.gmra.mxu1 %vm556_vm1, %v5227_v63  ;;  %v5360_v63 = vld [vmem:[#allocation2 + $0x298] sm:$0xff] }
 0x5e8   :  { %11827 = vmatprep.mubr.msk.f32.mxu0 %vm556_vm1, %v5228_v5  ;;  %11844 = vmatprep.mubr.msk.f32.mxu1 %vm556_vm1, %v5228_v5 }
 0x5e9   :  { %11850 = vmatpush3.msra.mxu0 %v15171_v16  ;;  %11867 = vmatpush3.msra.mxu1 %v15177_v9 }
 0x5ea   :  { %11851 = vmatprep.subr.mxu0 %v15189_v0  ;;  %11868 = vmatprep.subr.mxu1 %v15195_v25 }
 0x5eb   :  { %11828 = vmatmul.mubr.msk.f32.gmra.mxu0 %vm556_vm1, %v5229_v8  ;;  %11845 = vmatmul.mubr.msk.f32.gmra.mxu1 %vm556_vm1, %v5229_v8 }
 0x5ec   :  { %11852 = vmatpush3.msra.mxu0 %v15189_v0  ;;  %11869 = vmatpush3.msra.mxu1 %v15195_v25 }
 0x5ed   :  { %11853 = vmatprep.subr.mxu0 %v15205_v38  ;;  %11870 = vmatprep.subr.mxu1 %v15211_v12 }
 0x5ee   :  { %11854 = vmatpush3.msra.mxu0 %v15205_v38  ;;  %11871 = vmatpush3.msra.mxu1 %v15211_v12 }
 0x5ef   :  { %11881 = vmatprep.subr.mxu0 %v15089_v54  ;;  %11898 = vmatprep.subr.mxu1 %v15095_v57 }
 0x692   :  { %v11789_v11 = vpop.f32.mrf.mxu0  ;;  %v11806_v3 = vpop.f32.mrf.mxu1 }
 0x693   :  { %v5350_v1 = vadd.f32 %v11789_v11, %v5231_v15  ;;  %v5457_v13 = vadd.f32 %v11806_v3, %v5356_v56  ;;  %v5359_v3 = vld [vmem:[#allocation2 + $0x290] sm:$0xff] }
 0x694   :  { %v5320_v17 = vpop.f32.mrf.mxu0  ;;  %v5427_v6 = vpop.f32.mrf.mxu1 }
 0x695   :  { %v10227_v23 = vmul.f32 -1.442695, %v5350_v1  ;;  %v10221_v4 = vmul.f32 -1.442695, %v5457_v13  ;;  %v5349_v20 = vadd.f32 %v5320_v17, %v5230_v49  ;;  %v5456_v19 = vadd.f32 %v5427_v6, %v5355_v18 }
 0x697   :  { %12846 = vpow2.f32 %v10227_v23  ;;  %v10226_v22 = vmul.f32 -1.442695, %v5349_v20  ;;  %v10220_v30 = vmul.f32 -1.442695, %v5456_v19 }
 0x698   :  { %12848 = vpow2.f32 %v10221_v4  ;;  %v5570_v4 = vld [vmem:[#allocation2 + $0x578] sm:$0xff] }
 0x699   :  { %12850 = vpow2.f32 %v10226_v22  ;;  %v11792_v31 = vpop.f32.mrf.mxu0  ;;  %v11809_v44 = vpop.f32.mrf.mxu1 }
 0x69a   :  { %12852 = vpow2.f32 %v10220_v30  ;;  %v5352_v28 = vadd.f32 %v11792_v31, %v5233_v43  ;;  %v5459_v14 = vadd.f32 %v11809_v44, %v5358_v32  ;;  %v5463_v44 = vld [vmem:[#allocation2 + $0x3f8] sm:$0xff] }
 0x69b   :  { %v5330_v47 = vpop.f32.mrf.mxu0  ;;  %v5437_v50 = vpop.f32.mrf.mxu1 }
 0x69c   :  { %v10229_v51 = vmul.f32 -1.442695, %v5352_v28  ;;  %v10223_v21 = vmul.f32 -1.442695, %v5459_v14  ;;  %v5351_v53 = vadd.f32 %v5330_v47, %v5232_v46  ;;  %v5458_v35 = vadd.f32 %v5437_v50, %v5357_v48  ;;  %v5569_v48 = vld [vmem:[#allocation2 + $0x570] sm:$0xff] }
 0x69e   :  { %12854 = vpow2.f32 %v10229_v51  ;;  %v10228_v58 = vmul.f32 -1.442695, %v5351_v53  ;;  %v10222_v26 = vmul.f32 -1.442695, %v5458_v35 }
 0x69f   :  { %12856 = vpow2.f32 %v10223_v21  ;;  %v11795_v59 = vpop.f32.mrf.mxu0  ;;  %v11812_v33 = vpop.f32.mrf.mxu1 }
 0x6a0   :  { %12858 = vpow2.f32 %v10228_v58  ;;  %v5354_v34 = vadd.f32 %v11795_v59, %v5235_v27  ;;  %v5461_v37 = vadd.f32 %v11812_v33, %v5360_v63  ;;  %v5462_v27 = vld [vmem:[#allocation2 + $0x3f0] sm:$0xff] }
 0x6a1   :  { %12860 = vpow2.f32 %v10222_v26  ;;  %v5340_v5 = vpop.f32.mrf.mxu0  ;;  %v5447_v8 = vpop.f32.mrf.mxu1 }
 0x6a2   :  { %v10231_v15 = vmul.f32 -1.442695, %v5354_v34  ;;  %v10225_v11 = vmul.f32 -1.442695, %v5461_v37  ;;  %v5353_v56 = vadd.f32 %v5340_v5, %v5234_v52  ;;  %v5460_v1 = vadd.f32 %v5447_v8, %v5359_v3  ;;  %v5572_v5 = vld [vmem:[#allocation2 + $0x588] sm:$0xff]  ;;  %v5571_v3 = vld [vmem:[#allocation2 + $0x580] sm:$0xff] }
 0x6a3   :  { %v11840_v13 = vpop.f32.mrf.mxu1  ;;  %v11823_v23 = vpop.f32.mrf.mxu0 }
 0x6a4   :  { %v12847_v49 = vpop.eup %12846  ;;  %12862 = vpow2.f32 %v10231_v15  ;;  %v10230_v17 = vmul.f32 -1.442695, %v5353_v56  ;;  %v5671_v22 = vadd.f32 %v11840_v13, %v5570_v4  ;;  %v10224_v32 = vmul.f32 -1.442695, %v5460_v1 }
 0x6a5   :  { %v12849_v18 = vpop.eup %12848  ;;  %v5737_v6 = vadd.f32 1.0, %v12847_v49  ;;  %12864 = vpow2.f32 %v10225_v11  ;;  %v5641_v30 = vpop.f32.mrf.mxu1  ;;  %v5564_v28 = vadd.f32 %v11823_v23, %v5463_v44  ;;  %v5465_v49 = vld [vmem:[#allocation2 + $0x408] sm:$0xff]  ;;  %v5574_v44 = vld [vmem:[#allocation2 + $0x598] sm:$0xff] }
 0x6a6   :  { %v12851_v20 = vpop.eup %12850  ;;  %v5695_v19 = vadd.f32 1.0, %v12849_v18  ;;  %12866 = vpow2.f32 %v10230_v17  ;;  %v5534_v46 = vpop.f32.mrf.mxu0  ;;  %v10233_v47 = vmul.f32 -1.442695, %v5671_v22  ;;  %v5670_v21 = vadd.f32 %v5641_v30, %v5569_v48 }
 0x6a7   :  { %v12853_v43 = vpop.eup %12852  ;;  %v5736_v31 = vadd.f32 1.0, %v12851_v20  ;;  %12868 = vrcp.f32 %v5737_v6  ;;  %v11843_v50 = vpop.f32.mrf.mxu1  ;;  %v5563_v34 = vadd.f32 %v5534_v46, %v5462_v27  ;;  %v5467_v46 = vld [vmem:[#allocation2 + $0x418] sm:$0xff] }
 0x6a8   :  { %12870 = vrcp.f32 %v5695_v19  ;;  %v5694_v14 = vadd.f32 1.0, %v12853_v43  ;;  %v11826_v59 = vpop.f32.mrf.mxu0  ;;  %v10232_v52 = vmul.f32 -1.442695, %v5670_v21  ;;  %v5673_v15 = vadd.f32 %v11843_v50, %v5572_v5  ;;  %v5464_v19 = vld [vmem:[#allocation2 + $0x400] sm:$0xff] }
 0x6a9   :  { %12872 = vrcp.f32 %v5736_v31  ;;  %v5651_v37 = vpop.f32.mrf.mxu1  ;;  %v5566_v23 = vadd.f32 %v11826_v59, %v5465_v49 }
 0x6aa   :  { %12874 = vpow2.f32 %v10224_v32  ;;  %v5544_v56 = vpop.f32.mrf.mxu0  ;;  %v5672_v17 = vadd.f32 %v5651_v37, %v5571_v3  ;;  %v10235_v20 = vmul.f32 -1.442695, %v5673_v15  ;;  %v5466_v37 = vld [vmem:[#allocation2 + $0x410] sm:$0xff] }
 0x6ab   :  { %v12855_v51 = vpop.eup %12854  ;;  %12876 = vtanh.f32 %v5564_v28  ;;  %v11846_v18 = vpop.f32.mrf.mxu1  ;;  %v5565_v30 = vadd.f32 %v5544_v56, %v5464_v19 }
 0x6ac   :  { %v12857_v53 = vpop.eup %12856  ;;  %v5739_v35 = vadd.f32 1.0, %v12855_v51  ;;  %12878 = vrcp.f32 %v5694_v14  ;;  %v11829_v43 = vpop.f32.mrf.mxu0  ;;  %v10234_v32 = vmul.f32 -1.442695, %v5672_v17  ;;  %v5573_v51 = vld [vmem:[#allocation2 + $0x590] sm:$0xff] }
 0x6ad   :  { %v12859_v58 = vpop.eup %12858  ;;  %v5697_v26 = vadd.f32 1.0, %v12857_v53  ;;  %12880 = vpow2.f32 %v10233_v47  ;;  %v5661_v28 = vpop.f32.mrf.mxu1  ;;  %v5675_v47 = vadd.f32 %v11846_v18, %v5574_v44  ;;  %v5568_v50 = vadd.f32 %v11829_v43, %v5467_v46 }
 0x6ae   :  { %v12861_v63 = vpop.eup %12860  ;;  %v5738_v33 = vadd.f32 1.0, %v12859_v58  ;;  %12882 = vrcp.f32 %v5739_v35  ;;  %v5554_v35 = vpop.f32.mrf.mxu0  ;;  %v5674_v58 = vadd.f32 %v5661_v28, %v5573_v51 }
 0x6af   :  { %12884 = vrcp.f32 %v5697_v26  ;;  %v5696_v8 = vadd.f32 1.0, %v12861_v63  ;;  %v5567_v5 = vadd.f32 %v5554_v35, %v5466_v37 }
 0x6b0   :  { %12886 = vrcp.f32 %v5738_v33  ;;  %v10236_v15 = vmul.f32 -1.442695, %v5674_v58 }
 0x6b1   :  { %v12863_v11 = vpop.eup %12862  ;;  %12888 = vtanh.f32 %v5563_v34  ;;  %v10237_v34 = vmul.f32 -1.442695, %v5675_v47 }
 0x6b2   :  { %v12865_v1 = vpop.eup %12864  ;;  %v5741_v13 = vadd.f32 1.0, %v12863_v11  ;;  %12890 = vpow2.f32 %v10232_v52 }
 0x6b3   :  { %v5699_v6 = vadd.f32 1.0, %v12865_v1  ;;  %v12867_v4 = vpop.eup %12866  ;;  %12892 = vrcp.f32 %v5696_v8 }
 0x6b4   :  { %v12869_v22 = vpop.eup %12868  ;;  %12894 = vrcp.f32 %v5741_v13  ;;  %v5740_v27 = vadd.f32 1.0, %v12867_v4 }
 0x6b5   :  { %v12871_v31 = vpop.eup %12870  ;;  %12896 = vrcp.f32 %v5699_v6 }
 0x6b6   :  { %v12873_v14 = vpop.eup %12872  ;;  %12898 = vtanh.f32 %v5566_v23  ;;  %v5713_v59 = vmul.f32 %v12871_v31, %v15060_v40 }
 0x6b7   :  { %v12875_v48 = vpop.eup %12874  ;;  %12900 = vpow2.f32 %v10235_v20 }
 0x6b8   :  { %v12877_v21 = vpop.eup %12876  ;;  %v5698_v53 = vadd.f32 1.0, %v12875_v48  ;;  %12902 = vtanh.f32 %v5565_v30 }
 0x6b9   :  { %v12879_v26 = vpop.eup %12878  ;;  %v5761_v63 = vmul.f32 %v12877_v21, %v12869_v22  ;;  %12904 = vpow2.f32 %v10234_v32 }
 0x6ba   :  { %v12881_v33 = vpop.eup %12880  ;;  %12906 = vrcp.f32 %v5698_v53  ;;  %v5712_v3 = vmul.f32 %v12879_v26, %v15063_v55 }
 0x6bb   :  { %v12883_v52 = vpop.eup %12882  ;;  %12908 = vtanh.f32 %v5568_v50  ;;  %v15219_v56 = vadd.f32 %v5761_v63, %v5713_v59  ;;  %v5791_v17 = vadd.f32 1.0, %v12881_v33 }
 0x6bc   :  { %v12885_v8 = vpop.eup %12884  ;;  %12910 = vrcp.f32 %v5740_v27 }
 0x6bd   :  { %v12887_v11 = vpop.eup %12886  ;;  %12912 = vpow2.f32 %v10237_v34  ;;  %v5715_v20 = vmul.f32 %v12885_v8, %v15068_v62 }
 0x6be   :  { %v12889_v1 = vpop.eup %12888  ;;  %12914 = vtanh.f32 %v5567_v5 }
 0x6bf   :  { %v12891_v40 = vpop.eup %12890  ;;  %v5760_v13 = vmul.f32 %v12889_v1, %v12873_v14  ;;  %12916 = vpow2.f32 %v10236_v15 }
 0x6c0   :  { %v12893_v49 = vpop.eup %12892  ;;  %v5790_v18 = vadd.f32 1.0, %v12891_v40  ;;  %12918 = vtanh.f32 %v15219_v56 }
 0x6c1   :  { %v12895_v6 = vpop.eup %12894  ;;  %v15223_v23 = vadd.f32 %v5760_v13, %v5712_v3  ;;  %v5714_v30 = vmul.f32 %v12893_v49, %v15072_v10  ;;  %v5945_v49 = vld [vmem:[#allocation2 + $0x2a0] sm:$0xff] }
 0x6c2   :  { %v12897_v4 = vpop.eup %12896  ;;  %12920 = vrcp.f32 %v5790_v18 }
 0x6c3   :  { %v12899_v19 = vpop.eup %12898  ;;  %12922 = vtanh.f32 %v15223_v23  ;;  %v5717_v47 = vmul.f32 %v12897_v4, %v15075_v60 }
 0x6c4   :  { %v12901_v55 = vpop.eup %12900  ;;  %12924 = vrcp.f32 %v5791_v17  ;;  %v5763_v22 = vmul.f32 %v12899_v19, %v12883_v52  ;;  %v5948_v19 = vld [vmem:[#allocation2 + $0x2b8] sm:$0xff] }
 0x6c5   :  { %v12903_v43 = vpop.eup %12902  ;;  %v5793_v14 = vadd.f32 1.0, %v12901_v55 }
 0x6c6   :  { %v12905_v31 = vpop.eup %12904  ;;  %v15228_v32 = vadd.f32 %v5763_v22, %v5715_v20  ;;  %v5762_v44 = vmul.f32 %v12903_v43, %v12887_v11  ;;  %v5822_v43 = vld [vmem:[#allocation2 + $0x130] sm:$0xff] }
 0x6c7   :  { %v12907_v28 = vpop.eup %12906  ;;  %v5792_v46 = vadd.f32 1.0, %v12905_v31 }
 0x6c8   :  { %v12909_v48 = vpop.eup %12908  ;;  %12926 = vtanh.f32 %v15228_v32  ;;  %v15232_v62 = vadd.f32 %v5762_v44, %v5714_v30  ;;  %v5716_v53 = vmul.f32 %v12907_v28, %v15079_v24  ;;  %v5947_v44 = vld [vmem:[#allocation2 + $0x2b0] sm:$0xff] }
 0x6c9   :  { %12928 = vrcp.f32 %v5792_v46  ;;  %v5765_v50 = vmul.f32 %v12909_v48, %v12895_v6  ;;  %v12911_v51 = vpop.eup %12910 }
 0x6ca   :  { %12930 = vtanh.f32 %v15232_v62  ;;  %v12913_v10 = vpop.eup %12912 }
 0x6cb   :  { %12932 = vrcp.f32 %v5793_v14  ;;  %v15235_v21 = vadd.f32 %v5765_v50, %v5717_v47  ;;  %v12915_v35 = vpop.eup %12914  ;;  %v5795_v27 = vadd.f32 1.0, %v12913_v10  ;;  %v5825_v10 = vld [vmem:[#allocation2 + $0x148] sm:$0xff] }
 0x6cc   :  { %v12917_v58 = vpop.eup %12916  ;;  %v5764_v26 = vmul.f32 %v12915_v35, %v12911_v51  ;;  %v5950_v35 = vld [vmem:[#allocation2 + $0x2c8] sm:$0xff] }
 0x6cd   :  { %v12919_v60 = vpop.eup %12918  ;;  %v5794_v59 = vadd.f32 1.0, %v12917_v58  ;;  %12934 = vtanh.f32 %v15235_v21 }
 0x6ce   :  { %v15239_v33 = vadd.f32 %v5764_v26, %v5716_v53 }
 0x6cf   :  { %v12921_v63 = vpop.eup %12920  ;;  %12936 = vrcp.f32 %v5794_v59 }
 0x6d0   :  { %v12923_v34 = vpop.eup %12922  ;;  %12938 = vtanh.f32 %v15239_v33 }
 0x6d1   :  { %v12925_v37 = vpop.eup %12924  ;;  %v5814_v52 = vmul.f32 %v12923_v34, %v12921_v63  ;;  %12940 = vrcp.f32 %v5795_v27  ;;  %v5824_v27 = vld [vmem:[#allocation2 + $0x140] sm:$0xff] }
 0x6d2   :  { %v5815_v5 = vmul.f32 %v12925_v37, %v12919_v60 }
 0x6d3   :  { %11855 = vmatprep.mubr.msk.f32.mxu0 %vm556_vm1, %v5814_v52  ;;  %11872 = vmatprep.mubr.msk.f32.mxu1 %vm556_vm1, %v5814_v52 }
 0x6d4   :  { %11856 = vmatmul.mubr.msk.f32.vlgmr.msra.gmra.mxu0 %vm556_vm1, %v5815_v5  ;;  %11873 = vmatmul.mubr.msk.f32.vlgmr.msra.gmra.mxu1 %vm556_vm1, %v5815_v5 }
 0x6d5   :  { %v12927_v24 = vpop.eup %12926  ;;  %11882 = vmatpush3.msra.mxu0 %v15089_v54  ;;  %11899 = vmatpush3.msra.mxu1 %v15095_v57 }
 0x6d6   :  { %v12929_v8 = vpop.eup %12928  ;;  %11883 = vmatprep.subr.mxu0 %v15101_v41  ;;  %11900 = vmatprep.subr.mxu1 %v15107_v7 }
 0x6d7   :  { %v12931_v15 = vpop.eup %12930  ;;  %11884 = vmatpush3.msra.mxu0 %v15101_v41  ;;  %11901 = vmatpush3.msra.mxu1 %v15107_v7 }
 0x6d8   :  { %v12933_v11 = vpop.eup %12932  ;;  %v5816_v3 = vmul.f32 %v12931_v15, %v12929_v8  ;;  %11885 = vmatprep.subr.mxu0 %v15115_v39  ;;  %11902 = vmatprep.subr.mxu1 %v15121_v42 }
 0x6d9   :  { %v5817_v1 = vmul.f32 %v12933_v11, %v12927_v24  ;;  %11886 = vmatpush3.msra.mxu0 %v15115_v39  ;;  %11903 = vmatpush3.msra.mxu1 %v15121_v42 }
 0x6da   :  { %11858 = vmatprep.mubr.msk.f32.mxu0 %vm556_vm1, %v5816_v3  ;;  %11875 = vmatprep.mubr.msk.f32.mxu1 %vm556_vm1, %v5816_v3  ;;  %v12935_v41 = vpop.eup %12934 }
 0x6db   :  { %11859 = vmatmul.mubr.msk.f32.gmra.mxu0 %vm556_vm1, %v5817_v1  ;;  %11876 = vmatmul.mubr.msk.f32.gmra.mxu1 %vm556_vm1, %v5817_v1 }
 0x6dc   :  { %11887 = vmatprep.subr.mxu0 %v15133_v45  ;;  %11904 = vmatprep.subr.mxu1 %v15139_v36  ;;  %v12937_v7 = vpop.eup %12936 }
 0x6dd   :  { %11888 = vmatpush3.msra.mxu0 %v15133_v45  ;;  %11905 = vmatpush3.msra.mxu1 %v15139_v36  ;;  %v12939_v39 = vpop.eup %12938  ;;  %v5821_v45 = vld [vmem:[#allocation2 + $0x128] sm:$0xff] }
 0x6de   :  { %11915 = vmatprep.subr.mxu0 %v15147_v61  ;;  %11932 = vmatprep.subr.mxu1 %v15153_v29  ;;  %v12941_v42 = vpop.eup %12940  ;;  %v5818_v40 = vmul.f32 %v12939_v39, %v12937_v7 }
 0x6df   :  { %v5819_v13 = vmul.f32 %v12941_v42, %v12935_v41 }
 0x6e0   :  { %11861 = vmatprep.mubr.msk.f32.mxu0 %vm556_vm1, %v5818_v40  ;;  %11878 = vmatprep.mubr.msk.f32.mxu1 %vm556_vm1, %v5818_v40 }
 0x6e1   :  { %11862 = vmatmul.mubr.msk.f32.gmra.mxu0 %vm556_vm1, %v5819_v13  ;;  %11879 = vmatmul.mubr.msk.f32.gmra.mxu1 %vm556_vm1, %v5819_v13 }
 0x6e2   :  { %11889 = vmatprep.mubr.msk.f32.mxu0 %vm556_vm1, %v5814_v52  ;;  %11906 = vmatprep.mubr.msk.f32.mxu1 %vm556_vm1, %v5814_v52 }
 0x6e5   :  { %11890 = vmatmul.mubr.msk.f32.vlgmr.msra.gmra.mxu0 %vm556_vm1, %v5815_v5  ;;  %11907 = vmatmul.mubr.msk.f32.vlgmr.msra.gmra.mxu1 %vm556_vm1, %v5815_v5  ;;  %v5949_v5 = vld [vmem:[#allocation2 + $0x2c0] sm:$0xff] }
 0x6e6   :  { %11892 = vmatprep.mubr.msk.f32.mxu0 %vm556_vm1, %v5816_v3  ;;  %11909 = vmatprep.mubr.msk.f32.mxu1 %vm556_vm1, %v5816_v3 }
 0x6e7   :  { %11916 = vmatpush3.msra.mxu0 %v15147_v61  ;;  %11933 = vmatpush3.msra.mxu1 %v15153_v29  ;;  %v5946_v61 = vld [vmem:[#allocation2 + $0x2a8] sm:$0xff] }
 0x6e8   :  { %11917 = vmatprep.subr.mxu0 %v15171_v16  ;;  %11934 = vmatprep.subr.mxu1 %v15177_v9 }
 0x6e9   :  { %11893 = vmatmul.mubr.msk.f32.gmra.mxu0 %vm556_vm1, %v5817_v1  ;;  %11910 = vmatmul.mubr.msk.f32.gmra.mxu1 %vm556_vm1, %v5817_v1 }
 0x6ea   :  { %11895 = vmatprep.mubr.msk.f32.mxu0 %vm556_vm1, %v5818_v40  ;;  %11912 = vmatprep.mubr.msk.f32.mxu1 %vm556_vm1, %v5818_v40 }
 0x6eb   :  { %11918 = vmatpush3.msra.mxu0 %v15171_v16  ;;  %11935 = vmatpush3.msra.mxu1 %v15177_v9 }
 0x6ec   :  { %11919 = vmatprep.subr.mxu0 %v15189_v0  ;;  %11936 = vmatprep.subr.mxu1 %v15195_v25 }
 0x6ed   :  { %11896 = vmatmul.mubr.msk.f32.gmra.mxu0 %vm556_vm1, %v5819_v13  ;;  %11913 = vmatmul.mubr.msk.f32.gmra.mxu1 %vm556_vm1, %v5819_v13 }
 0x6ee   :  { %11920 = vmatpush3.msra.mxu0 %v15189_v0  ;;  %11937 = vmatpush3.msra.mxu1 %v15195_v25  ;;  %v5820_v0 = vld [vmem:[#allocation2 + $0x120] sm:$0xff] }
 0x6ef   :  { %11921 = vmatprep.subr.mxu0 %v15205_v38  ;;  %11938 = vmatprep.subr.mxu1 %v15211_v12 }
 0x6f0   :  { %11922 = vmatpush3.msra.mxu0 %v15205_v38  ;;  %11939 = vmatpush3.msra.mxu1 %v15211_v12 }
 0x6f1   :  { %11949 = vmatprep.subr.mxu0 %v15089_v54  ;;  %11966 = vmatprep.subr.mxu1 %v15095_v57  ;;  %v5823_v54 = vld [vmem:[#allocation2 + $0x138] sm:$0xff] }
 0x794   :  { %v11857_v36 = vpop.f32.mrf.mxu0  ;;  %v11874_v29 = vpop.f32.mrf.mxu1 }
 0x795   :  { %v5940_v16 = vadd.f32 %v11857_v36, %v5821_v45  ;;  %v6047_v9 = vadd.f32 %v11874_v29, %v5946_v61  ;;  %v6053_v36 = vld [vmem:[#allocation2 + $0x428] sm:$0xff] }
 0x796   :  { %v5910_v25 = vpop.f32.mrf.mxu0  ;;  %v6017_v17 = vpop.f32.mrf.mxu1  ;;  %v6160_v29 = vld [vmem:[#allocation2 + $0x5a8] sm:$0xff] }
 0x797   :  { %v10269_v18 = vmul.f32 -1.442695, %v5940_v16  ;;  %v10263_v6 = vmul.f32 -1.442695, %v6047_v9  ;;  %v5939_v4 = vadd.f32 %v5910_v25, %v5820_v0  ;;  %v6046_v38 = vadd.f32 %v6017_v17, %v5945_v49  ;;  %v6159_v17 = vld [vmem:[#allocation2 + $0x5a0] sm:$0xff] }
 0x799   :  { %12942 = vpow2.f32 %v10269_v18  ;;  %v10268_v12 = vmul.f32 -1.442695, %v5939_v4  ;;  %v10262_v20 = vmul.f32 -1.442695, %v6046_v38 }
 0x79a   :  { %12944 = vpow2.f32 %v10263_v6 }
 0x79b   :  { %12946 = vpow2.f32 %v10268_v12  ;;  %v11860_v57 = vpop.f32.mrf.mxu0  ;;  %v11877_v55 = vpop.f32.mrf.mxu1 }
 0x79c   :  { %12948 = vpow2.f32 %v10262_v20  ;;  %v5942_v22 = vadd.f32 %v11860_v57, %v5823_v54  ;;  %v6049_v30 = vadd.f32 %v11877_v55, %v5948_v19  ;;  %v6052_v55 = vld [vmem:[#allocation2 + $0x420] sm:$0xff] }
 0x79d   :  { %v5920_v31 = vpop.f32.mrf.mxu0  ;;  %v6027_v28 = vpop.f32.mrf.mxu1 }
 0x79e   :  { %v10271_v14 = vmul.f32 -1.442695, %v5942_v22  ;;  %v10265_v46 = vmul.f32 -1.442695, %v6049_v30  ;;  %v5941_v47 = vadd.f32 %v5920_v31, %v5822_v43  ;;  %v6048_v48 = vadd.f32 %v6027_v28, %v5947_v44  ;;  %v6162_v43 = vld [vmem:[#allocation2 + $0x5b8] sm:$0xff] }
 0x7a0   :  { %12950 = vpow2.f32 %v10271_v14  ;;  %v10270_v50 = vmul.f32 -1.442695, %v5941_v47  ;;  %v10264_v51 = vmul.f32 -1.442695, %v6048_v48  ;;  %v6055_v47 = vld [vmem:[#allocation2 + $0x438] sm:$0xff] }
 0x7a1   :  { %12952 = vpow2.f32 %v10265_v46  ;;  %v11863_v53 = vpop.f32.mrf.mxu0  ;;  %v11880_v58 = vpop.f32.mrf.mxu1  ;;  %v6161_v46 = vld [vmem:[#allocation2 + $0x5b0] sm:$0xff] }
 0x7a2   :  { %12954 = vpow2.f32 %v10270_v50  ;;  %v5944_v26 = vadd.f32 %v11863_v53, %v5825_v10  ;;  %v6051_v60 = vadd.f32 %v11880_v58, %v5950_v35 }
 0x7a3   :  { %12956 = vpow2.f32 %v10264_v51  ;;  %v5930_v59 = vpop.f32.mrf.mxu0  ;;  %v6037_v63 = vpop.f32.mrf.mxu1 }
 0x7a4   :  { %v10273_v34 = vmul.f32 -1.442695, %v5944_v26  ;;  %v10267_v37 = vmul.f32 -1.442695, %v6051_v60  ;;  %v5943_v52 = vadd.f32 %v5930_v59, %v5824_v27  ;;  %v6050_v8 = vadd.f32 %v6037_v63, %v5949_v5  ;;  %v6054_v26 = vld [vmem:[#allocation2 + $0x430] sm:$0xff] }
 0x7a5   :  { %v11908_v15 = vpop.f32.mrf.mxu1  ;;  %v11891_v1 = vpop.f32.mrf.mxu0 }
 0x7a6   :  { %v12943_v24 = vpop.eup %12942  ;;  %12958 = vpow2.f32 %v10267_v37  ;;  %v10272_v13 = vmul.f32 -1.442695, %v5943_v52  ;;  %v10266_v45 = vmul.f32 -1.442695, %v6050_v8  ;;  %v6154_v61 = vadd.f32 %v11891_v1, %v6053_v36  ;;  %v6164_v37 = vld [vmem:[#allocation2 + $0x5c8] sm:$0xff] }
 0x7a7   :  { %v12945_v11 = vpop.eup %12944  ;;  %v6327_v3 = vadd.f32 1.0, %v12943_v24  ;;  %v6231_v39 = vpop.f32.mrf.mxu1  ;;  %12960 = vpow2.f32 %v10273_v34  ;;  %v6261_v0 = vadd.f32 %v11908_v15, %v6160_v29 }
 0x7a8   :  { %v12947_v41 = vpop.eup %12946  ;;  %v6285_v7 = vadd.f32 1.0, %v12945_v11  ;;  %v6124_v16 = vpop.f32.mrf.mxu0  ;;  %v6260_v4 = vadd.f32 %v6231_v39, %v6159_v17  ;;  %v6057_v11 = vld [vmem:[#allocation2 + $0x448] sm:$0xff] }
 0x7a9   :  { %v12949_v42 = vpop.eup %12948  ;;  %v6326_v40 = vadd.f32 1.0, %v12947_v41  ;;  %12962 = vrcp.f32 %v6327_v3  ;;  %v11911_v25 = vpop.f32.mrf.mxu1  ;;  %v10275_v19 = vmul.f32 -1.442695, %v6261_v0  ;;  %v6153_v30 = vadd.f32 %v6124_v16, %v6052_v55  ;;  %v6163_v3 = vld [vmem:[#allocation2 + $0x5c0] sm:$0xff] }
 0x7aa   :  { %12964 = vrcp.f32 %v6285_v7  ;;  %v6284_v9 = vadd.f32 1.0, %v12949_v42  ;;  %v11894_v20 = vpop.f32.mrf.mxu0  ;;  %v10274_v31 = vmul.f32 -1.442695, %v6260_v4  ;;  %v6263_v44 = vadd.f32 %v11911_v25, %v6162_v43  ;;  %v6056_v16 = vld [vmem:[#allocation2 + $0x440] sm:$0xff] }
 0x7ab   :  { %12966 = vrcp.f32 %v6326_v40  ;;  %v6241_v22 = vpop.f32.mrf.mxu1  ;;  %v6156_v10 = vadd.f32 %v11894_v20, %v6055_v47 }
 0x7ac   :  { %12968 = vpow2.f32 %v10272_v13  ;;  %v6134_v14 = vpop.f32.mrf.mxu0  ;;  %v6262_v48 = vadd.f32 %v6241_v22, %v6161_v46  ;;  %v10277_v58 = vmul.f32 -1.442695, %v6263_v44 }
 0x7ad   :  { %v12951_v49 = vpop.eup %12950  ;;  %12970 = vpow2.f32 %v10266_v45  ;;  %v11914_v50 = vpop.f32.mrf.mxu1  ;;  %v6155_v27 = vadd.f32 %v6134_v14, %v6054_v26 }
 0x7ae   :  { %v12953_v18 = vpop.eup %12952  ;;  %v6329_v6 = vadd.f32 1.0, %v12951_v49  ;;  %12972 = vtanh.f32 %v6154_v61  ;;  %v11897_v59 = vpop.f32.mrf.mxu0  ;;  %v10276_v34 = vmul.f32 -1.442695, %v6262_v48  ;;  %v6265_v8 = vadd.f32 %v11914_v50, %v6164_v37 }
 0x7af   :  { %v12955_v38 = vpop.eup %12954  ;;  %v6287_v12 = vadd.f32 1.0, %v12953_v18  ;;  %12974 = vrcp.f32 %v6284_v9  ;;  %v6251_v52 = vpop.f32.mrf.mxu1  ;;  %v6158_v41 = vadd.f32 %v11897_v59, %v6057_v11 }
 0x7b0   :  { %v12957_v54 = vpop.eup %12956  ;;  %v6328_v57 = vadd.f32 1.0, %v12955_v38  ;;  %12976 = vrcp.f32 %v6329_v6  ;;  %v6144_v7 = vpop.f32.mrf.mxu0  ;;  %v6264_v39 = vadd.f32 %v6251_v52, %v6163_v3  ;;  %v10279_v29 = vmul.f32 -1.442695, %v6265_v8 }
 0x7b1   :  { %12978 = vrcp.f32 %v6287_v12  ;;  %v6286_v28 = vadd.f32 1.0, %v12957_v54  ;;  %v6157_v0 = vadd.f32 %v6144_v7, %v6056_v16 }
 0x7b2   :  { %12980 = vrcp.f32 %v6328_v57  ;;  %v10278_v49 = vmul.f32 -1.442695, %v6264_v39  ;;  %v13294_v39 = vld [vmem:[%s16040_s3 + $0x50] sm:$0xff] }
 0x7b3   :  { %12982 = vpow2.f32 %v10275_v19  ;;  %v12959_v51 = vpop.eup %12958 }
 0x7b4   :  { %12984 = vtanh.f32 %v6153_v30  ;;  %v12961_v53 = vpop.eup %12960  ;;  %v6289_v35 = vadd.f32 1.0, %v12959_v51 }
 0x7b5   :  { %12986 = vpow2.f32 %v10274_v31  ;;  %v6331_v24 = vadd.f32 1.0, %v12961_v53 }
 0x7b6   :  { %v12963_v60 = vpop.eup %12962  ;;  %12988 = vrcp.f32 %v6286_v28 }
 0x7b7   :  { %v12965_v63 = vpop.eup %12964  ;;  %12990 = vrcp.f32 %v6289_v35 }
 0x7b8   :  { %v12967_v5 = vpop.eup %12966  ;;  %12992 = vtanh.f32 %v6156_v10  ;;  %v6303_v36 = vmul.f32 %v12965_v63, %v15219_v56 }
 0x7b9   :  { %v12969_v15 = vpop.eup %12968  ;;  %12994 = vpow2.f32 %v10277_v58 }
 0x7ba   :  { %v12971_v1 = vpop.eup %12970  ;;  %12996 = vtanh.f32 %v6155_v27  ;;  %v6330_v40 = vadd.f32 1.0, %v12969_v15 }
 0x7bb   :  { %v12973_v42 = vpop.eup %12972  ;;  %v6288_v13 = vadd.f32 1.0, %v12971_v1  ;;  %12998 = vpow2.f32 %v10276_v34  ;;  %v13292_v1 = vld [vmem:[%s16040_s3 + $0x58] sm:$0xff] }
 0x7bc   :  { %v12975_v45 = vpop.eup %12974  ;;  %13000 = vrcp.f32 %v6331_v24  ;;  %v6351_v61 = vmul.f32 %v12973_v42, %v12963_v60  ;;  %v13295_v42 = vld [vmem:[%s16040_s3 + $0x70] sm:$0xff] }
 0x7bd   :  { %v12977_v9 = vpop.eup %12976  ;;  %13002 = vrcp.f32 %v6288_v13  ;;  %v6302_v4 = vmul.f32 %v12975_v45, %v15223_v23 }
 0x7be   :  { %v12979_v25 = vpop.eup %12978  ;;  %13004 = vtanh.f32 %v6158_v41  ;;  %v15299_v6 = vadd.f32 %v6351_v61, %v6303_v36  ;;  %v13293_v41 = vld [vmem:[%s16040_s3 + $0x78] sm:$0xff]  ;;  %v13296_v36 = vld [vmem:[%s16040_s3 + $0x48] sm:$0xff] }
 0x7bf   :  { %v12981_v17 = vpop.eup %12980  ;;  %13006 = vrcp.f32 %v6330_v40  ;;  %v6305_v22 = vmul.f32 %v12979_v25, %v15228_v32  ;;  %v13297_v61 = vld [vmem:[%s16040_s3 + $0x68] sm:$0xff] }
 0x7c0   :  { %v12983_v18 = vpop.eup %12982  ;;  %13008 = vpow2.f32 %v10279_v29 }
 0x7c1   :  { %v12985_v38 = vpop.eup %12984  ;;  %13010 = vtanh.f32 %v6157_v0  ;;  %v6381_v54 = vadd.f32 1.0, %v12983_v18  ;;  %v13299_v0 = vld [vmem:[%s16040_s3 + $0x60] sm:$0xff] }
 0x7c2   :  { %v12987_v56 = vpop.eup %12986  ;;  %v6350_v12 = vmul.f32 %v12985_v38, %v12967_v5  ;;  %13012 = vpow2.f32 %v10278_v49  ;;  %v10332_v38 = vld [vmem:[%s16042_s5 + $0x38] sm:$0xff] }
 0x7c3   :  { %v12989_v20 = vpop.eup %12988  ;;  %v6380_v57 = vadd.f32 1.0, %v12987_v56  ;;  %13014 = vtanh.f32 %v15299_v6  ;;  %v7002_v56 = vld [vmem:[%s16042_s5 + $0x10] sm:$0xff] }
 0x7c4   :  { %v12991_v19 = vpop.eup %12990  ;;  %v15303_v55 = vadd.f32 %v6350_v12, %v6302_v4  ;;  %v6304_v31 = vmul.f32 %v12989_v20, %v15232_v62  ;;  %v7003_v4 = vld [vmem:[%s16042_s5 + $0x18] sm:$0xff]  ;;  %v10331_v12 = vld [vmem:[%s16042_s5 + $0x30] sm:$0xff]  ;;  %v7001_v20 = vld [vmem:[%s16042_s5 + $0x8] sm:$0xff] }
 0x7c5   :  { %v12993_v30 = vpop.eup %12992  ;;  %13016 = vrcp.f32 %v6380_v57  ;;  %v6307_v10 = vmul.f32 %v12991_v19, %v15235_v21  ;;  %v7000_v57 = vld [vmem:[%s16042_s5] sm:$0xff] }
 0x7c6   :  { %v12995_v43 = vpop.eup %12994  ;;  %13018 = vtanh.f32 %v15303_v55  ;;  %v6353_v23 = vmul.f32 %v12993_v30, %v12977_v9  ;;  %v13298_v9 = vld [vmem:[%s16040_s3 + $0x40] sm:$0xff]  ;;  %v15402_v30 = vld [vmem:[%s16042_s5 + $0x78] sm:$0xff] }
 0x7c7   :  { %v12997_v44 = vpop.eup %12996  ;;  %13020 = vrcp.f32 %v6381_v54  ;;  %v6383_v48 = vadd.f32 1.0, %v12995_v43  ;;  %v10330_v54 = vld [vmem:[%s16042_s5 + $0x28] sm:$0xff]  ;;  %v10329_v19 = vld [vmem:[%s16042_s5 + $0x20] sm:$0xff]  ;;  %v6411_v43 = vld [vmem:[#allocation2 + $0x158] sm:$0xff] }
 0x7c8   :  { %v12999_v28 = vpop.eup %12998  ;;  %v15308_v14 = vadd.f32 %v6353_v23, %v6305_v22  ;;  %v6352_v46 = vmul.f32 %v12997_v44, %v12981_v17  ;;  %v15397_v22 = vld [vmem:[%s16042_s5 + $0x58] sm:$0xff] }
 0x7c9   :  { %v13001_v47 = vpop.eup %13000  ;;  %v6382_v50 = vadd.f32 1.0, %v12999_v28 }
 0x7ca   :  { %v13003_v51 = vpop.eup %13002  ;;  %13022 = vtanh.f32 %v15308_v14  ;;  %v15311_v32 = vadd.f32 %v6352_v46, %v6304_v31  ;;  %v6536_v31 = vld [vmem:[#allocation2 + $0x2d8] sm:$0xff] }
 0x7cb   :  { %v13005_v53 = vpop.eup %13004  ;;  %13024 = vrcp.f32 %v6382_v50  ;;  %v6306_v26 = vmul.f32 %v13003_v51, %v15239_v33  ;;  %v6535_v50 = vld [vmem:[#allocation2 + $0x2d0] sm:$0xff] }
 0x7cc   :  { %v13007_v35 = vpop.eup %13006  ;;  %13026 = vtanh.f32 %v15311_v32  ;;  %v6355_v62 = vmul.f32 %v13005_v53, %v13001_v47  ;;  %v6410_v47 = vld [vmem:[#allocation2 + $0x150] sm:$0xff] }
 0x7cd   :  { %v13009_v58 = vpop.eup %13008  ;;  %13028 = vrcp.f32 %v6383_v48 }
 0x7ce   :  { %v13011_v60 = vpop.eup %13010  ;;  %v15316_v27 = vadd.f32 %v6355_v62, %v6307_v10  ;;  %v6385_v34 = vadd.f32 1.0, %v13009_v58 }
 0x7cf   :  { %v13013_v59 = vpop.eup %13012  ;;  %v6354_v63 = vmul.f32 %v13011_v60, %v13007_v35  ;;  %v6413_v60 = vld [vmem:[#allocation2 + $0x168] sm:$0xff] }
 0x7d0   :  { %v6384_v37 = vadd.f32 1.0, %v13013_v59  ;;  %v13015_v52 = vpop.eup %13014  ;;  %13030 = vtanh.f32 %v15316_v27 }
 0x7d1   :  { %v15319_v21 = vadd.f32 %v6354_v63, %v6306_v26  ;;  %v6538_v63 = vld [vmem:[#allocation2 + $0x2e8] sm:$0xff] }
 0x7d2   :  { %v13017_v5 = vpop.eup %13016  ;;  %13032 = vrcp.f32 %v6384_v37 }
 0x7d3   :  { %v13019_v24 = vpop.eup %13018  ;;  %13034 = vtanh.f32 %v15319_v21 }
 0x7d4   :  { %v13021_v8 = vpop.eup %13020  ;;  %13036 = vrcp.f32 %v6385_v34  ;;  %v6404_v33 = vmul.f32 %v13019_v24, %v13017_v5  ;;  %v6412_v5 = vld [vmem:[#allocation2 + $0x160] sm:$0xff] }
 0x7d5   :  { %v6405_v15 = vmul.f32 %v13021_v8, %v13015_v52  ;;  %v6537_v8 = vld [vmem:[#allocation2 + $0x2e0] sm:$0xff] }
 0x7d6   :  { %11923 = vmatprep.mubr.msk.f32.mxu0 %vm556_vm1, %v6404_v33  ;;  %11940 = vmatprep.mubr.msk.f32.mxu1 %vm556_vm1, %v6404_v33 }
 0x7d7   :  { %v13023_v11 = vpop.eup %13022  ;;  %11924 = vmatmul.mubr.msk.f32.vlgmr.msra.gmra.mxu0 %vm556_vm1, %v6405_v15  ;;  %11941 = vmatmul.mubr.msk.f32.vlgmr.msra.gmra.mxu1 %vm556_vm1, %v6405_v15 }
 0x7d8   :  { %v13025_v3 = vpop.eup %13024  ;;  %11950 = vmatpush3.msra.mxu0 %v13292_v1  ;;  %11967 = vmatpush3.msra.mxu1 %v13293_v41 }
 0x7d9   :  { %v13027_v7 = vpop.eup %13026  ;;  %11951 = vmatprep.subr.mxu0 %v13294_v39  ;;  %11968 = vmatprep.subr.mxu1 %v13295_v42 }
 0x7da   :  { %v13029_v40 = vpop.eup %13028  ;;  %v6406_v13 = vmul.f32 %v13027_v7, %v13025_v3  ;;  %11952 = vmatpush3.msra.mxu0 %v13294_v39  ;;  %11969 = vmatpush3.msra.mxu1 %v13295_v42  ;;  %v6415_v39 = vld [vmem:[#allocation2 + $0x178] sm:$0xff] }
 0x7db   :  { %v6407_v45 = vmul.f32 %v13029_v40, %v13023_v11  ;;  %11953 = vmatprep.subr.mxu0 %v13296_v36  ;;  %11970 = vmatprep.subr.mxu1 %v13297_v61  ;;  %v6540_v40 = vld [vmem:[#allocation2 + $0x2f8] sm:$0xff] }
 0x7dc   :  { %11926 = vmatprep.mubr.msk.f32.mxu0 %vm556_vm1, %v6406_v13  ;;  %11943 = vmatprep.mubr.msk.f32.mxu1 %vm556_vm1, %v6406_v13 }
 0x7dd   :  { %11927 = vmatmul.mubr.msk.f32.gmra.mxu0 %vm556_vm1, %v6407_v45  ;;  %11944 = vmatmul.mubr.msk.f32.gmra.mxu1 %vm556_vm1, %v6407_v45  ;;  %v13031_v29 = vpop.eup %13030 }
 0x7de   :  { %11954 = vmatpush3.msra.mxu0 %v13296_v36  ;;  %11971 = vmatpush3.msra.mxu1 %v13297_v61  ;;  %v6414_v61 = vld [vmem:[#allocation2 + $0x170] sm:$0xff] }
 0x7df   :  { %v13033_v16 = vpop.eup %13032  ;;  %11955 = vmatprep.subr.mxu0 %v13298_v9  ;;  %11972 = vmatprep.subr.mxu1 %v13299_v0 }
 0x7e0   :  { %v13035_v25 = vpop.eup %13034  ;;  %11956 = vmatpush3.msra.mxu0 %v13298_v9  ;;  %11973 = vmatpush3.msra.mxu1 %v13299_v0 }
 0x7e1   :  { %v13037_v49 = vpop.eup %13036  ;;  %v6408_v17 = vmul.f32 %v13035_v25, %v13033_v16  ;;  %11983 = vmatprep.subr.mxu0 %v7003_v4  ;;  %12000 = vmatprep.subr.mxu1 %v10332_v38 }
 0x7e2   :  { %v6409_v18 = vmul.f32 %v13037_v49, %v13031_v29  ;;  %v6539_v49 = vld [vmem:[#allocation2 + $0x2f0] sm:$0xff] }
 0x7e3   :  { %11929 = vmatprep.mubr.msk.f32.mxu0 %vm556_vm1, %v6408_v17  ;;  %11946 = vmatprep.mubr.msk.f32.mxu1 %vm556_vm1, %v6408_v17 }
 0x7e4   :  { %11930 = vmatmul.mubr.msk.f32.gmra.mxu0 %vm556_vm1, %v6409_v18  ;;  %11947 = vmatmul.mubr.msk.f32.gmra.mxu1 %vm556_vm1, %v6409_v18 }
 0x7e5   :  { %11957 = vmatprep.mubr.msk.f32.mxu0 %vm556_vm1, %v6404_v33  ;;  %11974 = vmatprep.mubr.msk.f32.mxu1 %vm556_vm1, %v6404_v33 }
 0x7e8   :  { %11958 = vmatmul.mubr.msk.f32.vlgmr.msra.gmra.mxu0 %vm556_vm1, %v6405_v15  ;;  %11975 = vmatmul.mubr.msk.f32.vlgmr.msra.gmra.mxu1 %vm556_vm1, %v6405_v15 }
 0x7e9   :  { %11960 = vmatprep.mubr.msk.f32.mxu0 %vm556_vm1, %v6406_v13  ;;  %11977 = vmatprep.mubr.msk.f32.mxu1 %vm556_vm1, %v6406_v13 }
 0x7ea   :  { %11984 = vmatpush3.msra.mxu0 %v7003_v4  ;;  %12001 = vmatpush3.msra.mxu1 %v10332_v38 }
 0x7eb   :  { %11985 = vmatprep.subr.mxu0 %v7002_v56  ;;  %12002 = vmatprep.subr.mxu1 %v10331_v12 }
 0x7ec   :  { %11961 = vmatmul.mubr.msk.f32.gmra.mxu0 %vm556_vm1, %v6407_v45  ;;  %11978 = vmatmul.mubr.msk.f32.gmra.mxu1 %vm556_vm1, %v6407_v45 }
 0x7ed   :  { %11963 = vmatprep.mubr.msk.f32.mxu0 %vm556_vm1, %v6408_v17  ;;  %11980 = vmatprep.mubr.msk.f32.mxu1 %vm556_vm1, %v6408_v17 }
 0x7ee   :  { %11986 = vmatpush3.msra.mxu0 %v7002_v56  ;;  %12003 = vmatpush3.msra.mxu1 %v10331_v12 }
 0x7ef   :  { %11987 = vmatprep.subr.mxu0 %v7001_v20  ;;  %12004 = vmatprep.subr.mxu1 %v10330_v54 }
 0x7f0   :  { %11964 = vmatmul.mubr.msk.f32.gmra.mxu0 %vm556_vm1, %v6409_v18  ;;  %11981 = vmatmul.mubr.msk.f32.gmra.mxu1 %vm556_vm1, %v6409_v18 }
 0x7f1   :  { %11988 = vmatpush3.msra.mxu0 %v7001_v20  ;;  %12005 = vmatpush3.msra.mxu1 %v10330_v54 }
 0x7f2   :  { %11989 = vmatprep.subr.mxu0 %v7000_v57  ;;  %12006 = vmatprep.subr.mxu1 %v10329_v19 }
 0x7f3   :  { %11990 = vmatpush3.msra.mxu0 %v7000_v57  ;;  %12007 = vmatpush3.msra.mxu1 %v10329_v19 }
 0x7f4   :  { %12017 = vmatprep.subr.mxu0 %v15397_v22  ;;  %12034 = vmatprep.subr.mxu1 %v15402_v30 }
 0x897   :  { %v11925_v23 = vpop.f32.mrf.mxu0  ;;  %v11942_v44 = vpop.f32.mrf.mxu1 }
 0x898   :  { %v6530_v28 = vadd.f32 %v11925_v23, %v6411_v43  ;;  %v6637_v46 = vadd.f32 %v11942_v44, %v6536_v31  ;;  %v6643_v44 = vld [vmem:[#allocation2 + $0x458] sm:$0xff] }
 0x899   :  { %v6500_v48 = vpop.f32.mrf.mxu0  ;;  %v6607_v51 = vpop.f32.mrf.mxu1 }
 0x89a   :  { %v10311_v10 = vmul.f32 -1.442695, %v6530_v28  ;;  %v10305_v53 = vmul.f32 -1.442695, %v6637_v46  ;;  %v6529_v35 = vadd.f32 %v6500_v48, %v6410_v47  ;;  %v6636_v62 = vadd.f32 %v6607_v51, %v6535_v50  ;;  %v6750_v46 = vld [vmem:[#allocation2 + $0x5d8] sm:$0xff] }
 0x89c   :  { %13038 = vpow2.f32 %v10311_v10  ;;  %v10310_v58 = vmul.f32 -1.442695, %v6529_v35  ;;  %v10304_v26 = vmul.f32 -1.442695, %v6636_v62 }
 0x89d   :  { %13040 = vpow2.f32 %v10305_v53  ;;  %v11928_v59 = vpop.f32.mrf.mxu0  ;;  %v11945_v34 = vpop.f32.mrf.mxu1  ;;  %v6749_v53 = vld [vmem:[#allocation2 + $0x5d0] sm:$0xff] }
 0x89e   :  { %13042 = vpow2.f32 %v10310_v58  ;;  %v6532_v37 = vadd.f32 %v11928_v59, %v6413_v60  ;;  %v6639_v52 = vadd.f32 %v11945_v34, %v6538_v63 }
 0x89f   :  { %13044 = vpow2.f32 %v10304_v26  ;;  %v6510_v24 = vpop.f32.mrf.mxu0  ;;  %v6617_v33 = vpop.f32.mrf.mxu1 }
 0x8a0   :  { %v10313_v15 = vmul.f32 -1.442695, %v6532_v37  ;;  %v10307_v11 = vmul.f32 -1.442695, %v6639_v52  ;;  %v6531_v3 = vadd.f32 %v6510_v24, %v6412_v5  ;;  %v6638_v1 = vadd.f32 %v6617_v33, %v6537_v8  ;;  %v6642_v52 = vld [vmem:[#allocation2 + $0x450] sm:$0xff]  ;;  %v6752_v33 = vld [vmem:[#allocation2 + $0x5e8] sm:$0xff] }
 0x8a2   :  { %13046 = vpow2.f32 %v10313_v15  ;;  %v10312_v41 = vmul.f32 -1.442695, %v6531_v3  ;;  %v10306_v7 = vmul.f32 -1.442695, %v6638_v1 }
 0x8a3   :  { %13048 = vpow2.f32 %v10307_v11 }
 0x8a4   :  { %13050 = vpow2.f32 %v10312_v41  ;;  %v11931_v42 = vpop.f32.mrf.mxu0  ;;  %v11948_v13 = vpop.f32.mrf.mxu1  ;;  %v6751_v41 = vld [vmem:[#allocation2 + $0x5e0] sm:$0xff] }
 0x8a5   :  { %13052 = vpow2.f32 %v10306_v7  ;;  %v6534_v45 = vadd.f32 %v11931_v42, %v6415_v39  ;;  %v6641_v36 = vadd.f32 %v11948_v13, %v6540_v40  ;;  %v6645_v40 = vld [vmem:[#allocation2 + $0x468] sm:$0xff] }
 0x8a6   :  { %v6520_v29 = vpop.f32.mrf.mxu0  ;;  %v6627_v16 = vpop.f32.mrf.mxu1 }
 0x8a7   :  { %v10315_v9 = vmul.f32 -1.442695, %v6534_v45  ;;  %v10309_v0 = vmul.f32 -1.442695, %v6641_v36  ;;  %v6533_v25 = vadd.f32 %v6520_v29, %v6414_v61  ;;  %v6640_v17 = vadd.f32 %v6627_v16, %v6539_v49  ;;  %v6644_v16 = vld [vmem:[#allocation2 + $0x460] sm:$0xff]  ;;  %v6754_v49 = vld [vmem:[#allocation2 + $0x5f8] sm:$0xff] }
 0x8a8   :  { %v11976_v18 = vpop.f32.mrf.mxu1  ;;  %v11959_v56 = vpop.f32.mrf.mxu0 }
 0x8a9   :  { %v13039_v4 = vpop.eup %13038  ;;  %13054 = vpow2.f32 %v10315_v9  ;;  %v10314_v38 = vmul.f32 -1.442695, %v6533_v25  ;;  %v10308_v31 = vmul.f32 -1.442695, %v6640_v17  ;;  %v6744_v28 = vadd.f32 %v11959_v56, %v6643_v44 }
 0x8aa   :  { %v13041_v12 = vpop.eup %13040  ;;  %v6917_v20 = vadd.f32 1.0, %v13039_v4  ;;  %13056 = vpow2.f32 %v10309_v0  ;;  %v6821_v54 = vpop.f32.mrf.mxu1  ;;  %v6851_v50 = vadd.f32 %v11976_v18, %v6750_v46 }
 0x8ab   :  { %v13043_v57 = vpop.eup %13042  ;;  %v6875_v19 = vadd.f32 1.0, %v13041_v12  ;;  %13058 = vpow2.f32 %v10314_v38  ;;  %v6714_v47 = vpop.f32.mrf.mxu0  ;;  %v6850_v58 = vadd.f32 %v6821_v54, %v6749_v53  ;;  %v6647_v12 = vld [vmem:[#allocation2 + $0x478] sm:$0xff] }
 0x8ac   :  { %v13045_v43 = vpop.eup %13044  ;;  %v6916_v23 = vadd.f32 1.0, %v13043_v57  ;;  %13060 = vrcp.f32 %v6917_v20  ;;  %v11979_v51 = vpop.f32.mrf.mxu1  ;;  %v10317_v37 = vmul.f32 -1.442695, %v6851_v50  ;;  %v6743_v24 = vadd.f32 %v6714_v47, %v6642_v52  ;;  %v6753_v20 = vld [vmem:[#allocation2 + $0x5f0] sm:$0xff] }
 0x8ad   :  { %13062 = vrcp.f32 %v6875_v19  ;;  %v6874_v48 = vadd.f32 1.0, %v13045_v43  ;;  %v11962_v59 = vpop.f32.mrf.mxu0  ;;  %v10316_v8 = vmul.f32 -1.442695, %v6850_v58  ;;  %v6853_v11 = vadd.f32 %v11979_v51, %v6752_v33  ;;  %v6646_v50 = vld [vmem:[#allocation2 + $0x470] sm:$0xff] }
 0x8ae   :  { %13064 = vrcp.f32 %v6916_v23  ;;  %v6831_v5 = vpop.f32.mrf.mxu1  ;;  %v6746_v36 = vadd.f32 %v11962_v59, %v6645_v40 }
 0x8af   :  { %v13047_v10 = vpop.eup %13046  ;;  %13066 = vpow2.f32 %v10308_v31  ;;  %v6724_v3 = vpop.f32.mrf.mxu0  ;;  %v6852_v13 = vadd.f32 %v6831_v5, %v6751_v41  ;;  %v10319_v29 = vmul.f32 -1.442695, %v6853_v11 }
 0x8b0   :  { %v13049_v35 = vpop.eup %13048  ;;  %v6919_v62 = vadd.f32 1.0, %v13047_v10  ;;  %13068 = vtanh.f32 %v6744_v28  ;;  %v11982_v7 = vpop.f32.mrf.mxu1  ;;  %v6745_v25 = vadd.f32 %v6724_v3, %v6644_v16 }
 0x8b1   :  { %v13051_v26 = vpop.eup %13050  ;;  %v6877_v60 = vadd.f32 1.0, %v13049_v35  ;;  %13070 = vrcp.f32 %v6874_v48  ;;  %v11965_v9 = vpop.f32.mrf.mxu0  ;;  %v10318_v4 = vmul.f32 -1.442695, %v6852_v13  ;;  %v6855_v38 = vadd.f32 %v11982_v7, %v6754_v49 }
 0x8b2   :  { %v13053_v63 = vpop.eup %13052  ;;  %v6918_v34 = vadd.f32 1.0, %v13051_v26  ;;  %13072 = vrcp.f32 %v6919_v62  ;;  %v6841_v17 = vpop.f32.mrf.mxu1  ;;  %v6748_v57 = vadd.f32 %v11965_v9, %v6647_v12 }
 0x8b3   :  { %13074 = vrcp.f32 %v6877_v60  ;;  %v6876_v15 = vadd.f32 1.0, %v13053_v63  ;;  %v6734_v19 = vpop.f32.mrf.mxu0  ;;  %v6854_v43 = vadd.f32 %v6841_v17, %v6753_v20  ;;  %v10321_v48 = vmul.f32 -1.442695, %v6855_v38 }
 0x8b4   :  { %13076 = vrcp.f32 %v6918_v34  ;;  %v6747_v10 = vadd.f32 %v6734_v19, %v6646_v50 }
 0x8b5   :  { %13078 = vpow2.f32 %v10317_v37  ;;  %v10320_v35 = vmul.f32 -1.442695, %v6854_v43  ;;  %v10342_v43 = vld [vmem:[%s16042_s5 + $0x48] sm:$0xff] }
 0x8b6   :  { %v13055_v1 = vpop.eup %13054  ;;  %13080 = vtanh.f32 %v6743_v24 }
 0x8b7   :  { %v13057_v39 = vpop.eup %13056  ;;  %v6921_v42 = vadd.f32 1.0, %v13055_v1  ;;  %13082 = vpow2.f32 %v10316_v8 }
 0x8b8   :  { %v6879_v45 = vadd.f32 1.0, %v13057_v39  ;;  %v13059_v61 = vpop.eup %13058  ;;  %13084 = vrcp.f32 %v6876_v15 }
 0x8b9   :  { %v13061_v0 = vpop.eup %13060  ;;  %13086 = vrcp.f32 %v6921_v42  ;;  %v6920_v31 = vadd.f32 1.0, %v13059_v61 }
 0x8ba   :  { %v13063_v18 = vpop.eup %13062  ;;  %13088 = vrcp.f32 %v6879_v45 }
 0x8bb   :  { %v13065_v56 = vpop.eup %13064  ;;  %13090 = vtanh.f32 %v6746_v36  ;;  %v6893_v46 = vmul.f32 %v13063_v18, %v15299_v6 }
 0x8bc   :  { %v13067_v54 = vpop.eup %13066  ;;  %13092 = vpow2.f32 %v10319_v29 }
 0x8bd   :  { %v13069_v23 = vpop.eup %13068  ;;  %v6878_v44 = vadd.f32 1.0, %v13067_v54  ;;  %13094 = vtanh.f32 %v6745_v25 }
 0x8be   :  { %v13071_v28 = vpop.eup %13070  ;;  %v6941_v47 = vmul.f32 %v13069_v23, %v13061_v0  ;;  %13096 = vpow2.f32 %v10318_v4  ;;  %v10354_v23 = vld [vmem:[%s16042_s5 + $0x68] sm:$0xff] }
 0x8bf   :  { %v13073_v51 = vpop.eup %13072  ;;  %13098 = vrcp.f32 %v6878_v44  ;;  %v6892_v60 = vmul.f32 %v13071_v28, %v15303_v55 }
 0x8c0   :  { %v13075_v53 = vpop.eup %13074  ;;  %13100 = vtanh.f32 %v6748_v57  ;;  %v6947_v26 = vadd.f32 %v6941_v47, %v6893_v46  ;;  %v10355_v57 = vld [vmem:[%s16042_s5 + $0x70] sm:$0xff]  ;;  %v10353_v47 = vld [vmem:[%s16042_s5 + $0x60] sm:$0xff] }
 0x8c1   :  { %v13077_v62 = vpop.eup %13076  ;;  %13102 = vrcp.f32 %v6920_v31  ;;  %v6895_v33 = vmul.f32 %v13075_v53, %v15308_v14 }
 0x8c2   :  { %v13079_v58 = vpop.eup %13078  ;;  %13104 = vpow2.f32 %v10321_v48 }
 0x8c3   :  { %v13081_v59 = vpop.eup %13080  ;;  %13106 = vtanh.f32 %v6747_v10  ;;  %v6971_v37 = vadd.f32 1.0, %v13079_v58  ;;  %v15456_v58 = vld [vmem:[%s16043_s6 + $0x38] sm:$0xff] }
 0x8c4   :  { %v13083_v6 = vpop.eup %13082  ;;  %v6940_v63 = vmul.f32 %v13081_v59, %v13065_v56  ;;  %13108 = vpow2.f32 %v10320_v35  ;;  %v15483_v59 = vld [vmem:[%s16043_s6 + $0x8] sm:$0xff] }
 0x8c5   :  { %v13085_v34 = vpop.eup %13084  ;;  %v6970_v52 = vadd.f32 1.0, %v13083_v6  ;;  %13110 = vtanh.f32 %v6947_v26  ;;  %v15467_v26 = vld [vmem:[%s16043_s6 + $0x10] sm:$0xff]  ;;  %v15488_v6 = vld [vmem:[%s16043_s6 + $0x28] sm:$0xff] }
 0x8c6   :  { %v13087_v5 = vpop.eup %13086  ;;  %v6946_v24 = vadd.f32 %v6940_v63, %v6892_v60  ;;  %v6894_v3 = vmul.f32 %v13085_v34, %v15311_v32  ;;  %v15472_v60 = vld [vmem:[%s16043_s6 + $0x30] sm:$0xff]  ;;  %v15499_v63 = vld [vmem:[%s16043_s6] sm:$0xff] }
 0x8c7   :  { %v13089_v8 = vpop.eup %13088  ;;  %13112 = vrcp.f32 %v6970_v52  ;;  %v15504_v34 = vld [vmem:[%s16043_s6 + $0x20] sm:$0xff]  ;;  %v15524_v52 = vld [vmem:[%s16043_s6 + $0x78] sm:$0xff] }
 0x8c8   :  { %v13091_v15 = vpop.eup %13090  ;;  %13114 = vtanh.f32 %v6946_v24  ;;  %v6897_v45 = vmul.f32 %v13089_v8, %v15316_v27  ;;  %v15538_v24 = vld [vmem:[%s16043_s6 + $0x70] sm:$0xff]  ;;  %v15547_v8 = vld [vmem:[%s16043_s6 + $0x48] sm:$0xff] }
 0x8c9   :  { %v13093_v11 = vpop.eup %13092  ;;  %13116 = vrcp.f32 %v6971_v37  ;;  %v6943_v55 = vmul.f32 %v13091_v15, %v13073_v51  ;;  %v15519_v37 = vld [vmem:[%s16043_s6 + $0x58] sm:$0xff]  ;;  %v15561_v15 = vld [vmem:[%s16043_s6 + $0x40] sm:$0xff] }
 0x8ca   :  { %v13095_v1 = vpop.eup %13094  ;;  %v6973_v40 = vadd.f32 1.0, %v13093_v11  ;;  %v15568_v11 = vld [vmem:[%s16043_s6 + $0x60] sm:$0xff] }
 0x8cb   :  { %v13097_v41 = vpop.eup %13096  ;;  %v6949_v7 = vadd.f32 %v6943_v55, %v6895_v33  ;;  %v6942_v39 = vmul.f32 %v13095_v1, %v13077_v62  ;;  %v15451_v62 = vld [vmem:[%s16043_s6 + $0x18] sm:$0xff]  ;;  %v15552_v33 = vld [vmem:[%s16043_s6 + $0x68] sm:$0xff]  ;;  %v10322_v55 = vld [vmem:[%s16044_s7] ss:$0 sm:$0xff] }
 0x8cc   :  { %v13099_v42 = vpop.eup %13098  ;;  %v6972_v13 = vadd.f32 1.0, %v13097_v41 }
 0x8cd   :  { %v13101_v36 = vpop.eup %13100  ;;  %13118 = vtanh.f32 %v6949_v7  ;;  %v6948_v61 = vadd.f32 %v6942_v39, %v6894_v3  ;;  %v6896_v9 = vmul.f32 %v13099_v42, %v15319_v21  ;;  %v10343_v21 = vld [vmem:[%s16042_s5 + $0x50] sm:$0xff]  ;;  %v10334_v3 = vld [vmem:[%s16044_s7 + $0x1] ss:$0 sm:$0xff] }
 0x8ce   :  { %v13103_v14 = vpop.eup %13102  ;;  %13120 = vrcp.f32 %v6972_v13  ;;  %v6945_v29 = vmul.f32 %v13101_v36, %v13087_v5  ;;  %v15533_v5 = vld [vmem:[%s16043_s6 + $0x50] sm:$0xff] }
 0x8cf   :  { %v13105_v16 = vpop.eup %13104  ;;  %13122 = vtanh.f32 %v6948_v61 }
 0x8d0   :  { %v13107_v32 = vpop.eup %13106  ;;  %13124 = vrcp.f32 %v6973_v40  ;;  %v6951_v0 = vadd.f32 %v6945_v29, %v6897_v45  ;;  %v6975_v17 = vadd.f32 1.0, %v13105_v16 }
 0x8d1   :  { %v13109_v25 = vpop.eup %13108  ;;  %v6944_v49 = vmul.f32 %v13107_v32, %v13103_v14 }
 0x8d2   :  { %v6974_v18 = vadd.f32 1.0, %v13109_v25  ;;  %v13111_v4 = vpop.eup %13110  ;;  %13126 = vtanh.f32 %v6951_v0 }
 0x8d3   :  { %v6950_v27 = vadd.f32 %v6944_v49, %v6896_v9 }
 0x8d4   :  { %v13113_v38 = vpop.eup %13112  ;;  %13128 = vrcp.f32 %v6974_v18 }
 0x8d5   :  { %v13115_v56 = vpop.eup %13114  ;;  %13130 = vtanh.f32 %v6950_v27 }
 0x8d6   :  { %v13117_v12 = vpop.eup %13116  ;;  %13132 = vrcp.f32 %v6975_v17  ;;  %v6994_v20 = vmul.f32 %v13115_v56, %v13113_v38  ;;  %v10346_v38 = vld [vmem:[%s16044_s7 + $0x2] ss:$0 sm:$0xff]  ;;  %v10358_v56 = vld [vmem:[%s16044_s7 + $0x3] ss:$0 sm:$0xff] }
 0x8d7   :  { %v6995_v54 = vmul.f32 %v13117_v12, %v13111_v4 }
 0x8d8   :  { %11991 = vmatprep.mubr.msk.f32.mxu0 %vm556_vm1, %v6994_v20  ;;  %12008 = vmatprep.mubr.msk.f32.mxu1 %vm556_vm1, %v6994_v20 }
 0x8d9   :  { %11992 = vmatmul.mubr.msk.f32.vlgmr.msra.gmra.mxu0 %vm556_vm1, %v6995_v54  ;;  %12009 = vmatmul.mubr.msk.f32.vlgmr.msra.gmra.mxu1 %vm556_vm1, %v6995_v54 }
 0x8da   :  { %v13119_v19 = vpop.eup %13118  ;;  %12018 = vmatpush3.msra.mxu0 %v15397_v22  ;;  %12035 = vmatpush3.msra.mxu1 %v15402_v30  ;;  %v10341_v30 = vld [vmem:[%s16042_s5 + $0x40] sm:$0xff] }
 0x8db   :  { %v13121_v31 = vpop.eup %13120  ;;  %12019 = vmatprep.subr.mxu0 %v10343_v21  ;;  %12036 = vmatprep.subr.mxu1 %v10355_v57 }
 0x8dc   :  { %v13123_v44 = vpop.eup %13122  ;;  %12020 = vmatpush3.msra.mxu0 %v10343_v21  ;;  %12037 = vmatpush3.msra.mxu1 %v10355_v57 }
 0x8dd   :  { %v13125_v28 = vpop.eup %13124  ;;  %v6996_v46 = vmul.f32 %v13123_v44, %v13121_v31  ;;  %12021 = vmatprep.subr.mxu0 %v10342_v43  ;;  %12038 = vmatprep.subr.mxu1 %v10354_v23 }
 0x8de   :  { %v6997_v22 = vmul.f32 %v13125_v28, %v13119_v19  ;;  %12022 = vmatpush3.msra.mxu0 %v10342_v43  ;;  %12039 = vmatpush3.msra.mxu1 %v10354_v23 }
 0x8df   :  { %11994 = vmatprep.mubr.msk.f32.mxu0 %vm556_vm1, %v6996_v46  ;;  %12011 = vmatprep.mubr.msk.f32.mxu1 %vm556_vm1, %v6996_v46  ;;  %v13127_v48 = vpop.eup %13126 }
 0x8e0   :  { %11995 = vmatmul.mubr.msk.f32.gmra.mxu0 %vm556_vm1, %v6997_v22  ;;  %12012 = vmatmul.mubr.msk.f32.gmra.mxu1 %vm556_vm1, %v6997_v22 }
 0x8e1   :  { %v13129_v50 = vpop.eup %13128  ;;  %12023 = vmatprep.subr.mxu0 %v10341_v30  ;;  %12040 = vmatprep.subr.mxu1 %v10353_v47 }
 0x8e2   :  { %v13131_v51 = vpop.eup %13130  ;;  %12024 = vmatpush3.msra.mxu0 %v10341_v30  ;;  %12041 = vmatpush3.msra.mxu1 %v10353_v47 }
 0x8e3   :  { %v13133_v10 = vpop.eup %13132  ;;  %v6998_v53 = vmul.f32 %v13131_v51, %v13129_v50  ;;  %12051 = vmatprep.subr.mxu0 %v13308_v2  ;;  %12062 = vmatprep.subr.mxu1 %v13308_v2 }
 0x8e4   :  { %v6999_v35 = vmul.f32 %v13133_v10, %v13127_v48 }
 0x8e5   :  { %11997 = vmatprep.mubr.msk.f32.mxu0 %vm556_vm1, %v6998_v53  ;;  %12014 = vmatprep.mubr.msk.f32.mxu1 %vm556_vm1, %v6998_v53 }
 0x8e6   :  { %11998 = vmatmul.mubr.msk.f32.gmra.mxu0 %vm556_vm1, %v6999_v35  ;;  %12015 = vmatmul.mubr.msk.f32.gmra.mxu1 %vm556_vm1, %v6999_v35 }
 0x8e7   :  { %12025 = vmatprep.mubr.msk.f32.mxu0 %vm556_vm1, %v6994_v20  ;;  %12042 = vmatprep.mubr.msk.f32.mxu1 %vm556_vm1, %v6994_v20 }
 0x8ea   :  { %12026 = vmatmul.mubr.msk.f32.vlgmr.msra.gmra.mxu0 %vm556_vm1, %v6995_v54  ;;  %12043 = vmatmul.mubr.msk.f32.vlgmr.msra.gmra.mxu1 %vm556_vm1, %v6995_v54 }
 0x8eb   :  { %12028 = vmatprep.mubr.msk.f32.mxu0 %vm556_vm1, %v6996_v46  ;;  %12045 = vmatprep.mubr.msk.f32.mxu1 %vm556_vm1, %v6996_v46 }
 0x8ec   :  { %12052 = vmatpush3.msra.mxu0 %v15451_v62  ;;  %12063 = vmatpush3.msra.mxu1 %v15456_v58 }
 0x8ed   :  { %12053 = vmatprep.subr.mxu0 %v13308_v2  ;;  %12064 = vmatprep.subr.mxu1 %v13308_v2 }
 0x8ee   :  { %12029 = vmatmul.mubr.msk.f32.gmra.mxu0 %vm556_vm1, %v6997_v22  ;;  %12046 = vmatmul.mubr.msk.f32.gmra.mxu1 %vm556_vm1, %v6997_v22 }
 0x8ef   :  { %12054 = vmatpush3.msra.mxu0 %v15467_v26  ;;  %12065 = vmatpush3.msra.mxu1 %v15472_v60 }
 0x8f0   :  { %12031 = vmatprep.mubr.msk.f32.mxu0 %vm556_vm1, %v6998_v53  ;;  %12048 = vmatprep.mubr.msk.f32.mxu1 %vm556_vm1, %v6998_v53 }
 0x8f1   :  { %12055 = vmatprep.subr.mxu0 %v13308_v2  ;;  %12066 = vmatprep.subr.mxu1 %v13308_v2 }
 0x8f2   :  { %12056 = vmatpush3.msra.mxu0 %v15483_v59  ;;  %12067 = vmatpush3.msra.mxu1 %v15488_v6 }
 0x8f3   :  { %12032 = vmatmul.mubr.msk.f32.gmra.mxu0 %vm556_vm1, %v6999_v35  ;;  %12049 = vmatmul.mubr.msk.f32.gmra.mxu1 %vm556_vm1, %v6999_v35 }
 0x8f4   :  { %12057 = vmatprep.subr.mxu0 %v13308_v2  ;;  %12068 = vmatprep.subr.mxu1 %v13308_v2 }
 0x8f5   :  { %12058 = vmatpush3.msra.mxu0 %v15499_v63  ;;  %12069 = vmatpush3.msra.mxu1 %v15504_v34 }
 0x8f6   :  { %12059 = vmatprep.mubr.msk.f32.mxu0 %vm13309_vm2, %v13308_v2  ;;  %12070 = vmatprep.mubr.msk.f32.mxu1 %vm13309_vm2, %v13308_v2 }
 0x8f7   :  { %12073 = vmatprep.subr.mxu0 %v13308_v2  ;;  %12084 = vmatprep.subr.mxu1 %v13308_v2 }
 0x8f8   :  { %12060 = vmatmul.mubr.f32.vlgmr.msra.gmra.mxu0 %v13308_v2  ;;  %12071 = vmatmul.mubr.f32.vlgmr.msra.gmra.mxu1 %v13308_v2 }
 0x8f9   :  { %12074 = vmatpush3.msra.mxu0 %v15519_v37  ;;  %12085 = vmatpush3.msra.mxu1 %v15524_v52 }
 0x8fa   :  { %12075 = vmatprep.subr.mxu0 %v13308_v2  ;;  %12086 = vmatprep.subr.mxu1 %v13308_v2 }
 0x8fb   :  { %12076 = vmatpush3.msra.mxu0 %v15533_v5  ;;  %12087 = vmatpush3.msra.mxu1 %v15538_v24 }
 0x8fc   :  { %12077 = vmatprep.subr.mxu0 %v13308_v2  ;;  %12088 = vmatprep.subr.mxu1 %v13308_v2 }
 0x8fd   :  { %12078 = vmatpush3.msra.mxu0 %v15547_v8  ;;  %12089 = vmatpush3.msra.mxu1 %v15552_v33 }
 0x8fe   :  { %12079 = vmatprep.subr.mxu0 %v13308_v2  ;;  %12090 = vmatprep.subr.mxu1 %v13308_v2 }
 0x8ff   :  { %12080 = vmatpush3.msra.mxu0 %v15561_v15  ;;  %12081 = vmatprep.mubr.msk.f32.mxu0 %vm13309_vm2, %v13308_v2 }
 0x900   :  { %12091 = vmatpush3.msra.mxu1 %v15568_v11  ;;  %12092 = vmatprep.mubr.msk.f32.mxu1 %vm13309_vm2, %v13308_v2 }
 0x901   :  { %12082 = vmatmul.mubr.f32.vlgmr.msra.gmra.mxu0 %v13308_v2  ;;  %12093 = vmatmul.mubr.f32.vlgmr.msra.gmra.mxu1 %v13308_v2 }
 0x902   :  { %12095 = vmatprep.subr.mxu0 %v13308_v2  ;;  %12106 = vmatprep.subr.mxu1 %v13308_v2 }
 0x903   :  { %12096 = vmatpush3.msra.mxu0 %v15451_v62  ;;  %12107 = vmatpush3.msra.mxu1 %v15456_v58 }
 0x904   :  { %12097 = vmatprep.subr.mxu0 %v13308_v2  ;;  %12108 = vmatprep.subr.mxu1 %v13308_v2 }
 0x905   :  { %12098 = vmatpush3.msra.mxu0 %v15467_v26  ;;  %12109 = vmatpush3.msra.mxu1 %v15472_v60 }
 0x906   :  { %12099 = vmatprep.subr.mxu0 %v13308_v2  ;;  %12110 = vmatprep.subr.mxu1 %v13308_v2 }
 0x907   :  { %12100 = vmatpush3.msra.mxu0 %v15483_v59  ;;  %12111 = vmatpush3.msra.mxu1 %v15488_v6 }
 0x908   :  { %12101 = vmatprep.subr.mxu0 %v13308_v2  ;;  %12112 = vmatprep.subr.mxu1 %v13308_v2 }
 0x909   :  { %12102 = vmatpush3.msra.mxu0 %v15499_v63  ;;  %12113 = vmatpush3.msra.mxu1 %v15504_v34 }
 0x90a   :  { %12103 = vmatprep.mubr.msk.f32.mxu0 %vm13309_vm2, %v13308_v2  ;;  %12114 = vmatprep.mubr.msk.f32.mxu1 %vm13309_vm2, %v13308_v2 }
 0x90b   :  { %12117 = vmatprep.subr.mxu0 %v13308_v2  ;;  %12128 = vmatprep.subr.mxu1 %v13308_v2 }
 0x999   :  { %v11993_v1 = vpop.f32.mrf.mxu0  ;;  %v12010_v41 = vpop.f32.mrf.mxu1 }
 0x99a   :  { %v7101_v7 = vadd.f32 %v11993_v1, %v10322_v55  ;;  %v7215_v39 = vadd.f32 %v12010_v41, %v10334_v3 }
 0x99b   :  { %v7095_v42 = vpop.f32.mrf.mxu0  ;;  %v7209_v40 = vpop.f32.mrf.mxu1 }
 0x99c   :  { %7125 = vst.msk [vmem:[#allocation3 + $0x8] sm:$0xff] %vm556_vm1, %v7101_v7  ;;  %7240 = vst.msk [vmem:[#allocation3 + $0x38] sm:$0xff] %vm556_vm1, %v7215_v39  ;;  %v7096_v13 = vadd.f32 %v10322_v55, %v7095_v42  ;;  %v7210_v45 = vadd.f32 %v10334_v3, %v7209_v40 }
 0x99e   :  { %7124 = vst.msk [vmem:[#allocation3] sm:$0xff] %vm556_vm1, %v7096_v13  ;;  %7239 = vst.msk [vmem:[#allocation3 + $0x30] sm:$0xff] %vm556_vm1, %v7210_v45 }
 0x9a0   :  { %v11996_v36 = vpop.f32.mrf.mxu0  ;;  %v12013_v61 = vpop.f32.mrf.mxu1 }
 0x9a1   :  { %v7111_v14 = vadd.f32 %v11996_v36, %v10322_v55  ;;  %v7225_v29 = vadd.f32 %v12013_v61, %v10334_v3 }
 0x9a2   :  { %v7105_v16 = vpop.f32.mrf.mxu0  ;;  %v7219_v9 = vpop.f32.mrf.mxu1 }
 0x9a3   :  { %7127 = vst.msk [vmem:[#allocation3 + $0x18] sm:$0xff] %vm556_vm1, %v7111_v14  ;;  %7242 = vst.msk [vmem:[#allocation3 + $0x48] sm:$0xff] %vm556_vm1, %v7225_v29  ;;  %v7106_v32 = vadd.f32 %v10322_v55, %v7105_v16  ;;  %v7220_v0 = vadd.f32 %v10334_v3, %v7219_v9 }
 0x9a5   :  { %7126 = vst.msk [vmem:[#allocation3 + $0x10] sm:$0xff] %vm556_vm1, %v7106_v32  ;;  %7241 = vst.msk [vmem:[#allocation3 + $0x40] sm:$0xff] %vm556_vm1, %v7220_v0  ;;  %v7476_v39 = vld [vmem:[#allocation3] sm:$0xff]  ;;  %v7552_v40 = vld [vmem:[#allocation3 + $0x30] sm:$0xff] }
 0x9a6   :  { %v11999_v25 = vpop.f32.mrf.mxu0  ;;  %v12016_v49 = vpop.f32.mrf.mxu1 }
 0x9a7   :  { %v7121_v17 = vadd.f32 %v11999_v25, %v10322_v55  ;;  %v7235_v18 = vadd.f32 %v12016_v49, %v10334_v3 }
 0x9a8   :  { %v7115_v4 = vpop.f32.mrf.mxu0  ;;  %v7229_v27 = vpop.f32.mrf.mxu1 }
 0x9a9   :  { %7129 = vst.msk [vmem:[#allocation3 + $0x28] sm:$0xff] %vm556_vm1, %v7121_v17  ;;  %7244 = vst.msk [vmem:[#allocation3 + $0x58] sm:$0xff] %vm556_vm1, %v7235_v18  ;;  %v7116_v12 = vadd.f32 %v10322_v55, %v7115_v4  ;;  %v7230_v20 = vadd.f32 %v10334_v3, %v7229_v27 }
 0x9aa   :  { %v12027_v54 = vpop.f32.mrf.mxu0  ;;  %v12044_v21 = vpop.f32.mrf.mxu1 }
 0x9ab   :  { %7128 = vst.msk [vmem:[#allocation3 + $0x20] sm:$0xff] %vm556_vm1, %v7116_v12  ;;  %7243 = vst.msk [vmem:[#allocation3 + $0x50] sm:$0xff] %vm556_vm1, %v7230_v20  ;;  %v7330_v57 = vadd.f32 %v12027_v54, %v10346_v38  ;;  %v7445_v19 = vadd.f32 %v12044_v21, %v10358_v56 }
 0x9ac   :  { %v7324_v43 = vpop.f32.mrf.mxu0  ;;  %v7439_v23 = vpop.f32.mrf.mxu1 }
 0x9ad   :  { %7355 = vst.msk [vmem:[#allocation3 + $0x68] sm:$0xff] %vm556_vm1, %v7330_v57  ;;  %7470 = vst.msk [vmem:[#allocation3 + $0x98] sm:$0xff] %vm556_vm1, %v7445_v19  ;;  %v7325_v31 = vadd.f32 %v10346_v38, %v7324_v43  ;;  %v7440_v44 = vadd.f32 %v10358_v56, %v7439_v23  ;;  %v15641_v19 = vld [vmem:[%s16045_s1] sm:$0xff] }
 0x9ae   :  { %v12030_v28 = vpop.f32.mrf.mxu0  ;;  %v12047_v46 = vpop.f32.mrf.mxu1  ;;  %vm7807_vm3 = vcmp.gt.s32.totalorder %v15641_v19, 0  ;;  %vm8125_vm4 = vcmp.gt.s32.totalorder %v15641_v19, 1  ;;  %vm8444_vm5 = vcmp.gt.s32.totalorder %v15641_v19, 2  ;;  %vm8763_vm6 = vcmp.gt.s32.totalorder %v15641_v19, 3 }
 0x9af   :  { %7354 = vst.msk [vmem:[#allocation3 + $0x60] sm:$0xff] %vm556_vm1, %v7325_v31  ;;  %7469 = vst.msk [vmem:[#allocation3 + $0x90] sm:$0xff] %vm556_vm1, %v7440_v44  ;;  %v7340_v22 = vadd.f32 %v12030_v28, %v10346_v38  ;;  %v7455_v30 = vadd.f32 %v12047_v46, %v10358_v56  ;;  %vm9082_vm7 = vcmp.gt.s32.totalorder %v15641_v19, 4  ;;  %vm9401_vm8 = vcmp.gt.s32.totalorder %v15641_v19, 5  ;;  %v9618_v19 = vld [vmem:[%s16050_s11 + $0x18] sm:$0xff] }
 0x9b0   :  { %v7334_v47 = vpop.f32.mrf.mxu0  ;;  %v7449_v48 = vpop.f32.mrf.mxu1 }
 0x9b1   :  { %7357 = vst.msk [vmem:[#allocation3 + $0x78] sm:$0xff] %vm556_vm1, %v7340_v22  ;;  %7472 = vst.msk [vmem:[#allocation3 + $0xa8] sm:$0xff] %vm556_vm1, %v7455_v30  ;;  %v7335_v50 = vadd.f32 %v10346_v38, %v7334_v47  ;;  %v7450_v51 = vadd.f32 %v10358_v56, %v7449_v48 }
 0x9b3   :  { %7356 = vst.msk [vmem:[#allocation3 + $0x70] sm:$0xff] %vm556_vm1, %v7335_v50  ;;  %7471 = vst.msk [vmem:[#allocation3 + $0xa0] sm:$0xff] %vm556_vm1, %v7450_v51  ;;  %v12033_v10 = vpop.f32.mrf.mxu0  ;;  %v12050_v53 = vpop.f32.mrf.mxu1  ;;  %v7810_v50 = vld [vmem:[#allocation3 + $0x8] sm:$0xff] }
 0x9b4   :  { %v7350_v35 = vadd.f32 %v12033_v10, %v10346_v38  ;;  %v7465_v55 = vadd.f32 %v12050_v53, %v10358_v56  ;;  %v7885_v10 = vld [vmem:[#allocation3 + $0x38] sm:$0xff] }
 0x9b5   :  { %v7344_v3 = vpop.f32.mrf.mxu0  ;;  %v7459_v1 = vpop.f32.mrf.mxu1 }
 0x9b6   :  { %7359 = vst.msk [vmem:[#allocation3 + $0x88] sm:$0xff] %vm556_vm1, %v7350_v35  ;;  %7474 = vst.msk [vmem:[#allocation3 + $0xb8] sm:$0xff] %vm556_vm1, %v7465_v55  ;;  %v7345_v41 = vadd.f32 %v10346_v38, %v7344_v3  ;;  %v7460_v7 = vadd.f32 %v10358_v56, %v7459_v1  ;;  %v7706_v0 = vld [vmem:[#allocation3 + $0x90] sm:$0xff]  ;;  %v7629_v18 = vld [vmem:[#allocation3 + $0x60] sm:$0xff] }
 0x9b8   :  { %7358 = vst.msk [vmem:[#allocation3 + $0x80] sm:$0xff] %vm556_vm1, %v7345_v41  ;;  %7473 = vst.msk [vmem:[#allocation3 + $0xb0] sm:$0xff] %vm556_vm1, %v7460_v7  ;;  %v7547_v42 = vpop.f32.mrf.mxu0  ;;  %v7624_v13 = vpop.f32.mrf.mxu1 }
 0x9b9   :  { %v7551_v45 = vadd.f32 %v7547_v42, %v7476_v39  ;;  %v7628_v36 = vadd.f32 %v7624_v13, %v7552_v40  ;;  %v8029_v40 = vld [vmem:[#allocation3 + $0x98] sm:$0xff] }
 0x9ba   :  { %v12061_v61 = vpop.f32.mrf.mxu0  ;;  %v12072_v14 = vpop.f32.mrf.mxu1 }
 0x9bb   :  { %v10378_v29 = vmul.f32 -1.442695, %v7551_v45  ;;  %v10377_v16 = vmul.f32 -1.442695, %v7628_v36  ;;  %v7957_v61 = vld [vmem:[#allocation3 + $0x68] sm:$0xff] }
 0x9bd   :  { %13134 = vpow2.f32 %v10378_v29 }
 0x9be   :  { %13136 = vpow2.f32 %v10377_v16 }
 0x9c1   :  { %v7701_v9 = vpop.f32.mrf.mxu0  ;;  %v7778_v32 = vpop.f32.mrf.mxu1 }
 0x9c2   :  { %v7782_v25 = vadd.f32 %v7778_v32, %v7706_v0  ;;  %v7705_v27 = vadd.f32 %v7701_v9, %v7629_v18 }
 0x9c3   :  { %v12083_v49 = vpop.f32.mrf.mxu0  ;;  %v12094_v17 = vpop.f32.mrf.mxu1 }
 0x9c4   :  { %v10379_v4 = vmul.f32 -1.442695, %v7782_v25 }
 0x9c6   :  { %13138 = vpow2.f32 %v10379_v4 }
 0x9c7   :  { %13140 = vtanh.f32 %v7705_v27 }
 0x9ca   :  { %v13135_v38 = vpop.eup %13134 }
 0x9cb   :  { %v13137_v56 = vpop.eup %13136  ;;  %v7793_v12 = vadd.f32 1.0, %v13135_v38 }
 0x9cc   :  { %v7786_v20 = vadd.f32 1.0, %v13137_v56 }
 0x9cd   :  { %13142 = vrcp.f32 %v7793_v12 }
 0x9ce   :  { %13144 = vrcp.f32 %v7786_v20 }
 0x9d3   :  { %v13139_v54 = vpop.eup %13138 }
 0x9d4   :  { %v13141_v21 = vpop.eup %13140  ;;  %v7802_v31 = vadd.f32 1.0, %v13139_v54 }
 0x9d6   :  { %13146 = vrcp.f32 %v7802_v31 }
 0x9da   :  { %v13143_v57 = vpop.eup %13142 }
 0x9db   :  { %v13145_v43 = vpop.eup %13144  ;;  %v7797_v23 = vmul.f32 %v13143_v57, %v13141_v21 }
 0x9dc   :  { %v7789_v44 = vmul.f32 0.0, %v13145_v43 }
 0x9de   :  { %v7798_v28 = vadd.f32 %v7797_v23, %v7789_v44  ;;  %v8129_v23 = vld [vmem:[#allocation3 + $0x10] sm:$0xff]  ;;  %v8204_v44 = vld [vmem:[#allocation3 + $0x40] sm:$0xff] }
 0x9e0   :  { %13148 = vtanh.f32 %v7798_v28  ;;  %v15644_v46 = vsel %vm7807_vm3, %v7798_v28, 0.0 }
 0x9e3   :  { %v13147_v22 = vpop.eup %13146 }
 0x9ed   :  { %v13149_v30 = vpop.eup %13148 }
 0x9ee   :  { %v7806_v47 = vmul.f32 %v13149_v30, %v13147_v22 }
 0x9f0   :  { %v15646_v48 = vsel %vm7807_vm3, %v7806_v47, 0.0 }
 0x9f1   :  { %12104 = vmatmul.mubr.msk.f32.vlgmr.msra.gmra.mxu0 %vm556_vm1, %v15646_v48  ;;  %12115 = vmatmul.mubr.msk.f32.vlgmr.msra.gmra.mxu1 %vm556_vm1, %v15646_v48  ;;  %9404 = vst.msk [vmem:[%s16046_s13] sm:$0xff] %vm556_vm1, %v15646_v48 }
 0x9f2   :  { %12118 = vmatpush3.msra.mxu0 %v15519_v37  ;;  %12129 = vmatpush3.msra.mxu1 %v15524_v52 }
 0x9f3   :  { %12119 = vmatprep.subr.mxu0 %v13308_v2  ;;  %12130 = vmatprep.subr.mxu1 %v13308_v2 }
 0x9f4   :  { %12120 = vmatpush3.msra.mxu0 %v15533_v5  ;;  %12131 = vmatpush3.msra.mxu1 %v15538_v24 }
 0x9f5   :  { %12121 = vmatprep.subr.mxu0 %v13308_v2  ;;  %12132 = vmatprep.subr.mxu1 %v13308_v2 }
 0x9f6   :  { %12122 = vmatpush3.msra.mxu0 %v15547_v8  ;;  %12133 = vmatpush3.msra.mxu1 %v15552_v33 }
 0x9f7   :  { %12123 = vmatprep.subr.mxu0 %v13308_v2  ;;  %12134 = vmatprep.subr.mxu1 %v13308_v2 }
 0x9f8   :  { %12124 = vmatpush3.msra.mxu0 %v15561_v15  ;;  %12125 = vmatprep.mubr.msk.f32.mxu0 %vm13309_vm2, %v13308_v2 }
 0x9f9   :  { %12135 = vmatpush3.msra.mxu1 %v15568_v11  ;;  %12136 = vmatprep.mubr.msk.f32.mxu1 %vm13309_vm2, %v13308_v2 }
 0x9fa   :  { %12126 = vmatmul.mubr.msk.f32.vlgmr.msra.gmra.mxu0 %vm556_vm1, %v15646_v48  ;;  %12137 = vmatmul.mubr.msk.f32.vlgmr.msra.gmra.mxu1 %vm556_vm1, %v15646_v48 }
 0x9fb   :  { %12139 = vmatprep.subr.mxu0 %v13308_v2  ;;  %12150 = vmatprep.subr.mxu1 %v13308_v2 }
 0x9fc   :  { %12140 = vmatpush3.msra.mxu0 %v15451_v62  ;;  %12151 = vmatpush3.msra.mxu1 %v15456_v58 }
 0x9fd   :  { %12141 = vmatprep.subr.mxu0 %v13308_v2  ;;  %12152 = vmatprep.subr.mxu1 %v13308_v2 }
 0x9fe   :  { %12142 = vmatpush3.msra.mxu0 %v15467_v26  ;;  %12153 = vmatpush3.msra.mxu1 %v15472_v60 }
 0x9ff   :  { %12143 = vmatprep.subr.mxu0 %v13308_v2  ;;  %12154 = vmatprep.subr.mxu1 %v13308_v2 }
 0xa00   :  { %12144 = vmatpush3.msra.mxu0 %v15483_v59  ;;  %12155 = vmatpush3.msra.mxu1 %v15488_v6 }
 0xa01   :  { %12145 = vmatprep.subr.mxu0 %v13308_v2  ;;  %12156 = vmatprep.subr.mxu1 %v13308_v2 }
 0xa02   :  { %12146 = vmatpush3.msra.mxu0 %v15499_v63  ;;  %12157 = vmatpush3.msra.mxu1 %v15504_v34 }
 0xa03   :  { %12147 = vmatprep.mubr.msk.f32.mxu0 %vm13309_vm2, %v13308_v2  ;;  %12158 = vmatprep.mubr.msk.f32.mxu1 %vm13309_vm2, %v13308_v2 }
 0xa04   :  { %12161 = vmatprep.subr.mxu0 %v13308_v2  ;;  %12172 = vmatprep.subr.mxu1 %v13308_v2 }
 0xab1   :  { %v7880_v51 = vpop.f32.mrf.mxu0  ;;  %v7952_v53 = vpop.f32.mrf.mxu1 }
 0xab2   :  { %v7884_v35 = vadd.f32 %v7880_v51, %v7810_v50  ;;  %v7956_v55 = vadd.f32 %v7952_v53, %v7885_v10 }
 0xab3   :  { %v12105_v3 = vpop.f32.mrf.mxu0  ;;  %v12116_v1 = vpop.f32.mrf.mxu1 }
 0xab4   :  { %v10385_v41 = vmul.f32 -1.442695, %v7884_v35  ;;  %v10384_v7 = vmul.f32 -1.442695, %v7956_v55  ;;  %v8348_v35 = vld [vmem:[#allocation3 + $0xa0] sm:$0xff] }
 0xab6   :  { %13150 = vpow2.f32 %v10385_v41  ;;  %v8276_v41 = vld [vmem:[#allocation3 + $0x70] sm:$0xff] }
 0xab7   :  { %13152 = vpow2.f32 %v10384_v7 }
 0xaba   :  { %v8024_v39 = vpop.f32.mrf.mxu0  ;;  %v8096_v42 = vpop.f32.mrf.mxu1 }
 0xabb   :  { %v8100_v13 = vadd.f32 %v8096_v42, %v8029_v40  ;;  %v8028_v29 = vadd.f32 %v8024_v39, %v7957_v61 }
 0xabc   :  { %v12127_v45 = vpop.f32.mrf.mxu0  ;;  %v12138_v36 = vpop.f32.mrf.mxu1 }
 0xabd   :  { %v10386_v14 = vmul.f32 -1.442695, %v8100_v13 }
 0xabf   :  { %13154 = vpow2.f32 %v10386_v14 }
 0xac0   :  { %13156 = vtanh.f32 %v8028_v29 }
 0xac3   :  { %v13151_v16 = vpop.eup %13150 }
 0xac4   :  { %v13153_v9 = vpop.eup %13152  ;;  %v8111_v32 = vadd.f32 1.0, %v13151_v16 }
 0xac5   :  { %v8104_v0 = vadd.f32 1.0, %v13153_v9 }
 0xac6   :  { %13158 = vrcp.f32 %v8111_v32 }
 0xac7   :  { %13160 = vrcp.f32 %v8104_v0 }
 0xacc   :  { %v13155_v25 = vpop.eup %13154 }
 0xacd   :  { %v13157_v49 = vpop.eup %13156  ;;  %v8120_v27 = vadd.f32 1.0, %v13155_v25 }
 0xacf   :  { %13162 = vrcp.f32 %v8120_v27 }
 0xad3   :  { %v13159_v17 = vpop.eup %13158 }
 0xad4   :  { %v13161_v18 = vpop.eup %13160  ;;  %v8115_v4 = vmul.f32 %v13159_v17, %v13157_v49 }
 0xad5   :  { %v8107_v38 = vmul.f32 %v13161_v18, %v15644_v46 }
 0xad7   :  { %v8116_v56 = vadd.f32 %v8115_v4, %v8107_v38  ;;  %v8448_v38 = vld [vmem:[#allocation3 + $0x18] sm:$0xff] }
 0xad9   :  { %13164 = vtanh.f32 %v8116_v56  ;;  %v15704_v12 = vsel %vm8125_vm4, %v8116_v56, %v15644_v46 }
 0xadc   :  { %v13163_v20 = vpop.eup %13162 }
 0xae6   :  { %v13165_v54 = vpop.eup %13164 }
 0xae7   :  { %v8124_v21 = vmul.f32 %v13165_v54, %v13163_v20 }
 0xae9   :  { %v15707_v57 = vsel %vm8125_vm4, %v8124_v21, %v15646_v48  ;;  %v15709_v43 = vsel %vm8125_vm4, %v8124_v21, 0.0 }
 0xaea   :  { %12148 = vmatmul.mubr.msk.f32.vlgmr.msra.gmra.mxu0 %vm556_vm1, %v15707_v57  ;;  %12159 = vmatmul.mubr.msk.f32.vlgmr.msra.gmra.mxu1 %vm556_vm1, %v15707_v57  ;;  %9405 = vst.msk [vmem:[%s16046_s13 + $0x8] sm:$0xff] %vm556_vm1, %v15709_v43 }
 0xaeb   :  { %12162 = vmatpush3.msra.mxu0 %v15519_v37  ;;  %12173 = vmatpush3.msra.mxu1 %v15524_v52 }
 0xaec   :  { %12163 = vmatprep.subr.mxu0 %v13308_v2  ;;  %12174 = vmatprep.subr.mxu1 %v13308_v2 }
 0xaed   :  { %12164 = vmatpush3.msra.mxu0 %v15533_v5  ;;  %12175 = vmatpush3.msra.mxu1 %v15538_v24 }
 0xaee   :  { %12165 = vmatprep.subr.mxu0 %v13308_v2  ;;  %12176 = vmatprep.subr.mxu1 %v13308_v2 }
 0xaef   :  { %12166 = vmatpush3.msra.mxu0 %v15547_v8  ;;  %12177 = vmatpush3.msra.mxu1 %v15552_v33 }
 0xaf0   :  { %12167 = vmatprep.subr.mxu0 %v13308_v2  ;;  %12178 = vmatprep.subr.mxu1 %v13308_v2 }
 0xaf1   :  { %12168 = vmatpush3.msra.mxu0 %v15561_v15  ;;  %12169 = vmatprep.mubr.msk.f32.mxu0 %vm13309_vm2, %v13308_v2 }
 0xaf2   :  { %12179 = vmatpush3.msra.mxu1 %v15568_v11  ;;  %12180 = vmatprep.mubr.msk.f32.mxu1 %vm13309_vm2, %v13308_v2 }
 0xaf3   :  { %12170 = vmatmul.mubr.msk.f32.vlgmr.msra.gmra.mxu0 %vm556_vm1, %v15707_v57  ;;  %12181 = vmatmul.mubr.msk.f32.vlgmr.msra.gmra.mxu1 %vm556_vm1, %v15707_v57 }
 0xaf4   :  { %12183 = vmatprep.subr.mxu0 %v13308_v2  ;;  %12194 = vmatprep.subr.mxu1 %v13308_v2 }
 0xaf5   :  { %12184 = vmatpush3.msra.mxu0 %v15451_v62  ;;  %12195 = vmatpush3.msra.mxu1 %v15456_v58 }
 0xaf6   :  { %12185 = vmatprep.subr.mxu0 %v13308_v2  ;;  %12196 = vmatprep.subr.mxu1 %v13308_v2 }
 0xaf7   :  { %12186 = vmatpush3.msra.mxu0 %v15467_v26  ;;  %12197 = vmatpush3.msra.mxu1 %v15472_v60 }
 0xaf8   :  { %12187 = vmatprep.subr.mxu0 %v13308_v2  ;;  %12198 = vmatprep.subr.mxu1 %v13308_v2 }
 0xaf9   :  { %12188 = vmatpush3.msra.mxu0 %v15483_v59  ;;  %12199 = vmatpush3.msra.mxu1 %v15488_v6 }
 0xafa   :  { %12189 = vmatprep.subr.mxu0 %v13308_v2  ;;  %12200 = vmatprep.subr.mxu1 %v13308_v2 }
 0xafb   :  { %12190 = vmatpush3.msra.mxu0 %v15499_v63  ;;  %12201 = vmatpush3.msra.mxu1 %v15504_v34 }
 0xafc   :  { %12191 = vmatprep.mubr.msk.f32.mxu0 %vm13309_vm2, %v13308_v2  ;;  %12202 = vmatprep.mubr.msk.f32.mxu1 %vm13309_vm2, %v13308_v2 }
 0xafd   :  { %12205 = vmatprep.subr.mxu0 %v13308_v2  ;;  %12216 = vmatprep.subr.mxu1 %v13308_v2 }
 0xbaa   :  { %v8199_v31 = vpop.f32.mrf.mxu0  ;;  %v8271_v28 = vpop.f32.mrf.mxu1 }
 0xbab   :  { %v8203_v46 = vadd.f32 %v8199_v31, %v8129_v23  ;;  %v8275_v22 = vadd.f32 %v8271_v28, %v8204_v44 }
 0xbac   :  { %v12149_v30 = vpop.f32.mrf.mxu0  ;;  %v12160_v47 = vpop.f32.mrf.mxu1 }
 0xbad   :  { %v10392_v50 = vmul.f32 -1.442695, %v8203_v46  ;;  %v10391_v51 = vmul.f32 -1.442695, %v8275_v22  ;;  %v8667_v22 = vld [vmem:[#allocation3 + $0xa8] sm:$0xff] }
 0xbaf   :  { %13166 = vpow2.f32 %v10392_v50 }
 0xbb0   :  { %13168 = vpow2.f32 %v10391_v51  ;;  %v8595_v51 = vld [vmem:[#allocation3 + $0x78] sm:$0xff] }
 0xbb3   :  { %v8343_v10 = vpop.f32.mrf.mxu0  ;;  %v8415_v53 = vpop.f32.mrf.mxu1 }
 0xbb4   :  { %v8419_v55 = vadd.f32 %v8415_v53, %v8348_v35  ;;  %v8347_v39 = vadd.f32 %v8343_v10, %v8276_v41 }
 0xbb5   :  { %v12171_v3 = vpop.f32.mrf.mxu0  ;;  %v12182_v1 = vpop.f32.mrf.mxu1 }
 0xbb6   :  { %v10393_v7 = vmul.f32 -1.442695, %v8419_v55 }
 0xbb8   :  { %13170 = vpow2.f32 %v10393_v7 }
 0xbb9   :  { %13172 = vtanh.f32 %v8347_v39 }
 0xbbc   :  { %v13167_v42 = vpop.eup %13166 }
 0xbbd   :  { %v13169_v40 = vpop.eup %13168  ;;  %v8430_v13 = vadd.f32 1.0, %v13167_v42 }
 0xbbe   :  { %v8423_v45 = vadd.f32 1.0, %v13169_v40 }
 0xbbf   :  { %13174 = vrcp.f32 %v8430_v13 }
 0xbc0   :  { %13176 = vrcp.f32 %v8423_v45 }
 0xbc5   :  { %v13171_v36 = vpop.eup %13170 }
 0xbc6   :  { %v13173_v61 = vpop.eup %13172  ;;  %v8439_v9 = vadd.f32 1.0, %v13171_v36 }
 0xbc8   :  { %13178 = vrcp.f32 %v8439_v9 }
 0xbcc   :  { %v13175_v14 = vpop.eup %13174 }
 0xbcd   :  { %v13177_v29 = vpop.eup %13176  ;;  %v8434_v16 = vmul.f32 %v13175_v14, %v13173_v61 }
 0xbce   :  { %v8426_v32 = vmul.f32 %v13177_v29, %v15704_v12 }
 0xbd0   :  { %v8435_v0 = vadd.f32 %v8434_v16, %v8426_v32 }
 0xbd2   :  { %13180 = vtanh.f32 %v8435_v0  ;;  %v15767_v25 = vsel %vm8444_vm5, %v8435_v0, %v15704_v12  ;;  %v8523_v12 = vld [vmem:[#allocation3 + $0x48] sm:$0xff]  ;;  %v8914_v0 = vld [vmem:[#allocation3 + $0x80] sm:$0xff] }
 0xbd5   :  { %v13179_v49 = vpop.eup %13178 }
 0xbdf   :  { %v13181_v17 = vpop.eup %13180 }
 0xbe0   :  { %v8443_v18 = vmul.f32 %v13181_v17, %v13179_v49 }
 0xbe2   :  { %v15770_v4 = vsel %vm8444_vm5, %v8443_v18, %v15707_v57  ;;  %v15772_v27 = vsel %vm8444_vm5, %v8443_v18, 0.0 }
 0xbe3   :  { %12192 = vmatmul.mubr.msk.f32.vlgmr.msra.gmra.mxu0 %vm556_vm1, %v15770_v4  ;;  %12203 = vmatmul.mubr.msk.f32.vlgmr.msra.gmra.mxu1 %vm556_vm1, %v15770_v4  ;;  %9406 = vst.msk [vmem:[%s16046_s13 + $0x10] sm:$0xff] %vm556_vm1, %v15772_v27 }
 0xbe4   :  { %12206 = vmatpush3.msra.mxu0 %v15519_v37  ;;  %12217 = vmatpush3.msra.mxu1 %v15524_v52 }
 0xbe5   :  { %12207 = vmatprep.subr.mxu0 %v13308_v2  ;;  %12218 = vmatprep.subr.mxu1 %v13308_v2 }
 0xbe6   :  { %12208 = vmatpush3.msra.mxu0 %v15533_v5  ;;  %12219 = vmatpush3.msra.mxu1 %v15538_v24 }
 0xbe7   :  { %12209 = vmatprep.subr.mxu0 %v13308_v2  ;;  %12220 = vmatprep.subr.mxu1 %v13308_v2 }
 0xbe8   :  { %12210 = vmatpush3.msra.mxu0 %v15547_v8  ;;  %12221 = vmatpush3.msra.mxu1 %v15552_v33 }
 0xbe9   :  { %12211 = vmatprep.subr.mxu0 %v13308_v2  ;;  %12222 = vmatprep.subr.mxu1 %v13308_v2 }
 0xbea   :  { %12212 = vmatpush3.msra.mxu0 %v15561_v15  ;;  %12213 = vmatprep.mubr.msk.f32.mxu0 %vm13309_vm2, %v13308_v2 }
 0xbeb   :  { %12223 = vmatpush3.msra.mxu1 %v15568_v11  ;;  %12224 = vmatprep.mubr.msk.f32.mxu1 %vm13309_vm2, %v13308_v2 }
 0xbec   :  { %12214 = vmatmul.mubr.msk.f32.vlgmr.msra.gmra.mxu0 %vm556_vm1, %v15770_v4  ;;  %12225 = vmatmul.mubr.msk.f32.vlgmr.msra.gmra.mxu1 %vm556_vm1, %v15770_v4 }
 0xbed   :  { %12227 = vmatprep.subr.mxu0 %v13308_v2  ;;  %12238 = vmatprep.subr.mxu1 %v13308_v2 }
 0xbee   :  { %12228 = vmatpush3.msra.mxu0 %v15451_v62  ;;  %12239 = vmatpush3.msra.mxu1 %v15456_v58 }
 0xbef   :  { %12229 = vmatprep.subr.mxu0 %v13308_v2  ;;  %12240 = vmatprep.subr.mxu1 %v13308_v2 }
 0xbf0   :  { %12230 = vmatpush3.msra.mxu0 %v15467_v26  ;;  %12241 = vmatpush3.msra.mxu1 %v15472_v60 }
 0xbf1   :  { %12231 = vmatprep.subr.mxu0 %v13308_v2  ;;  %12242 = vmatprep.subr.mxu1 %v13308_v2 }
 0xbf2   :  { %12232 = vmatpush3.msra.mxu0 %v15483_v59  ;;  %12243 = vmatpush3.msra.mxu1 %v15488_v6 }
 0xbf3   :  { %12233 = vmatprep.subr.mxu0 %v13308_v2  ;;  %12244 = vmatprep.subr.mxu1 %v13308_v2 }
 0xbf4   :  { %12234 = vmatpush3.msra.mxu0 %v15499_v63  ;;  %12245 = vmatpush3.msra.mxu1 %v15504_v34 }
 0xbf5   :  { %12235 = vmatprep.mubr.msk.f32.mxu0 %vm13309_vm2, %v13308_v2  ;;  %12246 = vmatprep.mubr.msk.f32.mxu1 %vm13309_vm2, %v13308_v2 }
 0xbf6   :  { %12249 = vmatprep.subr.mxu0 %v13308_v2  ;;  %12260 = vmatprep.subr.mxu1 %v13308_v2 }
 0xca3   :  { %v8518_v56 = vpop.f32.mrf.mxu0  ;;  %v8590_v20 = vpop.f32.mrf.mxu1 }
 0xca4   :  { %v8522_v54 = vadd.f32 %v8518_v56, %v8448_v38  ;;  %v8594_v21 = vadd.f32 %v8590_v20, %v8523_v12 }
 0xca5   :  { %v12193_v57 = vpop.f32.mrf.mxu0  ;;  %v12204_v23 = vpop.f32.mrf.mxu1 }
 0xca6   :  { %v10399_v31 = vmul.f32 -1.442695, %v8522_v54  ;;  %v10398_v44 = vmul.f32 -1.442695, %v8594_v21 }
 0xca8   :  { %13182 = vpow2.f32 %v10399_v31 }
 0xca9   :  { %13184 = vpow2.f32 %v10398_v44 }
 0xcac   :  { %v8662_v28 = vpop.f32.mrf.mxu0  ;;  %v8734_v46 = vpop.f32.mrf.mxu1 }
 0xcad   :  { %v8738_v30 = vadd.f32 %v8734_v46, %v8667_v22  ;;  %v8666_v53 = vadd.f32 %v8662_v28, %v8595_v51  ;;  %v13301_v51 = vld [vmem:[%s16043_s6 + $0x78] sm:$0xff] }
 0xcae   :  { %v12215_v47 = vpop.f32.mrf.mxu0  ;;  %v12226_v50 = vpop.f32.mrf.mxu1 }
 0xcaf   :  { %v10400_v10 = vmul.f32 -1.442695, %v8738_v30  ;;  %v13300_v50 = vld [vmem:[%s16043_s6 + $0x58] sm:$0xff] }
 0xcb1   :  { %13186 = vpow2.f32 %v10400_v10  ;;  %v13302_v10 = vld [vmem:[%s16043_s6 + $0x50] sm:$0xff] }
 0xcb2   :  { %13188 = vtanh.f32 %v8666_v53  ;;  %v13303_v53 = vld [vmem:[%s16043_s6 + $0x70] sm:$0xff] }
 0xcb5   :  { %v13183_v35 = vpop.eup %13182 }
 0xcb6   :  { %v13185_v55 = vpop.eup %13184  ;;  %v8749_v3 = vadd.f32 1.0, %v13183_v35  ;;  %v13304_v35 = vld [vmem:[%s16043_s6 + $0x48] sm:$0xff] }
 0xcb7   :  { %v8742_v1 = vadd.f32 1.0, %v13185_v55  ;;  %v13305_v55 = vld [vmem:[%s16043_s6 + $0x68] sm:$0xff] }
 0xcb8   :  { %13190 = vrcp.f32 %v8749_v3  ;;  %v13306_v3 = vld [vmem:[%s16043_s6 + $0x40] sm:$0xff] }
 0xcb9   :  { %13192 = vrcp.f32 %v8742_v1  ;;  %v9498_v1 = vld [vmem:[%s16047_s8 + $0x18] sm:$0xff] }
 0xcbe   :  { %v13187_v41 = vpop.eup %13186 }
 0xcbf   :  { %v13189_v7 = vpop.eup %13188  ;;  %v8758_v13 = vadd.f32 1.0, %v13187_v41  ;;  %v13307_v41 = vld [vmem:[%s16043_s6 + $0x60] sm:$0xff] }
 0xcc1   :  { %13194 = vrcp.f32 %v8758_v13  ;;  %v9086_v13 = vld [vmem:[#allocation3 + $0x28] sm:$0xff] }
 0xcc5   :  { %v13191_v39 = vpop.eup %13190 }
 0xcc6   :  { %v13193_v42 = vpop.eup %13192  ;;  %v8753_v40 = vmul.f32 %v13191_v39, %v13189_v7  ;;  %v9497_v7 = vld [vmem:[%s16047_s8 + $0x10] sm:$0xff]  ;;  %v9496_v39 = vld [vmem:[%s16047_s8 + $0x8] sm:$0xff] }
 0xcc7   :  { %v8745_v45 = vmul.f32 %v13193_v42, %v15767_v25  ;;  %v9495_v42 = vld [vmem:[%s16047_s8] sm:$0xff] }
 0xcc9   :  { %v8754_v36 = vadd.f32 %v8753_v40, %v8745_v45  ;;  %v9413_v40 = vld [vmem:[%s16048_s9 + $0x10] sm:$0xff] }
 0xccb   :  { %13196 = vtanh.f32 %v8754_v36  ;;  %v15830_v61 = vsel %vm8763_vm6, %v8754_v36, %v15767_v25  ;;  %v9161_v36 = vld [vmem:[#allocation3 + $0x58] sm:$0xff] }
 0xcce   :  { %v13195_v14 = vpop.eup %13194 }
 0xcd8   :  { %v13197_v29 = vpop.eup %13196 }
 0xcd9   :  { %v8762_v16 = vmul.f32 %v13197_v29, %v13195_v14 }
 0xcdb   :  { %v15833_v9 = vsel %vm8763_vm6, %v8762_v16, %v15770_v4  ;;  %v15835_v32 = vsel %vm8763_vm6, %v8762_v16, 0.0 }
 0xcdc   :  { %12236 = vmatmul.mubr.msk.f32.vlgmr.msra.gmra.mxu0 %vm556_vm1, %v15833_v9  ;;  %12247 = vmatmul.mubr.msk.f32.vlgmr.msra.gmra.mxu1 %vm556_vm1, %v15833_v9  ;;  %9407 = vst.msk [vmem:[%s16046_s13 + $0x18] sm:$0xff] %vm556_vm1, %v15835_v32 }
 0xcdd   :  { %12250 = vmatpush3.msra.mxu0 %v15519_v37  ;;  %12261 = vmatpush3.msra.mxu1 %v15524_v52 }
 0xcde   :  { %12251 = vmatprep.subr.mxu0 %v13308_v2  ;;  %12262 = vmatprep.subr.mxu1 %v13308_v2 }
 0xcdf   :  { %12252 = vmatpush3.msra.mxu0 %v15533_v5  ;;  %12263 = vmatpush3.msra.mxu1 %v15538_v24 }
 0xce0   :  { %12253 = vmatprep.subr.mxu0 %v13308_v2  ;;  %12264 = vmatprep.subr.mxu1 %v13308_v2 }
 0xce1   :  { %12254 = vmatpush3.msra.mxu0 %v15547_v8  ;;  %12265 = vmatpush3.msra.mxu1 %v15552_v33  ;;  %v8986_v8 = vld [vmem:[#allocation3 + $0xb0] sm:$0xff] }
 0xce2   :  { %12255 = vmatprep.subr.mxu0 %v13308_v2  ;;  %12266 = vmatprep.subr.mxu1 %v13308_v2 }
 0xce3   :  { %12256 = vmatpush3.msra.mxu0 %v15561_v15  ;;  %12257 = vmatprep.mubr.msk.f32.mxu0 %vm13309_vm2, %v13308_v2 }
 0xce4   :  { %12267 = vmatpush3.msra.mxu1 %v15568_v11  ;;  %12268 = vmatprep.mubr.msk.f32.mxu1 %vm13309_vm2, %v13308_v2 }
 0xce5   :  { %12258 = vmatmul.mubr.msk.f32.vlgmr.msra.gmra.mxu0 %vm556_vm1, %v15833_v9  ;;  %12269 = vmatmul.mubr.msk.f32.vlgmr.msra.gmra.mxu1 %vm556_vm1, %v15833_v9 }
 0xce6   :  { %12271 = vmatprep.subr.mxu0 %v13308_v2  ;;  %12282 = vmatprep.subr.mxu1 %v13308_v2 }
 0xce7   :  { %12272 = vmatpush3.msra.mxu0 %v15451_v62  ;;  %12283 = vmatpush3.msra.mxu1 %v15456_v58  ;;  %v8767_v62 = vld [vmem:[#allocation3 + $0x20] sm:$0xff] }
 0xce8   :  { %12273 = vmatprep.subr.mxu0 %v13308_v2  ;;  %12284 = vmatprep.subr.mxu1 %v13308_v2 }
 0xce9   :  { %12274 = vmatpush3.msra.mxu0 %v15467_v26  ;;  %12285 = vmatpush3.msra.mxu1 %v15472_v60  ;;  %v8842_v26 = vld [vmem:[#allocation3 + $0x50] sm:$0xff] }
 0xcea   :  { %12275 = vmatprep.subr.mxu0 %v13308_v2  ;;  %12286 = vmatprep.subr.mxu1 %v13308_v2 }
 0xceb   :  { %12276 = vmatpush3.msra.mxu0 %v15483_v59  ;;  %12287 = vmatpush3.msra.mxu1 %v15488_v6 }
 0xcec   :  { %12277 = vmatprep.subr.mxu0 %v13308_v2  ;;  %12288 = vmatprep.subr.mxu1 %v13308_v2 }
 0xced   :  { %12278 = vmatpush3.msra.mxu0 %v15499_v63  ;;  %12289 = vmatpush3.msra.mxu1 %v15504_v34 }
 0xcee   :  { %12279 = vmatprep.mubr.msk.f32.mxu0 %vm13309_vm2, %v13308_v2  ;;  %12290 = vmatprep.mubr.msk.f32.mxu1 %vm13309_vm2, %v13308_v2 }
 0xcef   :  { %12293 = vmatprep.subr.mxu0 %v13308_v2  ;;  %12304 = vmatprep.subr.mxu1 %v13308_v2 }
 0xd9c   :  { %v8837_v58 = vpop.f32.mrf.mxu0  ;;  %v8909_v60 = vpop.f32.mrf.mxu1 }
 0xd9d   :  { %v8841_v59 = vadd.f32 %v8837_v58, %v8767_v62  ;;  %v8913_v6 = vadd.f32 %v8909_v60, %v8842_v26  ;;  %v9305_v60 = vld [vmem:[#allocation3 + $0xb8] sm:$0xff] }
 0xd9e   :  { %v12237_v37 = vpop.f32.mrf.mxu0  ;;  %v12248_v63 = vpop.f32.mrf.mxu1 }
 0xd9f   :  { %v10406_v52 = vmul.f32 -1.442695, %v8841_v59  ;;  %v10405_v34 = vmul.f32 -1.442695, %v8913_v6 }
 0xda1   :  { %13198 = vpow2.f32 %v10406_v52 }
 0xda2   :  { %13200 = vpow2.f32 %v10405_v34 }
 0xda5   :  { %v8981_v5 = vpop.f32.mrf.mxu0  ;;  %v9053_v24 = vpop.f32.mrf.mxu1 }
 0xda6   :  { %v9057_v33 = vadd.f32 %v9053_v24, %v8986_v8  ;;  %v8985_v49 = vadd.f32 %v8981_v5, %v8914_v0 }
 0xda7   :  { %v12259_v15 = vpop.f32.mrf.mxu0  ;;  %v12270_v11 = vpop.f32.mrf.mxu1 }
 0xda8   :  { %v10407_v25 = vmul.f32 -1.442695, %v9057_v33 }
 0xdaa   :  { %13202 = vpow2.f32 %v10407_v25 }
 0xdab   :  { %13204 = vtanh.f32 %v8985_v49 }
 0xdae   :  { %v13199_v17 = vpop.eup %13198 }
 0xdaf   :  { %v13201_v18 = vpop.eup %13200  ;;  %v9068_v4 = vadd.f32 1.0, %v13199_v17 }
 0xdb0   :  { %v9061_v38 = vadd.f32 1.0, %v13201_v18 }
 0xdb1   :  { %13206 = vrcp.f32 %v9068_v4 }
 0xdb2   :  { %13208 = vrcp.f32 %v9061_v38 }
 0xdb7   :  { %v13203_v56 = vpop.eup %13202 }
 0xdb8   :  { %v13205_v12 = vpop.eup %13204  ;;  %v9077_v57 = vadd.f32 1.0, %v13203_v56 }
 0xdba   :  { %13210 = vrcp.f32 %v9077_v57  ;;  %v9615_v57 = vld [vmem:[%s16050_s11] sm:$0xff] }
 0xdbe   :  { %v13207_v20 = vpop.eup %13206 }
 0xdbf   :  { %v13209_v54 = vpop.eup %13208  ;;  %v9072_v21 = vmul.f32 %v13207_v20, %v13205_v12 }
 0xdc0   :  { %v9064_v23 = vmul.f32 %v13209_v54, %v15830_v61  ;;  %v9617_v54 = vld [vmem:[%s16050_s11 + $0x10] sm:$0xff] }
 0xdc2   :  { %v9073_v31 = vadd.f32 %v9072_v21, %v9064_v23  ;;  %v9616_v21 = vld [vmem:[%s16050_s11 + $0x8] sm:$0xff]  ;;  %v21_v23 = vstv %s16051_s12 }
 0xdc3   :  { %22 = vst [vmem:[#allocation4] sm:$0x1] %v21_v23 }
 0xdc4   :  { %13212 = vtanh.f32 %v9073_v31  ;;  %v15893_v44 = vsel %vm9082_vm7, %v9073_v31, %v15830_v61 }
 0xdc7   :  { %v13211_v28 = vpop.eup %13210 }
 0xdd1   :  { %v13213_v46 = vpop.eup %13212 }
 0xdd2   :  { %v9081_v22 = vmul.f32 %v13213_v46, %v13211_v28 }
 0xdd4   :  { %v15896_v30 = vsel %vm9082_vm7, %v9081_v22, %v15833_v9  ;;  %v9085_v47 = vsel %vm9082_vm7, %v9081_v22, 0.0  ;;  %v10415_v22 = vld [vmem:[%s16052_s10] ss:$0 sm:$0xff] }
 0xdd5   :  { %12280 = vmatmul.mubr.msk.f32.vlgmr.msra.gmra.mxu0 %vm556_vm1, %v15896_v30  ;;  %12291 = vmatmul.mubr.msk.f32.vlgmr.msra.gmra.mxu1 %vm556_vm1, %v15896_v30  ;;  %9408 = vst.msk [vmem:[%s16046_s13 + $0x20] sm:$0xff] %vm556_vm1, %v9085_v47 }
 0xdd6   :  { %12294 = vmatpush3.msra.mxu0 %v13300_v50  ;;  %12305 = vmatpush3.msra.mxu1 %v13301_v51 }
 0xdd7   :  { %12295 = vmatprep.subr.mxu0 %v13308_v2  ;;  %12306 = vmatprep.subr.mxu1 %v13308_v2 }
 0xdd8   :  { %12296 = vmatpush3.msra.mxu0 %v13302_v10  ;;  %12307 = vmatpush3.msra.mxu1 %v13303_v53 }
 0xdd9   :  { %12297 = vmatprep.subr.mxu0 %v13308_v2  ;;  %12308 = vmatprep.subr.mxu1 %v13308_v2 }
 0xdda   :  { %12298 = vmatpush3.msra.mxu0 %v13304_v35  ;;  %12309 = vmatpush3.msra.mxu1 %v13305_v55 }
 0xddb   :  { %12299 = vmatprep.subr.mxu0 %v13308_v2  ;;  %12310 = vmatprep.subr.mxu1 %v13308_v2 }
 0xddc   :  { %12300 = vmatpush3.msra.mxu0 %v13306_v3  ;;  %12301 = vmatprep.mubr.msk.f32.mxu0 %vm13309_vm2, %v13308_v2 }
 0xddd   :  { %12311 = vmatpush3.msra.mxu1 %v13307_v41  ;;  %12312 = vmatprep.mubr.msk.f32.mxu1 %vm13309_vm2, %v13308_v2 }
 0xdde   :  { %12302 = vmatmul.mubr.msk.f32.vlgmr.msra.gmra.mxu0 %vm556_vm1, %v15896_v30  ;;  %12313 = vmatmul.mubr.msk.f32.vlgmr.msra.gmra.mxu1 %vm556_vm1, %v15896_v30 }
 0xddf   :  { %12326 = vmatprep.subr.mxu1 %v9498_v1  ;;  %12334 = vmatprep.mubr.msk.f32.mxu1 %vm556_vm1, %v15646_v48  ;;  %v9414_v48 = vld [vmem:[%s16048_s9 + $0x18] sm:$0xff] }
 0xde0   :  { %12327 = vmatpush3.msra.mxu1 %v9498_v1  ;;  %12315 = vmatprep.subr.mxu0 %v13308_v2 }
 0xde1   :  { %12328 = vmatprep.subr.mxu1 %v9497_v7  ;;  %12323 = vmatprep.mubr.msk.f32.mxu0 %vm13309_vm2, %v13308_v2 }
 0xde2   :  { %12329 = vmatpush3.msra.mxu1 %v9497_v7  ;;  %12316 = vmatpush3.msra.mxu0 %v9414_v48 }
 0xde3   :  { %12330 = vmatprep.subr.mxu1 %v9496_v39  ;;  %12317 = vmatprep.subr.mxu0 %v13308_v2 }
 0xde4   :  { %12331 = vmatpush3.msra.mxu1 %v9496_v39  ;;  %12318 = vmatpush3.msra.mxu0 %v9413_v40 }
 0xde5   :  { %12332 = vmatprep.subr.mxu1 %v9495_v42  ;;  %12319 = vmatprep.subr.mxu0 %v13308_v2 }
 0xde6   :  { %12333 = vmatpush3.msra.mxu1 %v9495_v42 }
 0xde7   :  { %12335 = vmatmul.mubr.msk.f32.vlgmr.msra.gmra.mxu1 %vm556_vm1, %v15709_v43  ;;  %v9412_v43 = vld [vmem:[%s16048_s9 + $0x8] sm:$0xff] }
 0xde8   :  { %12337 = vmatprep.mubr.msk.f32.mxu1 %vm556_vm1, %v15772_v27  ;;  %v9411_v27 = vld [vmem:[%s16048_s9] sm:$0xff]  ;;  %12320 = vmatpush3.msra.mxu0 %v9412_v43 }
 0xde9   :  { %12321 = vmatprep.subr.mxu0 %v13308_v2  ;;  %v9233_v2 = vld [vmem:[#allocation3 + $0x88] sm:$0xff] }
 0xdea   :  { %12322 = vmatpush3.msra.mxu0 %v9411_v27 }
 0xdeb   :  { %12338 = vmatmul.mubr.msk.f32.gmra.mxu1 %vm556_vm1, %v15835_v32  ;;  %12343 = vmatprep.subr.mxu0 %v9618_v19 }
 0xdec   :  { %12340 = vmatprep.mubr.msk.f32.mxu1 %vm556_vm1, %v9085_v47 }
 0xe95   :  { %v9156_v45 = vpop.f32.mrf.mxu0  ;;  %v9228_v61 = vpop.f32.mrf.mxu1 }
 0xe96   :  { %v9160_v14 = vadd.f32 %v9156_v45, %v9086_v13  ;;  %v9232_v29 = vadd.f32 %v9228_v61, %v9161_v36  ;;  %v10423_v13 = vld [vmem:[#allocation4] ss:$0 sm:$0xff] }
 0xe97   :  { %v12281_v16 = vpop.f32.mrf.mxu0  ;;  %v12292_v9 = vpop.f32.mrf.mxu1 }
 0xe98   :  { %v10413_v32 = vmul.f32 -1.442695, %v9160_v14  ;;  %v10412_v62 = vmul.f32 -1.442695, %v9232_v29 }
 0xe9a   :  { %13214 = vpow2.f32 %v10413_v32 }
 0xe9b   :  { %13216 = vpow2.f32 %v10412_v62 }
 0xe9e   :  { %v9300_v58 = vpop.f32.mrf.mxu0  ;;  %v9372_v26 = vpop.f32.mrf.mxu1 }
 0xe9f   :  { %v9376_v59 = vadd.f32 %v9372_v26, %v9305_v60  ;;  %v9304_v52 = vadd.f32 %v9300_v58, %v9233_v2 }
 0xea0   :  { %v12303_v6 = vpop.f32.mrf.mxu0  ;;  %v12314_v37 = vpop.f32.mrf.mxu1 }
 0xea1   :  { %v10414_v63 = vmul.f32 -1.442695, %v9376_v59 }
 0xea3   :  { %13218 = vpow2.f32 %v10414_v63 }
 0xea4   :  { %13220 = vtanh.f32 %v9304_v52 }
 0xea7   :  { %v13215_v34 = vpop.eup %13214  ;;  %v12336_v31 = vpop.f32.mrf.mxu1 }
 0xea8   :  { %v13217_v5 = vpop.eup %13216  ;;  %v9387_v24 = vadd.f32 1.0, %v13215_v34 }
 0xea9   :  { %v9380_v8 = vadd.f32 1.0, %v13217_v5 }
 0xeaa   :  { %13222 = vrcp.f32 %v9387_v24 }
 0xeab   :  { %13224 = vrcp.f32 %v9380_v8 }
 0xeb0   :  { %v13219_v33 = vpop.eup %13218 }
 0xeb1   :  { %v13221_v15 = vpop.eup %13220  ;;  %v9396_v49 = vadd.f32 1.0, %v13219_v33 }
 0xeb3   :  { %13226 = vrcp.f32 %v9396_v49 }
 0xeb7   :  { %v13223_v11 = vpop.eup %13222 }
 0xeb8   :  { %v13225_v0 = vpop.eup %13224  ;;  %v9391_v25 = vmul.f32 %v13223_v11, %v13221_v15 }
 0xeb9   :  { %v9383_v17 = vmul.f32 %v13225_v0, %v15893_v44  ;;  %v9580_v44 = vpop.f32.mrf.mxu1 }
 0xebb   :  { %v9392_v18 = vadd.f32 %v9391_v25, %v9383_v17  ;;  %v12339_v28 = vpop.f32.mrf.mxu1 }
 0xebd   :  { %13228 = vtanh.f32 %v9392_v18  ;;  %v9590_v46 = vpop.f32.mrf.mxu1 }
 0xec0   :  { %v13227_v4 = vpop.eup %13226 }
 0xeca   :  { %v13229_v38 = vpop.eup %13228 }
 0xecb   :  { %v9400_v56 = vmul.f32 %v13229_v38, %v13227_v4 }
 0xecd   :  { %v9402_v12 = vsel %vm9401_vm8, %v9400_v56, %v15896_v30  ;;  %v9403_v20 = vsel %vm9401_vm8, %v9400_v56, 0.0 }
 0xece   :  { %9410 = vst.msk [vmem:[%s16049_s15] sm:$0xff] %vm556_vm1, %v9402_v12  ;;  %12324 = vmatmul.mubr.msk.f32.vlgmr.msra.gmra.mxu0 %vm556_vm1, %v9402_v12  ;;  %9409 = vst.msk [vmem:[%s16046_s13 + $0x28] sm:$0xff] %vm556_vm1, %v9403_v20  ;;  %12341 = vmatmul.mubr.msk.f32.gmra.mxu1 %vm556_vm1, %v9403_v20 }
 0xecf   :  { %12344 = vmatpush3.msra.mxu0 %v9618_v19 }
 0xed0   :  { %12345 = vmatprep.subr.mxu0 %v9617_v54 }
 0xed1   :  { %12346 = vmatpush3.msra.mxu0 %v9617_v54 }
 0xed2   :  { %12347 = vmatprep.subr.mxu0 %v9616_v21 }
 0xed3   :  { %12348 = vmatpush3.msra.mxu0 %v9616_v21 }
 0xed4   :  { %12349 = vmatprep.subr.mxu0 %v9615_v57 }
 0xed5   :  { %12350 = vmatpush3.msra.mxu0 %v9615_v57 }
 0xf8e   :  { %v9491_v30 = vpop.f32.mrf.mxu0  ;;  %v12342_v47 = vpop.f32.mrf.mxu1 }
 0xf8f   :  { %v9492_v50 = vadd.f32 %v10415_v22, %v9491_v30 }
 0xf90   :  { %v12325_v51 = vpop.f32.mrf.mxu0  ;;  %v9600_v35 = vpop.f32.mrf.mxu1 }
 0xf91   :  { %v9581_v10 = vadd.f32 %v9580_v44, %v9492_v50  ;;  %v9586_v53 = vadd.f32 %v12336_v31, %v9492_v50  ;;  %v9591_v55 = vadd.f32 %v9590_v46, %v9492_v50  ;;  %v9596_v41 = vadd.f32 %v12339_v28, %v9492_v50 }
 0xf92   :  { %v9601_v7 = vadd.f32 %v9600_v35, %v9492_v50  ;;  %v9606_v42 = vadd.f32 %v12342_v47, %v9492_v50 }
 0xf93   :  { %v9609_v3 = vmax.f32 %v9581_v10, 0.0  ;;  %v9610_v1 = vmax.f32 %v9586_v53, 0.0  ;;  %v9611_v39 = vmax.f32 %v9591_v55, 0.0  ;;  %v9612_v48 = vmax.f32 %v9596_v41, 0.0 }
 0xf94   :  { %v9613_v40 = vmax.f32 %v9601_v7, 0.0  ;;  %v9614_v43 = vmax.f32 %v9606_v42, 0.0 }
 0xf95   :  { %12351 = vmatprep.mubr.msk.f32.mxu0 %vm556_vm1, %v9609_v3 }
 0xf96   :  { %12352 = vmatmul.mubr.msk.f32.vlgmr.msra.gmra.mxu0 %vm556_vm1, %v9610_v1 }
 0xf97   :  { %12354 = vmatprep.mubr.msk.f32.mxu0 %vm556_vm1, %v9611_v39 }
 0xf9a   :  { %12355 = vmatmul.mubr.msk.f32.gmra.mxu0 %vm556_vm1, %v9612_v48 }
 0xf9b   :  { %12357 = vmatprep.mubr.msk.f32.mxu0 %vm556_vm1, %v9613_v40 }
 0xf9e   :  { %12358 = vmatmul.mubr.msk.f32.gmra.mxu0 %vm556_vm1, %v9614_v43 }
0x1056   :  { %v12353_v27 = vpop.f32.mrf.mxu0 }
0x1057   :  { %v9716_v14 = vadd.f32 %v12353_v27, %v10423_v13 }
0x1058   :  { %v9710_v45 = vpop.f32.mrf.mxu0 }
0x1059   :  { %v9711_v36 = vadd.f32 %v10423_v13, %v9710_v45 }
0x105a   :  { %v12356_v61 = vpop.f32.mrf.mxu0 }
0x105b   :  { %v9739_v16 = vmax.f32 %v9711_v36, %v9716_v14  ;;  %v9726_v62 = vadd.f32 %v12356_v61, %v10423_v13 }
0x105c   :  { %v9720_v29 = vpop.f32.mrf.mxu0 }
0x105d   :  { %v9721_v9 = vadd.f32 %v10423_v13, %v9720_v29 }
0x105e   :  { %v12359_v32 = vpop.f32.mrf.mxu0 }
0x105f   :  { %v9740_v58 = vmax.f32 %v9739_v16, %v9721_v9  ;;  %v9736_v6 = vadd.f32 %v12359_v32, %v10423_v13 }
0x1060   :  { %v9730_v26 = vpop.f32.mrf.mxu0 }
0x1061   :  { %v9731_v60 = vadd.f32 %v10423_v13, %v9730_v26  ;;  %v9741_v59 = vmax.f32 %v9740_v58, %v9726_v62 }
0x1063   :  { %v9742_v37 = vmax.f32 %v9741_v59, %v9731_v60 }
0x1065   :  { %v9743_v2 = vmax.f32 %v9742_v37, %v9736_v6 }
0x1067   :  { %v9744_v63 = vsub.f32 %v9711_v36, %v9743_v2  ;;  %v9747_v52 = vsub.f32 %v9716_v14, %v9743_v2  ;;  %v9750_v34 = vsub.f32 %v9721_v9, %v9743_v2  ;;  %v9753_v5 = vsub.f32 %v9726_v62, %v9743_v2 }
0x1068   :  { %v9756_v15 = vsub.f32 %v9731_v60, %v9743_v2  ;;  %v9759_v0 = vsub.f32 %v9736_v6, %v9743_v2 }
0x1069   :  { %v9745_v24 = vmul.f32 1.442695, %v9744_v63  ;;  %v9748_v8 = vmul.f32 1.442695, %v9747_v52  ;;  %v9751_v33 = vmul.f32 1.442695, %v9750_v34 }
0x106a   :  { %v9754_v11 = vmul.f32 1.442695, %v9753_v5  ;;  %v9757_v25 = vmul.f32 1.442695, %v9756_v15  ;;  %v9760_v49 = vmul.f32 1.442695, %v9759_v0 }
0x106b   :  { %13230 = vpow2.f32 %v9745_v24 }
0x106c   :  { %13232 = vpow2.f32 %v9748_v8 }
0x106d   :  { %13234 = vpow2.f32 %v9751_v33 }
0x106e   :  { %13236 = vpow2.f32 %v9754_v11 }
0x106f   :  { %13238 = vpow2.f32 %v9757_v25 }
0x1070   :  { %13240 = vpow2.f32 %v9760_v49 }
0x1078   :  { %v13231_v17 = vpop.eup %13230 }
0x1079   :  { %v13233_v18 = vpop.eup %13232 }
0x107a   :  { %v9762_v4 = vadd.f32 %v13233_v18, %v13231_v17  ;;  %v13235_v38 = vpop.eup %13234 }
0x107b   :  { %v13237_v12 = vpop.eup %13236 }
0x107c   :  { %v9763_v56 = vadd.f32 %v13235_v38, %v9762_v4  ;;  %v13239_v19 = vpop.eup %13238 }
0x107d   :  { %v13241_v21 = vpop.eup %13240 }
0x107e   :  { %v9764_v20 = vadd.f32 %v13237_v12, %v9763_v56 }
0x1080   :  { %v9765_v54 = vadd.f32 %v13239_v19, %v9764_v20 }
0x1082   :  { %v9766_v57 = vadd.f32 %v13241_v21, %v9765_v54 }
0x1084   :  { %13242 = vrcp.f32 %v9766_v57 }
0x1091   :  { %v13243_v23 = vpop.eup %13242 }
0x1092   :  { %v9768_v31 = vmul.f32 %v13243_v23, %v13231_v17  ;;  %v9769_v44 = vmul.f32 %v13243_v23, %v13233_v18  ;;  %v9770_v28 = vmul.f32 %v13243_v23, %v13235_v38  ;;  %v9771_v46 = vmul.f32 %v13243_v23, %v13237_v12 }
0x1093   :  { %v9772_v22 = vmul.f32 %v13243_v23, %v13239_v19  ;;  %v9773_v30 = vmul.f32 %v13243_v23, %v13241_v21 }
0x1094   :  { %9775 = vst.msk [vmem:[%s16053_s14] sm:$0xff] %vm9774_vm9, %v9768_v31  ;;  %9776 = vst.msk [vmem:[%s16053_s14 + $0x8] sm:$0xff] %vm9774_vm9, %v9769_v44 }
0x1095   :  { %9777 = vst.msk [vmem:[%s16053_s14 + $0x10] sm:$0xff] %vm9774_vm9, %v9770_v28  ;;  %9778 = vst.msk [vmem:[%s16053_s14 + $0x18] sm:$0xff] %vm9774_vm9, %v9771_v46 }
0x1096   :  { %9779 = vst.msk [vmem:[%s16053_s14 + $0x20] sm:$0xff] %vm9774_vm9, %v9772_v22  ;;  %9780 = vst.msk [vmem:[%s16053_s14 + $0x28] sm:$0xff] %vm9774_vm9, %v9773_v30 }

</bundles_post_ra>
